<compile_context>
chip_gen: v7x
topology: tpu7x:2x2x1
jax: 0.10.0
libtpu: 0.0.40
codegen_flags: <defaults>
</compile_context>

<pallas_src>
import numpy as np
import jax
import jax.numpy as jnp
from jax.experimental import pallas as pl
from jax.experimental.pallas import tpu as pltpu


# ----------------------------- Pallas kernel ----------------------------------

def _conv_bn_relu_kernel(p_ref, w_ref, scale_ref, bias_ref, o_ref):
    # p_ref     : (M, K)   bf16 im2col patches, M = N*H*W, K = 9*Cin
    # w_ref     : (K, Tc)  bf16 weights for this Cout tile
    # scale/bias: (1, Tc)  f32 folded conv-bias + BatchNorm(inference) affine
    # o_ref     : (M, Tc)  f32 output tile
    acc = jnp.dot(p_ref[...], w_ref[...], preferred_element_type=jnp.float32)
    o_ref[...] = jnp.maximum(acc * scale_ref[...] + bias_ref[...], 0.0)


# ----------------------------- wrapper -----------------------------------------

def conv_bn_relu_pallas(x, p, cout_tile=256):
    """Fused Conv2d(3x3,'same') + BatchNorm(eval) + ReLU. x: (N, H, W, Cin) NHWC f32."""
    w, scale, bias = p                              # w: (9*Cin, Cout) bf16
    N, H, W, Cin = x.shape
    K, Cout = w.shape
    M = N * H * W
    tc = min(cout_tile, Cout)

    # 'same' zero padding + im2col: (N,H,W,9,Cin) -> (M, 9*Cin); bf16 for the MXU.
    xp = jnp.pad(x, ((0, 0), (1, 1), (1, 1), (0, 0)))
    taps = [xp[:, dy:dy + H, dx:dx + W, :] for dy in range(3) for dx in range(3)]
    patches = jnp.stack(taps, axis=3).reshape(M, K).astype(jnp.bfloat16)

    cost = pl.CostEstimate(
        flops=2 * M * K * Cout,
        transcendentals=0,
        bytes_accessed=M * K * 2 + K * Cout * 2 + 2 * Cout * 4 + M * Cout * 4)

    out = pl.pallas_call(
        _conv_bn_relu_kernel,
        out_shape=jax.ShapeDtypeStruct((M, Cout), jnp.float32),
        grid=(Cout // tc,),
        in_specs=[
            pl.BlockSpec((M, K), lambda j: (0, 0)),     # patch slab (constant index)
            pl.BlockSpec((K, tc), lambda j: (0, j)),    # weight Cout tile
            pl.BlockSpec((1, tc), lambda j: (0, j)),
            pl.BlockSpec((1, tc), lambda j: (0, j)),
        ],
        out_specs=pl.BlockSpec((M, tc), lambda j: (0, j)),
        compiler_params=pltpu.CompilerParams(
            dimension_semantics=("parallel",),          # Cout tiles -> both v7x cores
            vmem_limit_bytes=48 * 1024 * 1024),         # <= v7x 64 MiB physical VMEM
        cost_estimate=cost,
    )(patches, w, scale, bias)
    return out.reshape(N, H, W, Cout)


# ----------------------------- parameters --------------------------------------

def init_conv_block(key, cin, cout, eps=1e-3):
    """Deterministic synthetic params for Conv2d(bias) + BatchNorm2d(eps=0.001), folded."""
    kw, kb, kg, kbe, km, kv = jax.random.split(key, 6)
    w = jax.random.normal(kw, (3, 3, cin, cout), jnp.float32) * (2.0 / (9 * cin)) ** 0.5
    conv_b = 0.01 * jax.random.normal(kb, (cout,), jnp.float32)
    gamma = 1.0 + 0.1 * jax.random.normal(kg, (cout,), jnp.float32)
    beta = 0.1 * jax.random.normal(kbe, (cout,), jnp.float32)
    rmean = 0.1 * jax.random.normal(km, (cout,), jnp.float32)
    rvar = 0.9 + 0.2 * jax.random.uniform(kv, (cout,), jnp.float32)
    scale = gamma / jnp.sqrt(rvar + eps)
    bias = beta + scale * (conv_b - rmean)
    # Weights stored bf16 (halves HBM weight traffic; native MXU input on v5e/v6e/v7x),
    # flattened to (9*Cin, Cout) to match the im2col K layout: k = (dy*3+dx)*Cin + c.
    w_flat = w.reshape(9 * cin, cout).astype(jnp.bfloat16)
    return (w_flat,
            scale.reshape(1, cout).astype(jnp.float32),
            bias.reshape(1, cout).astype(jnp.float32))


def init_params(key, in_channels):
    keys = jax.random.split(key, 6)
    chans = [(in_channels, 128), (128, 128),   # ResidualBlock 1
             (256, 128), (128, 256),           # ResidualBlock 2
             (384, 256), (256, 1024)]          # trailing ConvBlocks (self.conv)
    return [init_conv_block(keys[i], ci, co) for i, (ci, co) in enumerate(chans)]


# ----------------------------- model forward ------------------------------------

def spatial_attention(x, params, block_fn):
    """SpatialAttention forward. x: (N, H, W, Cin) NHWC. Returns (N, H, W, 1024)."""
    # ResidualBlock 1 (pooling=False)
    a1 = block_fn(x, params[0])                  # in_channels -> 128
    a2 = block_fn(a1, params[1])                 # 128 -> 128
    a = jnp.concatenate([a1, a2], axis=-1)       # torch.cat dim=1 -> 256 channels
    # ResidualBlock 2 (pooling=False)
    b1 = block_fn(a, params[2])                  # 256 -> 128
    b2 = block_fn(b1, params[3])                 # 128 -> 256
    b = jnp.concatenate([b1, b2], axis=-1)       # 384 channels
    # self.conv: ConvBlock(384->256) -> ConvBlock(256->1024)
    c = block_fn(b, params[4])
    return block_fn(c, params[5])


# ----------------------------- pure-JAX reference -------------------------------

def conv_bn_relu_ref(x, p):
    """Reference ConvBlock using lax.conv with the same bf16-quantized weights/activations."""
    w, scale, bias = p
    K, Cout = w.shape
    Cin = x.shape[-1]
    w4 = w.reshape(3, 3, Cin, Cout).astype(jnp.float32)
    xq = x.astype(jnp.bfloat16).astype(jnp.float32)    # match kernel's bf16 activation cast
    y = jax.lax.conv_general_dilated(
        xq, w4, window_strides=(1, 1), padding='SAME',
        dimension_numbers=('NHWC', 'HWIO', 'NHWC'))
    return jnp.maximum(y * scale.reshape(1, 1, 1, Cout) + bias.reshape(1, 1, 1, Cout), 0.0)


# ----------------------------- main ---------------------------------------------

if __name__ == "__main__":
    key = jax.random.PRNGKey(0)
    kx, kp = jax.random.split(key)

    N, Cin, H, W = 2, 4, 8, 8                                  # N*H*W = 128 -> full MXU rows
    x_nchw = jax.random.normal(kx, (N, Cin, H, W), jnp.float32)  # PyTorch NCHW input
    x = jnp.transpose(x_nchw, (0, 2, 3, 1))                    # -> NHWC for kernels

    params = init_params(kp, Cin)

    # Pallas forward (jit the whole stack so the 6 small calls are scheduled tightly)
    fwd = jax.jit(lambda xx, pp: spatial_attention(xx, pp, conv_bn_relu_pallas))
    out = jax.block_until_ready(fwd(x, params))

    # Reference forward (plain JAX) for validation
    out_r = spatial_attention(x, params, conv_bn_relu_ref)
    np.testing.assert_allclose(np.asarray(out), np.asarray(out_r), atol=2e-2, rtol=2e-2)

    out_nchw = jnp.transpose(out, (0, 3, 1, 2))                # back to NCHW: (2, 1024, 8, 8)
    jax.block_until_ready(out_nchw)
    print("KERNEL_OK")
</pallas_src>

<mosaic_0001>
module attributes {stable_mosaic.version = 11 : i64} {
  func.func @_conv_bn_relu_kernel(%arg0: i32, %arg1: memref<128x36xbf16, #tpu.memory_space<vmem>>, %arg2: memref<36x128xbf16, #tpu.memory_space<vmem>>, %arg3: memref<1x128xf32, #tpu.memory_space<vmem>>, %arg4: memref<1x128xf32, #tpu.memory_space<vmem>>, %arg5: memref<128x128xf32, #tpu.memory_space<vmem>>) attributes {dimension_semantics = [#tpu.dimension_semantics<parallel>], iteration_bounds = array<i64: 1>, scalar_prefetch = 0 : i64, scratch_operands = 0 : i64, tpu.core_type = #tpu.core_type<tc>, window_params = [{pipeline_mode = #tpu.pipeline_mode<synchronous>, transform_indices = @transform_0, window_bounds = array<i64: 128, 36>}, {transform_indices = @transform_1, window_bounds = array<i64: 36, 128>}, {transform_indices = @transform_2, window_bounds = array<i64: 1, 128>}, {transform_indices = @transform_3, window_bounds = array<i64: 1, 128>}, {transform_indices = @transform_4, window_bounds = array<i64: 128, 128>}]} {
    %c0 = arith.constant 0 : index
    %c0_0 = arith.constant 0 : index
    %0 = vector.load %arg1[%c0, %c0_0] : memref<128x36xbf16, #tpu.memory_space<vmem>>, vector<128x36xbf16>
    %c0_1 = arith.constant 0 : index
    %c0_2 = arith.constant 0 : index
    %1 = vector.load %arg2[%c0_1, %c0_2] : memref<36x128xbf16, #tpu.memory_space<vmem>>, vector<36x128xbf16>
    %cst = arith.constant dense<0.000000e+00> : vector<128x128xf32>
    %2 = tpu.matmul %0, %1, %cst {dimension_numbers = #tpu.dot_dimension_numbers<[1], [0], [0], [1], [0, 0, 1, 1], [], []>} : vector<128x36xbf16>, vector<36x128xbf16>, vector<128x128xf32> -> vector<128x128xf32>
    %c0_3 = arith.constant 0 : index
    %c0_4 = arith.constant 0 : index
    %3 = vector.load %arg3[%c0_3, %c0_4] : memref<1x128xf32, #tpu.memory_space<vmem>>, vector<1x128xf32>
    %4 = vector.broadcast %3 : vector<1x128xf32> to vector<128x128xf32>
    %5 = arith.mulf %2, %4 : vector<128x128xf32>
    %c0_5 = arith.constant 0 : index
    %c0_6 = arith.constant 0 : index
    %6 = vector.load %arg4[%c0_5, %c0_6] : memref<1x128xf32, #tpu.memory_space<vmem>>, vector<1x128xf32>
    %7 = vector.broadcast %6 : vector<1x128xf32> to vector<128x128xf32>
    %8 = arith.addf %5, %7 : vector<128x128xf32>
    %cst_7 = arith.constant 0.000000e+00 : f32
    %9 = vector.broadcast %cst_7 : f32 to vector<128x128xf32>
    %10 = arith.maximumf %8, %9 : vector<128x128xf32>
    %c0_8 = arith.constant 0 : index
    %c0_9 = arith.constant 0 : index
    %11 = vector.load %arg5[%c0_8, %c0_9] : memref<128x128xf32, #tpu.memory_space<vmem>>, vector<128x128xf32>
    tpu.vector_store %arg5[%c0_8, %c0_9], %10 {strides = array<i32>} : memref<128x128xf32, #tpu.memory_space<vmem>>, vector<128x128xf32>,
    return
  }
  func.func @transform_0(%arg0: i32) -> (i32, i32) {
    %c0_i32 = arith.constant 0 : i32
    %c0_i32_0 = arith.constant 0 : i32
    %c0_i32_1 = arith.constant 0 : i32
    return %c0_i32, %c0_i32_0 : i32, i32
  }
  func.func @transform_1(%arg0: i32) -> (i32, i32) {
    %c0_i32 = arith.constant 0 : i32
    %c0_i32_0 = arith.constant 0 : i32
    return %c0_i32, %arg0 : i32, i32
  }
  func.func @transform_2(%arg0: i32) -> (i32, i32) {
    %c0_i32 = arith.constant 0 : i32
    %c0_i32_0 = arith.constant 0 : i32
    return %c0_i32, %arg0 : i32, i32
  }
  func.func @transform_3(%arg0: i32) -> (i32, i32) {
    %c0_i32 = arith.constant 0 : i32
    %c0_i32_0 = arith.constant 0 : i32
    return %c0_i32, %arg0 : i32, i32
  }
  func.func @transform_4(%arg0: i32) -> (i32, i32) {
    %c0_i32 = arith.constant 0 : i32
    %c0_i32_0 = arith.constant 0 : i32
    return %c0_i32, %arg0 : i32, i32
  }
}

module attributes {stable_mosaic.version = 11 : i64} {
  func.func @_conv_bn_relu_kernel(%arg0: i32, %arg1: memref<128x1152xbf16, #tpu.memory_space<vmem>>, %arg2: memref<1152x128xbf16, #tpu.memory_space<vmem>>, %arg3: memref<1x128xf32, #tpu.memory_space<vmem>>, %arg4: memref<1x128xf32, #tpu.memory_space<vmem>>, %arg5: memref<128x128xf32, #tpu.memory_space<vmem>>) attributes {dimension_semantics = [#tpu.dimension_semantics<parallel>], iteration_bounds = array<i64: 1>, scalar_prefetch = 0 : i64, scratch_operands = 0 : i64, tpu.core_type = #tpu.core_type<tc>, window_params = [{pipeline_mode = #tpu.pipeline_mode<synchronous>, transform_indices = @transform_0, window_bounds = array<i64: 128, 1152>}, {transform_indices = @transform_1, window_bounds = array<i64: 1152, 128>}, {transform_indices = @transform_2, window_bounds = array<i64: 1, 128>}, {transform_indices = @transform_3, window_bounds = array<i64: 1, 128>}, {transform_indices = @transform_4, window_bounds = array<i64: 128, 128>}]} {
    %c0 = arith.constant 0 : index
    %c0_0 = arith.constant 0 : index
    %0 = vector.load %arg1[%c0, %c0_0] : memref<128x1152xbf16, #tpu.memory_space<vmem>>, vector<128x1152xbf16>
    %c0_1 = arith.constant 0 : index
    %c0_2 = arith.constant 0 : index
    %1 = vector.load %arg2[%c0_1, %c0_2] : memref<1152x128xbf16, #tpu.memory_space<vmem>>, vector<1152x128xbf16>
    %cst = arith.constant dense<0.000000e+00> : vector<128x128xf32>
    %2 = tpu.matmul %0, %1, %cst {dimension_numbers = #tpu.dot_dimension_numbers<[1], [0], [0], [1], [0, 0, 1, 1], [], []>} : vector<128x1152xbf16>, vector<1152x128xbf16>, vector<128x128xf32> -> vector<128x128xf32>
    %c0_3 = arith.constant 0 : index
    %c0_4 = arith.constant 0 : index
    %3 = vector.load %arg3[%c0_3, %c0_4] : memref<1x128xf32, #tpu.memory_space<vmem>>, vector<1x128xf32>
    %4 = vector.broadcast %3 : vector<1x128xf32> to vector<128x128xf32>
    %5 = arith.mulf %2, %4 : vector<128x128xf32>
    %c0_5 = arith.constant 0 : index
    %c0_6 = arith.constant 0 : index
    %6 = vector.load %arg4[%c0_5, %c0_6] : memref<1x128xf32, #tpu.memory_space<vmem>>, vector<1x128xf32>
    %7 = vector.broadcast %6 : vector<1x128xf32> to vector<128x128xf32>
    %8 = arith.addf %5, %7 : vector<128x128xf32>
    %cst_7 = arith.constant 0.000000e+00 : f32
    %9 = vector.broadcast %cst_7 : f32 to vector<128x128xf32>
    %10 = arith.maximumf %8, %9 : vector<128x128xf32>
    %c0_8 = arith.constant 0 : index
    %c0_9 = arith.constant 0 : index
    %11 = vector.load %arg5[%c0_8, %c0_9] : memref<128x128xf32, #tpu.memory_space<vmem>>, vector<128x128xf32>
    tpu.vector_store %arg5[%c0_8, %c0_9], %10 {strides = array<i32>} : memref<128x128xf32, #tpu.memory_space<vmem>>, vector<128x128xf32>,
    return
  }
  func.func @transform_0(%arg0: i32) -> (i32, i32) {
    %c0_i32 = arith.constant 0 : i32
    %c0_i32_0 = arith.constant 0 : i32
    %c0_i32_1 = arith.constant 0 : i32
    return %c0_i32, %c0_i32_0 : i32, i32
  }
  func.func @transform_1(%arg0: i32) -> (i32, i32) {
    %c0_i32 = arith.constant 0 : i32
    %c0_i32_0 = arith.constant 0 : i32
    return %c0_i32, %arg0 : i32, i32
  }
  func.func @transform_2(%arg0: i32) -> (i32, i32) {
    %c0_i32 = arith.constant 0 : i32
    %c0_i32_0 = arith.constant 0 : i32
    return %c0_i32, %arg0 : i32, i32
  }
  func.func @transform_3(%arg0: i32) -> (i32, i32) {
    %c0_i32 = arith.constant 0 : i32
    %c0_i32_0 = arith.constant 0 : i32
    return %c0_i32, %arg0 : i32, i32
  }
  func.func @transform_4(%arg0: i32) -> (i32, i32) {
    %c0_i32 = arith.constant 0 : i32
    %c0_i32_0 = arith.constant 0 : i32
    return %c0_i32, %arg0 : i32, i32
  }
}

module attributes {stable_mosaic.version = 11 : i64} {
  func.func @_conv_bn_relu_kernel(%arg0: i32, %arg1: memref<128x2304xbf16, #tpu.memory_space<vmem>>, %arg2: memref<2304x128xbf16, #tpu.memory_space<vmem>>, %arg3: memref<1x128xf32, #tpu.memory_space<vmem>>, %arg4: memref<1x128xf32, #tpu.memory_space<vmem>>, %arg5: memref<128x128xf32, #tpu.memory_space<vmem>>) attributes {dimension_semantics = [#tpu.dimension_semantics<parallel>], iteration_bounds = array<i64: 1>, scalar_prefetch = 0 : i64, scratch_operands = 0 : i64, tpu.core_type = #tpu.core_type<tc>, window_params = [{pipeline_mode = #tpu.pipeline_mode<synchronous>, transform_indices = @transform_0, window_bounds = array<i64: 128, 2304>}, {transform_indices = @transform_1, window_bounds = array<i64: 2304, 128>}, {transform_indices = @transform_2, window_bounds = array<i64: 1, 128>}, {transform_indices = @transform_3, window_bounds = array<i64: 1, 128>}, {transform_indices = @transform_4, window_bounds = array<i64: 128, 128>}]} {
    %c0 = arith.constant 0 : index
    %c0_0 = arith.constant 0 : index
    %0 = vector.load %arg1[%c0, %c0_0] : memref<128x2304xbf16, #tpu.memory_space<vmem>>, vector<128x2304xbf16>
    %c0_1 = arith.constant 0 : index
    %c0_2 = arith.constant 0 : index
    %1 = vector.load %arg2[%c0_1, %c0_2] : memref<2304x128xbf16, #tpu.memory_space<vmem>>, vector<2304x128xbf16>
    %cst = arith.constant dense<0.000000e+00> : vector<128x128xf32>
    %2 = tpu.matmul %0, %1, %cst {dimension_numbers = #tpu.dot_dimension_numbers<[1], [0], [0], [1], [0, 0, 1, 1], [], []>} : vector<128x2304xbf16>, vector<2304x128xbf16>, vector<128x128xf32> -> vector<128x128xf32>
    %c0_3 = arith.constant 0 : index
    %c0_4 = arith.constant 0 : index
    %3 = vector.load %arg3[%c0_3, %c0_4] : memref<1x128xf32, #tpu.memory_space<vmem>>, vector<1x128xf32>
    %4 = vector.broadcast %3 : vector<1x128xf32> to vector<128x128xf32>
    %5 = arith.mulf %2, %4 : vector<128x128xf32>
    %c0_5 = arith.constant 0 : index
    %c0_6 = arith.constant 0 : index
    %6 = vector.load %arg4[%c0_5, %c0_6] : memref<1x128xf32, #tpu.memory_space<vmem>>, vector<1x128xf32>
    %7 = vector.broadcast %6 : vector<1x128xf32> to vector<128x128xf32>
    %8 = arith.addf %5, %7 : vector<128x128xf32>
    %cst_7 = arith.constant 0.000000e+00 : f32
    %9 = vector.broadcast %cst_7 : f32 to vector<128x128xf32>
    %10 = arith.maximumf %8, %9 : vector<128x128xf32>
    %c0_8 = arith.constant 0 : index
    %c0_9 = arith.constant 0 : index
    %11 = vector.load %arg5[%c0_8, %c0_9] : memref<128x128xf32, #tpu.memory_space<vmem>>, vector<128x128xf32>
    tpu.vector_store %arg5[%c0_8, %c0_9], %10 {strides = array<i32>} : memref<128x128xf32, #tpu.memory_space<vmem>>, vector<128x128xf32>,
    return
  }
  func.func @transform_0(%arg0: i32) -> (i32, i32) {
    %c0_i32 = arith.constant 0 : i32
    %c0_i32_0 = arith.constant 0 : i32
    %c0_i32_1 = arith.constant 0 : i32
    return %c0_i32, %c0_i32_0 : i32, i32
  }
  func.func @transform_1(%arg0: i32) -> (i32, i32) {
    %c0_i32 = arith.constant 0 : i32
    %c0_i32_0 = arith.constant 0 : i32
    return %c0_i32, %arg0 : i32, i32
  }
  func.func @transform_2(%arg0: i32) -> (i32, i32) {
    %c0_i32 = arith.constant 0 : i32
    %c0_i32_0 = arith.constant 0 : i32
    return %c0_i32, %arg0 : i32, i32
  }
  func.func @transform_3(%arg0: i32) -> (i32, i32) {
    %c0_i32 = arith.constant 0 : i32
    %c0_i32_0 = arith.constant 0 : i32
    return %c0_i32, %arg0 : i32, i32
  }
  func.func @transform_4(%arg0: i32) -> (i32, i32) {
    %c0_i32 = arith.constant 0 : i32
    %c0_i32_0 = arith.constant 0 : i32
    return %c0_i32, %arg0 : i32, i32
  }
}

module attributes {stable_mosaic.version = 11 : i64} {
  func.func @_conv_bn_relu_kernel(%arg0: i32, %arg1: memref<128x1152xbf16, #tpu.memory_space<vmem>>, %arg2: memref<1152x256xbf16, #tpu.memory_space<vmem>>, %arg3: memref<1x256xf32, #tpu.memory_space<vmem>>, %arg4: memref<1x256xf32, #tpu.memory_space<vmem>>, %arg5: memref<128x256xf32, #tpu.memory_space<vmem>>) attributes {dimension_semantics = [#tpu.dimension_semantics<parallel>], iteration_bounds = array<i64: 1>, scalar_prefetch = 0 : i64, scratch_operands = 0 : i64, tpu.core_type = #tpu.core_type<tc>, window_params = [{pipeline_mode = #tpu.pipeline_mode<synchronous>, transform_indices = @transform_0, window_bounds = array<i64: 128, 1152>}, {transform_indices = @transform_1, window_bounds = array<i64: 1152, 256>}, {transform_indices = @transform_2, window_bounds = array<i64: 1, 256>}, {transform_indices = @transform_3, window_bounds = array<i64: 1, 256>}, {transform_indices = @transform_4, window_bounds = array<i64: 128, 256>}]} {
    %c0 = arith.constant 0 : index
    %c0_0 = arith.constant 0 : index
    %0 = vector.load %arg1[%c0, %c0_0] : memref<128x1152xbf16, #tpu.memory_space<vmem>>, vector<128x1152xbf16>
    %c0_1 = arith.constant 0 : index
    %c0_2 = arith.constant 0 : index
    %1 = vector.load %arg2[%c0_1, %c0_2] : memref<1152x256xbf16, #tpu.memory_space<vmem>>, vector<1152x256xbf16>
    %cst = arith.constant dense<0.000000e+00> : vector<128x256xf32>
    %2 = tpu.matmul %0, %1, %cst {dimension_numbers = #tpu.dot_dimension_numbers<[1], [0], [0], [1], [0, 0, 1, 1], [], []>} : vector<128x1152xbf16>, vector<1152x256xbf16>, vector<128x256xf32> -> vector<128x256xf32>
    %c0_3 = arith.constant 0 : index
    %c0_4 = arith.constant 0 : index
    %3 = vector.load %arg3[%c0_3, %c0_4] : memref<1x256xf32, #tpu.memory_space<vmem>>, vector<1x256xf32>
    %4 = vector.broadcast %3 : vector<1x256xf32> to vector<128x256xf32>
    %5 = arith.mulf %2, %4 : vector<128x256xf32>
    %c0_5 = arith.constant 0 : index
    %c0_6 = arith.constant 0 : index
    %6 = vector.load %arg4[%c0_5, %c0_6] : memref<1x256xf32, #tpu.memory_space<vmem>>, vector<1x256xf32>
    %7 = vector.broadcast %6 : vector<1x256xf32> to vector<128x256xf32>
    %8 = arith.addf %5, %7 : vector<128x256xf32>
    %cst_7 = arith.constant 0.000000e+00 : f32
    %9 = vector.broadcast %cst_7 : f32 to vector<128x256xf32>
    %10 = arith.maximumf %8, %9 : vector<128x256xf32>
    %c0_8 = arith.constant 0 : index
    %c0_9 = arith.constant 0 : index
    %11 = vector.load %arg5[%c0_8, %c0_9] : memref<128x256xf32, #tpu.memory_space<vmem>>, vector<128x256xf32>
    tpu.vector_store %arg5[%c0_8, %c0_9], %10 {strides = array<i32>} : memref<128x256xf32, #tpu.memory_space<vmem>>, vector<128x256xf32>,
    return
  }
  func.func @transform_0(%arg0: i32) -> (i32, i32) {
    %c0_i32 = arith.constant 0 : i32
    %c0_i32_0 = arith.constant 0 : i32
    %c0_i32_1 = arith.constant 0 : i32
    return %c0_i32, %c0_i32_0 : i32, i32
  }
  func.func @transform_1(%arg0: i32) -> (i32, i32) {
    %c0_i32 = arith.constant 0 : i32
    %c0_i32_0 = arith.constant 0 : i32
    return %c0_i32, %arg0 : i32, i32
  }
  func.func @transform_2(%arg0: i32) -> (i32, i32) {
    %c0_i32 = arith.constant 0 : i32
    %c0_i32_0 = arith.constant 0 : i32
    return %c0_i32, %arg0 : i32, i32
  }
  func.func @transform_3(%arg0: i32) -> (i32, i32) {
    %c0_i32 = arith.constant 0 : i32
    %c0_i32_0 = arith.constant 0 : i32
    return %c0_i32, %arg0 : i32, i32
  }
  func.func @transform_4(%arg0: i32) -> (i32, i32) {
    %c0_i32 = arith.constant 0 : i32
    %c0_i32_0 = arith.constant 0 : i32
    return %c0_i32, %arg0 : i32, i32
  }
}

module attributes {stable_mosaic.version = 11 : i64} {
  func.func @_conv_bn_relu_kernel(%arg0: i32, %arg1: memref<128x3456xbf16, #tpu.memory_space<vmem>>, %arg2: memref<3456x256xbf16, #tpu.memory_space<vmem>>, %arg3: memref<1x256xf32, #tpu.memory_space<vmem>>, %arg4: memref<1x256xf32, #tpu.memory_space<vmem>>, %arg5: memref<128x256xf32, #tpu.memory_space<vmem>>) attributes {dimension_semantics = [#tpu.dimension_semantics<parallel>], iteration_bounds = array<i64: 1>, scalar_prefetch = 0 : i64, scratch_operands = 0 : i64, tpu.core_type = #tpu.core_type<tc>, window_params = [{pipeline_mode = #tpu.pipeline_mode<synchronous>, transform_indices = @transform_0, window_bounds = array<i64: 128, 3456>}, {transform_indices = @transform_1, window_bounds = array<i64: 3456, 256>}, {transform_indices = @transform_2, window_bounds = array<i64: 1, 256>}, {transform_indices = @transform_3, window_bounds = array<i64: 1, 256>}, {transform_indices = @transform_4, window_bounds = array<i64: 128, 256>}]} {
    %c0 = arith.constant 0 : index
    %c0_0 = arith.constant 0 : index
    %0 = vector.load %arg1[%c0, %c0_0] : memref<128x3456xbf16, #tpu.memory_space<vmem>>, vector<128x3456xbf16>
    %c0_1 = arith.constant 0 : index
    %c0_2 = arith.constant 0 : index
    %1 = vector.load %arg2[%c0_1, %c0_2] : memref<3456x256xbf16, #tpu.memory_space<vmem>>, vector<3456x256xbf16>
    %cst = arith.constant dense<0.000000e+00> : vector<128x256xf32>
    %2 = tpu.matmul %0, %1, %cst {dimension_numbers = #tpu.dot_dimension_numbers<[1], [0], [0], [1], [0, 0, 1, 1], [], []>} : vector<128x3456xbf16>, vector<3456x256xbf16>, vector<128x256xf32> -> vector<128x256xf32>
    %c0_3 = arith.constant 0 : index
    %c0_4 = arith.constant 0 : index
    %3 = vector.load %arg3[%c0_3, %c0_4] : memref<1x256xf32, #tpu.memory_space<vmem>>, vector<1x256xf32>
    %4 = vector.broadcast %3 : vector<1x256xf32> to vector<128x256xf32>
    %5 = arith.mulf %2, %4 : vector<128x256xf32>
    %c0_5 = arith.constant 0 : index
    %c0_6 = arith.constant 0 : index
    %6 = vector.load %arg4[%c0_5, %c0_6] : memref<1x256xf32, #tpu.memory_space<vmem>>, vector<1x256xf32>
    %7 = vector.broadcast %6 : vector<1x256xf32> to vector<128x256xf32>
    %8 = arith.addf %5, %7 : vector<128x256xf32>
    %cst_7 = arith.constant 0.000000e+00 : f32
    %9 = vector.broadcast %cst_7 : f32 to vector<128x256xf32>
    %10 = arith.maximumf %8, %9 : vector<128x256xf32>
    %c0_8 = arith.constant 0 : index
    %c0_9 = arith.constant 0 : index
    %11 = vector.load %arg5[%c0_8, %c0_9] : memref<128x256xf32, #tpu.memory_space<vmem>>, vector<128x256xf32>
    tpu.vector_store %arg5[%c0_8, %c0_9], %10 {strides = array<i32>} : memref<128x256xf32, #tpu.memory_space<vmem>>, vector<128x256xf32>,
    return
  }
  func.func @transform_0(%arg0: i32) -> (i32, i32) {
    %c0_i32 = arith.constant 0 : i32
    %c0_i32_0 = arith.constant 0 : i32
    %c0_i32_1 = arith.constant 0 : i32
    return %c0_i32, %c0_i32_0 : i32, i32
  }
  func.func @transform_1(%arg0: i32) -> (i32, i32) {
    %c0_i32 = arith.constant 0 : i32
    %c0_i32_0 = arith.constant 0 : i32
    return %c0_i32, %arg0 : i32, i32
  }
  func.func @transform_2(%arg0: i32) -> (i32, i32) {
    %c0_i32 = arith.constant 0 : i32
    %c0_i32_0 = arith.constant 0 : i32
    return %c0_i32, %arg0 : i32, i32
  }
  func.func @transform_3(%arg0: i32) -> (i32, i32) {
    %c0_i32 = arith.constant 0 : i32
    %c0_i32_0 = arith.constant 0 : i32
    return %c0_i32, %arg0 : i32, i32
  }
  func.func @transform_4(%arg0: i32) -> (i32, i32) {
    %c0_i32 = arith.constant 0 : i32
    %c0_i32_0 = arith.constant 0 : i32
    return %c0_i32, %arg0 : i32, i32
  }
}

module attributes {stable_mosaic.version = 11 : i64} {
  func.func @_conv_bn_relu_kernel(%arg0: i32, %arg1: memref<128x2304xbf16, #tpu.memory_space<vmem>>, %arg2: memref<2304x256xbf16, #tpu.memory_space<vmem>>, %arg3: memref<1x256xf32, #tpu.memory_space<vmem>>, %arg4: memref<1x256xf32, #tpu.memory_space<vmem>>, %arg5: memref<128x256xf32, #tpu.memory_space<vmem>>) attributes {dimension_semantics = [#tpu.dimension_semantics<parallel>], iteration_bounds = array<i64: 4>, scalar_prefetch = 0 : i64, scratch_operands = 0 : i64, tpu.core_type = #tpu.core_type<tc>, window_params = [{pipeline_mode = #tpu.pipeline_mode<synchronous>, transform_indices = @transform_0, window_bounds = array<i64: 128, 2304>}, {transform_indices = @transform_1, window_bounds = array<i64: 2304, 256>}, {transform_indices = @transform_2, window_bounds = array<i64: 1, 256>}, {transform_indices = @transform_3, window_bounds = array<i64: 1, 256>}, {transform_indices = @transform_4, window_bounds = array<i64: 128, 256>}]} {
    %c0 = arith.constant 0 : index
    %c0_0 = arith.constant 0 : index
    %0 = vector.load %arg1[%c0, %c0_0] : memref<128x2304xbf16, #tpu.memory_space<vmem>>, vector<128x2304xbf16>
    %c0_1 = arith.constant 0 : index
    %c0_2 = arith.constant 0 : index
    %1 = vector.load %arg2[%c0_1, %c0_2] : memref<2304x256xbf16, #tpu.memory_space<vmem>>, vector<2304x256xbf16>
    %cst = arith.constant dense<0.000000e+00> : vector<128x256xf32>
    %2 = tpu.matmul %0, %1, %cst {dimension_numbers = #tpu.dot_dimension_numbers<[1], [0], [0], [1], [0, 0, 1, 1], [], []>} : vector<128x2304xbf16>, vector<2304x256xbf16>, vector<128x256xf32> -> vector<128x256xf32>
    %c0_3 = arith.constant 0 : index
    %c0_4 = arith.constant 0 : index
    %3 = vector.load %arg3[%c0_3, %c0_4] : memref<1x256xf32, #tpu.memory_space<vmem>>, vector<1x256xf32>
    %4 = vector.broadcast %3 : vector<1x256xf32> to vector<128x256xf32>
    %5 = arith.mulf %2, %4 : vector<128x256xf32>
    %c0_5 = arith.constant 0 : index
    %c0_6 = arith.constant 0 : index
    %6 = vector.load %arg4[%c0_5, %c0_6] : memref<1x256xf32, #tpu.memory_space<vmem>>, vector<1x256xf32>
    %7 = vector.broadcast %6 : vector<1x256xf32> to vector<128x256xf32>
    %8 = arith.addf %5, %7 : vector<128x256xf32>
    %cst_7 = arith.constant 0.000000e+00 : f32
    %9 = vector.broadcast %cst_7 : f32 to vector<128x256xf32>
    %10 = arith.maximumf %8, %9 : vector<128x256xf32>
    %c0_8 = arith.constant 0 : index
    %c0_9 = arith.constant 0 : index
    %11 = vector.load %arg5[%c0_8, %c0_9] : memref<128x256xf32, #tpu.memory_space<vmem>>, vector<128x256xf32>
    tpu.vector_store %arg5[%c0_8, %c0_9], %10 {strides = array<i32>} : memref<128x256xf32, #tpu.memory_space<vmem>>, vector<128x256xf32>,
    return
  }
  func.func @transform_0(%arg0: i32) -> (i32, i32) {
    %c0_i32 = arith.constant 0 : i32
    %c0_i32_0 = arith.constant 0 : i32
    %c0_i32_1 = arith.constant 0 : i32
    return %c0_i32, %c0_i32_0 : i32, i32
  }
  func.func @transform_1(%arg0: i32) -> (i32, i32) {
    %c0_i32 = arith.constant 0 : i32
    %c0_i32_0 = arith.constant 0 : i32
    return %c0_i32, %arg0 : i32, i32
  }
  func.func @transform_2(%arg0: i32) -> (i32, i32) {
    %c0_i32 = arith.constant 0 : i32
    %c0_i32_0 = arith.constant 0 : i32
    return %c0_i32, %arg0 : i32, i32
  }
  func.func @transform_3(%arg0: i32) -> (i32, i32) {
    %c0_i32 = arith.constant 0 : i32
    %c0_i32_0 = arith.constant 0 : i32
    return %c0_i32, %arg0 : i32, i32
  }
  func.func @transform_4(%arg0: i32) -> (i32, i32) {
    %c0_i32 = arith.constant 0 : i32
    %c0_i32_0 = arith.constant 0 : i32
    return %c0_i32, %arg0 : i32, i32
  }
}

</mosaic_0001>

<bundles_post_ra>
// kernel: _lambda_.6
= control target key start
LH: loop header
LB: loop body
LE: loop exit
PB: predicated region body
PF: predicated region fallthrough
CT: control target
= control target key end

     0   :  { %9 = vsyncpa [#allocation3], 0  ;;  %s660_s0 = inlined_call_operand.vmem [shape: bf16[128,36], index: 0, kind: input, shape index: {}]   ;;  %s661_s1 = inlined_call_operand.hbm [shape: bf16[36,128], index: 1, kind: input, shape index: {}]   ;;  %s662_s2 = inlined_call_operand.hbm [shape: f32[1,128], index: 2, kind: input, shape index: {}]   ;;  %s663_s3 = inlined_call_operand.hbm [shape: f32[1,128], index: 3, kind: input, shape index: {}]   ;;  %s664_s4 = inlined_call_operand.vmem [shape: f32[128,128], index: 4, kind: output, shape index: {}]  }
   0x1   :  { %10 = vsyncpa [#allocation5], 0  ;;  %s489_s15 = smov [#allocation4]   ;;  %s490_s17 = smov [#allocation2]  }
   0x2   :  { %s31_s16 = sshll.u32 %s489_s15, 4  ;;  %s18_s18 = sshll.u32 %s490_s17, 4  ;;  %s32_s16 = int_to_ptr.vmem [resolvable:$true] %s31_s16  ;;  %s519_s18 = int_to_ptr.vmem [resolvable:$true] %s18_s18 }
   0x3   :  { %s419_s21 = scalar_lea.hbm %s662_s2, 16 }
   0x4   :  { %p420_p0 = scmp.ne.s32.totalorder %s662_s2, %s419_s21  ;;  %p423_p1 = scmp.lt.u32.totalorder %s419_s21, %s662_s2 }
   0x6   :  { %p425_p2 = pnand %p423_p1, %p420_p0 }
   0x8   :  { %428 = shalt.err (!%p425_p2)
}
   0x9   :  { %s429_s26 = scalar_lea.vmem %s32_s16, 16  ;;  %s433_s27 = scalar_lea.vmem %s32_s16, 32 }
   0xa   :  { %p430_p3 = scmp.ne.s32.totalorder %s32_s16, %s429_s26  ;;  %p434_p4 = scmp.lt.s32.totalorder %s32_s16, %s32_s16 }
   0xb   :  { %p435_p5 = scmp.lt.s32.totalorder %s433_s27, %s429_s26 }
   0xd   :  { %p436_p6 = por %p435_p5, %p434_p4 }
   0xf   :  { %p437_p7 = pnand %p436_p6, %p430_p3 }
  0x11   :  { %440 = shalt.err (!%p437_p7)
}
  0x12   :  { %34 = dma.hbm_to_vmem [thread:$0]  %s662_s2, 16, %s32_s16, [#allocation5]  }
  0x13   :  { %s441_s6 = scalar_lea.hbm %s661_s1, 320 }
  0x14   :  { %p442_p8 = scmp.ne.s32.totalorder %s661_s1, %s441_s6  ;;  %p445_p9 = scmp.lt.u32.totalorder %s441_s6, %s661_s1 }
  0x16   :  { %p447_p10 = pnand %p445_p9, %p442_p8 }
  0x18   :  { %450 = shalt.err (!%p447_p10)
}
  0x19   :  { %s451_s11 = scalar_lea.vmem %s519_s18, 320  ;;  %p456_p12 = scmp.lt.s32.totalorder %s519_s18, %s519_s18 }
  0x1a   :  { %p452_p11 = scmp.ne.s32.totalorder %s519_s18, %s451_s11  ;;  %p457_p13 = scmp.lt.s32.totalorder %s451_s11, %s451_s11 }
  0x1c   :  { %p458_p0 = por %p457_p13, %p456_p12 }
  0x1e   :  { %p459_p1 = pnand %p458_p0, %p452_p11 }
  0x20   :  { %462 = shalt.err (!%p459_p1)
}
  0x21   :  { %s491_s2 = smov 64   ;;  %s492_s12 = smov 4  }
  0x22   :  { %24 = dma.hbm_to_vmem [thread:$0]  %s661_s1, 320, %s519_s18, [#allocation3], %s491_s2, %s491_s2, %s492_s12  }
  0x23   :  { %s493_s15 = smov [#allocation6]   ;;  %s463_s20 = scalar_lea.hbm %s663_s3, 16 }
  0x24   :  { %s41_s16 = sshll.u32 %s493_s15, 4  ;;  %p464_p2 = scmp.ne.s32.totalorder %s663_s3, %s463_s20  ;;  %s42_s16 = int_to_ptr.vmem [resolvable:$true] %s41_s16 }
  0x25   :  { %p467_p3 = scmp.lt.u32.totalorder %s463_s20, %s663_s3 }
  0x27   :  { %p469_p4 = pnand %p467_p3, %p464_p2 }
  0x29   :  { %472 = shalt.err (!%p469_p4)
}
  0x2a   :  { %s473_s25 = scalar_lea.vmem %s42_s16, 16  ;;  %s477_s1 = scalar_lea.vmem %s42_s16, 32 }
  0x2b   :  { %p474_p5 = scmp.ne.s32.totalorder %s42_s16, %s473_s25  ;;  %p478_p6 = scmp.lt.s32.totalorder %s42_s16, %s42_s16 }
  0x2c   :  { %p479_p7 = scmp.lt.s32.totalorder %s477_s1, %s473_s25 }
  0x2e   :  { %p480_p8 = por %p479_p7, %p478_p6 }
  0x30   :  { %p481_p9 = pnand %p480_p8, %p474_p5 }
  0x32   :  { %484 = shalt.err (!%p481_p9)
}
  0x33   :  { %44 = dma.hbm_to_vmem [thread:$0]  %s663_s3, 16, %s42_s16, [#allocation5]  }
  0x34   :  { %485 = dma.done.wait [#allocation3], 320  }
  0x35   :  { %486 = vsyncadd [#allocation3], 4294966976 }
  0x36   :  { %487 = dma.done.wait [#allocation5], 32  }
  0x37   :  { %488 = vsyncadd [#allocation5], 4294967264  ;;  %v408_v0 = vld [vmem:[#allocation2] sm:$0xff]   ;;  %v409_v1 = vld [vmem:[#allocation2 + $0x8] sm:$0xff]   ;;  %vm131_vm0 = vcmask 293888   ;;  %vm156_vm1 = vcmask 1041408  }
  0x38   :  { %373 = vmatprep.subr.bf16.mxu0 %v408_v0  ;;  %395 = vmatprep.subr.bf16.mxu1 %v408_v0  ;;  %v410_v2 = vld [vmem:[#allocation2 + $0x10] ss:$0 sps:$4 sm:$0x33]   ;;  %v411_v3 = vld [vmem:[%s660_s0] sm:$0xff]   ;;  %v413_v6 = vld [vmem:[%s660_s0 + $0x8] sm:$0xff]  }
  0x39   :  { %374 = vmatpush3.bf16.msra.mxu0 %v408_v0  ;;  %398 = vmatpush3.bf16.msra.mxu1 %v408_v0  ;;  %v412_v4 = vld [vmem:[%s660_s0 + $0x20] sm:$0xff]   ;;  %v158_v5 = vsel %vm156_vm1, %v410_v2, 0  ;;  %v414_v7 = vld [vmem:[%s660_s0 + $0x28] sm:$0xff]   ;;  %v415_v8 = vld [vmem:[%s660_s0 + $0x10] sm:$0xff]  }
  0x3a   :  { %375 = vmatprep.subr.bf16.mxu0 %v409_v1  ;;  %396 = vmatprep.subr.bf16.mxu1 %v409_v1  ;;  %v416_v9 = vld [vmem:[%s660_s0 + $0x30] sm:$0xff]   ;;  %v417_v10 = vld [vmem:[%s660_s0 + $0x18] sm:$0xff]  }
  0x3b   :  { %379 = vmatprep.mubr.msk.bf16.mxu0 %vm131_vm0, %v411_v3  ;;  %387 = vmatprep.mubr.msk.bf16.mxu1 %vm131_vm0, %v412_v4  ;;  %v418_v11 = vld [vmem:[%s660_s0 + $0x38] sm:$0xff]   ;;  %v360_v12 = vld [vmem:[#allocation4] ss:$0 sm:$0xff]  ;;  %v594_v14 = vld [vmem:[#allocation6] ss:$0 sm:$0xff] }
  0x3d   :  { %376 = vmatpush3.bf16.msra.mxu0 %v409_v1  ;;  %399 = vmatpush3.bf16.msra.mxu1 %v409_v1 }
  0x3e   :  { %401 = vmatprep.subr.msk.bf16.mxu0 %vm156_vm1, %v410_v2  ;;  %402 = vmatprep.subr.msk.bf16.mxu1 %vm156_vm1, %v410_v2 }
  0x41   :  { %378 = vmatpush3.bf16.msra.mxu0 %v158_v5  ;;  %400 = vmatpush3.bf16.msra.mxu1 %v158_v5 }
  0x44   :  { %380 = vmatmul.mubr.msk.bf16.vlgmr.msra.gmra.mrb[0].mxu0 %vm131_vm0, %v413_v6  ;;  %388 = vmatmul.mubr.msk.bf16.vlgmr.msra.gmra.mrb[0].mxu1 %vm131_vm0, %v414_v7 }
  0x45   :  { %383 = vmatprep.mubr.msk.bf16.mxu0 %vm131_vm0, %v415_v8  ;;  %391 = vmatprep.mubr.msk.bf16.mxu1 %vm131_vm0, %v416_v9 }
  0x4c   :  { %384 = vmatmul.mubr.msk.bf16.gmra.mrb[4].mxu0 %vm131_vm0, %v417_v10  ;;  %392 = vmatmul.mubr.msk.bf16.gmra.mrb[4].mxu1 %vm131_vm0, %v418_v11 }
 0x117   :  { %v381_v13 = vpop.f32.mrb[0].mxu0  ;;  %v389_v15 = vpop.f32.mrb[0].mxu1 }
 0x118   :  { %v266_v16 = vmul.f32 %v381_v13, %v360_v12  ;;  %v274_v17 = vmul.f32 %v389_v15, %v360_v12  ;;  %v194_v18 = vpop.f32.mrb[1].mxu0  ;;  %v226_v19 = vpop.f32.mrb[1].mxu1 }
 0x119   :  { %v264_v20 = vmul.f32 %v360_v12, %v194_v18  ;;  %v272_v21 = vmul.f32 %v360_v12, %v226_v19  ;;  %v382_v22 = vpop.f32.mrb[2].mxu0  ;;  %v390_v23 = vpop.f32.mrb[2].mxu1 }
 0x11a   :  { %v289_v24 = vadd.f32 %v594_v14, %v266_v16  ;;  %v297_v25 = vadd.f32 %v594_v14, %v274_v17  ;;  %v267_v26 = vmul.f32 %v382_v22, %v360_v12  ;;  %v275_v27 = vmul.f32 %v390_v23, %v360_v12  ;;  %v197_v28 = vpop.f32.mrb[3].mxu0  ;;  %v229_v29 = vpop.f32.mrb[3].mxu1 }
 0x11b   :  { %v287_v30 = vadd.f32 %v594_v14, %v264_v20  ;;  %v295_v31 = vadd.f32 %v594_v14, %v272_v21  ;;  %v265_v32 = vmul.f32 %v360_v12, %v197_v28  ;;  %v273_v33 = vmul.f32 %v360_v12, %v229_v29 }
 0x11c   :  { %v305_v34 = vmax.f32 %v289_v24, 0.0  ;;  %v313_v35 = vmax.f32 %v297_v25, 0.0  ;;  %v290_v36 = vadd.f32 %v594_v14, %v267_v26  ;;  %v298_v37 = vadd.f32 %v594_v14, %v275_v27 }
 0x11d   :  { %v303_v38 = vmax.f32 %v287_v30, 0.0  ;;  %v311_v39 = vmax.f32 %v295_v31, 0.0  ;;  %v288_v40 = vadd.f32 %v594_v14, %v265_v32  ;;  %v296_v41 = vadd.f32 %v594_v14, %v273_v33 }
 0x11e   :  { %321 = vst [vmem:[%s664_s4 + $0x10] sm:$0xff] %v305_v34  ;;  %329 = vst [vmem:[%s664_s4 + $0x50] sm:$0xff] %v313_v35  ;;  %v306_v42 = vmax.f32 %v290_v36, 0.0  ;;  %v314_v43 = vmax.f32 %v298_v37, 0.0 }
 0x11f   :  { %319 = vst [vmem:[%s664_s4] sm:$0xff] %v303_v38  ;;  %327 = vst [vmem:[%s664_s4 + $0x40] sm:$0xff] %v311_v39  ;;  %v304_v44 = vmax.f32 %v288_v40, 0.0  ;;  %v312_v45 = vmax.f32 %v296_v41, 0.0  ;;  %v385_v46 = vpop.f32.mrb[4].mxu0  ;;  %v393_v47 = vpop.f32.mrb[4].mxu1 }
 0x120   :  { %322 = vst [vmem:[%s664_s4 + $0x18] sm:$0xff] %v306_v42  ;;  %330 = vst [vmem:[%s664_s4 + $0x58] sm:$0xff] %v314_v43  ;;  %v270_v48 = vmul.f32 %v385_v46, %v360_v12  ;;  %v278_v49 = vmul.f32 %v393_v47, %v360_v12  ;;  %v210_v50 = vpop.f32.mrb[5].mxu0  ;;  %v242_v51 = vpop.f32.mrb[5].mxu1 }
 0x121   :  { %320 = vst [vmem:[%s664_s4 + $0x8] sm:$0xff] %v304_v44  ;;  %328 = vst [vmem:[%s664_s4 + $0x48] sm:$0xff] %v312_v45  ;;  %v268_v52 = vmul.f32 %v360_v12, %v210_v50  ;;  %v276_v53 = vmul.f32 %v360_v12, %v242_v51  ;;  %v386_v54 = vpop.f32.mrb[6].mxu0  ;;  %v394_v55 = vpop.f32.mrb[6].mxu1 }
 0x122   :  { %v293_v56 = vadd.f32 %v594_v14, %v270_v48  ;;  %v301_v57 = vadd.f32 %v594_v14, %v278_v49  ;;  %v271_v58 = vmul.f32 %v386_v54, %v360_v12  ;;  %v279_v59 = vmul.f32 %v394_v55, %v360_v12  ;;  %v213_v60 = vpop.f32.mrb[7].mxu0  ;;  %v245_v61 = vpop.f32.mrb[7].mxu1 }
 0x123   :  { %v291_v62 = vadd.f32 %v594_v14, %v268_v52  ;;  %v299_v63 = vadd.f32 %v594_v14, %v276_v53  ;;  %v269_v0 = vmul.f32 %v360_v12, %v213_v60  ;;  %v277_v1 = vmul.f32 %v360_v12, %v245_v61 }
 0x124   :  { %v309_v2 = vmax.f32 %v293_v56, 0.0  ;;  %v317_v3 = vmax.f32 %v301_v57, 0.0  ;;  %v294_v4 = vadd.f32 %v594_v14, %v271_v58  ;;  %v302_v5 = vadd.f32 %v594_v14, %v279_v59 }
 0x125   :  { %v307_v6 = vmax.f32 %v291_v62, 0.0  ;;  %v315_v7 = vmax.f32 %v299_v63, 0.0  ;;  %v292_v8 = vadd.f32 %v594_v14, %v269_v0  ;;  %v300_v9 = vadd.f32 %v594_v14, %v277_v1 }
 0x126   :  { %325 = vst [vmem:[%s664_s4 + $0x30] sm:$0xff] %v309_v2  ;;  %333 = vst [vmem:[%s664_s4 + $0x70] sm:$0xff] %v317_v3  ;;  %v310_v10 = vmax.f32 %v294_v4, 0.0  ;;  %v318_v11 = vmax.f32 %v302_v5, 0.0 }
 0x127   :  { %323 = vst [vmem:[%s664_s4 + $0x20] sm:$0xff] %v307_v6  ;;  %331 = vst [vmem:[%s664_s4 + $0x60] sm:$0xff] %v315_v7  ;;  %v308_v12 = vmax.f32 %v292_v8, 0.0  ;;  %v316_v13 = vmax.f32 %v300_v9, 0.0 }
 0x128   :  { %326 = vst [vmem:[%s664_s4 + $0x38] sm:$0xff] %v310_v10  ;;  %334 = vst [vmem:[%s664_s4 + $0x78] sm:$0xff] %v318_v11 }
 0x129   :  { %324 = vst [vmem:[%s664_s4 + $0x28] sm:$0xff] %v308_v12  ;;  %332 = vst [vmem:[%s664_s4 + $0x68] sm:$0xff] %v316_v13 }
 0x12a   :  { %339 = vsyncpa [#allocation3], 1 }
 0x12b   :  { %340 = vsyncpa [#allocation5], 1 }

// kernel: _lambda_.7
= control target key start
LH: loop header
LB: loop body
LE: loop exit
PB: predicated region body
PF: predicated region fallthrough
CT: control target
= control target key end

     0   :  { %9 = vsyncpa [#allocation3], 0  ;;  %s2822_s0 = inlined_call_operand.vmem [shape: bf16[128,1152], index: 0, kind: input, shape index: {}]   ;;  %s2823_s1 = inlined_call_operand.hbm [shape: bf16[1152,128], index: 1, kind: input, shape index: {}]   ;;  %s2824_s2 = inlined_call_operand.hbm [shape: f32[1,128], index: 2, kind: input, shape index: {}]   ;;  %s2825_s3 = inlined_call_operand.hbm [shape: f32[1,128], index: 3, kind: input, shape index: {}]   ;;  %s2826_s4 = inlined_call_operand.vmem [shape: f32[128,128], index: 4, kind: output, shape index: {}]  }
   0x1   :  { %10 = vsyncpa [#allocation5], 0  ;;  %s2365_s15 = smov [#allocation4]   ;;  %s2366_s17 = smov [#allocation2]  }
   0x2   :  { %s31_s16 = sshll.u32 %s2365_s15, 4  ;;  %s18_s18 = sshll.u32 %s2366_s17, 4  ;;  %s32_s16 = int_to_ptr.vmem [resolvable:$true] %s31_s16  ;;  %s2395_s18 = int_to_ptr.vmem [resolvable:$true] %s18_s18 }
   0x3   :  { %s2295_s21 = scalar_lea.hbm %s2824_s2, 16 }
   0x4   :  { %p2296_p0 = scmp.ne.s32.totalorder %s2824_s2, %s2295_s21  ;;  %p2299_p1 = scmp.lt.u32.totalorder %s2295_s21, %s2824_s2 }
   0x6   :  { %p2301_p2 = pnand %p2299_p1, %p2296_p0 }
   0x8   :  { %2304 = shalt.err (!%p2301_p2)
}
   0x9   :  { %s2305_s26 = scalar_lea.vmem %s32_s16, 16  ;;  %s2309_s27 = scalar_lea.vmem %s32_s16, 32 }
   0xa   :  { %p2306_p3 = scmp.ne.s32.totalorder %s32_s16, %s2305_s26  ;;  %p2310_p4 = scmp.lt.s32.totalorder %s32_s16, %s32_s16 }
   0xb   :  { %p2311_p5 = scmp.lt.s32.totalorder %s2309_s27, %s2305_s26 }
   0xd   :  { %p2312_p6 = por %p2311_p5, %p2310_p4 }
   0xf   :  { %p2313_p7 = pnand %p2312_p6, %p2306_p3 }
  0x11   :  { %2316 = shalt.err (!%p2313_p7)
}
  0x12   :  { %34 = dma.hbm_to_vmem [thread:$0]  %s2824_s2, 16, %s32_s16, [#allocation5]  }
  0x13   :  { %s2317_s6 = scalar_lea.hbm %s2823_s1, 9216 }
  0x14   :  { %p2318_p8 = scmp.ne.s32.totalorder %s2823_s1, %s2317_s6  ;;  %p2321_p9 = scmp.lt.u32.totalorder %s2317_s6, %s2823_s1 }
  0x16   :  { %p2323_p10 = pnand %p2321_p9, %p2318_p8 }
  0x18   :  { %2326 = shalt.err (!%p2323_p10)
}
  0x19   :  { %s2327_s11 = scalar_lea.vmem %s2395_s18, 9216  ;;  %p2332_p12 = scmp.lt.s32.totalorder %s2395_s18, %s2395_s18 }
  0x1a   :  { %p2328_p11 = scmp.ne.s32.totalorder %s2395_s18, %s2327_s11  ;;  %p2333_p13 = scmp.lt.s32.totalorder %s2327_s11, %s2327_s11 }
  0x1c   :  { %p2334_p0 = por %p2333_p13, %p2332_p12 }
  0x1e   :  { %p2335_p1 = pnand %p2334_p0, %p2328_p11 }
  0x20   :  { %2338 = shalt.err (!%p2335_p1)
}
  0x21   :  { %s2367_s2 = smov 64   ;;  %s2368_s12 = smov 4  }
  0x22   :  { %24 = dma.hbm_to_vmem [thread:$0]  %s2823_s1, 9216, %s2395_s18, [#allocation3], %s2367_s2, %s2367_s2, %s2368_s12  }
  0x23   :  { %s2369_s15 = smov [#allocation6]   ;;  %s2339_s20 = scalar_lea.hbm %s2825_s3, 16 }
  0x24   :  { %s41_s16 = sshll.u32 %s2369_s15, 4  ;;  %p2340_p2 = scmp.ne.s32.totalorder %s2825_s3, %s2339_s20  ;;  %s42_s16 = int_to_ptr.vmem [resolvable:$true] %s41_s16 }
  0x25   :  { %p2343_p3 = scmp.lt.u32.totalorder %s2339_s20, %s2825_s3 }
  0x27   :  { %p2345_p4 = pnand %p2343_p3, %p2340_p2 }
  0x29   :  { %2348 = shalt.err (!%p2345_p4)
}
  0x2a   :  { %s2349_s25 = scalar_lea.vmem %s42_s16, 16  ;;  %s2353_s1 = scalar_lea.vmem %s42_s16, 32 }
  0x2b   :  { %p2350_p5 = scmp.ne.s32.totalorder %s42_s16, %s2349_s25  ;;  %p2354_p6 = scmp.lt.s32.totalorder %s42_s16, %s42_s16 }
  0x2c   :  { %p2355_p7 = scmp.lt.s32.totalorder %s2353_s1, %s2349_s25 }
  0x2e   :  { %p2356_p8 = por %p2355_p7, %p2354_p6 }
  0x30   :  { %p2357_p9 = pnand %p2356_p8, %p2350_p5 }
  0x32   :  { %2360 = shalt.err (!%p2357_p9)
}
  0x33   :  { %44 = dma.hbm_to_vmem [thread:$0]  %s2825_s3, 16, %s42_s16, [#allocation5]  }
  0x34   :  { %2361 = dma.done.wait [#allocation3], 9216  }
  0x35   :  { %2362 = vsyncadd [#allocation3], 4294958080 }
  0x36   :  { %2363 = dma.done.wait [#allocation5], 32  }
  0x37   :  { %2364 = vsyncadd [#allocation5], 4294967264  ;;  %v2119_v0 = vld [vmem:[#allocation2 + $0x40] sm:$0xff]   ;;  %v2123_v4 = vld [vmem:[#allocation2 + $0x48] sm:$0xff]  }
  0x38   :  { %v2120_v1 = vld [vmem:[#allocation2 + $0xc0] sm:$0xff]   ;;  %1794 = vmatprep.subr.bf16.mxu0 %v2119_v0  ;;  %v2124_v5 = vld [vmem:[#allocation2 + $0xc8] sm:$0xff]   ;;  %v2127_v8 = vld [vmem:[#allocation2 + $0x50] sm:$0xff]  }
  0x39   :  { %v2121_v2 = vld [vmem:[#allocation2] sm:$0xff]   ;;  %1858 = vmatprep.subr.bf16.mxu1 %v2120_v1  ;;  %v2125_v6 = vld [vmem:[#allocation2 + $0x8] sm:$0xff]   ;;  %v2128_v9 = vld [vmem:[#allocation2 + $0xd0] sm:$0xff]  }
  0x3a   :  { %v2122_v3 = vld [vmem:[#allocation2 + $0x80] sm:$0xff]   ;;  %1795 = vmatpush3.bf16.msra.mxu0 %v2121_v2  ;;  %v2126_v7 = vld [vmem:[#allocation2 + $0x88] sm:$0xff]   ;;  %v2129_v10 = vld [vmem:[#allocation2 + $0x10] sm:$0xff]  }
  0x3b   :  { %1859 = vmatpush3.bf16.msra.mxu1 %v2122_v3  ;;  %1796 = vmatprep.subr.bf16.mxu0 %v2123_v4  ;;  %v2130_v11 = vld [vmem:[#allocation2 + $0x90] sm:$0xff]   ;;  %v2131_v12 = vld [vmem:[#allocation2 + $0x58] sm:$0xff]   ;;  %v2135_v16 = vld [vmem:[#allocation2 + $0x60] sm:$0xff]  }
  0x3c   :  { %1860 = vmatprep.subr.bf16.mxu1 %v2124_v5  ;;  %v2132_v13 = vld [vmem:[#allocation2 + $0xd8] sm:$0xff]   ;;  %v2136_v17 = vld [vmem:[#allocation2 + $0xe0] sm:$0xff]   ;;  %v2139_v20 = vld [vmem:[#allocation2 + $0x68] sm:$0xff]  }
  0x3d   :  { %v2133_v14 = vld [vmem:[#allocation2 + $0x18] sm:$0xff]   ;;  %v2137_v18 = vld [vmem:[#allocation2 + $0x20] sm:$0xff]   ;;  %v2140_v21 = vld [vmem:[#allocation2 + $0xe8] sm:$0xff]  }
  0x3e   :  { %1797 = vmatpush3.bf16.msra.mxu0 %v2125_v6  ;;  %v2134_v15 = vld [vmem:[#allocation2 + $0x98] sm:$0xff]   ;;  %v2138_v19 = vld [vmem:[#allocation2 + $0xa0] sm:$0xff]   ;;  %v2141_v22 = vld [vmem:[#allocation2 + $0x28] sm:$0xff]  }
  0x3f   :  { %1861 = vmatpush3.bf16.msra.mxu1 %v2126_v7  ;;  %1798 = vmatprep.subr.bf16.mxu0 %v2127_v8  ;;  %v2142_v23 = vld [vmem:[#allocation2 + $0xa8] sm:$0xff]   ;;  %v2143_v24 = vld [vmem:[#allocation2 + $0x70] sm:$0xff]   ;;  %v2147_v28 = vld [vmem:[#allocation2 + $0x78] sm:$0xff]  }
  0x40   :  { %1862 = vmatprep.subr.bf16.mxu1 %v2128_v9  ;;  %v2144_v25 = vld [vmem:[#allocation2 + $0xf0] sm:$0xff]   ;;  %v2148_v29 = vld [vmem:[#allocation2 + $0xf8] sm:$0xff]   ;;  %v2151_v32 = vld [vmem:[%s2822_s0] ss:$36 sps:$4 sm:$0xff]  }
  0x41   :  { %v2145_v26 = vld [vmem:[#allocation2 + $0x30] sm:$0xff]   ;;  %v2149_v30 = vld [vmem:[#allocation2 + $0x38] sm:$0xff]   ;;  %v2153_v33 = vld [vmem:[%s2822_s0 + $0x4] ss:$36 sps:$4 sm:$0xff]  }
  0x42   :  { %1799 = vmatpush3.bf16.msra.mxu0 %v2129_v10  ;;  %v2146_v27 = vld [vmem:[#allocation2 + $0xb0] sm:$0xff]   ;;  %v2150_v31 = vld [vmem:[#allocation2 + $0xb8] sm:$0xff]   ;;  %v2154_v34 = vld [vmem:[%s2822_s0 + $0x8] ss:$36 sps:$4 sm:$0xff]   ;;  %1111 = vmatprep.mubr.bf16.mxu0 %v2153_v33 }
  0x43   :  { %1863 = vmatpush3.bf16.msra.mxu1 %v2130_v11  ;;  %1800 = vmatprep.subr.bf16.mxu0 %v2131_v12  ;;  %v2156_v35 = vld [vmem:[%s2822_s0 + $0xc] ss:$36 sps:$4 sm:$0xff]   ;;  %v2157_v36 = vld [vmem:[#allocation2 + $0x140] sm:$0xff]   ;;  %v2163_v41 = vld [vmem:[%s2822_s0 + $0x54] ss:$36 sps:$4 sm:$0xff]  }
  0x44   :  { %1864 = vmatprep.subr.bf16.mxu1 %v2132_v13  ;;  %1208 = vmatprep.mubr.bf16.mxu1 %v2156_v35  ;;  %v2158_v37 = vld [vmem:[#allocation2 + $0x1c0] sm:$0xff]   ;;  %v2161_v40 = vld [vmem:[%s2822_s0 + $0x4c] ss:$36 sps:$4 sm:$0xff]   ;;  %v2171_v48 = vld [vmem:[%s2822_s0 + $0x94] ss:$36 sps:$4 sm:$0xff]  }
  0x45   :  { %v2159_v38 = vld [vmem:[#allocation2 + $0x100] sm:$0xff]   ;;  %v2165_v42 = vld [vmem:[%s2822_s0 + $0x48] ss:$36 sps:$4 sm:$0xff]   ;;  %v2166_v43 = vld [vmem:[%s2822_s0 + $0x50] ss:$36 sps:$4 sm:$0xff]  }
  0x46   :  { %1801 = vmatpush3.bf16.msra.mxu0 %v2133_v14  ;;  %v2160_v39 = vld [vmem:[#allocation2 + $0x180] sm:$0xff]   ;;  %v2167_v44 = vld [vmem:[#allocation2 + $0x148] sm:$0xff]   ;;  %v2175_v50 = vld [vmem:[%s2822_s0 + $0x90] ss:$36 sps:$4 sm:$0xff]  }
  0x47   :  { %1865 = vmatpush3.bf16.msra.mxu1 %v2134_v15  ;;  %1802 = vmatprep.subr.bf16.mxu0 %v2135_v16  ;;  %v2168_v45 = vld [vmem:[#allocation2 + $0x1c8] sm:$0xff]   ;;  %v2173_v49 = vld [vmem:[%s2822_s0 + $0x9c] ss:$36 sps:$4 sm:$0xff]   ;;  %v2177_v52 = vld [vmem:[#allocation2 + $0x150] sm:$0xff]  }
  0x48   :  { %1866 = vmatprep.subr.bf16.mxu1 %v2136_v17  ;;  %v2169_v46 = vld [vmem:[#allocation2 + $0x108] sm:$0xff]   ;;  %v2176_v51 = vld [vmem:[%s2822_s0 + $0x98] ss:$36 sps:$4 sm:$0xff]   ;;  %v2178_v53 = vld [vmem:[#allocation2 + $0x1d0] sm:$0xff]  }
  0x49   :  { %v2170_v47 = vld [vmem:[#allocation2 + $0x188] sm:$0xff]   ;;  %v2179_v54 = vld [vmem:[#allocation2 + $0x110] sm:$0xff]   ;;  %v2181_v56 = vld [vmem:[%s2822_s0 + $0xdc] ss:$36 sps:$4 sm:$0xff]  }
  0x4a   :  { %1803 = vmatpush3.bf16.msra.mxu0 %v2137_v18  ;;  %v2180_v55 = vld [vmem:[#allocation2 + $0x190] sm:$0xff]   ;;  %v2183_v57 = vld [vmem:[%s2822_s0 + $0xe4] ss:$36 sps:$4 sm:$0xff]   ;;  %v2185_v58 = vld [vmem:[%s2822_s0 + $0xd8] ss:$36 sps:$4 sm:$0xff]  }
  0x4b   :  { %1867 = vmatpush3.bf16.msra.mxu1 %v2138_v19  ;;  %1804 = vmatprep.subr.bf16.mxu0 %v2139_v20  ;;  %v2186_v59 = vld [vmem:[%s2822_s0 + $0xe0] ss:$36 sps:$4 sm:$0xff]   ;;  %v2187_v60 = vld [vmem:[#allocation2 + $0x158] sm:$0xff]   ;;  %v2193_v1 = vld [vmem:[%s2822_s0 + $0x12c] ss:$36 sps:$4 sm:$0xff]  }
  0x4c   :  { %1868 = vmatprep.subr.bf16.mxu1 %v2140_v21  ;;  %v2188_v61 = vld [vmem:[#allocation2 + $0x1d8] sm:$0xff]   ;;  %v2191_v0 = vld [vmem:[%s2822_s0 + $0x124] ss:$36 sps:$4 sm:$0xff]   ;;  %v2201_v8 = vld [vmem:[%s2822_s0 + $0x16c] ss:$36 sps:$4 sm:$0xff]  }
  0x4d   :  { %v2189_v62 = vld [vmem:[#allocation2 + $0x118] sm:$0xff]   ;;  %v2195_v2 = vld [vmem:[%s2822_s0 + $0x120] ss:$36 sps:$4 sm:$0xff]   ;;  %v2196_v4 = vld [vmem:[%s2822_s0 + $0x128] ss:$36 sps:$4 sm:$0xff]  }
  0x4e   :  { %1805 = vmatpush3.bf16.msra.mxu0 %v2141_v22  ;;  %v2190_v63 = vld [vmem:[#allocation2 + $0x198] sm:$0xff]   ;;  %v2197_v3 = vld [vmem:[#allocation2 + $0x160] sm:$0xff]   ;;  %v2207_v10 = vld [vmem:[#allocation2 + $0x168] sm:$0xff]  }
  0x4f   :  { %1869 = vmatpush3.bf16.msra.mxu1 %v2142_v23  ;;  %1806 = vmatprep.subr.bf16.mxu0 %v2143_v24  ;;  %v2198_v5 = vld [vmem:[#allocation2 + $0x1e0] sm:$0xff]   ;;  %v2203_v9 = vld [vmem:[%s2822_s0 + $0x174] ss:$36 sps:$4 sm:$0xff]   ;;  %v2208_v11 = vld [vmem:[#allocation2 + $0x1e8] sm:$0xff]  }
  0x50   :  { %1870 = vmatprep.subr.bf16.mxu1 %v2144_v25  ;;  %v2199_v6 = vld [vmem:[#allocation2 + $0x120] sm:$0xff]   ;;  %v2205_v12 = vld [vmem:[%s2822_s0 + $0x168] ss:$36 sps:$4 sm:$0xff]   ;;  %v2206_v15 = vld [vmem:[%s2822_s0 + $0x170] ss:$36 sps:$4 sm:$0xff]  }
  0x51   :  { %v2200_v7 = vld [vmem:[#allocation2 + $0x1a0] sm:$0xff]   ;;  %v2209_v13 = vld [vmem:[#allocation2 + $0x128] sm:$0xff]   ;;  %v2211_v16 = vld [vmem:[%s2822_s0 + $0x1b4] ss:$36 sps:$4 sm:$0xff]  }
  0x52   :  { %1807 = vmatpush3.bf16.msra.mxu0 %v2145_v26  ;;  %v2210_v14 = vld [vmem:[#allocation2 + $0x1a8] sm:$0xff]   ;;  %v2213_v17 = vld [vmem:[%s2822_s0 + $0x1bc] ss:$36 sps:$4 sm:$0xff]   ;;  %v2217_v18 = vld [vmem:[#allocation2 + $0x170] sm:$0xff]  }
  0x53   :  { %1871 = vmatpush3.bf16.msra.mxu1 %v2146_v27  ;;  %1808 = vmatprep.subr.bf16.mxu0 %v2147_v28  ;;  %v2218_v19 = vld [vmem:[#allocation2 + $0x1f0] sm:$0xff]   ;;  %v2216_v23 = vld [vmem:[%s2822_s0 + $0x1b8] ss:$36 sps:$4 sm:$0xff]   ;;  %v2223_v25 = vld [vmem:[%s2822_s0 + $0x204] ss:$36 sps:$4 sm:$0xff]  }
  0x54   :  { %1872 = vmatprep.subr.bf16.mxu1 %v2148_v29  ;;  %v2219_v20 = vld [vmem:[#allocation2 + $0x130] sm:$0xff]   ;;  %v2221_v24 = vld [vmem:[%s2822_s0 + $0x1fc] ss:$36 sps:$4 sm:$0xff]  }
  0x55   :  { %v2220_v21 = vld [vmem:[#allocation2 + $0x1b0] sm:$0xff]   ;;  %v2227_v26 = vld [vmem:[#allocation2 + $0x178] sm:$0xff]  }
  0x56   :  { %1809 = vmatpush3.bf16.msra.mxu0 %v2149_v30  ;;  %v2215_v22 = vld [vmem:[%s2822_s0 + $0x1b0] ss:$36 sps:$4 sm:$0xff]   ;;  %v2228_v27 = vld [vmem:[#allocation2 + $0x1f8] sm:$0xff]  }
  0x57   :  { %1873 = vmatpush3.bf16.msra.mxu1 %v2150_v31  ;;  %1922 = vmatprep.subr.bf16.mxu0 %v2157_v36  ;;  %v2229_v28 = vld [vmem:[#allocation2 + $0x138] sm:$0xff]   ;;  %v2226_v31 = vld [vmem:[%s2822_s0 + $0x200] ss:$36 sps:$4 sm:$0xff]   ;;  %v2231_v35 = vld [vmem:[%s2822_s0 + $0x10] ss:$36 sps:$4 sm:$0xff]  }
  0x58   :  { %1986 = vmatprep.subr.bf16.mxu1 %v2158_v37  ;;  %v2230_v29 = vld [vmem:[#allocation2 + $0x1b8] sm:$0xff]  }
  0x59   :  { %1112 = vmatmul.mubr.bf16.vlgmr.msra.gmra.mrb[0].mxu0 %v2151_v32  ;;  %v2225_v30 = vld [vmem:[%s2822_s0 + $0x1f8] ss:$36 sps:$4 sm:$0xff]   ;;  %v2237_v32 = vld [vmem:[#allocation2 + $0x200] sm:$0xff]  }
  0x5a   :  { %1209 = vmatmul.mubr.bf16.vlgmr.msra.gmra.mrb[0].mxu1 %v2154_v34  ;;  %1923 = vmatpush3.bf16.msra.mxu0 %v2159_v38  ;;  %v2233_v33 = vld [vmem:[%s2822_s0 + $0x14] ss:$36 sps:$4 sm:$0xff]   ;;  %v2236_v34 = vld [vmem:[%s2822_s0 + $0x1c] ss:$36 sps:$4 sm:$0xff]   ;;  %v2240_v38 = vld [vmem:[%s2822_s0 + $0x64] ss:$36 sps:$4 sm:$0xff]  }
  0x5b   :  { %1987 = vmatpush3.bf16.msra.mxu1 %v2160_v39  ;;  %1119 = vmatprep.mubr.bf16.mxu0 %v2161_v40  ;;  %v2234_v36 = vld [vmem:[%s2822_s0 + $0x18] ss:$36 sps:$4 sm:$0xff]   ;;  %v2244_v39 = vld [vmem:[#allocation2 + $0x208] sm:$0xff]   ;;  %v2251_v40 = vld [vmem:[#allocation2 + $0x210] sm:$0xff]  }
  0x5c   :  { %1216 = vmatprep.mubr.bf16.mxu1 %v2163_v41  ;;  %1924 = vmatprep.subr.bf16.mxu0 %v2167_v44  ;;  %v2238_v37 = vld [vmem:[%s2822_s0 + $0x5c] ss:$36 sps:$4 sm:$0xff]   ;;  %v2247_v44 = vld [vmem:[%s2822_s0 + $0xac] ss:$36 sps:$4 sm:$0xff]  }
  0x5d   :  { %1988 = vmatprep.subr.bf16.mxu1 %v2168_v45  ;;  %v2242_v41 = vld [vmem:[%s2822_s0 + $0x58] ss:$36 sps:$4 sm:$0xff]  }
  0x5e   :  { %1925 = vmatpush3.bf16.msra.mxu0 %v2169_v46  ;;  %v2258_v45 = vld [vmem:[#allocation2 + $0x218] sm:$0xff]   ;;  %v2265_v46 = vld [vmem:[#allocation2 + $0x220] sm:$0xff]  }
  0x5f   :  { %1989 = vmatpush3.bf16.msra.mxu1 %v2170_v47  ;;  %1926 = vmatprep.subr.bf16.mxu0 %v2177_v52  ;;  %v2249_v47 = vld [vmem:[%s2822_s0 + $0xa0] ss:$36 sps:$4 sm:$0xff]   ;;  %v2256_v52 = vld [vmem:[%s2822_s0 + $0xe8] ss:$36 sps:$4 sm:$0xff]  }
  0x60   :  { %1990 = vmatprep.subr.bf16.mxu1 %v2178_v53  ;;  %v2279_v53 = vld [vmem:[#allocation2 + $0x230] sm:$0xff]  }
  0x61   :  { %1120 = vmatmul.mubr.bf16.gmra.mrb[4].mxu0 %v2165_v42  ;;  %v2243_v42 = vld [vmem:[%s2822_s0 + $0x60] ss:$36 sps:$4 sm:$0xff]  }
  0x62   :  { %1217 = vmatmul.mubr.bf16.gmra.mrb[4].mxu1 %v2166_v43  ;;  %1127 = vmatprep.mubr.bf16.mxu0 %v2171_v48  ;;  %v2245_v43 = vld [vmem:[%s2822_s0 + $0xa4] ss:$36 sps:$4 sm:$0xff]  }
  0x63   :  { %1224 = vmatprep.mubr.bf16.mxu1 %v2173_v49  ;;  %1927 = vmatpush3.bf16.msra.mxu0 %v2179_v54  ;;  %v2250_v48 = vld [vmem:[%s2822_s0 + $0xa8] ss:$36 sps:$4 sm:$0xff]   ;;  %v2257_v54 = vld [vmem:[%s2822_s0 + $0xf0] ss:$36 sps:$4 sm:$0xff]  }
  0x64   :  { %1991 = vmatpush3.bf16.msra.mxu1 %v2180_v55  ;;  %1928 = vmatprep.subr.bf16.mxu0 %v2187_v60  ;;  %v2252_v49 = vld [vmem:[%s2822_s0 + $0xec] ss:$36 sps:$4 sm:$0xff]   ;;  %v2259_v55 = vld [vmem:[%s2822_s0 + $0x134] ss:$36 sps:$4 sm:$0xff]   ;;  %v2266_v60 = vld [vmem:[%s2822_s0 + $0x17c] ss:$36 sps:$4 sm:$0xff]  }
  0x65   :  { %1992 = vmatprep.subr.bf16.mxu1 %v2188_v61  ;;  %v2268_v61 = vld [vmem:[%s2822_s0 + $0x184] ss:$36 sps:$4 sm:$0xff]  }
  0x67   :  { %1929 = vmatpush3.bf16.msra.mxu0 %v2189_v62  ;;  %v2270_v62 = vld [vmem:[%s2822_s0 + $0x178] ss:$36 sps:$4 sm:$0xff]  }
  0x68   :  { %1993 = vmatpush3.bf16.msra.mxu1 %v2190_v63  ;;  %1930 = vmatprep.subr.bf16.mxu0 %v2197_v3  ;;  %v2271_v63 = vld [vmem:[%s2822_s0 + $0x180] ss:$36 sps:$4 sm:$0xff]   ;;  %v2278_v3 = vld [vmem:[%s2822_s0 + $0x1c8] ss:$36 sps:$4 sm:$0xff]  }
  0x69   :  { %1128 = vmatmul.mubr.bf16.gmra.mrb[8].mxu0 %v2175_v50  ;;  %1994 = vmatprep.subr.bf16.mxu1 %v2198_v5  ;;  %v2254_v50 = vld [vmem:[%s2822_s0 + $0xf4] ss:$36 sps:$4 sm:$0xff]  }
  0x6a   :  { %1225 = vmatmul.mubr.bf16.gmra.mrb[8].mxu1 %v2176_v51  ;;  %1135 = vmatprep.mubr.bf16.mxu0 %v2181_v56  ;;  %v2272_v51 = vld [vmem:[#allocation2 + $0x228] sm:$0xff]   ;;  %v2261_v56 = vld [vmem:[%s2822_s0 + $0x13c] ss:$36 sps:$4 sm:$0xff]   ;;  %v2282_v5 = vld [vmem:[%s2822_s0 + $0x214] ss:$36 sps:$4 sm:$0xff]  }
  0x6b   :  { %1232 = vmatprep.mubr.bf16.mxu1 %v2183_v57  ;;  %1931 = vmatpush3.bf16.msra.mxu0 %v2199_v6  ;;  %v2286_v57 = vld [vmem:[#allocation2 + $0x238] sm:$0xff]   ;;  %v2284_v6 = vld [vmem:[%s2822_s0 + $0x208] ss:$36 sps:$4 sm:$0xff]  }
  0x6c   :  { %1995 = vmatpush3.bf16.msra.mxu1 %v2200_v7  ;;  %1932 = vmatprep.subr.bf16.mxu0 %v2207_v10  ;;  %v2285_v7 = vld [vmem:[%s2822_s0 + $0x210] ss:$36 sps:$4 sm:$0xff]   ;;  %v2289_v10 = vld [vmem:[%s2822_s0 + $0x68] ss:$36 sps:$4 sm:$0xff]  }
  0x6d   :  { %1996 = vmatprep.subr.bf16.mxu1 %v2208_v11  ;;  %v2290_v11 = vld [vmem:[%s2822_s0 + $0x188] ss:$36 sps:$4 sm:$0xff]  }
  0x6f   :  { %1933 = vmatpush3.bf16.msra.mxu0 %v2209_v13  ;;  %v2292_v13 = vld [vmem:[%s2822_s0 + $0x1d0] ss:$36 sps:$4 sm:$0xff]  }
  0x70   :  { %1997 = vmatpush3.bf16.msra.mxu1 %v2210_v14  ;;  %1934 = vmatprep.subr.bf16.mxu0 %v2217_v18  ;;  %v2293_v14 = vld [vmem:[%s2822_s0 + $0xf8] ss:$36 sps:$4 sm:$0xff]  }
  0x71   :  { %1136 = vmatmul.mubr.bf16.gmra.mrb[12].mxu0 %v2185_v58  ;;  %1998 = vmatprep.subr.bf16.mxu1 %v2218_v19  ;;  %v2263_v58 = vld [vmem:[%s2822_s0 + $0x130] ss:$36 sps:$4 sm:$0xff]  }
  0x72   :  { %1233 = vmatmul.mubr.bf16.gmra.mrb[12].mxu1 %v2186_v59  ;;  %1143 = vmatprep.mubr.bf16.mxu0 %v2191_v0  ;;  %v2264_v59 = vld [vmem:[%s2822_s0 + $0x138] ss:$36 sps:$4 sm:$0xff]   ;;  %v2273_v0 = vld [vmem:[%s2822_s0 + $0x1c4] ss:$36 sps:$4 sm:$0xff]  }
  0x73   :  { %1240 = vmatprep.mubr.bf16.mxu1 %v2193_v1  ;;  %1935 = vmatpush3.bf16.msra.mxu0 %v2219_v20  ;;  %v2275_v1 = vld [vmem:[%s2822_s0 + $0x1cc] ss:$36 sps:$4 sm:$0xff]  }
  0x74   :  { %1999 = vmatpush3.bf16.msra.mxu1 %v2220_v21  ;;  %1936 = vmatprep.subr.bf16.mxu0 %v2227_v26 }
  0x75   :  { %2000 = vmatprep.subr.bf16.mxu1 %v2228_v27 }
  0x77   :  { %1937 = vmatpush3.bf16.msra.mxu0 %v2229_v28 }
  0x78   :  { %2001 = vmatpush3.bf16.msra.mxu1 %v2230_v29  ;;  %2066 = vmatprep.subr.bf16.mxu0 %v2237_v32 }
  0x79   :  { %1144 = vmatmul.mubr.bf16.gmra.mrb[16].mxu0 %v2195_v2  ;;  %2098 = vmatprep.subr.bf16.mxu1 %v2237_v32  ;;  %v2277_v2 = vld [vmem:[%s2822_s0 + $0x1c0] ss:$36 sps:$4 sm:$0xff]  }
  0x7a   :  { %1241 = vmatmul.mubr.bf16.gmra.mrb[16].mxu1 %v2196_v4  ;;  %1151 = vmatprep.mubr.bf16.mxu0 %v2201_v8  ;;  %v2280_v4 = vld [vmem:[%s2822_s0 + $0x20c] ss:$36 sps:$4 sm:$0xff]   ;;  %v2287_v8 = vld [vmem:[%s2822_s0 + $0x20] ss:$36 sps:$4 sm:$0xff]  }
  0x7b   :  { %1248 = vmatprep.mubr.bf16.mxu1 %v2203_v9  ;;  %v2288_v9 = vld [vmem:[%s2822_s0 + $0x140] ss:$36 sps:$4 sm:$0xff]  }
  0x81   :  { %1152 = vmatmul.mubr.bf16.gmra.mrb[20].mxu0 %v2205_v12  ;;  %v2291_v12 = vld [vmem:[%s2822_s0 + $0xb0] ss:$36 sps:$4 sm:$0xff]  }
  0x82   :  { %1249 = vmatmul.mubr.bf16.gmra.mrb[20].mxu1 %v2206_v15  ;;  %1159 = vmatprep.mubr.bf16.mxu0 %v2211_v16  ;;  %v2294_v15 = vld [vmem:[%s2822_s0 + $0x218] ss:$36 sps:$4 sm:$0xff]  }
  0x83   :  { %1256 = vmatprep.mubr.bf16.mxu1 %v2213_v17 }
  0x89   :  { %1160 = vmatmul.mubr.bf16.gmra.mrb[24].mxu0 %v2215_v22 }
  0x8a   :  { %1257 = vmatmul.mubr.bf16.gmra.mrb[24].mxu1 %v2216_v23  ;;  %1167 = vmatprep.mubr.bf16.mxu0 %v2221_v24 }
  0x8b   :  { %1264 = vmatprep.mubr.bf16.mxu1 %v2223_v25 }
  0x91   :  { %1168 = vmatmul.mubr.bf16.gmra.mrb[28].mxu0 %v2225_v30 }
  0x92   :  { %1265 = vmatmul.mubr.bf16.gmra.mrb[28].mxu1 %v2226_v31  ;;  %1305 = vmatprep.mubr.bf16.mxu0 %v2233_v33 }
  0x93   :  { %1402 = vmatprep.mubr.bf16.mxu1 %v2236_v34 }
  0x99   :  { %1306 = vmatmul.mubr.bf16.vlgmr.msra.gmra.mrb[32].mxu0 %v2231_v35 }
  0x9a   :  { %1403 = vmatmul.mubr.bf16.vlgmr.msra.gmra.mrb[32].mxu1 %v2234_v36  ;;  %2067 = vmatpush3.bf16.msra.mxu0 %v2237_v32 }
  0x9b   :  { %2106 = vmatpush3.bf16.msra.mxu1 %v2237_v32  ;;  %1313 = vmatprep.mubr.bf16.mxu0 %v2238_v37 }
  0x9c   :  { %1410 = vmatprep.mubr.bf16.mxu1 %v2240_v38  ;;  %2068 = vmatprep.subr.bf16.mxu0 %v2244_v39 }
  0x9d   :  { %2099 = vmatprep.subr.bf16.mxu1 %v2244_v39 }
  0x9e   :  { %2069 = vmatpush3.bf16.msra.mxu0 %v2244_v39 }
  0x9f   :  { %2107 = vmatpush3.bf16.msra.mxu1 %v2244_v39  ;;  %2070 = vmatprep.subr.bf16.mxu0 %v2251_v40 }
  0xa0   :  { %2100 = vmatprep.subr.bf16.mxu1 %v2251_v40 }
  0xa1   :  { %1314 = vmatmul.mubr.bf16.gmra.mrb[36].mxu0 %v2242_v41 }
  0xa2   :  { %1411 = vmatmul.mubr.bf16.gmra.mrb[36].mxu1 %v2243_v42  ;;  %1321 = vmatprep.mubr.bf16.mxu0 %v2245_v43 }
  0xa3   :  { %1418 = vmatprep.mubr.bf16.mxu1 %v2247_v44  ;;  %2071 = vmatpush3.bf16.msra.mxu0 %v2251_v40 }
  0xa4   :  { %2108 = vmatpush3.bf16.msra.mxu1 %v2251_v40  ;;  %2072 = vmatprep.subr.bf16.mxu0 %v2258_v45 }
  0xa5   :  { %2101 = vmatprep.subr.bf16.mxu1 %v2258_v45 }
  0xa7   :  { %2073 = vmatpush3.bf16.msra.mxu0 %v2258_v45 }
  0xa8   :  { %2109 = vmatpush3.bf16.msra.mxu1 %v2258_v45  ;;  %2074 = vmatprep.subr.bf16.mxu0 %v2265_v46 }
  0xa9   :  { %1322 = vmatmul.mubr.bf16.gmra.mrb[40].mxu0 %v2249_v47  ;;  %2102 = vmatprep.subr.bf16.mxu1 %v2265_v46 }
  0xaa   :  { %1419 = vmatmul.mubr.bf16.gmra.mrb[40].mxu1 %v2250_v48  ;;  %1329 = vmatprep.mubr.bf16.mxu0 %v2252_v49 }
  0xab   :  { %1426 = vmatprep.mubr.bf16.mxu1 %v2254_v50  ;;  %2075 = vmatpush3.bf16.msra.mxu0 %v2265_v46 }
  0xac   :  { %2110 = vmatpush3.bf16.msra.mxu1 %v2265_v46  ;;  %2076 = vmatprep.subr.bf16.mxu0 %v2272_v51 }
  0xad   :  { %2103 = vmatprep.subr.bf16.mxu1 %v2272_v51 }
  0xaf   :  { %2077 = vmatpush3.bf16.msra.mxu0 %v2272_v51 }
  0xb0   :  { %2111 = vmatpush3.bf16.msra.mxu1 %v2272_v51  ;;  %2078 = vmatprep.subr.bf16.mxu0 %v2279_v53 }
  0xb1   :  { %1330 = vmatmul.mubr.bf16.gmra.mrb[44].mxu0 %v2256_v52  ;;  %2104 = vmatprep.subr.bf16.mxu1 %v2279_v53 }
  0xb2   :  { %1427 = vmatmul.mubr.bf16.gmra.mrb[44].mxu1 %v2257_v54  ;;  %1337 = vmatprep.mubr.bf16.mxu0 %v2259_v55 }
  0xb3   :  { %1434 = vmatprep.mubr.bf16.mxu1 %v2261_v56  ;;  %2079 = vmatpush3.bf16.msra.mxu0 %v2279_v53 }
  0xb4   :  { %2112 = vmatpush3.bf16.msra.mxu1 %v2279_v53  ;;  %2080 = vmatprep.subr.bf16.mxu0 %v2286_v57 }
  0xb5   :  { %2105 = vmatprep.subr.bf16.mxu1 %v2286_v57 }
  0xb7   :  { %2081 = vmatpush3.bf16.msra.mxu0 %v2286_v57 }
  0xb8   :  { %2113 = vmatpush3.bf16.msra.mxu1 %v2286_v57 }
  0xb9   :  { %1338 = vmatmul.mubr.bf16.gmra.mrb[48].mxu0 %v2263_v58 }
  0xba   :  { %1435 = vmatmul.mubr.bf16.gmra.mrb[48].mxu1 %v2264_v59  ;;  %1345 = vmatprep.mubr.bf16.mxu0 %v2266_v60 }
  0xbb   :  { %1442 = vmatprep.mubr.bf16.mxu1 %v2268_v61 }
  0xc1   :  { %1346 = vmatmul.mubr.bf16.gmra.mrb[52].mxu0 %v2270_v62 }
  0xc2   :  { %1443 = vmatmul.mubr.bf16.gmra.mrb[52].mxu1 %v2271_v63  ;;  %1353 = vmatprep.mubr.bf16.mxu0 %v2273_v0 }
  0xc3   :  { %1450 = vmatprep.mubr.bf16.mxu1 %v2275_v1 }
  0xc9   :  { %1354 = vmatmul.mubr.bf16.gmra.mrb[56].mxu0 %v2277_v2 }
  0xca   :  { %1451 = vmatmul.mubr.bf16.gmra.mrb[56].mxu1 %v2278_v3  ;;  %1361 = vmatprep.mubr.bf16.mxu0 %v2280_v4 }
  0xcb   :  { %1458 = vmatprep.mubr.bf16.mxu1 %v2282_v5 }
  0xd1   :  { %1362 = vmatmul.mubr.bf16.gmra.mrb[60].mxu0 %v2284_v6 }
  0xd2   :  { %1459 = vmatmul.mubr.bf16.gmra.mrb[60].mxu1 %v2285_v7  ;;  %2082 = vmatprep.mubr.bf16.mxu0 %v2287_v8 }
  0xd3   :  { %2090 = vmatprep.mubr.bf16.mxu1 %v2288_v9 }
  0xd9   :  { %2083 = vmatmul.mubr.bf16.vlgmr.msra.gmra.mrb[64].mxu0 %v2289_v10 }
  0xda   :  { %2091 = vmatmul.mubr.bf16.vlgmr.msra.gmra.mrb[64].mxu1 %v2290_v11  ;;  %2086 = vmatprep.mubr.bf16.mxu0 %v2291_v12 }
  0xdb   :  { %2094 = vmatprep.mubr.bf16.mxu1 %v2292_v13 }
  0xe1   :  { %2087 = vmatmul.mubr.bf16.gmra.mrb[68].mxu0 %v2293_v14 }
  0xe2   :  { %2095 = vmatmul.mubr.bf16.gmra.mrb[68].mxu1 %v2294_v15 }
 0x12c   :  { %v1810_v16 = vpop.f32.mrb[0].mxu0 }
 0x12d   :  { %v1874_v17 = vpop.f32.mrb[0].mxu1  ;;  %v1811_v18 = vpop.f32.mrb[1].mxu0 }
 0x12e   :  { %v1812_v19 = vadd.f32 %v1811_v18, %v1810_v16  ;;  %v1875_v20 = vpop.f32.mrb[1].mxu1  ;;  %v1813_v21 = vpop.f32.mrb[2].mxu0 }
 0x12f   :  { %v1876_v22 = vadd.f32 %v1875_v20, %v1874_v17  ;;  %v1877_v23 = vpop.f32.mrb[2].mxu1  ;;  %v1814_v24 = vpop.f32.mrb[3].mxu0 }
 0x130   :  { %v1815_v25 = vadd.f32 %v1814_v24, %v1813_v21  ;;  %v1878_v26 = vpop.f32.mrb[3].mxu1 }
 0x131   :  { %v2654_v27 = vadd.f32 %v1876_v22, %v1812_v19  ;;  %v1879_v28 = vadd.f32 %v1878_v26, %v1877_v23 }
 0x133   :  { %v2656_v29 = vadd.f32 %v1879_v28, %v1815_v25 }
 0x134   :  { %v1816_v30 = vpop.f32.mrb[4].mxu0 }
 0x135   :  { %v1880_v31 = vpop.f32.mrb[4].mxu1  ;;  %v1817_v32 = vpop.f32.mrb[5].mxu0 }
 0x136   :  { %v1818_v33 = vadd.f32 %v1817_v32, %v1816_v30  ;;  %v1881_v34 = vpop.f32.mrb[5].mxu1  ;;  %v1819_v35 = vpop.f32.mrb[6].mxu0 }
 0x137   :  { %v1882_v36 = vadd.f32 %v1881_v34, %v1880_v31  ;;  %v1883_v37 = vpop.f32.mrb[6].mxu1  ;;  %v1820_v38 = vpop.f32.mrb[7].mxu0 }
 0x138   :  { %v1821_v39 = vadd.f32 %v1820_v38, %v1819_v35  ;;  %v1884_v40 = vpop.f32.mrb[7].mxu1 }
 0x139   :  { %v2658_v41 = vadd.f32 %v1882_v36, %v1818_v33  ;;  %v1885_v42 = vadd.f32 %v1884_v40, %v1883_v37 }
 0x13b   :  { %v2660_v43 = vadd.f32 %v1885_v42, %v1821_v39 }
 0x13c   :  { %v1822_v44 = vpop.f32.mrb[8].mxu0 }
 0x13d   :  { %v1886_v45 = vpop.f32.mrb[8].mxu1  ;;  %v1823_v46 = vpop.f32.mrb[9].mxu0 }
 0x13e   :  { %v1824_v47 = vadd.f32 %v1823_v46, %v1822_v44  ;;  %v1887_v48 = vpop.f32.mrb[9].mxu1  ;;  %v1825_v49 = vpop.f32.mrb[10].mxu0 }
 0x13f   :  { %v1888_v50 = vadd.f32 %v1887_v48, %v1886_v45  ;;  %v1889_v51 = vpop.f32.mrb[10].mxu1  ;;  %v1826_v52 = vpop.f32.mrb[11].mxu0 }
 0x140   :  { %v1827_v53 = vadd.f32 %v1826_v52, %v1825_v49  ;;  %v1890_v54 = vpop.f32.mrb[11].mxu1 }
 0x141   :  { %v2662_v55 = vadd.f32 %v1888_v50, %v1824_v47  ;;  %v1891_v56 = vadd.f32 %v1890_v54, %v1889_v51 }
 0x143   :  { %v2664_v57 = vadd.f32 %v1891_v56, %v1827_v53 }
 0x144   :  { %v1828_v58 = vpop.f32.mrb[12].mxu0 }
 0x145   :  { %v1892_v59 = vpop.f32.mrb[12].mxu1  ;;  %v1829_v60 = vpop.f32.mrb[13].mxu0 }
 0x146   :  { %v1830_v61 = vadd.f32 %v1829_v60, %v1828_v58  ;;  %v1893_v62 = vpop.f32.mrb[13].mxu1  ;;  %v1831_v63 = vpop.f32.mrb[14].mxu0 }
 0x147   :  { %v1894_v0 = vadd.f32 %v1893_v62, %v1892_v59  ;;  %v1895_v1 = vpop.f32.mrb[14].mxu1  ;;  %v1832_v2 = vpop.f32.mrb[15].mxu0 }
 0x148   :  { %v1833_v3 = vadd.f32 %v1832_v2, %v1831_v63  ;;  %v1896_v4 = vpop.f32.mrb[15].mxu1 }
 0x149   :  { %v2666_v5 = vadd.f32 %v1894_v0, %v1830_v61  ;;  %v1897_v6 = vadd.f32 %v1896_v4, %v1895_v1 }
 0x14b   :  { %v2668_v7 = vadd.f32 %v1897_v6, %v1833_v3 }
 0x14c   :  { %v1834_v8 = vpop.f32.mrb[16].mxu0 }
 0x14d   :  { %v1898_v9 = vpop.f32.mrb[16].mxu1  ;;  %v1835_v10 = vpop.f32.mrb[17].mxu0 }
 0x14e   :  { %v1836_v11 = vadd.f32 %v1835_v10, %v1834_v8  ;;  %v1899_v12 = vpop.f32.mrb[17].mxu1  ;;  %v1837_v13 = vpop.f32.mrb[18].mxu0 }
 0x14f   :  { %v1900_v14 = vadd.f32 %v1899_v12, %v1898_v9  ;;  %v1901_v15 = vpop.f32.mrb[18].mxu1  ;;  %v1838_v16 = vpop.f32.mrb[19].mxu0 }
 0x150   :  { %v1839_v17 = vadd.f32 %v1838_v16, %v1837_v13  ;;  %v1902_v18 = vpop.f32.mrb[19].mxu1 }
 0x151   :  { %v2670_v19 = vadd.f32 %v1900_v14, %v1836_v11  ;;  %v1903_v20 = vadd.f32 %v1902_v18, %v1901_v15 }
 0x153   :  { %v2672_v21 = vadd.f32 %v1903_v20, %v1839_v17 }
 0x154   :  { %v1840_v22 = vpop.f32.mrb[20].mxu0 }
 0x155   :  { %v1904_v23 = vpop.f32.mrb[20].mxu1  ;;  %v1841_v24 = vpop.f32.mrb[21].mxu0 }
 0x156   :  { %v1842_v25 = vadd.f32 %v1841_v24, %v1840_v22  ;;  %v1905_v26 = vpop.f32.mrb[21].mxu1  ;;  %v1843_v28 = vpop.f32.mrb[22].mxu0 }
 0x157   :  { %v1906_v30 = vadd.f32 %v1905_v26, %v1904_v23  ;;  %v1907_v31 = vpop.f32.mrb[22].mxu1  ;;  %v1844_v32 = vpop.f32.mrb[23].mxu0 }
 0x158   :  { %v1845_v33 = vadd.f32 %v1844_v32, %v1843_v28  ;;  %v1908_v34 = vpop.f32.mrb[23].mxu1 }
 0x159   :  { %v2674_v35 = vadd.f32 %v1906_v30, %v1842_v25  ;;  %v1909_v36 = vadd.f32 %v1908_v34, %v1907_v31 }
 0x15b   :  { %v2676_v37 = vadd.f32 %v1909_v36, %v1845_v33 }
 0x15c   :  { %v1846_v38 = vpop.f32.mrb[24].mxu0 }
 0x15d   :  { %v1910_v39 = vpop.f32.mrb[24].mxu1  ;;  %v1847_v40 = vpop.f32.mrb[25].mxu0 }
 0x15e   :  { %v1848_v42 = vadd.f32 %v1847_v40, %v1846_v38  ;;  %v1911_v44 = vpop.f32.mrb[25].mxu1  ;;  %v1849_v45 = vpop.f32.mrb[26].mxu0 }
 0x15f   :  { %v1912_v46 = vadd.f32 %v1911_v44, %v1910_v39  ;;  %v1913_v47 = vpop.f32.mrb[26].mxu1  ;;  %v1850_v48 = vpop.f32.mrb[27].mxu0 }
 0x160   :  { %v1851_v49 = vadd.f32 %v1850_v48, %v1849_v45  ;;  %v1914_v50 = vpop.f32.mrb[27].mxu1 }
 0x161   :  { %v2678_v51 = vadd.f32 %v1912_v46, %v1848_v42  ;;  %v1915_v52 = vadd.f32 %v1914_v50, %v1913_v47 }
 0x163   :  { %v2680_v53 = vadd.f32 %v1915_v52, %v1851_v49 }
 0x164   :  { %v1852_v54 = vpop.f32.mrb[28].mxu0 }
 0x165   :  { %v1916_v56 = vpop.f32.mrb[28].mxu1  ;;  %v1853_v58 = vpop.f32.mrb[29].mxu0 }
 0x166   :  { %v1854_v59 = vadd.f32 %v1853_v58, %v1852_v54  ;;  %v1917_v60 = vpop.f32.mrb[29].mxu1  ;;  %v1855_v61 = vpop.f32.mrb[30].mxu0 }
 0x167   :  { %v1918_v62 = vadd.f32 %v1917_v60, %v1916_v56  ;;  %v1919_v63 = vpop.f32.mrb[30].mxu1  ;;  %v1856_v0 = vpop.f32.mrb[31].mxu0 }
 0x168   :  { %v1857_v1 = vadd.f32 %v1856_v0, %v1855_v61  ;;  %v1920_v2 = vpop.f32.mrb[31].mxu1 }
 0x169   :  { %v2682_v3 = vadd.f32 %v1918_v62, %v1854_v59  ;;  %v1921_v4 = vadd.f32 %v1920_v2, %v1919_v63 }
 0x16b   :  { %v2684_v6 = vadd.f32 %v1921_v4, %v1857_v1 }
 0x16c   :  { %v1938_v8 = vpop.f32.mrb[32].mxu0 }
 0x16d   :  { %v2002_v9 = vpop.f32.mrb[32].mxu1  ;;  %v1939_v10 = vpop.f32.mrb[33].mxu0 }
 0x16e   :  { %v1940_v11 = vadd.f32 %v1939_v10, %v1938_v8  ;;  %v2003_v12 = vpop.f32.mrb[33].mxu1  ;;  %v1941_v13 = vpop.f32.mrb[34].mxu0 }
 0x16f   :  { %v2004_v14 = vadd.f32 %v2003_v12, %v2002_v9  ;;  %v2005_v15 = vpop.f32.mrb[34].mxu1  ;;  %v1942_v16 = vpop.f32.mrb[35].mxu0 }
 0x170   :  { %v1308_v17 = vadd.f32 %v1940_v11, %v2654_v27  ;;  %v1943_v18 = vadd.f32 %v1942_v16, %v1941_v13  ;;  %v2006_v20 = vpop.f32.mrb[35].mxu1 }
 0x171   :  { %v2007_v22 = vadd.f32 %v2006_v20, %v2005_v15 }
 0x172   :  { %v1311_v23 = vadd.f32 %v1943_v18, %v2656_v29  ;;  %v2688_v24 = vadd.f32 %v2004_v14, %v1308_v17 }
 0x174   :  { %v1944_v25 = vpop.f32.mrb[36].mxu0  ;;  %v2690_v26 = vadd.f32 %v2007_v22, %v1311_v23 }
 0x175   :  { %v2008_v28 = vpop.f32.mrb[36].mxu1  ;;  %v1945_v30 = vpop.f32.mrb[37].mxu0 }
 0x176   :  { %v1946_v31 = vadd.f32 %v1945_v30, %v1944_v25  ;;  %v2009_v32 = vpop.f32.mrb[37].mxu1  ;;  %v1947_v33 = vpop.f32.mrb[38].mxu0 }
 0x177   :  { %v2010_v34 = vadd.f32 %v2009_v32, %v2008_v28  ;;  %v2011_v36 = vpop.f32.mrb[38].mxu1  ;;  %v1948_v38 = vpop.f32.mrb[39].mxu0 }
 0x178   :  { %v1316_v27 = vadd.f32 %v1946_v31, %v2658_v41  ;;  %v1949_v39 = vadd.f32 %v1948_v38, %v1947_v33  ;;  %v2012_v40 = vpop.f32.mrb[39].mxu1 }
 0x179   :  { %v2013_v42 = vadd.f32 %v2012_v40, %v2011_v36 }
 0x17a   :  { %v1319_v29 = vadd.f32 %v1949_v39, %v2660_v43  ;;  %v2694_v44 = vadd.f32 %v2010_v34, %v1316_v27 }
 0x17c   :  { %v1950_v45 = vpop.f32.mrb[40].mxu0  ;;  %v2696_v46 = vadd.f32 %v2013_v42, %v1319_v29 }
 0x17d   :  { %v2014_v47 = vpop.f32.mrb[40].mxu1  ;;  %v1951_v48 = vpop.f32.mrb[41].mxu0 }
 0x17e   :  { %v1952_v49 = vadd.f32 %v1951_v48, %v1950_v45  ;;  %v2015_v50 = vpop.f32.mrb[41].mxu1  ;;  %v1953_v52 = vpop.f32.mrb[42].mxu0 }
 0x17f   :  { %v2016_v54 = vadd.f32 %v2015_v50, %v2014_v47  ;;  %v2017_v56 = vpop.f32.mrb[42].mxu1  ;;  %v1954_v58 = vpop.f32.mrb[43].mxu0 }
 0x180   :  { %v1324_v41 = vadd.f32 %v1952_v49, %v2662_v55  ;;  %v1955_v59 = vadd.f32 %v1954_v58, %v1953_v52  ;;  %v2018_v60 = vpop.f32.mrb[43].mxu1 }
 0x181   :  { %v2019_v61 = vadd.f32 %v2018_v60, %v2017_v56 }
 0x182   :  { %v1327_v43 = vadd.f32 %v1955_v59, %v2664_v57  ;;  %v2700_v62 = vadd.f32 %v2016_v54, %v1324_v41 }
 0x184   :  { %v1956_v63 = vpop.f32.mrb[44].mxu0  ;;  %v2702_v0 = vadd.f32 %v2019_v61, %v1327_v43 }
 0x185   :  { %v2020_v1 = vpop.f32.mrb[44].mxu1  ;;  %v1957_v2 = vpop.f32.mrb[45].mxu0 }
 0x186   :  { %v1958_v4 = vadd.f32 %v1957_v2, %v1956_v63  ;;  %v2021_v8 = vpop.f32.mrb[45].mxu1  ;;  %v1959_v9 = vpop.f32.mrb[46].mxu0 }
 0x187   :  { %v2022_v10 = vadd.f32 %v2021_v8, %v2020_v1  ;;  %v2023_v11 = vpop.f32.mrb[46].mxu1  ;;  %v1960_v12 = vpop.f32.mrb[47].mxu0 }
 0x188   :  { %v1332_v55 = vadd.f32 %v1958_v4, %v2666_v5  ;;  %v1961_v13 = vadd.f32 %v1960_v12, %v1959_v9  ;;  %v2024_v14 = vpop.f32.mrb[47].mxu1 }
 0x189   :  { %v2025_v15 = vadd.f32 %v2024_v14, %v2023_v11 }
 0x18a   :  { %v1335_v57 = vadd.f32 %v1961_v13, %v2668_v7  ;;  %v2706_v16 = vadd.f32 %v2022_v10, %v1332_v55 }
 0x18c   :  { %v1962_v17 = vpop.f32.mrb[48].mxu0  ;;  %v2708_v18 = vadd.f32 %v2025_v15, %v1335_v57 }
 0x18d   :  { %v2026_v20 = vpop.f32.mrb[48].mxu1  ;;  %v1963_v22 = vpop.f32.mrb[49].mxu0 }
 0x18e   :  { %v1964_v23 = vadd.f32 %v1963_v22, %v1962_v17  ;;  %v2027_v25 = vpop.f32.mrb[49].mxu1  ;;  %v1965_v28 = vpop.f32.mrb[50].mxu0 }
 0x18f   :  { %v2028_v30 = vadd.f32 %v2027_v25, %v2026_v20  ;;  %v2029_v31 = vpop.f32.mrb[50].mxu1  ;;  %v1966_v32 = vpop.f32.mrb[51].mxu0 }
 0x190   :  { %v1340_v5 = vadd.f32 %v1964_v23, %v2670_v19  ;;  %v1967_v33 = vadd.f32 %v1966_v32, %v1965_v28  ;;  %v2030_v34 = vpop.f32.mrb[51].mxu1 }
 0x191   :  { %v2031_v36 = vadd.f32 %v2030_v34, %v2029_v31 }
 0x192   :  { %v1343_v7 = vadd.f32 %v1967_v33, %v2672_v21  ;;  %v1437_v38 = vadd.f32 %v2028_v30, %v1340_v5  ;;  %v2724_v33 = vld [vmem:[#allocation4] ss:$0 sm:$0xff] }
 0x194   :  { %v1968_v27 = vpop.f32.mrb[52].mxu0  ;;  %v2712_v39 = vadd.f32 %v2031_v36, %v1343_v7 }
 0x195   :  { %v2032_v40 = vpop.f32.mrb[52].mxu1  ;;  %v1969_v42 = vpop.f32.mrb[53].mxu0 }
 0x196   :  { %v1970_v29 = vadd.f32 %v1969_v42, %v1968_v27  ;;  %v2033_v45 = vpop.f32.mrb[53].mxu1  ;;  %v1971_v47 = vpop.f32.mrb[54].mxu0 }
 0x197   :  { %v2034_v48 = vadd.f32 %v2033_v45, %v2032_v40  ;;  %v2035_v49 = vpop.f32.mrb[54].mxu1  ;;  %v1972_v50 = vpop.f32.mrb[55].mxu0  ;;  %v2729_v40 = vld [vmem:[#allocation6] ss:$0 sm:$0xff] }
 0x198   :  { %v1348_v52 = vadd.f32 %v1970_v29, %v2674_v35  ;;  %v1973_v19 = vadd.f32 %v1972_v50, %v1971_v47  ;;  %v2036_v54 = vpop.f32.mrb[55].mxu1 }
 0x199   :  { %v2037_v56 = vadd.f32 %v2036_v54, %v2035_v49 }
 0x19a   :  { %v1351_v58 = vadd.f32 %v1973_v19, %v2676_v37  ;;  %v1445_v21 = vadd.f32 %v2034_v48, %v1348_v52 }
 0x19c   :  { %v1974_v41 = vpop.f32.mrb[56].mxu0  ;;  %v1448_v59 = vadd.f32 %v2037_v56, %v1351_v58 }
 0x19d   :  { %v2038_v60 = vpop.f32.mrb[56].mxu1  ;;  %v1975_v61 = vpop.f32.mrb[57].mxu0 }
 0x19e   :  { %v1976_v43 = vadd.f32 %v1975_v61, %v1974_v41  ;;  %v2039_v63 = vpop.f32.mrb[57].mxu1  ;;  %v1977_v1 = vpop.f32.mrb[58].mxu0 }
 0x19f   :  { %v2040_v2 = vadd.f32 %v2039_v63, %v2038_v60  ;;  %v2041_v4 = vpop.f32.mrb[58].mxu1  ;;  %v1978_v8 = vpop.f32.mrb[59].mxu0 }
 0x1a0   :  { %v1356_v9 = vadd.f32 %v1976_v43, %v2678_v51  ;;  %v1979_v10 = vadd.f32 %v1978_v8, %v1977_v1  ;;  %v2042_v35 = vpop.f32.mrb[59].mxu1 }
 0x1a1   :  { %v2043_v11 = vadd.f32 %v2042_v35, %v2041_v4 }
 0x1a2   :  { %v1359_v12 = vadd.f32 %v1979_v10, %v2680_v53  ;;  %v2718_v55 = vadd.f32 %v2040_v2, %v1356_v9 }
 0x1a4   :  { %v1980_v37 = vpop.f32.mrb[60].mxu0  ;;  %v2720_v13 = vadd.f32 %v2043_v11, %v1359_v12 }
 0x1a5   :  { %v2044_v14 = vpop.f32.mrb[60].mxu1  ;;  %v1981_v15 = vpop.f32.mrb[61].mxu0 }
 0x1a6   :  { %v1982_v57 = vadd.f32 %v1981_v15, %v1980_v37  ;;  %v2045_v17 = vpop.f32.mrb[61].mxu1  ;;  %v1983_v20 = vpop.f32.mrb[62].mxu0 }
 0x1a7   :  { %v2046_v22 = vadd.f32 %v2045_v17, %v2044_v14  ;;  %v2047_v23 = vpop.f32.mrb[62].mxu1  ;;  %v1984_v25 = vpop.f32.mrb[63].mxu0 }
 0x1a8   :  { %v1364_v51 = vadd.f32 %v1982_v57, %v2682_v3  ;;  %v1985_v28 = vadd.f32 %v1984_v25, %v1983_v20  ;;  %v2048_v30 = vpop.f32.mrb[63].mxu1 }
 0x1a9   :  { %v2049_v31 = vadd.f32 %v2048_v30, %v2047_v23 }
 0x1aa   :  { %v1367_v53 = vadd.f32 %v1985_v28, %v2684_v6  ;;  %v1461_v32 = vadd.f32 %v2046_v22, %v1364_v51 }
 0x1ac   :  { %v2084_v5 = vpop.f32.mrb[64].mxu0  ;;  %v2726_v34 = vadd.f32 %v2049_v31, %v1367_v53 }
 0x1ad   :  { %v1510_v36 = vadd.f32 %v2084_v5, %v2694_v44  ;;  %v2092_v7 = vpop.f32.mrb[64].mxu1  ;;  %v1501_v27 = vpop.f32.mrb[65].mxu0 }
 0x1ae   :  { %v1542_v42 = vadd.f32 %v2092_v7, %v1445_v21  ;;  %v1502_v3 = vadd.f32 %v1501_v27, %v2688_v24  ;;  %v1533_v29 = vpop.f32.mrb[65].mxu1  ;;  %v2085_v45 = vpop.f32.mrb[66].mxu0 }
 0x1af   :  { %v1573_v47 = vmul.f32 %v2724_v33, %v1510_v36  ;;  %v1534_v6 = vadd.f32 %v1533_v29, %v1437_v38  ;;  %v1513_v48 = vadd.f32 %v2085_v45, %v2696_v46  ;;  %v2093_v49 = vpop.f32.mrb[66].mxu1  ;;  %v1504_v50 = vpop.f32.mrb[67].mxu0 }
 0x1b0   :  { %v1581_v52 = vmul.f32 %v2724_v33, %v1542_v42  ;;  %v1571_v44 = vmul.f32 %v2724_v33, %v1502_v3  ;;  %v1545_v19 = vadd.f32 %v2093_v49, %v1448_v59  ;;  %v1505_v54 = vadd.f32 %v1504_v50, %v2690_v26  ;;  %v1536_v56 = vpop.f32.mrb[67].mxu1 }
 0x1b1   :  { %v1596_v58 = vadd.f32 %v2729_v40, %v1573_v47  ;;  %v1579_v24 = vmul.f32 %v2724_v33, %v1534_v6  ;;  %v1574_v21 = vmul.f32 %v2724_v33, %v1513_v48  ;;  %v1537_v38 = vadd.f32 %v1536_v56, %v2712_v39 }
 0x1b2   :  { %v1604_v46 = vadd.f32 %v2729_v40, %v1581_v52  ;;  %v1594_v41 = vadd.f32 %v2729_v40, %v1571_v44  ;;  %v1582_v60 = vmul.f32 %v2724_v33, %v1545_v19  ;;  %v1572_v61 = vmul.f32 %v2724_v33, %v1505_v54 }
 0x1b3   :  { %v1612_v59 = vmax.f32 %v1596_v58, 0.0  ;;  %v1602_v26 = vadd.f32 %v2729_v40, %v1579_v24  ;;  %v1597_v43 = vadd.f32 %v2729_v40, %v1574_v21  ;;  %v1580_v63 = vmul.f32 %v2724_v33, %v1537_v38 }
 0x1b4   :  { %v1620_v1 = vmax.f32 %v1604_v46, 0.0  ;;  %v1610_v2 = vmax.f32 %v1594_v41, 0.0  ;;  %v1605_v4 = vadd.f32 %v2729_v40, %v1582_v60  ;;  %v1595_v39 = vadd.f32 %v2729_v40, %v1572_v61  ;;  %v2088_v8 = vpop.f32.mrb[68].mxu0 }
 0x1b5   :  { %1628 = vst [vmem:[%s2826_s4 + $0x10] sm:$0xff] %v1612_v59  ;;  %v1618_v9 = vmax.f32 %v1602_v26, 0.0  ;;  %v1613_v10 = vmax.f32 %v1597_v43, 0.0  ;;  %v1603_v35 = vadd.f32 %v2729_v40, %v1580_v63  ;;  %v1526_v11 = vadd.f32 %v2088_v8, %v2706_v16  ;;  %v2096_v12 = vpop.f32.mrb[68].mxu1  ;;  %v1517_v37 = vpop.f32.mrb[69].mxu0 }
 0x1b6   :  { %1636 = vst [vmem:[%s2826_s4 + $0x50] sm:$0xff] %v1620_v1  ;;  %1626 = vst [vmem:[%s2826_s4] sm:$0xff] %v1610_v2  ;;  %v1621_v14 = vmax.f32 %v1605_v4, 0.0  ;;  %v1611_v15 = vmax.f32 %v1595_v39, 0.0  ;;  %v1558_v57 = vadd.f32 %v2096_v12, %v1461_v32  ;;  %v1518_v17 = vadd.f32 %v1517_v37, %v2700_v62  ;;  %v1549_v20 = vpop.f32.mrb[69].mxu1  ;;  %v2089_v22 = vpop.f32.mrb[70].mxu0 }
 0x1b7   :  { %1634 = vst [vmem:[%s2826_s4 + $0x40] sm:$0xff] %v1618_v9  ;;  %1629 = vst [vmem:[%s2826_s4 + $0x18] sm:$0xff] %v1613_v10  ;;  %v1619_v16 = vmax.f32 %v1603_v35, 0.0  ;;  %v1577_v23 = vmul.f32 %v2724_v33, %v1526_v11  ;;  %v1550_v25 = vadd.f32 %v1549_v20, %v2718_v55  ;;  %v1529_v51 = vadd.f32 %v2089_v22, %v2708_v18  ;;  %v2097_v28 = vpop.f32.mrb[70].mxu1  ;;  %v1520_v30 = vpop.f32.mrb[71].mxu0 }
 0x1b8   :  { %1637 = vst [vmem:[%s2826_s4 + $0x58] sm:$0xff] %v1621_v14  ;;  %1627 = vst [vmem:[%s2826_s4 + $0x8] sm:$0xff] %v1611_v15  ;;  %v1585_v62 = vmul.f32 %v2724_v33, %v1558_v57  ;;  %v1575_v31 = vmul.f32 %v2724_v33, %v1518_v17  ;;  %v1561_v53 = vadd.f32 %v2097_v28, %v2726_v34  ;;  %v1552_v32 = vpop.f32.mrb[71].mxu1 }
 0x1b9   :  { %v1521_v55 = vadd.f32 %v1520_v30, %v2702_v0  ;;  %1635 = vst [vmem:[%s2826_s4 + $0x48] sm:$0xff] %v1619_v16  ;;  %v1600_v18 = vadd.f32 %v2729_v40, %v1577_v23  ;;  %v1583_v5 = vmul.f32 %v2724_v33, %v1550_v25  ;;  %v1578_v36 = vmul.f32 %v2724_v33, %v1529_v51 }
 0x1ba   :  { %v1553_v7 = vadd.f32 %v1552_v32, %v2720_v13  ;;  %v1608_v27 = vadd.f32 %v2729_v40, %v1585_v62  ;;  %v1598_v42 = vadd.f32 %v2729_v40, %v1575_v31  ;;  %v1586_v34 = vmul.f32 %v2724_v33, %v1561_v53 }
 0x1bb   :  { %v1576_v0 = vmul.f32 %v2724_v33, %v1521_v55  ;;  %v1616_v3 = vmax.f32 %v1600_v18, 0.0  ;;  %v1606_v29 = vadd.f32 %v2729_v40, %v1583_v5  ;;  %v1601_v45 = vadd.f32 %v2729_v40, %v1578_v36 }
 0x1bc   :  { %v1584_v47 = vmul.f32 %v2724_v33, %v1553_v7  ;;  %v1624_v6 = vmax.f32 %v1608_v27, 0.0  ;;  %v1614_v48 = vmax.f32 %v1598_v42, 0.0  ;;  %v1609_v49 = vadd.f32 %v2729_v40, %v1586_v34 }
 0x1bd   :  { %v1599_v13 = vadd.f32 %v2729_v40, %v1576_v0  ;;  %1632 = vst [vmem:[%s2826_s4 + $0x30] sm:$0xff] %v1616_v3  ;;  %v1622_v50 = vmax.f32 %v1606_v29, 0.0  ;;  %v1617_v52 = vmax.f32 %v1601_v45, 0.0 }
 0x1be   :  { %v1607_v44 = vadd.f32 %v2729_v40, %v1584_v47  ;;  %1640 = vst [vmem:[%s2826_s4 + $0x70] sm:$0xff] %v1624_v6  ;;  %1630 = vst [vmem:[%s2826_s4 + $0x20] sm:$0xff] %v1614_v48  ;;  %v1625_v33 = vmax.f32 %v1609_v49, 0.0 }
 0x1bf   :  { %v1615_v19 = vmax.f32 %v1599_v13, 0.0  ;;  %1638 = vst [vmem:[%s2826_s4 + $0x60] sm:$0xff] %v1622_v50  ;;  %1633 = vst [vmem:[%s2826_s4 + $0x38] sm:$0xff] %v1617_v52 }
 0x1c0   :  { %v1623_v54 = vmax.f32 %v1607_v44, 0.0  ;;  %1641 = vst [vmem:[%s2826_s4 + $0x78] sm:$0xff] %v1625_v33 }
 0x1c1   :  { %1631 = vst [vmem:[%s2826_s4 + $0x28] sm:$0xff] %v1615_v19 }
 0x1c2   :  { %1639 = vst [vmem:[%s2826_s4 + $0x68] sm:$0xff] %v1623_v54 }
 0x1c3   :  { %1646 = vsyncpa [#allocation3], 1 }
 0x1c4   :  { %1647 = vsyncpa [#allocation5], 1 }

// kernel: _lambda_.8
= control target key start
LH: loop header
LB: loop body
LE: loop exit
PB: predicated region body
PF: predicated region fallthrough
CT: control target
= control target key end

     0   :  { %s5402_s1 = inlined_call_operand.vmem [shape: bf16[2304,128], index: 1, kind: input, shape index: {}]   ;;  %s5403_s0 = inlined_call_operand.vmem [shape: bf16[128,2304], index: 0, kind: input, shape index: {}]   ;;  %s5404_s2 = inlined_call_operand.vmem [shape: f32[1,128], index: 2, kind: input, shape index: {}]   ;;  %s5405_s3 = inlined_call_operand.vmem [shape: f32[1,128], index: 3, kind: input, shape index: {}]   ;;  %s5406_s4 = inlined_call_operand.vmem [shape: f32[128,128], index: 4, kind: output, shape index: {}]  }
   0x1   :  { %v3871_v0 = vld [vmem:[%s5402_s1 + $0x40] sm:$0xff]   ;;  %v3873_v2 = vld [vmem:[%s5402_s1 + $0x48] sm:$0xff]   ;;  %v3875_v4 = vld [vmem:[%s5402_s1 + $0x50] sm:$0xff]  }
   0x2   :  { %v3872_v1 = vld [vmem:[%s5402_s1] sm:$0xff]   ;;  %3279 = vmatprep.subr.bf16.mxu0 %v3871_v0  ;;  %3855 = vmatprep.subr.bf16.mxu1 %v3871_v0  ;;  %v3874_v3 = vld [vmem:[%s5402_s1 + $0x8] sm:$0xff]   ;;  %v3876_v5 = vld [vmem:[%s5402_s1 + $0x10] sm:$0xff]  }
   0x3   :  { %3280 = vmatpush3.bf16.msra.mxu0 %v3872_v1  ;;  %3863 = vmatpush3.bf16.msra.mxu1 %v3872_v1  ;;  %v3877_v6 = vld [vmem:[%s5402_s1 + $0x58] sm:$0xff]   ;;  %v3879_v8 = vld [vmem:[%s5402_s1 + $0x60] sm:$0xff]   ;;  %v3881_v10 = vld [vmem:[%s5402_s1 + $0x68] sm:$0xff]  }
   0x4   :  { %3281 = vmatprep.subr.bf16.mxu0 %v3873_v2  ;;  %3856 = vmatprep.subr.bf16.mxu1 %v3873_v2  ;;  %v3878_v7 = vld [vmem:[%s5402_s1 + $0x18] sm:$0xff]   ;;  %v3880_v9 = vld [vmem:[%s5402_s1 + $0x20] sm:$0xff]   ;;  %v3882_v13 = vld [vmem:[%s5402_s1 + $0x28] sm:$0xff]  }
   0x5   :  { %v3889_v11 = vld [vmem:[%s5403_s0 + $0x4] ss:$72 sps:$4 sm:$0xff]   ;;  %v3883_v14 = vld [vmem:[%s5402_s1 + $0x70] sm:$0xff]   ;;  %v3885_v16 = vld [vmem:[%s5402_s1 + $0x78] sm:$0xff]  }
   0x6   :  { %v3892_v12 = vld [vmem:[%s5403_s0 + $0x244] ss:$72 sps:$4 sm:$0xff]   ;;  %2066 = vmatprep.mubr.bf16.mxu0 %v3889_v11  ;;  %v3884_v15 = vld [vmem:[%s5402_s1 + $0x30] sm:$0xff]   ;;  %v3886_v17 = vld [vmem:[%s5402_s1 + $0x38] sm:$0xff]  }
   0x7   :  { %3282 = vmatpush3.bf16.msra.mxu0 %v3874_v3  ;;  %3864 = vmatpush3.bf16.msra.mxu1 %v3874_v3  ;;  %v3887_v18 = vld [vmem:[%s5403_s0] ss:$72 sps:$4 sm:$0xff]   ;;  %v3901_v26 = vld [vmem:[%s5403_s0 + $0x94] ss:$72 sps:$4 sm:$0xff]   ;;  %v3905_v31 = vld [vmem:[%s5403_s0 + $0x90] ss:$72 sps:$4 sm:$0xff]  }
   0x8   :  { %3283 = vmatprep.subr.bf16.mxu0 %v3875_v4  ;;  %3857 = vmatprep.subr.bf16.mxu1 %v3875_v4  ;;  %v3890_v19 = vld [vmem:[%s5403_s0 + $0x240] ss:$72 sps:$4 sm:$0xff]   ;;  %v3903_v28 = vld [vmem:[%s5403_s0 + $0x2d4] ss:$72 sps:$4 sm:$0xff]   ;;  %v3906_v33 = vld [vmem:[%s5403_s0 + $0x2d0] ss:$72 sps:$4 sm:$0xff]  }
   0x9   :  { %2098 = vmatprep.mubr.bf16.mxu1 %v3892_v12  ;;  %v3893_v20 = vld [vmem:[%s5402_s1 + $0xc0] sm:$0xff]   ;;  %v3897_v24 = vld [vmem:[%s5402_s1 + $0xc8] sm:$0xff]   ;;  %v3907_v30 = vld [vmem:[%s5402_s1 + $0xd0] sm:$0xff]  }
   0xa   :  { %v3894_v21 = vld [vmem:[%s5402_s1 + $0x140] sm:$0xff]   ;;  %v3898_v25 = vld [vmem:[%s5402_s1 + $0x148] sm:$0xff]   ;;  %v3908_v32 = vld [vmem:[%s5402_s1 + $0x150] sm:$0xff]  }
   0xb   :  { %3284 = vmatpush3.bf16.msra.mxu0 %v3876_v5  ;;  %3865 = vmatpush3.bf16.msra.mxu1 %v3876_v5  ;;  %v3895_v22 = vld [vmem:[%s5402_s1 + $0x80] sm:$0xff]   ;;  %v3899_v27 = vld [vmem:[%s5402_s1 + $0x88] sm:$0xff]   ;;  %v3909_v34 = vld [vmem:[%s5402_s1 + $0x90] sm:$0xff]  }
   0xc   :  { %3285 = vmatprep.subr.bf16.mxu0 %v3877_v6  ;;  %3858 = vmatprep.subr.bf16.mxu1 %v3877_v6  ;;  %v3896_v23 = vld [vmem:[%s5402_s1 + $0x100] sm:$0xff]   ;;  %v3900_v29 = vld [vmem:[%s5402_s1 + $0x108] sm:$0xff]   ;;  %v3910_v35 = vld [vmem:[%s5402_s1 + $0x110] sm:$0xff]  }
   0xd   :  { %v3911_v36 = vld [vmem:[%s5402_s1 + $0xd8] sm:$0xff]   ;;  %v3915_v38 = vld [vmem:[%s5403_s0 + $0x124] ss:$72 sps:$4 sm:$0xff]   ;;  %v3919_v43 = vld [vmem:[%s5403_s0 + $0x120] ss:$72 sps:$4 sm:$0xff]  }
   0xe   :  { %v3912_v37 = vld [vmem:[%s5402_s1 + $0x158] sm:$0xff]   ;;  %v3917_v40 = vld [vmem:[%s5403_s0 + $0x364] ss:$72 sps:$4 sm:$0xff]   ;;  %v3920_v44 = vld [vmem:[%s5403_s0 + $0x360] ss:$72 sps:$4 sm:$0xff]  }
   0xf   :  { %3286 = vmatpush3.bf16.msra.mxu0 %v3878_v7  ;;  %3866 = vmatpush3.bf16.msra.mxu1 %v3878_v7  ;;  %v3913_v39 = vld [vmem:[%s5402_s1 + $0x98] sm:$0xff]   ;;  %v3921_v42 = vld [vmem:[%s5402_s1 + $0xe0] sm:$0xff]   ;;  %v3925_v48 = vld [vmem:[%s5402_s1 + $0xe8] sm:$0xff]  }
  0x10   :  { %3287 = vmatprep.subr.bf16.mxu0 %v3879_v8  ;;  %3859 = vmatprep.subr.bf16.mxu1 %v3879_v8  ;;  %v3914_v41 = vld [vmem:[%s5402_s1 + $0x118] sm:$0xff]   ;;  %v3922_v45 = vld [vmem:[%s5402_s1 + $0x160] sm:$0xff]   ;;  %v3926_v49 = vld [vmem:[%s5402_s1 + $0x168] sm:$0xff]  }
  0x11   :  { %v3923_v46 = vld [vmem:[%s5402_s1 + $0xa0] sm:$0xff]   ;;  %v3929_v50 = vld [vmem:[%s5403_s0 + $0x1b4] ss:$72 sps:$4 sm:$0xff]   ;;  %v3927_v52 = vld [vmem:[%s5402_s1 + $0xa8] sm:$0xff]  }
  0x12   :  { %v3924_v47 = vld [vmem:[%s5402_s1 + $0x120] sm:$0xff]   ;;  %v3931_v51 = vld [vmem:[%s5403_s0 + $0x3f4] ss:$72 sps:$4 sm:$0xff]   ;;  %v3928_v53 = vld [vmem:[%s5402_s1 + $0x128] sm:$0xff]  }
  0x13   :  { %3288 = vmatpush3.bf16.msra.mxu0 %v3880_v9  ;;  %3867 = vmatpush3.bf16.msra.mxu1 %v3880_v9  ;;  %v3935_v54 = vld [vmem:[%s5402_s1 + $0xf0] sm:$0xff]   ;;  %v3939_v60 = vld [vmem:[%s5402_s1 + $0xf8] sm:$0xff]   ;;  %v3949_v4 = vld [vmem:[%s5402_s1 + $0x1c0] sm:$0xff]  }
  0x14   :  { %3289 = vmatprep.subr.bf16.mxu0 %v3881_v10  ;;  %3860 = vmatprep.subr.bf16.mxu1 %v3881_v10  ;;  %v3933_v55 = vld [vmem:[%s5403_s0 + $0x1b0] ss:$72 sps:$4 sm:$0xff]   ;;  %v3945_v0 = vld [vmem:[%s5403_s0 + $0xc] ss:$72 sps:$4 sm:$0xff]   ;;  %v3950_v5 = vld [vmem:[%s5402_s1 + $0x180] sm:$0xff]  }
  0x15   :  { %v3934_v56 = vld [vmem:[%s5403_s0 + $0x3f0] ss:$72 sps:$4 sm:$0xff]   ;;  %v3948_v3 = vld [vmem:[%s5403_s0 + $0x14] ss:$72 sps:$4 sm:$0xff]   ;;  %v3951_v6 = vld [vmem:[%s5402_s1 + $0x240] sm:$0xff]  }
  0x16   :  { %v3936_v57 = vld [vmem:[%s5402_s1 + $0x170] sm:$0xff]   ;;  %v3940_v61 = vld [vmem:[%s5402_s1 + $0x178] sm:$0xff]   ;;  %v3952_v7 = vld [vmem:[%s5402_s1 + $0x200] sm:$0xff]  }
  0x17   :  { %3290 = vmatpush3.bf16.msra.mxu0 %v3882_v13  ;;  %3868 = vmatpush3.bf16.msra.mxu1 %v3882_v13  ;;  %v3937_v58 = vld [vmem:[%s5402_s1 + $0xb0] sm:$0xff]   ;;  %v3941_v62 = vld [vmem:[%s5402_s1 + $0xb8] sm:$0xff]   ;;  %v3955_v9 = vld [vmem:[%s5403_s0 + $0xa4] ss:$72 sps:$4 sm:$0xff]  }
  0x18   :  { %3291 = vmatprep.subr.bf16.mxu0 %v3883_v14  ;;  %3861 = vmatprep.subr.bf16.mxu1 %v3883_v14  ;;  %v3938_v59 = vld [vmem:[%s5402_s1 + $0x130] sm:$0xff]   ;;  %v3942_v63 = vld [vmem:[%s5402_s1 + $0x138] sm:$0xff]   ;;  %v3958_v11 = vld [vmem:[%s5403_s0 + $0xa0] ss:$72 sps:$4 sm:$0xff]  }
  0x19   :  { %v3943_v1 = vld [vmem:[%s5403_s0 + $0x8] ss:$72 sps:$4 sm:$0xff]   ;;  %v3953_v8 = vld [vmem:[%s5403_s0 + $0x9c] ss:$72 sps:$4 sm:$0xff]   ;;  %v3957_v10 = vld [vmem:[%s5403_s0 + $0x98] ss:$72 sps:$4 sm:$0xff]  }
  0x1a   :  { %v3946_v2 = vld [vmem:[%s5403_s0 + $0x10] ss:$72 sps:$4 sm:$0xff]   ;;  %v3959_v12 = vld [vmem:[%s5402_s1 + $0x1c8] sm:$0xff]  }
  0x1b   :  { %3292 = vmatpush3.bf16.msra.mxu0 %v3884_v15  ;;  %3869 = vmatpush3.bf16.msra.mxu1 %v3884_v15  ;;  %v3960_v13 = vld [vmem:[%s5402_s1 + $0x188] sm:$0xff]  }
  0x1c   :  { %3293 = vmatprep.subr.bf16.mxu0 %v3885_v16  ;;  %3862 = vmatprep.subr.bf16.mxu1 %v3885_v16  ;;  %v3961_v14 = vld [vmem:[%s5402_s1 + $0x248] sm:$0xff]  }
  0x1d   :  { %v3962_v15 = vld [vmem:[%s5402_s1 + $0x208] sm:$0xff]  }
  0x1e   :  { %v3963_v16 = vld [vmem:[%s5403_s0 + $0x12c] ss:$72 sps:$4 sm:$0xff]  }
  0x1f   :  { %3294 = vmatpush3.bf16.msra.mxu0 %v3886_v17  ;;  %3870 = vmatpush3.bf16.msra.mxu1 %v3886_v17  ;;  %v3965_v17 = vld [vmem:[%s5403_s0 + $0x134] ss:$72 sps:$4 sm:$0xff]  }
  0x20   :  { %3343 = vmatprep.subr.bf16.mxu1 %v3893_v20  ;;  %3407 = vmatprep.subr.bf16.mxu0 %v3894_v21  ;;  %v3968_v20 = vld [vmem:[%s5403_s0 + $0x130] ss:$72 sps:$4 sm:$0xff]  }
  0x21   :  { %v3970_v21 = vld [vmem:[%s5402_s1 + $0x190] sm:$0xff]  }
  0x22   :  { %2067 = vmatmul.mubr.bf16.vlgmr.msra.gmra.mrb[0].mxu0 %v3887_v18  ;;  %2099 = vmatmul.mubr.bf16.vlgmr.msra.gmra.mrb[0].mxu1 %v3890_v19  ;;  %v3969_v18 = vld [vmem:[%s5402_s1 + $0x1d0] sm:$0xff]  }
  0x23   :  { %3344 = vmatpush3.bf16.msra.mxu1 %v3895_v22  ;;  %3408 = vmatpush3.bf16.msra.mxu0 %v3896_v23  ;;  %v3967_v19 = vld [vmem:[%s5403_s0 + $0x128] ss:$72 sps:$4 sm:$0xff]  }
  0x24   :  { %3345 = vmatprep.subr.bf16.mxu1 %v3897_v24  ;;  %3409 = vmatprep.subr.bf16.mxu0 %v3898_v25  ;;  %v3971_v22 = vld [vmem:[%s5402_s1 + $0x250] sm:$0xff]   ;;  %v3973_v24 = vld [vmem:[%s5403_s0 + $0x1bc] ss:$72 sps:$4 sm:$0xff]  }
  0x25   :  { %2074 = vmatprep.mubr.bf16.mxu0 %v3901_v26  ;;  %2106 = vmatprep.mubr.bf16.mxu1 %v3903_v28  ;;  %v3972_v23 = vld [vmem:[%s5402_s1 + $0x210] sm:$0xff]   ;;  %v3975_v25 = vld [vmem:[%s5403_s0 + $0x1c4] ss:$72 sps:$4 sm:$0xff]   ;;  %v3979_v26 = vld [vmem:[%s5402_s1 + $0x1d8] sm:$0xff]  }
  0x26   :  { %v3977_v28 = vld [vmem:[%s5403_s0 + $0x1b8] ss:$72 sps:$4 sm:$0xff]  }
  0x27   :  { %3346 = vmatpush3.bf16.msra.mxu1 %v3899_v27  ;;  %3410 = vmatpush3.bf16.msra.mxu0 %v3900_v29  ;;  %v3980_v27 = vld [vmem:[%s5402_s1 + $0x198] sm:$0xff]  }
  0x28   :  { %3347 = vmatprep.subr.bf16.mxu1 %v3907_v30  ;;  %3411 = vmatprep.subr.bf16.mxu0 %v3908_v32  ;;  %v3981_v29 = vld [vmem:[%s5402_s1 + $0x258] sm:$0xff]   ;;  %v3983_v32 = vld [vmem:[%s5403_s0 + $0x24c] ss:$72 sps:$4 sm:$0xff]  }
  0x29   :  { %v3982_v30 = vld [vmem:[%s5402_s1 + $0x218] sm:$0xff]  }
  0x2a   :  { %2075 = vmatmul.mubr.bf16.gmra.mrb[4].mxu0 %v3905_v31  ;;  %2107 = vmatmul.mubr.bf16.gmra.mrb[4].mxu1 %v3906_v33  ;;  %v3978_v31 = vld [vmem:[%s5403_s0 + $0x1c0] ss:$72 sps:$4 sm:$0xff]   ;;  %v3985_v33 = vld [vmem:[%s5403_s0 + $0x254] ss:$72 sps:$4 sm:$0xff]  }
  0x2b   :  { %3348 = vmatpush3.bf16.msra.mxu1 %v3909_v34  ;;  %3412 = vmatpush3.bf16.msra.mxu0 %v3910_v35  ;;  %v3989_v34 = vld [vmem:[%s5402_s1 + $0x1e0] sm:$0xff]  }
  0x2c   :  { %3349 = vmatprep.subr.bf16.mxu1 %v3911_v36  ;;  %3413 = vmatprep.subr.bf16.mxu0 %v3912_v37  ;;  %v3990_v35 = vld [vmem:[%s5402_s1 + $0x1a0] sm:$0xff]  }
  0x2d   :  { %2082 = vmatprep.mubr.bf16.mxu0 %v3915_v38  ;;  %2114 = vmatprep.mubr.bf16.mxu1 %v3917_v40  ;;  %v3991_v36 = vld [vmem:[%s5402_s1 + $0x260] sm:$0xff]   ;;  %v3987_v38 = vld [vmem:[%s5403_s0 + $0x248] ss:$72 sps:$4 sm:$0xff]  }
  0x2e   :  { %v3992_v37 = vld [vmem:[%s5402_s1 + $0x220] sm:$0xff]  }
  0x2f   :  { %3350 = vmatpush3.bf16.msra.mxu1 %v3913_v39  ;;  %3414 = vmatpush3.bf16.msra.mxu0 %v3914_v41  ;;  %v3988_v39 = vld [vmem:[%s5403_s0 + $0x250] ss:$72 sps:$4 sm:$0xff]   ;;  %v3993_v40 = vld [vmem:[%s5403_s0 + $0x2dc] ss:$72 sps:$4 sm:$0xff]  }
  0x30   :  { %3351 = vmatprep.subr.bf16.mxu1 %v3921_v42  ;;  %3415 = vmatprep.subr.bf16.mxu0 %v3922_v45  ;;  %v3995_v41 = vld [vmem:[%s5403_s0 + $0x2e4] ss:$72 sps:$4 sm:$0xff]  }
  0x31   :  { %v3999_v42 = vld [vmem:[%s5402_s1 + $0x1e8] sm:$0xff]  }
  0x32   :  { %2083 = vmatmul.mubr.bf16.gmra.mrb[8].mxu0 %v3919_v43  ;;  %2115 = vmatmul.mubr.bf16.gmra.mrb[8].mxu1 %v3920_v44  ;;  %v4000_v43 = vld [vmem:[%s5402_s1 + $0x1a8] sm:$0xff]  }
  0x33   :  { %3352 = vmatpush3.bf16.msra.mxu1 %v3923_v46  ;;  %3416 = vmatpush3.bf16.msra.mxu0 %v3924_v47  ;;  %v4001_v44 = vld [vmem:[%s5402_s1 + $0x268] sm:$0xff]   ;;  %v3997_v46 = vld [vmem:[%s5403_s0 + $0x2d8] ss:$72 sps:$4 sm:$0xff]  }
  0x34   :  { %3353 = vmatprep.subr.bf16.mxu1 %v3925_v48  ;;  %3417 = vmatprep.subr.bf16.mxu0 %v3926_v49  ;;  %v4002_v45 = vld [vmem:[%s5402_s1 + $0x228] sm:$0xff]   ;;  %v4005_v49 = vld [vmem:[%s5403_s0 + $0x374] ss:$72 sps:$4 sm:$0xff]  }
  0x35   :  { %2090 = vmatprep.mubr.bf16.mxu0 %v3929_v50  ;;  %2122 = vmatprep.mubr.bf16.mxu1 %v3931_v51  ;;  %v3998_v47 = vld [vmem:[%s5403_s0 + $0x2e0] ss:$72 sps:$4 sm:$0xff]   ;;  %v4003_v48 = vld [vmem:[%s5403_s0 + $0x36c] ss:$72 sps:$4 sm:$0xff]  }
  0x36   :  { %v4009_v50 = vld [vmem:[%s5402_s1 + $0x1f0] sm:$0xff]  }
  0x37   :  { %3354 = vmatpush3.bf16.msra.mxu1 %v3927_v52  ;;  %3418 = vmatpush3.bf16.msra.mxu0 %v3928_v53  ;;  %v4010_v51 = vld [vmem:[%s5402_s1 + $0x1b0] sm:$0xff]  }
  0x38   :  { %3355 = vmatprep.subr.bf16.mxu1 %v3935_v54  ;;  %3419 = vmatprep.subr.bf16.mxu0 %v3936_v57  ;;  %v4011_v52 = vld [vmem:[%s5402_s1 + $0x270] sm:$0xff]   ;;  %v4013_v57 = vld [vmem:[%s5403_s0 + $0x3fc] ss:$72 sps:$4 sm:$0xff]  }
  0x39   :  { %v4012_v53 = vld [vmem:[%s5402_s1 + $0x230] sm:$0xff]  }
  0x3a   :  { %2091 = vmatmul.mubr.bf16.gmra.mrb[12].mxu0 %v3933_v55  ;;  %2123 = vmatmul.mubr.bf16.gmra.mrb[12].mxu1 %v3934_v56  ;;  %v4007_v54 = vld [vmem:[%s5403_s0 + $0x368] ss:$72 sps:$4 sm:$0xff]   ;;  %v4019_v56 = vld [vmem:[%s5402_s1 + $0x1f8] sm:$0xff]  }
  0x3b   :  { %3356 = vmatpush3.bf16.msra.mxu1 %v3937_v58  ;;  %3420 = vmatpush3.bf16.msra.mxu0 %v3938_v59  ;;  %v4008_v55 = vld [vmem:[%s5403_s0 + $0x370] ss:$72 sps:$4 sm:$0xff]   ;;  %v4015_v58 = vld [vmem:[%s5403_s0 + $0x404] ss:$72 sps:$4 sm:$0xff]  }
  0x3c   :  { %3357 = vmatprep.subr.bf16.mxu1 %v3939_v60  ;;  %3421 = vmatprep.subr.bf16.mxu0 %v3940_v61  ;;  %v4020_v59 = vld [vmem:[%s5402_s1 + $0x1b8] sm:$0xff]  }
  0x3d   :  { %2163 = vmatprep.mubr.bf16.mxu1 %v3945_v0  ;;  %2260 = vmatprep.mubr.bf16.mxu0 %v3948_v3  ;;  %v4021_v60 = vld [vmem:[%s5402_s1 + $0x278] sm:$0xff]   ;;  %v4018_v0 = vld [vmem:[%s5403_s0 + $0x400] ss:$72 sps:$4 sm:$0xff]   ;;  %v4028_v3 = vld [vmem:[%s5403_s0 + $0x24] ss:$72 sps:$4 sm:$0xff]  }
  0x3e   :  { %v4022_v61 = vld [vmem:[%s5402_s1 + $0x238] sm:$0xff]  }
  0x3f   :  { %3358 = vmatpush3.bf16.msra.mxu1 %v3941_v62  ;;  %3422 = vmatpush3.bf16.msra.mxu0 %v3942_v63  ;;  %v4029_v62 = vld [vmem:[%s5402_s1 + $0x2c0] sm:$0xff]  }
  0x40   :  { %3471 = vmatprep.subr.bf16.mxu1 %v3949_v4  ;;  %3535 = vmatprep.subr.bf16.mxu0 %v3951_v6  ;;  %v4017_v63 = vld [vmem:[%s5403_s0 + $0x3f8] ss:$72 sps:$4 sm:$0xff]  }
  0x41   :  { %v4023_v4 = vld [vmem:[%s5403_s0 + $0x18] ss:$72 sps:$4 sm:$0xff]  }
  0x42   :  { %2164 = vmatmul.mubr.bf16.vlgmr.msra.gmra.mrb[16].mxu1 %v3943_v1  ;;  %2261 = vmatmul.mubr.bf16.vlgmr.msra.gmra.mrb[16].mxu0 %v3946_v2  ;;  %v4031_v1 = vld [vmem:[%s5402_s1 + $0x340] sm:$0xff]  }
  0x43   :  { %3472 = vmatpush3.bf16.msra.mxu1 %v3950_v5  ;;  %3536 = vmatpush3.bf16.msra.mxu0 %v3952_v7  ;;  %v4025_v2 = vld [vmem:[%s5403_s0 + $0x1c] ss:$72 sps:$4 sm:$0xff]   ;;  %v4026_v5 = vld [vmem:[%s5403_s0 + $0x20] ss:$72 sps:$4 sm:$0xff]  }
  0x44   :  { %2171 = vmatprep.mubr.bf16.mxu1 %v3953_v8  ;;  %2268 = vmatprep.mubr.bf16.mxu0 %v3955_v9  ;;  %v4030_v6 = vld [vmem:[%s5402_s1 + $0x280] sm:$0xff]   ;;  %v4033_v8 = vld [vmem:[%s5403_s0 + $0xac] ss:$72 sps:$4 sm:$0xff]  }
  0x45   :  { %3473 = vmatprep.subr.bf16.mxu1 %v3959_v12  ;;  %3537 = vmatprep.subr.bf16.mxu0 %v3961_v14  ;;  %v4032_v7 = vld [vmem:[%s5402_s1 + $0x300] sm:$0xff]   ;;  %v4035_v9 = vld [vmem:[%s5403_s0 + $0xb4] ss:$72 sps:$4 sm:$0xff]   ;;  %v4041_v12 = vld [vmem:[%s5402_s1 + $0x348] sm:$0xff]  }
  0x46   :  { %v4049_v14 = vld [vmem:[%s5402_s1 + $0x2d0] sm:$0xff]  }
  0x47   :  { %3474 = vmatpush3.bf16.msra.mxu1 %v3960_v13  ;;  %3538 = vmatpush3.bf16.msra.mxu0 %v3962_v15  ;;  %v4042_v13 = vld [vmem:[%s5402_s1 + $0x308] sm:$0xff]  }
  0x48   :  { %3475 = vmatprep.subr.bf16.mxu1 %v3969_v18  ;;  %3539 = vmatprep.subr.bf16.mxu0 %v3971_v22  ;;  %v4037_v15 = vld [vmem:[%s5403_s0 + $0xa8] ss:$72 sps:$4 sm:$0xff]   ;;  %v4043_v18 = vld [vmem:[%s5403_s0 + $0x13c] ss:$72 sps:$4 sm:$0xff]  }
  0x49   :  { %v4059_v22 = vld [vmem:[%s5402_s1 + $0x2d8] sm:$0xff]  }
  0x4a   :  { %2172 = vmatmul.mubr.bf16.gmra.mrb[20].mxu1 %v3957_v10  ;;  %2269 = vmatmul.mubr.bf16.gmra.mrb[20].mxu0 %v3958_v11  ;;  %v4039_v10 = vld [vmem:[%s5402_s1 + $0x2c8] sm:$0xff]  }
  0x4b   :  { %2179 = vmatprep.mubr.bf16.mxu1 %v3963_v16  ;;  %2276 = vmatprep.mubr.bf16.mxu0 %v3965_v17  ;;  %v4040_v11 = vld [vmem:[%s5402_s1 + $0x288] sm:$0xff]   ;;  %v4038_v16 = vld [vmem:[%s5403_s0 + $0xb0] ss:$72 sps:$4 sm:$0xff]  }
  0x4c   :  { %3476 = vmatpush3.bf16.msra.mxu1 %v3970_v21  ;;  %3540 = vmatpush3.bf16.msra.mxu0 %v3972_v23  ;;  %v4051_v17 = vld [vmem:[%s5402_s1 + $0x350] sm:$0xff]   ;;  %v4061_v23 = vld [vmem:[%s5402_s1 + $0x358] sm:$0xff]  }
  0x4d   :  { %3477 = vmatprep.subr.bf16.mxu1 %v3979_v26  ;;  %3541 = vmatprep.subr.bf16.mxu0 %v3981_v29  ;;  %v4052_v21 = vld [vmem:[%s5402_s1 + $0x310] sm:$0xff]   ;;  %v4060_v26 = vld [vmem:[%s5402_s1 + $0x298] sm:$0xff]  }
  0x4e   :  { %v4055_v29 = vld [vmem:[%s5403_s0 + $0x1d4] ss:$72 sps:$4 sm:$0xff]  }
  0x50   :  { %3478 = vmatpush3.bf16.msra.mxu1 %v3980_v27  ;;  %3542 = vmatpush3.bf16.msra.mxu0 %v3982_v30  ;;  %v4062_v27 = vld [vmem:[%s5402_s1 + $0x318] sm:$0xff]   ;;  %v4069_v30 = vld [vmem:[%s5402_s1 + $0x2e0] sm:$0xff]  }
  0x51   :  { %3479 = vmatprep.subr.bf16.mxu1 %v3989_v34  ;;  %3543 = vmatprep.subr.bf16.mxu0 %v3991_v36  ;;  %v4057_v34 = vld [vmem:[%s5403_s0 + $0x1c8] ss:$72 sps:$4 sm:$0xff]  }
  0x52   :  { %2180 = vmatmul.mubr.bf16.gmra.mrb[24].mxu1 %v3967_v19  ;;  %2277 = vmatmul.mubr.bf16.gmra.mrb[24].mxu0 %v3968_v20  ;;  %v4045_v19 = vld [vmem:[%s5403_s0 + $0x144] ss:$72 sps:$4 sm:$0xff]   ;;  %v4050_v20 = vld [vmem:[%s5402_s1 + $0x290] sm:$0xff]  }
  0x53   :  { %2187 = vmatprep.mubr.bf16.mxu1 %v3973_v24  ;;  %2284 = vmatprep.mubr.bf16.mxu0 %v3975_v25  ;;  %v4047_v24 = vld [vmem:[%s5403_s0 + $0x138] ss:$72 sps:$4 sm:$0xff]   ;;  %v4079_v36 = vld [vmem:[%s5402_s1 + $0x2e8] sm:$0xff]  }
  0x54   :  { %3480 = vmatpush3.bf16.msra.mxu1 %v3990_v35  ;;  %3544 = vmatpush3.bf16.msra.mxu0 %v3992_v37  ;;  %v4048_v25 = vld [vmem:[%s5403_s0 + $0x140] ss:$72 sps:$4 sm:$0xff]   ;;  %v4058_v35 = vld [vmem:[%s5403_s0 + $0x1d0] ss:$72 sps:$4 sm:$0xff]   ;;  %v4063_v37 = vld [vmem:[%s5403_s0 + $0x25c] ss:$72 sps:$4 sm:$0xff]  }
  0x55   :  { %3481 = vmatprep.subr.bf16.mxu1 %v3999_v42  ;;  %3545 = vmatprep.subr.bf16.mxu0 %v4001_v44  ;;  %v4089_v42 = vld [vmem:[%s5402_s1 + $0x2f0] sm:$0xff]   ;;  %v4068_v44 = vld [vmem:[%s5403_s0 + $0x260] ss:$72 sps:$4 sm:$0xff]  }
  0x58   :  { %3482 = vmatpush3.bf16.msra.mxu1 %v4000_v43  ;;  %3546 = vmatpush3.bf16.msra.mxu0 %v4002_v45  ;;  %v4067_v43 = vld [vmem:[%s5403_s0 + $0x258] ss:$72 sps:$4 sm:$0xff]   ;;  %v4090_v45 = vld [vmem:[%s5402_s1 + $0x2b0] sm:$0xff]  }
  0x59   :  { %3483 = vmatprep.subr.bf16.mxu1 %v4009_v50  ;;  %3547 = vmatprep.subr.bf16.mxu0 %v4011_v52  ;;  %v4099_v50 = vld [vmem:[%s5402_s1 + $0x2f8] sm:$0xff]  }
  0x5a   :  { %2188 = vmatmul.mubr.bf16.gmra.mrb[28].mxu1 %v3977_v28  ;;  %2285 = vmatmul.mubr.bf16.gmra.mrb[28].mxu0 %v3978_v31  ;;  %v4053_v28 = vld [vmem:[%s5403_s0 + $0x1cc] ss:$72 sps:$4 sm:$0xff]   ;;  %v4070_v31 = vld [vmem:[%s5402_s1 + $0x2a0] sm:$0xff]   ;;  %v4101_v52 = vld [vmem:[%s5402_s1 + $0x378] sm:$0xff]  }
  0x5b   :  { %2195 = vmatprep.mubr.bf16.mxu1 %v3983_v32  ;;  %2292 = vmatprep.mubr.bf16.mxu0 %v3985_v33  ;;  %v4071_v32 = vld [vmem:[%s5402_s1 + $0x360] sm:$0xff]  }
  0x5c   :  { %3484 = vmatpush3.bf16.msra.mxu1 %v4010_v51  ;;  %3548 = vmatpush3.bf16.msra.mxu0 %v4012_v53  ;;  %v4072_v33 = vld [vmem:[%s5402_s1 + $0x320] sm:$0xff]   ;;  %v4100_v51 = vld [vmem:[%s5402_s1 + $0x2b8] sm:$0xff]  }
  0x5d   :  { %3485 = vmatprep.subr.bf16.mxu1 %v4019_v56  ;;  %3549 = vmatprep.subr.bf16.mxu0 %v4021_v60  ;;  %v4102_v53 = vld [vmem:[%s5402_s1 + $0x338] sm:$0xff]  }
  0x5e   :  { %v4083_v56 = vld [vmem:[%s5403_s0 + $0x37c] ss:$72 sps:$4 sm:$0xff]   ;;  %v4087_v60 = vld [vmem:[%s5403_s0 + $0x378] ss:$72 sps:$4 sm:$0xff]  }
  0x60   :  { %3486 = vmatpush3.bf16.msra.mxu1 %v4020_v59  ;;  %3550 = vmatpush3.bf16.msra.mxu0 %v4022_v61  ;;  %v4111_v59 = vld [vmem:[%s5402_s1 + $0x440] sm:$0xff]  }
  0x61   :  { %3599 = vmatprep.subr.bf16.mxu1 %v4029_v62  ;;  %3663 = vmatprep.subr.bf16.mxu0 %v4031_v1  ;;  %v4088_v61 = vld [vmem:[%s5403_s0 + $0x380] ss:$72 sps:$4 sm:$0xff]   ;;  %v4093_v62 = vld [vmem:[%s5403_s0 + $0x40c] ss:$72 sps:$4 sm:$0xff]   ;;  %v4098_v1 = vld [vmem:[%s5403_s0 + $0x410] ss:$72 sps:$4 sm:$0xff]  }
  0x62   :  { %2196 = vmatmul.mubr.bf16.gmra.mrb[32].mxu1 %v3987_v38  ;;  %2293 = vmatmul.mubr.bf16.gmra.mrb[32].mxu0 %v3988_v39  ;;  %v4065_v38 = vld [vmem:[%s5403_s0 + $0x264] ss:$72 sps:$4 sm:$0xff]  }
  0x63   :  { %2203 = vmatprep.mubr.bf16.mxu1 %v3993_v40  ;;  %2300 = vmatprep.mubr.bf16.mxu0 %v3995_v41  ;;  %v4080_v39 = vld [vmem:[%s5402_s1 + $0x2a8] sm:$0xff]  }
  0x64   :  { %v4081_v40 = vld [vmem:[%s5402_s1 + $0x368] sm:$0xff]  }
  0x65   :  { %v4082_v41 = vld [vmem:[%s5402_s1 + $0x328] sm:$0xff]  }
  0x6a   :  { %2204 = vmatmul.mubr.bf16.gmra.mrb[36].mxu1 %v3997_v46  ;;  %2301 = vmatmul.mubr.bf16.gmra.mrb[36].mxu0 %v3998_v47  ;;  %v4073_v46 = vld [vmem:[%s5403_s0 + $0x2ec] ss:$72 sps:$4 sm:$0xff]  }
  0x6b   :  { %2211 = vmatprep.mubr.bf16.mxu1 %v4003_v48  ;;  %2308 = vmatprep.mubr.bf16.mxu0 %v4005_v49  ;;  %v4091_v47 = vld [vmem:[%s5402_s1 + $0x370] sm:$0xff]  }
  0x6c   :  { %v4092_v48 = vld [vmem:[%s5402_s1 + $0x330] sm:$0xff]  }
  0x6d   :  { %v4075_v49 = vld [vmem:[%s5403_s0 + $0x2f4] ss:$72 sps:$4 sm:$0xff]  }
  0x72   :  { %2212 = vmatmul.mubr.bf16.gmra.mrb[40].mxu1 %v4007_v54  ;;  %2309 = vmatmul.mubr.bf16.gmra.mrb[40].mxu0 %v4008_v55  ;;  %v4077_v54 = vld [vmem:[%s5403_s0 + $0x2e8] ss:$72 sps:$4 sm:$0xff]  }
  0x73   :  { %2219 = vmatprep.mubr.bf16.mxu1 %v4013_v57  ;;  %2316 = vmatprep.mubr.bf16.mxu0 %v4015_v58  ;;  %v4078_v55 = vld [vmem:[%s5403_s0 + $0x2f0] ss:$72 sps:$4 sm:$0xff]   ;;  %v4085_v57 = vld [vmem:[%s5403_s0 + $0x384] ss:$72 sps:$4 sm:$0xff]  }
  0x74   :  { %v4109_v58 = vld [vmem:[%s5402_s1 + $0x3c0] sm:$0xff]  }
  0x7a   :  { %2220 = vmatmul.mubr.bf16.gmra.mrb[44].mxu1 %v4017_v63  ;;  %2317 = vmatmul.mubr.bf16.gmra.mrb[44].mxu0 %v4018_v0  ;;  %v4095_v63 = vld [vmem:[%s5403_s0 + $0x414] ss:$72 sps:$4 sm:$0xff]   ;;  %v4097_v0 = vld [vmem:[%s5403_s0 + $0x408] ss:$72 sps:$4 sm:$0xff]  }
  0x7b   :  { %2357 = vmatprep.mubr.bf16.mxu1 %v4025_v2  ;;  %2454 = vmatprep.mubr.bf16.mxu0 %v4028_v3  ;;  %v4105_v2 = vld [vmem:[%s5403_s0 + $0x2c] ss:$72 sps:$4 sm:$0xff]  }
  0x7c   :  { %v4108_v3 = vld [vmem:[%s5403_s0 + $0x34] ss:$72 sps:$4 sm:$0xff]  }
  0x82   :  { %2358 = vmatmul.mubr.bf16.vlgmr.msra.gmra.mrb[48].mxu1 %v4023_v4  ;;  %2455 = vmatmul.mubr.bf16.vlgmr.msra.gmra.mrb[48].mxu0 %v4026_v5  ;;  %v4103_v4 = vld [vmem:[%s5403_s0 + $0x28] ss:$72 sps:$4 sm:$0xff]  }
  0x83   :  { %3600 = vmatpush3.bf16.msra.mxu1 %v4030_v6  ;;  %3664 = vmatpush3.bf16.msra.mxu0 %v4032_v7  ;;  %v4106_v5 = vld [vmem:[%s5403_s0 + $0x30] ss:$72 sps:$4 sm:$0xff]   ;;  %v4110_v6 = vld [vmem:[%s5402_s1 + $0x380] sm:$0xff]  }
  0x84   :  { %2365 = vmatprep.mubr.bf16.mxu1 %v4033_v8  ;;  %2462 = vmatprep.mubr.bf16.mxu0 %v4035_v9  ;;  %v4112_v7 = vld [vmem:[%s5402_s1 + $0x400] sm:$0xff]  }
  0x85   :  { %3601 = vmatprep.subr.bf16.mxu1 %v4039_v10  ;;  %3665 = vmatprep.subr.bf16.mxu0 %v4041_v12  ;;  %v4113_v8 = vld [vmem:[%s5403_s0 + $0xbc] ss:$72 sps:$4 sm:$0xff]   ;;  %v4119_v10 = vld [vmem:[%s5402_s1 + $0x3c8] sm:$0xff]  }
  0x86   :  { %v4115_v9 = vld [vmem:[%s5403_s0 + $0xc4] ss:$72 sps:$4 sm:$0xff]  }
  0x87   :  { %3602 = vmatpush3.bf16.msra.mxu1 %v4040_v11  ;;  %3666 = vmatpush3.bf16.msra.mxu0 %v4042_v13  ;;  %v4121_v11 = vld [vmem:[%s5402_s1 + $0x448] sm:$0xff]  }
  0x88   :  { %3603 = vmatprep.subr.bf16.mxu1 %v4049_v14  ;;  %3667 = vmatprep.subr.bf16.mxu0 %v4051_v17  ;;  %v4120_v12 = vld [vmem:[%s5402_s1 + $0x388] sm:$0xff]   ;;  %v4129_v14 = vld [vmem:[%s5402_s1 + $0x3d0] sm:$0xff]  }
  0x89   :  { %v4122_v13 = vld [vmem:[%s5402_s1 + $0x408] sm:$0xff]   ;;  %v4131_v17 = vld [vmem:[%s5402_s1 + $0x450] sm:$0xff]  }
  0x8a   :  { %2366 = vmatmul.mubr.bf16.gmra.mrb[52].mxu1 %v4037_v15  ;;  %2463 = vmatmul.mubr.bf16.gmra.mrb[52].mxu0 %v4038_v16  ;;  %v4117_v15 = vld [vmem:[%s5403_s0 + $0xb8] ss:$72 sps:$4 sm:$0xff]  }
  0x8b   :  { %2373 = vmatprep.mubr.bf16.mxu1 %v4043_v18  ;;  %2470 = vmatprep.mubr.bf16.mxu0 %v4045_v19  ;;  %v4118_v16 = vld [vmem:[%s5403_s0 + $0xc0] ss:$72 sps:$4 sm:$0xff]   ;;  %v4123_v18 = vld [vmem:[%s5403_s0 + $0x14c] ss:$72 sps:$4 sm:$0xff]  }
  0x8c   :  { %3604 = vmatpush3.bf16.msra.mxu1 %v4050_v20  ;;  %3668 = vmatpush3.bf16.msra.mxu0 %v4052_v21  ;;  %v4125_v19 = vld [vmem:[%s5403_s0 + $0x154] ss:$72 sps:$4 sm:$0xff]  }
  0x8d   :  { %3605 = vmatprep.subr.bf16.mxu1 %v4059_v22  ;;  %3669 = vmatprep.subr.bf16.mxu0 %v4061_v23  ;;  %v4130_v20 = vld [vmem:[%s5402_s1 + $0x390] sm:$0xff]   ;;  %v4139_v22 = vld [vmem:[%s5402_s1 + $0x3d8] sm:$0xff]  }
  0x8e   :  { %v4132_v21 = vld [vmem:[%s5402_s1 + $0x410] sm:$0xff]   ;;  %v4141_v23 = vld [vmem:[%s5402_s1 + $0x458] sm:$0xff]  }
  0x90   :  { %3606 = vmatpush3.bf16.msra.mxu1 %v4060_v26  ;;  %3670 = vmatpush3.bf16.msra.mxu0 %v4062_v27  ;;  %v4127_v26 = vld [vmem:[%s5403_s0 + $0x148] ss:$72 sps:$4 sm:$0xff]  }
  0x91   :  { %3607 = vmatprep.subr.bf16.mxu1 %v4069_v30  ;;  %3671 = vmatprep.subr.bf16.mxu0 %v4071_v32  ;;  %v4128_v27 = vld [vmem:[%s5403_s0 + $0x150] ss:$72 sps:$4 sm:$0xff]   ;;  %v4133_v30 = vld [vmem:[%s5403_s0 + $0x1dc] ss:$72 sps:$4 sm:$0xff]  }
  0x92   :  { %2374 = vmatmul.mubr.bf16.gmra.mrb[56].mxu1 %v4047_v24  ;;  %2471 = vmatmul.mubr.bf16.gmra.mrb[56].mxu0 %v4048_v25  ;;  %v4140_v24 = vld [vmem:[%s5402_s1 + $0x398] sm:$0xff]   ;;  %v4150_v32 = vld [vmem:[%s5402_s1 + $0x3a0] sm:$0xff]  }
  0x93   :  { %2381 = vmatprep.mubr.bf16.mxu1 %v4053_v28  ;;  %2478 = vmatprep.mubr.bf16.mxu0 %v4055_v29  ;;  %v4142_v25 = vld [vmem:[%s5402_s1 + $0x418] sm:$0xff]   ;;  %v4149_v28 = vld [vmem:[%s5402_s1 + $0x3e0] sm:$0xff]  }
  0x94   :  { %3608 = vmatpush3.bf16.msra.mxu1 %v4070_v31  ;;  %3672 = vmatpush3.bf16.msra.mxu0 %v4072_v33  ;;  %v4151_v29 = vld [vmem:[%s5402_s1 + $0x460] sm:$0xff]  }
  0x95   :  { %3609 = vmatprep.subr.bf16.mxu1 %v4079_v36  ;;  %3673 = vmatprep.subr.bf16.mxu0 %v4081_v40  ;;  %v4135_v31 = vld [vmem:[%s5403_s0 + $0x1e4] ss:$72 sps:$4 sm:$0xff]   ;;  %v4169_v40 = vld [vmem:[%s5402_s1 + $0x3f0] sm:$0xff]  }
  0x96   :  { %v4152_v33 = vld [vmem:[%s5402_s1 + $0x420] sm:$0xff]   ;;  %v4160_v36 = vld [vmem:[%s5402_s1 + $0x3a8] sm:$0xff]  }
  0x98   :  { %3610 = vmatpush3.bf16.msra.mxu1 %v4080_v39  ;;  %3674 = vmatpush3.bf16.msra.mxu0 %v4082_v41  ;;  %v4138_v39 = vld [vmem:[%s5403_s0 + $0x1e0] ss:$72 sps:$4 sm:$0xff]   ;;  %v4143_v41 = vld [vmem:[%s5403_s0 + $0x26c] ss:$72 sps:$4 sm:$0xff]  }
  0x99   :  { %3611 = vmatprep.subr.bf16.mxu1 %v4089_v42  ;;  %3675 = vmatprep.subr.bf16.mxu0 %v4091_v47  ;;  %v4171_v42 = vld [vmem:[%s5402_s1 + $0x470] sm:$0xff]   ;;  %v4181_v47 = vld [vmem:[%s5402_s1 + $0x478] sm:$0xff]  }
  0x9a   :  { %2382 = vmatmul.mubr.bf16.gmra.mrb[60].mxu1 %v4057_v34  ;;  %2479 = vmatmul.mubr.bf16.gmra.mrb[60].mxu0 %v4058_v35  ;;  %v4159_v34 = vld [vmem:[%s5402_s1 + $0x3e8] sm:$0xff]  }
  0x9b   :  { %2389 = vmatprep.mubr.bf16.mxu1 %v4063_v37  ;;  %2486 = vmatprep.mubr.bf16.mxu0 %v4065_v38  ;;  %v4161_v35 = vld [vmem:[%s5402_s1 + $0x468] sm:$0xff]   ;;  %v4137_v38 = vld [vmem:[%s5403_s0 + $0x1d8] ss:$72 sps:$4 sm:$0xff]  }
  0x9c   :  { %3612 = vmatpush3.bf16.msra.mxu1 %v4090_v45  ;;  %3676 = vmatpush3.bf16.msra.mxu0 %v4092_v48  ;;  %v4162_v37 = vld [vmem:[%s5402_s1 + $0x428] sm:$0xff]   ;;  %v4172_v45 = vld [vmem:[%s5402_s1 + $0x430] sm:$0xff]   ;;  %v4180_v48 = vld [vmem:[%s5402_s1 + $0x3b8] sm:$0xff]  }
  0x9d   :  { %3613 = vmatprep.subr.bf16.mxu1 %v4099_v50  ;;  %3677 = vmatprep.subr.bf16.mxu0 %v4101_v52  ;;  %v4147_v50 = vld [vmem:[%s5403_s0 + $0x268] ss:$72 sps:$4 sm:$0xff]   ;;  %v4153_v52 = vld [vmem:[%s5403_s0 + $0x2fc] ss:$72 sps:$4 sm:$0xff]  }
  0xa0   :  { %3614 = vmatpush3.bf16.msra.mxu1 %v4100_v51  ;;  %3678 = vmatpush3.bf16.msra.mxu0 %v4102_v53  ;;  %v4148_v51 = vld [vmem:[%s5403_s0 + $0x270] ss:$72 sps:$4 sm:$0xff]   ;;  %v4155_v53 = vld [vmem:[%s5403_s0 + $0x304] ss:$72 sps:$4 sm:$0xff]  }
  0xa1   :  { %3727 = vmatprep.subr.bf16.mxu1 %v4109_v58  ;;  %3791 = vmatprep.subr.bf16.mxu0 %v4111_v59  ;;  %v4167_v58 = vld [vmem:[%s5403_s0 + $0x388] ss:$72 sps:$4 sm:$0xff]  }
  0xa2   :  { %2390 = vmatmul.mubr.bf16.gmra.mrb[64].mxu1 %v4067_v43  ;;  %2487 = vmatmul.mubr.bf16.gmra.mrb[64].mxu0 %v4068_v44  ;;  %v4145_v43 = vld [vmem:[%s5403_s0 + $0x274] ss:$72 sps:$4 sm:$0xff]   ;;  %v4168_v59 = vld [vmem:[%s5403_s0 + $0x390] ss:$72 sps:$4 sm:$0xff]  }
  0xa3   :  { %2397 = vmatprep.mubr.bf16.mxu1 %v4073_v46  ;;  %2494 = vmatprep.mubr.bf16.mxu0 %v4075_v49  ;;  %v4170_v44 = vld [vmem:[%s5402_s1 + $0x3b0] sm:$0xff]   ;;  %v4179_v46 = vld [vmem:[%s5402_s1 + $0x3f8] sm:$0xff]  }
  0xa4   :  { %v4182_v49 = vld [vmem:[%s5402_s1 + $0x438] sm:$0xff]  }
  0xaa   :  { %2398 = vmatmul.mubr.bf16.gmra.mrb[68].mxu1 %v4077_v54  ;;  %2495 = vmatmul.mubr.bf16.gmra.mrb[68].mxu0 %v4078_v55  ;;  %v4157_v54 = vld [vmem:[%s5403_s0 + $0x2f8] ss:$72 sps:$4 sm:$0xff]  }
  0xab   :  { %2405 = vmatprep.mubr.bf16.mxu1 %v4083_v56  ;;  %2502 = vmatprep.mubr.bf16.mxu0 %v4085_v57  ;;  %v4158_v55 = vld [vmem:[%s5403_s0 + $0x300] ss:$72 sps:$4 sm:$0xff]   ;;  %v4163_v56 = vld [vmem:[%s5403_s0 + $0x38c] ss:$72 sps:$4 sm:$0xff]  }
  0xac   :  { %v4165_v57 = vld [vmem:[%s5403_s0 + $0x394] ss:$72 sps:$4 sm:$0xff]  }
  0xb2   :  { %2406 = vmatmul.mubr.bf16.gmra.mrb[72].mxu1 %v4087_v60  ;;  %2503 = vmatmul.mubr.bf16.gmra.mrb[72].mxu0 %v4088_v61  ;;  %v4173_v60 = vld [vmem:[%s5403_s0 + $0x41c] ss:$72 sps:$4 sm:$0xff]  }
  0xb3   :  { %2413 = vmatprep.mubr.bf16.mxu1 %v4093_v62  ;;  %2510 = vmatprep.mubr.bf16.mxu0 %v4095_v63  ;;  %v4175_v61 = vld [vmem:[%s5403_s0 + $0x424] ss:$72 sps:$4 sm:$0xff]  }
  0xba   :  { %2414 = vmatmul.mubr.bf16.gmra.mrb[76].mxu1 %v4097_v0  ;;  %2511 = vmatmul.mubr.bf16.gmra.mrb[76].mxu0 %v4098_v1 }
  0xbb   :  { %2551 = vmatprep.mubr.bf16.mxu1 %v4105_v2  ;;  %2648 = vmatprep.mubr.bf16.mxu0 %v4108_v3  ;;  %v4177_v2 = vld [vmem:[%s5403_s0 + $0x418] ss:$72 sps:$4 sm:$0xff]  }
  0xbc   :  { %v4178_v3 = vld [vmem:[%s5403_s0 + $0x420] ss:$72 sps:$4 sm:$0xff]  }
  0xc2   :  { %2552 = vmatmul.mubr.bf16.vlgmr.msra.gmra.mrb[80].mxu1 %v4103_v4  ;;  %2649 = vmatmul.mubr.bf16.vlgmr.msra.gmra.mrb[80].mxu0 %v4106_v5 }
  0xc3   :  { %3728 = vmatpush3.bf16.msra.mxu1 %v4110_v6  ;;  %3792 = vmatpush3.bf16.msra.mxu0 %v4112_v7 }
  0xc4   :  { %2559 = vmatprep.mubr.bf16.mxu1 %v4113_v8  ;;  %2656 = vmatprep.mubr.bf16.mxu0 %v4115_v9  ;;  %v4185_v8 = vld [vmem:[%s5403_s0 + $0x3c] ss:$72 sps:$4 sm:$0xff]  }
  0xc5   :  { %3729 = vmatprep.subr.bf16.mxu1 %v4119_v10  ;;  %3793 = vmatprep.subr.bf16.mxu0 %v4121_v11  ;;  %v4188_v9 = vld [vmem:[%s5403_s0 + $0x44] ss:$72 sps:$4 sm:$0xff]  }
  0xc7   :  { %3730 = vmatpush3.bf16.msra.mxu1 %v4120_v12  ;;  %3794 = vmatpush3.bf16.msra.mxu0 %v4122_v13 }
  0xc8   :  { %3731 = vmatprep.subr.bf16.mxu1 %v4129_v14  ;;  %3795 = vmatprep.subr.bf16.mxu0 %v4131_v17 }
  0xca   :  { %2560 = vmatmul.mubr.bf16.gmra.mrb[84].mxu1 %v4117_v15  ;;  %2657 = vmatmul.mubr.bf16.gmra.mrb[84].mxu0 %v4118_v16 }
  0xcb   :  { %2567 = vmatprep.mubr.bf16.mxu1 %v4123_v18  ;;  %2664 = vmatprep.mubr.bf16.mxu0 %v4125_v19  ;;  %v4183_v18 = vld [vmem:[%s5403_s0 + $0x38] ss:$72 sps:$4 sm:$0xff]  }
  0xcc   :  { %3732 = vmatpush3.bf16.msra.mxu1 %v4130_v20  ;;  %3796 = vmatpush3.bf16.msra.mxu0 %v4132_v21  ;;  %v4186_v19 = vld [vmem:[%s5403_s0 + $0x40] ss:$72 sps:$4 sm:$0xff]  }
  0xcd   :  { %3733 = vmatprep.subr.bf16.mxu1 %v4139_v22  ;;  %3797 = vmatprep.subr.bf16.mxu0 %v4141_v23 }
  0xd0   :  { %3734 = vmatpush3.bf16.msra.mxu1 %v4140_v24  ;;  %3798 = vmatpush3.bf16.msra.mxu0 %v4142_v25  ;;  %v4189_v24 = vld [vmem:[%s5403_s0 + $0xcc] ss:$72 sps:$4 sm:$0xff]  }
  0xd1   :  { %3735 = vmatprep.subr.bf16.mxu1 %v4149_v28  ;;  %3799 = vmatprep.subr.bf16.mxu0 %v4151_v29  ;;  %v4191_v25 = vld [vmem:[%s5403_s0 + $0xd4] ss:$72 sps:$4 sm:$0xff]  }
  0xd2   :  { %2568 = vmatmul.mubr.bf16.gmra.mrb[88].mxu1 %v4127_v26  ;;  %2665 = vmatmul.mubr.bf16.gmra.mrb[88].mxu0 %v4128_v27 }
  0xd3   :  { %2575 = vmatprep.mubr.bf16.mxu1 %v4133_v30  ;;  %2672 = vmatprep.mubr.bf16.mxu0 %v4135_v31 }
  0xd4   :  { %3736 = vmatpush3.bf16.msra.mxu1 %v4150_v32  ;;  %3800 = vmatpush3.bf16.msra.mxu0 %v4152_v33 }
  0xd5   :  { %3737 = vmatprep.subr.bf16.mxu1 %v4159_v34  ;;  %3801 = vmatprep.subr.bf16.mxu0 %v4161_v35  ;;  %v4193_v34 = vld [vmem:[%s5403_s0 + $0xc8] ss:$72 sps:$4 sm:$0xff]  }
  0xd6   :  { %v4194_v35 = vld [vmem:[%s5403_s0 + $0xd0] ss:$72 sps:$4 sm:$0xff]  }
  0xd8   :  { %3738 = vmatpush3.bf16.msra.mxu1 %v4160_v36  ;;  %3802 = vmatpush3.bf16.msra.mxu0 %v4162_v37 }
  0xd9   :  { %3739 = vmatprep.subr.bf16.mxu1 %v4169_v40  ;;  %3803 = vmatprep.subr.bf16.mxu0 %v4171_v42  ;;  %v4195_v40 = vld [vmem:[%s5403_s0 + $0x15c] ss:$72 sps:$4 sm:$0xff]  }
  0xda   :  { %2576 = vmatmul.mubr.bf16.gmra.mrb[92].mxu1 %v4137_v38  ;;  %2673 = vmatmul.mubr.bf16.gmra.mrb[92].mxu0 %v4138_v39 }
  0xdb   :  { %2583 = vmatprep.mubr.bf16.mxu1 %v4143_v41  ;;  %2680 = vmatprep.mubr.bf16.mxu0 %v4145_v43  ;;  %v4197_v41 = vld [vmem:[%s5403_s0 + $0x164] ss:$72 sps:$4 sm:$0xff]  }
  0xdc   :  { %3740 = vmatpush3.bf16.msra.mxu1 %v4170_v44  ;;  %3804 = vmatpush3.bf16.msra.mxu0 %v4172_v45 }
  0xdd   :  { %3741 = vmatprep.subr.bf16.mxu1 %v4179_v46  ;;  %3805 = vmatprep.subr.bf16.mxu0 %v4181_v47 }
  0xe0   :  { %3742 = vmatpush3.bf16.msra.mxu1 %v4180_v48  ;;  %3806 = vmatpush3.bf16.msra.mxu0 %v4182_v49 }
  0xe2   :  { %2584 = vmatmul.mubr.bf16.gmra.mrb[96].mxu1 %v4147_v50  ;;  %2681 = vmatmul.mubr.bf16.gmra.mrb[96].mxu0 %v4148_v51  ;;  %v4199_v50 = vld [vmem:[%s5403_s0 + $0x158] ss:$72 sps:$4 sm:$0xff]  }
  0xe3   :  { %2591 = vmatprep.mubr.bf16.mxu1 %v4153_v52  ;;  %2688 = vmatprep.mubr.bf16.mxu0 %v4155_v53  ;;  %v4200_v51 = vld [vmem:[%s5403_s0 + $0x160] ss:$72 sps:$4 sm:$0xff]  }
  0xea   :  { %2592 = vmatmul.mubr.bf16.gmra.mrb[100].mxu1 %v4157_v54  ;;  %2689 = vmatmul.mubr.bf16.gmra.mrb[100].mxu0 %v4158_v55 }
  0xeb   :  { %2599 = vmatprep.mubr.bf16.mxu1 %v4163_v56  ;;  %2696 = vmatprep.mubr.bf16.mxu0 %v4165_v57  ;;  %v4201_v56 = vld [vmem:[%s5403_s0 + $0x1ec] ss:$72 sps:$4 sm:$0xff]  }
  0xec   :  { %v4203_v57 = vld [vmem:[%s5403_s0 + $0x1f4] ss:$72 sps:$4 sm:$0xff]  }
  0xf2   :  { %2600 = vmatmul.mubr.bf16.gmra.mrb[104].mxu1 %v4167_v58  ;;  %2697 = vmatmul.mubr.bf16.gmra.mrb[104].mxu0 %v4168_v59 }
  0xf3   :  { %2607 = vmatprep.mubr.bf16.mxu1 %v4173_v60  ;;  %2704 = vmatprep.mubr.bf16.mxu0 %v4175_v61 }
  0xf5   :  { %v3295_v62 = vpop.f32.mrb[0].mxu0  ;;  %v3319_v63 = vpop.f32.mrb[0].mxu1 }
  0xf6   :  { %v3296_v0 = vpop.f32.mrb[1].mxu0  ;;  %v3320_v1 = vpop.f32.mrb[1].mxu1 }
  0xf7   :  { %v5024_v4 = vadd.f32 %v3296_v0, %v3295_v62  ;;  %v5026_v5 = vadd.f32 %v3320_v1, %v3319_v63  ;;  %v3298_v6 = vpop.f32.mrb[2].mxu0  ;;  %v3322_v7 = vpop.f32.mrb[2].mxu1 }
  0xf8   :  { %v3299_v10 = vpop.f32.mrb[3].mxu0  ;;  %v3323_v11 = vpop.f32.mrb[3].mxu1 }
  0xf9   :  { %v5034_v12 = vadd.f32 %v3299_v10, %v3298_v6  ;;  %v5036_v13 = vadd.f32 %v3323_v11, %v3322_v7  ;;  %v4207_v10 = vld [vmem:[%s5403_s0 + $0x27c] ss:$72 sps:$4 sm:$0xff]  }
  0xfa   :  { %2608 = vmatmul.mubr.bf16.gmra.mrb[108].mxu1 %v4177_v2  ;;  %2705 = vmatmul.mubr.bf16.gmra.mrb[108].mxu0 %v4178_v3  ;;  %v4205_v2 = vld [vmem:[%s5403_s0 + $0x1e8] ss:$72 sps:$4 sm:$0xff]   ;;  %v4209_v11 = vld [vmem:[%s5403_s0 + $0x284] ss:$72 sps:$4 sm:$0xff]  }
  0xfb   :  { %2745 = vmatprep.mubr.bf16.mxu1 %v4185_v8  ;;  %2842 = vmatprep.mubr.bf16.mxu0 %v4188_v9  ;;  %v4206_v3 = vld [vmem:[%s5403_s0 + $0x1f0] ss:$72 sps:$4 sm:$0xff]  }
  0xfd   :  { %v3301_v14 = vpop.f32.mrb[4].mxu0  ;;  %v3325_v15 = vpop.f32.mrb[4].mxu1 }
  0xfe   :  { %v3302_v16 = vpop.f32.mrb[5].mxu0  ;;  %v3326_v17 = vpop.f32.mrb[5].mxu1 }
  0xff   :  { %v5044_v20 = vadd.f32 %v3302_v16, %v3301_v14  ;;  %v5046_v21 = vadd.f32 %v3326_v17, %v3325_v15  ;;  %v3304_v22 = vpop.f32.mrb[6].mxu0  ;;  %v3328_v23 = vpop.f32.mrb[6].mxu1 }
 0x100   :  { %v3305_v26 = vpop.f32.mrb[7].mxu0  ;;  %v3329_v27 = vpop.f32.mrb[7].mxu1 }
 0x101   :  { %v5054_v28 = vadd.f32 %v3305_v26, %v3304_v22  ;;  %v5056_v29 = vadd.f32 %v3329_v27, %v3328_v23 }
 0x102   :  { %2746 = vmatmul.mubr.bf16.vlgmr.msra.gmra.mrb[112].mxu1 %v4183_v18  ;;  %2843 = vmatmul.mubr.bf16.vlgmr.msra.gmra.mrb[112].mxu0 %v4186_v19 }
 0x103   :  { %2753 = vmatprep.mubr.bf16.mxu1 %v4189_v24  ;;  %2850 = vmatprep.mubr.bf16.mxu0 %v4191_v25 }
 0x105   :  { %v3307_v30 = vpop.f32.mrb[8].mxu0  ;;  %v3331_v31 = vpop.f32.mrb[8].mxu1 }
 0x106   :  { %v3308_v32 = vpop.f32.mrb[9].mxu0  ;;  %v3332_v33 = vpop.f32.mrb[9].mxu1 }
 0x107   :  { %v5064_v36 = vadd.f32 %v3308_v32, %v3307_v30  ;;  %v5066_v37 = vadd.f32 %v3332_v33, %v3331_v31  ;;  %v3310_v38 = vpop.f32.mrb[10].mxu0  ;;  %v3334_v39 = vpop.f32.mrb[10].mxu1  ;;  %v4212_v30 = vld [vmem:[%s5403_s0 + $0x280] ss:$72 sps:$4 sm:$0xff]  }
 0x108   :  { %v3311_v42 = vpop.f32.mrb[11].mxu0  ;;  %v3335_v43 = vpop.f32.mrb[11].mxu1 }
 0x109   :  { %v5074_v44 = vadd.f32 %v3311_v42, %v3310_v38  ;;  %v5076_v45 = vadd.f32 %v3335_v43, %v3334_v39 }
 0x10a   :  { %2754 = vmatmul.mubr.bf16.gmra.mrb[116].mxu1 %v4193_v34  ;;  %2851 = vmatmul.mubr.bf16.gmra.mrb[116].mxu0 %v4194_v35  ;;  %v4213_v34 = vld [vmem:[%s5403_s0 + $0x30c] ss:$72 sps:$4 sm:$0xff]  }
 0x10b   :  { %2761 = vmatprep.mubr.bf16.mxu1 %v4195_v40  ;;  %2858 = vmatprep.mubr.bf16.mxu0 %v4197_v41  ;;  %v4215_v35 = vld [vmem:[%s5403_s0 + $0x314] ss:$72 sps:$4 sm:$0xff]  }
 0x10d   :  { %v3313_v46 = vpop.f32.mrb[12].mxu0  ;;  %v3337_v47 = vpop.f32.mrb[12].mxu1 }
 0x10e   :  { %v3314_v48 = vpop.f32.mrb[13].mxu0  ;;  %v3338_v49 = vpop.f32.mrb[13].mxu1 }
 0x10f   :  { %v5084_v52 = vadd.f32 %v3314_v48, %v3313_v46  ;;  %v5086_v53 = vadd.f32 %v3338_v49, %v3337_v47  ;;  %v3316_v54 = vpop.f32.mrb[14].mxu0  ;;  %v3340_v55 = vpop.f32.mrb[14].mxu1 }
 0x110   :  { %v3317_v58 = vpop.f32.mrb[15].mxu0  ;;  %v3341_v59 = vpop.f32.mrb[15].mxu1 }
 0x111   :  { %v5094_v60 = vadd.f32 %v3317_v58, %v3316_v54  ;;  %v5096_v61 = vadd.f32 %v3341_v59, %v3340_v55  ;;  %v4218_v54 = vld [vmem:[%s5403_s0 + $0x310] ss:$72 sps:$4 sm:$0xff]   ;;  %v4219_v58 = vld [vmem:[%s5403_s0 + $0x39c] ss:$72 sps:$4 sm:$0xff]  }
 0x112   :  { %2762 = vmatmul.mubr.bf16.gmra.mrb[120].mxu1 %v4199_v50  ;;  %2859 = vmatmul.mubr.bf16.gmra.mrb[120].mxu0 %v4200_v51  ;;  %v4221_v59 = vld [vmem:[%s5403_s0 + $0x3a4] ss:$72 sps:$4 sm:$0xff]  }
 0x113   :  { %2769 = vmatprep.mubr.bf16.mxu1 %v4201_v56  ;;  %2866 = vmatprep.mubr.bf16.mxu0 %v4203_v57 }
 0x115   :  { %v3359_v62 = vpop.f32.mrb[16].mxu1  ;;  %v3423_v63 = vpop.f32.mrb[16].mxu0 }
 0x116   :  { %v3360_v0 = vpop.f32.mrb[17].mxu1  ;;  %v3424_v1 = vpop.f32.mrb[17].mxu0 }
 0x117   :  { %v3361_v6 = vadd.f32 %v3360_v0, %v3359_v62  ;;  %v3425_v7 = vadd.f32 %v3424_v1, %v3423_v63  ;;  %v3362_v8 = vpop.f32.mrb[18].mxu1  ;;  %v3426_v9 = vpop.f32.mrb[18].mxu0 }
 0x118   :  { %v3363_v14 = vpop.f32.mrb[19].mxu1  ;;  %v3427_v15 = vpop.f32.mrb[19].mxu0 }
 0x119   :  { %v2166_v16 = vadd.f32 %v3361_v6, %v5024_v4  ;;  %v3364_v17 = vadd.f32 %v3363_v14, %v3362_v8  ;;  %v3428_v18 = vadd.f32 %v3427_v15, %v3426_v9  ;;  %v4211_v4 = vld [vmem:[%s5403_s0 + $0x278] ss:$72 sps:$4 sm:$0xff]  }
 0x11a   :  { %2770 = vmatmul.mubr.bf16.gmra.mrb[124].mxu1 %v4205_v2  ;;  %2867 = vmatmul.mubr.bf16.gmra.mrb[124].mxu0 %v4206_v3  ;;  %v4224_v14 = vld [vmem:[%s5403_s0 + $0x3a0] ss:$72 sps:$4 sm:$0xff]  }
 0x11b   :  { %v5111_v19 = vadd.f32 %v3425_v7, %v2166_v16  ;;  %v2169_v22 = vadd.f32 %v3364_v17, %v5034_v12  ;;  %2777 = vmatprep.mubr.bf16.mxu1 %v4207_v10  ;;  %2874 = vmatprep.mubr.bf16.mxu0 %v4209_v11 }
 0x11d   :  { %v5114_v23 = vadd.f32 %v3428_v18, %v2169_v22  ;;  %v3365_v24 = vpop.f32.mrb[20].mxu1  ;;  %v3429_v25 = vpop.f32.mrb[20].mxu0  ;;  %v4225_v18 = vld [vmem:[%s5403_s0 + $0x42c] ss:$72 sps:$4 sm:$0xff]  }
 0x11e   :  { %v3366_v26 = vpop.f32.mrb[21].mxu1  ;;  %v3430_v27 = vpop.f32.mrb[21].mxu0  ;;  %v4227_v22 = vld [vmem:[%s5403_s0 + $0x434] ss:$72 sps:$4 sm:$0xff]  }
 0x11f   :  { %v3367_v31 = vadd.f32 %v3366_v26, %v3365_v24  ;;  %v3431_v32 = vadd.f32 %v3430_v27, %v3429_v25  ;;  %v3368_v33 = vpop.f32.mrb[22].mxu1  ;;  %v3432_v12 = vpop.f32.mrb[22].mxu0 }
 0x120   :  { %v3369_v38 = vpop.f32.mrb[23].mxu1  ;;  %v3433_v39 = vpop.f32.mrb[23].mxu0 }
 0x121   :  { %v2174_v40 = vadd.f32 %v3367_v31, %v5044_v20  ;;  %v3370_v41 = vadd.f32 %v3369_v38, %v3368_v33  ;;  %v3434_v42 = vadd.f32 %v3433_v39, %v3432_v12  ;;  %v4217_v20 = vld [vmem:[%s5403_s0 + $0x308] ss:$72 sps:$4 sm:$0xff]  }
 0x122   :  { %2778 = vmatmul.mubr.bf16.gmra.mrb[128].mxu1 %v4211_v4  ;;  %2875 = vmatmul.mubr.bf16.gmra.mrb[128].mxu0 %v4212_v30  ;;  %v4230_v38 = vld [vmem:[%s5403_s0 + $0x430] ss:$72 sps:$4 sm:$0xff]  }
 0x123   :  { %v5129_v43 = vadd.f32 %v3431_v32, %v2174_v40  ;;  %v2177_v46 = vadd.f32 %v3370_v41, %v5054_v28  ;;  %2785 = vmatprep.mubr.bf16.mxu1 %v4213_v34  ;;  %2882 = vmatprep.mubr.bf16.mxu0 %v4215_v35 }
 0x125   :  { %v5132_v47 = vadd.f32 %v3434_v42, %v2177_v46  ;;  %v3371_v48 = vpop.f32.mrb[24].mxu1  ;;  %v3435_v49 = vpop.f32.mrb[24].mxu0 }
 0x126   :  { %v3372_v50 = vpop.f32.mrb[25].mxu1  ;;  %v3436_v51 = vpop.f32.mrb[25].mxu0 }
 0x127   :  { %v3373_v55 = vadd.f32 %v3372_v50, %v3371_v48  ;;  %v3437_v56 = vadd.f32 %v3436_v51, %v3435_v49  ;;  %v3374_v57 = vpop.f32.mrb[26].mxu1  ;;  %v3438_v28 = vpop.f32.mrb[26].mxu0 }
 0x128   :  { %v3375_v62 = vpop.f32.mrb[27].mxu1  ;;  %v3439_v63 = vpop.f32.mrb[27].mxu0 }
 0x129   :  { %v2182_v0 = vadd.f32 %v3373_v55, %v5064_v36  ;;  %v3376_v1 = vadd.f32 %v3375_v62, %v3374_v57  ;;  %v3440_v2 = vadd.f32 %v3439_v63, %v3438_v28  ;;  %v4223_v36 = vld [vmem:[%s5403_s0 + $0x398] ss:$72 sps:$4 sm:$0xff]  }
 0x12a   :  { %2786 = vmatmul.mubr.bf16.gmra.mrb[132].mxu1 %v4217_v20  ;;  %2883 = vmatmul.mubr.bf16.gmra.mrb[132].mxu0 %v4218_v54 }
 0x12b   :  { %v5147_v3 = vadd.f32 %v3437_v56, %v2182_v0  ;;  %v2185_v6 = vadd.f32 %v3376_v1, %v5074_v44  ;;  %2793 = vmatprep.mubr.bf16.mxu1 %v4219_v58  ;;  %2890 = vmatprep.mubr.bf16.mxu0 %v4221_v59 }
 0x12d   :  { %v5150_v7 = vadd.f32 %v3440_v2, %v2185_v6  ;;  %v3377_v8 = vpop.f32.mrb[28].mxu1  ;;  %v3441_v9 = vpop.f32.mrb[28].mxu0 }
 0x12e   :  { %v3378_v10 = vpop.f32.mrb[29].mxu1  ;;  %v3442_v11 = vpop.f32.mrb[29].mxu0 }
 0x12f   :  { %v3379_v15 = vadd.f32 %v3378_v10, %v3377_v8  ;;  %v3443_v16 = vadd.f32 %v3442_v11, %v3441_v9  ;;  %v3380_v17 = vpop.f32.mrb[30].mxu1  ;;  %v3444_v44 = vpop.f32.mrb[30].mxu0 }
 0x130   :  { %v3381_v24 = vpop.f32.mrb[31].mxu1  ;;  %v3445_v25 = vpop.f32.mrb[31].mxu0 }
 0x131   :  { %v2190_v26 = vadd.f32 %v3379_v15, %v5084_v52  ;;  %v3382_v27 = vadd.f32 %v3381_v24, %v3380_v17  ;;  %v3446_v4 = vadd.f32 %v3445_v25, %v3444_v44  ;;  %v4229_v52 = vld [vmem:[%s5403_s0 + $0x428] ss:$72 sps:$4 sm:$0xff]  }
 0x132   :  { %2794 = vmatmul.mubr.bf16.gmra.mrb[136].mxu1 %v4223_v36  ;;  %2891 = vmatmul.mubr.bf16.gmra.mrb[136].mxu0 %v4224_v14 }
 0x133   :  { %v5165_v30 = vadd.f32 %v3443_v16, %v2190_v26  ;;  %v2193_v31 = vadd.f32 %v3382_v27, %v5094_v60  ;;  %2801 = vmatprep.mubr.bf16.mxu1 %v4225_v18  ;;  %2898 = vmatprep.mubr.bf16.mxu0 %v4227_v22 }
 0x135   :  { %v5168_v32 = vadd.f32 %v3446_v4, %v2193_v31  ;;  %v3383_v33 = vpop.f32.mrb[32].mxu1  ;;  %v3447_v12 = vpop.f32.mrb[32].mxu0 }
 0x136   :  { %v3384_v34 = vpop.f32.mrb[33].mxu1  ;;  %v3448_v35 = vpop.f32.mrb[33].mxu0 }
 0x137   :  { %v3385_v39 = vadd.f32 %v3384_v34, %v3383_v33  ;;  %v3449_v40 = vadd.f32 %v3448_v35, %v3447_v12  ;;  %v3386_v41 = vpop.f32.mrb[34].mxu1  ;;  %v3450_v60 = vpop.f32.mrb[34].mxu0 }
 0x138   :  { %v3387_v42 = vpop.f32.mrb[35].mxu1  ;;  %v3451_v46 = vpop.f32.mrb[35].mxu0 }
 0x139   :  { %v2198_v48 = vadd.f32 %v3385_v39, %v5026_v5  ;;  %v3388_v49 = vadd.f32 %v3387_v42, %v3386_v41  ;;  %v3452_v50 = vadd.f32 %v3451_v46, %v3450_v60 }
 0x13a   :  { %2802 = vmatmul.mubr.bf16.gmra.mrb[140].mxu1 %v4229_v52  ;;  %2899 = vmatmul.mubr.bf16.gmra.mrb[140].mxu0 %v4230_v38 }
 0x13b   :  { %v5177_v51 = vadd.f32 %v3449_v40, %v2198_v48  ;;  %v2201_v20 = vadd.f32 %v3388_v49, %v5036_v13 }
 0x13d   :  { %v5180_v54 = vadd.f32 %v3452_v50, %v2201_v20  ;;  %v3389_v55 = vpop.f32.mrb[36].mxu1  ;;  %v3453_v56 = vpop.f32.mrb[36].mxu0 }
 0x13e   :  { %v3390_v57 = vpop.f32.mrb[37].mxu1  ;;  %v3454_v28 = vpop.f32.mrb[37].mxu0 }
 0x13f   :  { %v3391_v58 = vadd.f32 %v3390_v57, %v3389_v55  ;;  %v3455_v59 = vadd.f32 %v3454_v28, %v3453_v56  ;;  %v3392_v62 = vpop.f32.mrb[38].mxu1  ;;  %v3456_v63 = vpop.f32.mrb[38].mxu0 }
 0x140   :  { %v3393_v0 = vpop.f32.mrb[39].mxu1  ;;  %v3457_v5 = vpop.f32.mrb[39].mxu0 }
 0x141   :  { %v2206_v1 = vadd.f32 %v3391_v58, %v5046_v21  ;;  %v3394_v2 = vadd.f32 %v3393_v0, %v3392_v62  ;;  %v3458_v6 = vadd.f32 %v3457_v5, %v3456_v63 }
 0x143   :  { %v5183_v8 = vadd.f32 %v3455_v59, %v2206_v1  ;;  %v2209_v13 = vadd.f32 %v3394_v2, %v5056_v29 }
 0x145   :  { %v5186_v9 = vadd.f32 %v3458_v6, %v2209_v13  ;;  %v3395_v10 = vpop.f32.mrb[40].mxu1  ;;  %v3459_v11 = vpop.f32.mrb[40].mxu0 }
 0x146   :  { %v3396_v36 = vpop.f32.mrb[41].mxu1  ;;  %v3460_v14 = vpop.f32.mrb[41].mxu0 }
 0x147   :  { %v3397_v15 = vadd.f32 %v3396_v36, %v3395_v10  ;;  %v3461_v16 = vadd.f32 %v3460_v14, %v3459_v11  ;;  %v3398_v17 = vpop.f32.mrb[42].mxu1  ;;  %v3462_v44 = vpop.f32.mrb[42].mxu0 }
 0x148   :  { %v3399_v18 = vpop.f32.mrb[43].mxu1  ;;  %v3463_v22 = vpop.f32.mrb[43].mxu0 }
 0x149   :  { %v2214_v21 = vadd.f32 %v3397_v15, %v5066_v37  ;;  %v3400_v24 = vadd.f32 %v3399_v18, %v3398_v17  ;;  %v3464_v25 = vadd.f32 %v3463_v22, %v3462_v44 }
 0x14b   :  { %v5189_v26 = vadd.f32 %v3461_v16, %v2214_v21  ;;  %v2217_v29 = vadd.f32 %v3400_v24, %v5076_v45 }
 0x14d   :  { %v5192_v27 = vadd.f32 %v3464_v25, %v2217_v29  ;;  %v3401_v4 = vpop.f32.mrb[44].mxu1  ;;  %v3465_v31 = vpop.f32.mrb[44].mxu0 }
 0x14e   :  { %v3402_v33 = vpop.f32.mrb[45].mxu1  ;;  %v3466_v12 = vpop.f32.mrb[45].mxu0 }
 0x14f   :  { %v3403_v34 = vadd.f32 %v3402_v33, %v3401_v4  ;;  %v3467_v35 = vadd.f32 %v3466_v12, %v3465_v31  ;;  %v3404_v52 = vpop.f32.mrb[46].mxu1  ;;  %v3468_v38 = vpop.f32.mrb[46].mxu0 }
 0x150   :  { %v3405_v39 = vpop.f32.mrb[47].mxu1  ;;  %v3469_v40 = vpop.f32.mrb[47].mxu0 }
 0x151   :  { %v2222_v37 = vadd.f32 %v3403_v34, %v5086_v53  ;;  %v3406_v41 = vadd.f32 %v3405_v39, %v3404_v52  ;;  %v3470_v60 = vadd.f32 %v3469_v40, %v3468_v38 }
 0x153   :  { %v5195_v42 = vadd.f32 %v3467_v35, %v2222_v37  ;;  %v2225_v45 = vadd.f32 %v3406_v41, %v5096_v61 }
 0x155   :  { %v5198_v46 = vadd.f32 %v3470_v60, %v2225_v45  ;;  %v3487_v48 = vpop.f32.mrb[48].mxu1  ;;  %v3551_v49 = vpop.f32.mrb[48].mxu0 }
 0x156   :  { %v3488_v50 = vpop.f32.mrb[49].mxu1  ;;  %v3552_v20 = vpop.f32.mrb[49].mxu0 }
 0x157   :  { %v3489_v55 = vadd.f32 %v3488_v50, %v3487_v48  ;;  %v3553_v56 = vadd.f32 %v3552_v20, %v3551_v49  ;;  %v3490_v57 = vpop.f32.mrb[50].mxu1  ;;  %v3554_v28 = vpop.f32.mrb[50].mxu0 }
 0x158   :  { %v3491_v58 = vpop.f32.mrb[51].mxu1  ;;  %v3555_v59 = vpop.f32.mrb[51].mxu0 }
 0x159   :  { %v2360_v53 = vadd.f32 %v3489_v55, %v5111_v19  ;;  %v3492_v62 = vadd.f32 %v3491_v58, %v3490_v57  ;;  %v3556_v63 = vadd.f32 %v3555_v59, %v3554_v28 }
 0x15b   :  { %v5201_v0 = vadd.f32 %v3553_v56, %v2360_v53  ;;  %v2363_v61 = vadd.f32 %v3492_v62, %v5114_v23 }
 0x15d   :  { %v5204_v5 = vadd.f32 %v3556_v63, %v2363_v61  ;;  %v3493_v1 = vpop.f32.mrb[52].mxu1  ;;  %v3557_v2 = vpop.f32.mrb[52].mxu0 }
 0x15e   :  { %v3494_v6 = vpop.f32.mrb[53].mxu1  ;;  %v3558_v13 = vpop.f32.mrb[53].mxu0 }
 0x15f   :  { %v3495_v10 = vadd.f32 %v3494_v6, %v3493_v1  ;;  %v3559_v11 = vadd.f32 %v3558_v13, %v3557_v2  ;;  %v3496_v36 = vpop.f32.mrb[54].mxu1  ;;  %v3560_v14 = vpop.f32.mrb[54].mxu0 }
 0x160   :  { %v3497_v15 = vpop.f32.mrb[55].mxu1  ;;  %v3561_v16 = vpop.f32.mrb[55].mxu0 }
 0x161   :  { %v2368_v19 = vadd.f32 %v3495_v10, %v5129_v43  ;;  %v3498_v17 = vadd.f32 %v3497_v15, %v3496_v36  ;;  %v3562_v44 = vadd.f32 %v3561_v16, %v3560_v14 }
 0x163   :  { %v5207_v18 = vadd.f32 %v3559_v11, %v2368_v19  ;;  %v2371_v23 = vadd.f32 %v3498_v17, %v5132_v47 }
 0x165   :  { %v5210_v22 = vadd.f32 %v3562_v44, %v2371_v23  ;;  %v3499_v21 = vpop.f32.mrb[56].mxu1  ;;  %v3563_v24 = vpop.f32.mrb[56].mxu0 }
 0x166   :  { %v3500_v25 = vpop.f32.mrb[57].mxu1  ;;  %v3564_v29 = vpop.f32.mrb[57].mxu0 }
 0x167   :  { %v3501_v4 = vadd.f32 %v3500_v25, %v3499_v21  ;;  %v3565_v31 = vadd.f32 %v3564_v29, %v3563_v24  ;;  %v3502_v33 = vpop.f32.mrb[58].mxu1  ;;  %v3566_v12 = vpop.f32.mrb[58].mxu0 }
 0x168   :  { %v3503_v34 = vpop.f32.mrb[59].mxu1  ;;  %v3567_v35 = vpop.f32.mrb[59].mxu0 }
 0x169   :  { %v2376_v43 = vadd.f32 %v3501_v4, %v5147_v3  ;;  %v3504_v52 = vadd.f32 %v3503_v34, %v3502_v33  ;;  %v3568_v38 = vadd.f32 %v3567_v35, %v3566_v12 }
 0x16b   :  { %v5213_v39 = vadd.f32 %v3565_v31, %v2376_v43  ;;  %v2379_v47 = vadd.f32 %v3504_v52, %v5150_v7 }
 0x16d   :  { %v5216_v40 = vadd.f32 %v3568_v38, %v2379_v47  ;;  %v3505_v37 = vpop.f32.mrb[60].mxu1  ;;  %v3569_v41 = vpop.f32.mrb[60].mxu0 }
 0x16e   :  { %v3506_v60 = vpop.f32.mrb[61].mxu1  ;;  %v3570_v45 = vpop.f32.mrb[61].mxu0 }
 0x16f   :  { %v3507_v48 = vadd.f32 %v3506_v60, %v3505_v37  ;;  %v3571_v49 = vadd.f32 %v3570_v45, %v3569_v41  ;;  %v3508_v50 = vpop.f32.mrb[62].mxu1  ;;  %v3572_v20 = vpop.f32.mrb[62].mxu0 }
 0x170   :  { %v3509_v55 = vpop.f32.mrb[63].mxu1  ;;  %v3573_v56 = vpop.f32.mrb[63].mxu0 }
 0x171   :  { %v2384_v3 = vadd.f32 %v3507_v48, %v5165_v30  ;;  %v3510_v57 = vadd.f32 %v3509_v55, %v3508_v50  ;;  %v3574_v28 = vadd.f32 %v3573_v56, %v3572_v20 }
 0x173   :  { %v5219_v58 = vadd.f32 %v3571_v49, %v2384_v3  ;;  %v2387_v7 = vadd.f32 %v3510_v57, %v5168_v32 }
 0x175   :  { %v5222_v59 = vadd.f32 %v3574_v28, %v2387_v7  ;;  %v3511_v53 = vpop.f32.mrb[64].mxu1  ;;  %v3575_v62 = vpop.f32.mrb[64].mxu0 }
 0x176   :  { %v3512_v63 = vpop.f32.mrb[65].mxu1  ;;  %v3576_v61 = vpop.f32.mrb[65].mxu0 }
 0x177   :  { %v3513_v1 = vadd.f32 %v3512_v63, %v3511_v53  ;;  %v3577_v2 = vadd.f32 %v3576_v61, %v3575_v62  ;;  %v3514_v6 = vpop.f32.mrb[66].mxu1  ;;  %v3578_v13 = vpop.f32.mrb[66].mxu0 }
 0x178   :  { %v3515_v10 = vpop.f32.mrb[67].mxu1  ;;  %v3579_v11 = vpop.f32.mrb[67].mxu0 }
 0x179   :  { %v2392_v30 = vadd.f32 %v3513_v1, %v5177_v51  ;;  %v3516_v36 = vadd.f32 %v3515_v10, %v3514_v6  ;;  %v3580_v14 = vadd.f32 %v3579_v11, %v3578_v13 }
 0x17b   :  { %v5225_v15 = vadd.f32 %v3577_v2, %v2392_v30  ;;  %v2395_v32 = vadd.f32 %v3516_v36, %v5180_v54 }
 0x17d   :  { %v5228_v16 = vadd.f32 %v3580_v14, %v2395_v32  ;;  %v3517_v19 = vpop.f32.mrb[68].mxu1  ;;  %v3581_v17 = vpop.f32.mrb[68].mxu0 }
 0x17e   :  { %v3518_v44 = vpop.f32.mrb[69].mxu1  ;;  %v3582_v23 = vpop.f32.mrb[69].mxu0 }
 0x17f   :  { %v3519_v21 = vadd.f32 %v3518_v44, %v3517_v19  ;;  %v3583_v24 = vadd.f32 %v3582_v23, %v3581_v17  ;;  %v3520_v25 = vpop.f32.mrb[70].mxu1  ;;  %v3584_v29 = vpop.f32.mrb[70].mxu0 }
 0x180   :  { %v3521_v4 = vpop.f32.mrb[71].mxu1  ;;  %v3585_v31 = vpop.f32.mrb[71].mxu0 }
 0x181   :  { %v2400_v51 = vadd.f32 %v3519_v21, %v5183_v8  ;;  %v3522_v33 = vadd.f32 %v3521_v4, %v3520_v25  ;;  %v3586_v12 = vadd.f32 %v3585_v31, %v3584_v29 }
 0x183   :  { %v5231_v34 = vadd.f32 %v3583_v24, %v2400_v51  ;;  %v2403_v54 = vadd.f32 %v3522_v33, %v5186_v9 }
 0x185   :  { %v5234_v35 = vadd.f32 %v3586_v12, %v2403_v54  ;;  %v3523_v43 = vpop.f32.mrb[72].mxu1  ;;  %v3587_v52 = vpop.f32.mrb[72].mxu0 }
 0x186   :  { %v3524_v38 = vpop.f32.mrb[73].mxu1  ;;  %v3588_v47 = vpop.f32.mrb[73].mxu0 }
 0x187   :  { %v3525_v37 = vadd.f32 %v3524_v38, %v3523_v43  ;;  %v3589_v41 = vadd.f32 %v3588_v47, %v3587_v52  ;;  %v3526_v60 = vpop.f32.mrb[74].mxu1  ;;  %v3590_v45 = vpop.f32.mrb[74].mxu0 }
 0x188   :  { %v3527_v48 = vpop.f32.mrb[75].mxu1  ;;  %v3591_v49 = vpop.f32.mrb[75].mxu0 }
 0x189   :  { %v2408_v8 = vadd.f32 %v3525_v37, %v5189_v26  ;;  %v3528_v50 = vadd.f32 %v3527_v48, %v3526_v60  ;;  %v3592_v20 = vadd.f32 %v3591_v49, %v3590_v45 }
 0x18b   :  { %v5237_v55 = vadd.f32 %v3589_v41, %v2408_v8  ;;  %v2411_v9 = vadd.f32 %v3528_v50, %v5192_v27 }
 0x18d   :  { %v5240_v56 = vadd.f32 %v3592_v20, %v2411_v9  ;;  %v3529_v3 = vpop.f32.mrb[76].mxu1  ;;  %v3593_v57 = vpop.f32.mrb[76].mxu0 }
 0x18e   :  { %v3530_v28 = vpop.f32.mrb[77].mxu1  ;;  %v3594_v7 = vpop.f32.mrb[77].mxu0 }
 0x18f   :  { %v3531_v53 = vadd.f32 %v3530_v28, %v3529_v3  ;;  %v3595_v62 = vadd.f32 %v3594_v7, %v3593_v57  ;;  %v3532_v63 = vpop.f32.mrb[78].mxu1  ;;  %v3596_v61 = vpop.f32.mrb[78].mxu0 }
 0x190   :  { %v3533_v1 = vpop.f32.mrb[79].mxu1  ;;  %v3597_v2 = vpop.f32.mrb[79].mxu0 }
 0x191   :  { %v2416_v26 = vadd.f32 %v3531_v53, %v5195_v42  ;;  %v3534_v6 = vadd.f32 %v3533_v1, %v3532_v63  ;;  %v3598_v13 = vadd.f32 %v3597_v2, %v3596_v61 }
 0x193   :  { %v5243_v10 = vadd.f32 %v3595_v62, %v2416_v26  ;;  %v2419_v27 = vadd.f32 %v3534_v6, %v5198_v46 }
 0x195   :  { %v5246_v11 = vadd.f32 %v3598_v13, %v2419_v27  ;;  %v3615_v30 = vpop.f32.mrb[80].mxu1  ;;  %v3679_v36 = vpop.f32.mrb[80].mxu0 }
 0x196   :  { %v3616_v14 = vpop.f32.mrb[81].mxu1  ;;  %v3680_v32 = vpop.f32.mrb[81].mxu0 }
 0x197   :  { %v3617_v19 = vadd.f32 %v3616_v14, %v3615_v30  ;;  %v3681_v17 = vadd.f32 %v3680_v32, %v3679_v36  ;;  %v3618_v44 = vpop.f32.mrb[82].mxu1  ;;  %v3682_v23 = vpop.f32.mrb[82].mxu0 }
 0x198   :  { %v3619_v21 = vpop.f32.mrb[83].mxu1  ;;  %v3683_v24 = vpop.f32.mrb[83].mxu0 }
 0x199   :  { %v2554_v42 = vadd.f32 %v3617_v19, %v5201_v0  ;;  %v3620_v25 = vadd.f32 %v3619_v21, %v3618_v44  ;;  %v3684_v29 = vadd.f32 %v3683_v24, %v3682_v23 }
 0x19b   :  { %v5249_v4 = vadd.f32 %v3681_v17, %v2554_v42  ;;  %v2557_v46 = vadd.f32 %v3620_v25, %v5204_v5 }
 0x19d   :  { %v5252_v31 = vadd.f32 %v3684_v29, %v2557_v46  ;;  %v3621_v51 = vpop.f32.mrb[84].mxu1  ;;  %v3685_v33 = vpop.f32.mrb[84].mxu0 }
 0x19e   :  { %v3622_v12 = vpop.f32.mrb[85].mxu1  ;;  %v3686_v54 = vpop.f32.mrb[85].mxu0 }
 0x19f   :  { %v3623_v43 = vadd.f32 %v3622_v12, %v3621_v51  ;;  %v3687_v52 = vadd.f32 %v3686_v54, %v3685_v33  ;;  %v3624_v38 = vpop.f32.mrb[86].mxu1  ;;  %v3688_v47 = vpop.f32.mrb[86].mxu0 }
 0x1a0   :  { %v3625_v37 = vpop.f32.mrb[87].mxu1  ;;  %v3689_v41 = vpop.f32.mrb[87].mxu0 }
 0x1a1   :  { %v2562_v0 = vadd.f32 %v3623_v43, %v5207_v18  ;;  %v3626_v60 = vadd.f32 %v3625_v37, %v3624_v38  ;;  %v3690_v45 = vadd.f32 %v3689_v41, %v3688_v47 }
 0x1a3   :  { %v5255_v48 = vadd.f32 %v3687_v52, %v2562_v0  ;;  %v2565_v5 = vadd.f32 %v3626_v60, %v5210_v22 }
 0x1a5   :  { %v5258_v49 = vadd.f32 %v3690_v45, %v2565_v5  ;;  %v3627_v8 = vpop.f32.mrb[88].mxu1  ;;  %v3691_v50 = vpop.f32.mrb[88].mxu0 }
 0x1a6   :  { %v3628_v20 = vpop.f32.mrb[89].mxu1  ;;  %v3692_v9 = vpop.f32.mrb[89].mxu0 }
 0x1a7   :  { %v3629_v3 = vadd.f32 %v3628_v20, %v3627_v8  ;;  %v3693_v57 = vadd.f32 %v3692_v9, %v3691_v50  ;;  %v3630_v28 = vpop.f32.mrb[90].mxu1  ;;  %v3694_v7 = vpop.f32.mrb[90].mxu0 }
 0x1a8   :  { %v3631_v53 = vpop.f32.mrb[91].mxu1  ;;  %v3695_v62 = vpop.f32.mrb[91].mxu0 }
 0x1a9   :  { %v2570_v18 = vadd.f32 %v3629_v3, %v5213_v39  ;;  %v3632_v63 = vadd.f32 %v3631_v53, %v3630_v28  ;;  %v3696_v61 = vadd.f32 %v3695_v62, %v3694_v7 }
 0x1ab   :  { %v5261_v1 = vadd.f32 %v3693_v57, %v2570_v18  ;;  %v2573_v22 = vadd.f32 %v3632_v63, %v5216_v40 }
 0x1ad   :  { %v5264_v2 = vadd.f32 %v3696_v61, %v2573_v22  ;;  %v3633_v26 = vpop.f32.mrb[92].mxu1  ;;  %v3697_v6 = vpop.f32.mrb[92].mxu0 }
 0x1ae   :  { %v3634_v13 = vpop.f32.mrb[93].mxu1  ;;  %v3698_v27 = vpop.f32.mrb[93].mxu0 }
 0x1af   :  { %v3635_v30 = vadd.f32 %v3634_v13, %v3633_v26  ;;  %v3699_v36 = vadd.f32 %v3698_v27, %v3697_v6  ;;  %v3636_v14 = vpop.f32.mrb[94].mxu1  ;;  %v3700_v32 = vpop.f32.mrb[94].mxu0 }
 0x1b0   :  { %v3637_v19 = vpop.f32.mrb[95].mxu1  ;;  %v3701_v17 = vpop.f32.mrb[95].mxu0 }
 0x1b1   :  { %v2578_v39 = vadd.f32 %v3635_v30, %v5219_v58  ;;  %v3638_v44 = vadd.f32 %v3637_v19, %v3636_v14  ;;  %v3702_v23 = vadd.f32 %v3701_v17, %v3700_v32 }
 0x1b3   :  { %v5267_v21 = vadd.f32 %v3699_v36, %v2578_v39  ;;  %v2581_v40 = vadd.f32 %v3638_v44, %v5222_v59 }
 0x1b5   :  { %v5270_v24 = vadd.f32 %v3702_v23, %v2581_v40  ;;  %v3639_v42 = vpop.f32.mrb[96].mxu1  ;;  %v3703_v25 = vpop.f32.mrb[96].mxu0 }
 0x1b6   :  { %v3640_v29 = vpop.f32.mrb[97].mxu1  ;;  %v3704_v46 = vpop.f32.mrb[97].mxu0 }
 0x1b7   :  { %v3641_v51 = vadd.f32 %v3640_v29, %v3639_v42  ;;  %v3705_v33 = vadd.f32 %v3704_v46, %v3703_v25  ;;  %v3642_v12 = vpop.f32.mrb[98].mxu1  ;;  %v3706_v54 = vpop.f32.mrb[98].mxu0 }
 0x1b8   :  { %v3643_v43 = vpop.f32.mrb[99].mxu1  ;;  %v3707_v52 = vpop.f32.mrb[99].mxu0 }
 0x1b9   :  { %v2586_v58 = vadd.f32 %v3641_v51, %v5225_v15  ;;  %v3644_v38 = vadd.f32 %v3643_v43, %v3642_v12  ;;  %v3708_v47 = vadd.f32 %v3707_v52, %v3706_v54 }
 0x1bb   :  { %v5273_v37 = vadd.f32 %v3705_v33, %v2586_v58  ;;  %v2589_v59 = vadd.f32 %v3644_v38, %v5228_v16 }
 0x1bd   :  { %v5276_v41 = vadd.f32 %v3708_v47, %v2589_v59  ;;  %v3645_v0 = vpop.f32.mrb[100].mxu1  ;;  %v3709_v60 = vpop.f32.mrb[100].mxu0 }
 0x1be   :  { %v3646_v45 = vpop.f32.mrb[101].mxu1  ;;  %v3710_v5 = vpop.f32.mrb[101].mxu0 }
 0x1bf   :  { %v3647_v8 = vadd.f32 %v3646_v45, %v3645_v0  ;;  %v3711_v50 = vadd.f32 %v3710_v5, %v3709_v60  ;;  %v3648_v20 = vpop.f32.mrb[102].mxu1  ;;  %v3712_v9 = vpop.f32.mrb[102].mxu0 }
 0x1c0   :  { %v3649_v3 = vpop.f32.mrb[103].mxu1  ;;  %v3713_v57 = vpop.f32.mrb[103].mxu0 }
 0x1c1   :  { %v2594_v15 = vadd.f32 %v3647_v8, %v5231_v34  ;;  %v3650_v28 = vadd.f32 %v3649_v3, %v3648_v20  ;;  %v3714_v7 = vadd.f32 %v3713_v57, %v3712_v9 }
 0x1c3   :  { %v5279_v53 = vadd.f32 %v3711_v50, %v2594_v15  ;;  %v2597_v16 = vadd.f32 %v3650_v28, %v5234_v35  ;;  %v5306_v15 = vld [vmem:[%s5405_s3] ss:$0 sm:$0xff] }
 0x1c5   :  { %v5282_v62 = vadd.f32 %v3714_v7, %v2597_v16  ;;  %v3651_v18 = vpop.f32.mrb[104].mxu1  ;;  %v3715_v63 = vpop.f32.mrb[104].mxu0 }
 0x1c6   :  { %v3652_v61 = vpop.f32.mrb[105].mxu1  ;;  %v3716_v22 = vpop.f32.mrb[105].mxu0 }
 0x1c7   :  { %v3653_v26 = vadd.f32 %v3652_v61, %v3651_v18  ;;  %v3717_v6 = vadd.f32 %v3716_v22, %v3715_v63  ;;  %v3654_v13 = vpop.f32.mrb[106].mxu1  ;;  %v3718_v27 = vpop.f32.mrb[106].mxu0 }
 0x1c8   :  { %v3655_v30 = vpop.f32.mrb[107].mxu1  ;;  %v3719_v36 = vpop.f32.mrb[107].mxu0 }
 0x1c9   :  { %v2602_v34 = vadd.f32 %v3653_v26, %v5237_v55  ;;  %v3656_v14 = vadd.f32 %v3655_v30, %v3654_v13  ;;  %v3720_v32 = vadd.f32 %v3719_v36, %v3718_v27 }
 0x1cb   :  { %v5285_v19 = vadd.f32 %v3717_v6, %v2602_v34  ;;  %v2605_v35 = vadd.f32 %v3656_v14, %v5240_v56 }
 0x1cd   :  { %v5288_v17 = vadd.f32 %v3720_v32, %v2605_v35  ;;  %v3657_v39 = vpop.f32.mrb[108].mxu1  ;;  %v3721_v44 = vpop.f32.mrb[108].mxu0 }
 0x1ce   :  { %v3658_v23 = vpop.f32.mrb[109].mxu1  ;;  %v3722_v40 = vpop.f32.mrb[109].mxu0 }
 0x1cf   :  { %v3659_v42 = vadd.f32 %v3658_v23, %v3657_v39  ;;  %v3723_v25 = vadd.f32 %v3722_v40, %v3721_v44  ;;  %v3660_v29 = vpop.f32.mrb[110].mxu1  ;;  %v3724_v46 = vpop.f32.mrb[110].mxu0 }
 0x1d0   :  { %v3661_v51 = vpop.f32.mrb[111].mxu1  ;;  %v3725_v33 = vpop.f32.mrb[111].mxu0 }
 0x1d1   :  { %v2610_v55 = vadd.f32 %v3659_v42, %v5243_v10  ;;  %v3662_v12 = vadd.f32 %v3661_v51, %v3660_v29  ;;  %v3726_v54 = vadd.f32 %v3725_v33, %v3724_v46 }
 0x1d3   :  { %v5291_v43 = vadd.f32 %v3723_v25, %v2610_v55  ;;  %v2613_v56 = vadd.f32 %v3662_v12, %v5246_v11  ;;  %v5300_v11 = vld [vmem:[%s5404_s2] ss:$0 sm:$0xff] }
 0x1d5   :  { %v5294_v52 = vadd.f32 %v3726_v54, %v2613_v56  ;;  %v3743_v58 = vpop.f32.mrb[112].mxu1  ;;  %v3807_v38 = vpop.f32.mrb[112].mxu0 }
 0x1d6   :  { %v3744_v47 = vpop.f32.mrb[113].mxu1  ;;  %v3808_v59 = vpop.f32.mrb[113].mxu0 }
 0x1d7   :  { %v3745_v0 = vadd.f32 %v3744_v47, %v3743_v58  ;;  %v3809_v60 = vadd.f32 %v3808_v59, %v3807_v38  ;;  %v3746_v45 = vpop.f32.mrb[114].mxu1  ;;  %v3810_v5 = vpop.f32.mrb[114].mxu0 }
 0x1d8   :  { %v3747_v8 = vpop.f32.mrb[115].mxu1  ;;  %v3811_v50 = vpop.f32.mrb[115].mxu0 }
 0x1d9   :  { %v2748_v10 = vadd.f32 %v3745_v0, %v5249_v4  ;;  %v3748_v20 = vadd.f32 %v3747_v8, %v3746_v45  ;;  %v3812_v9 = vadd.f32 %v3811_v50, %v3810_v5 }
 0x1db   :  { %v2845_v3 = vadd.f32 %v3809_v60, %v2748_v10  ;;  %v2751_v57 = vadd.f32 %v3748_v20, %v5252_v31 }
 0x1dd   :  { %v2914_v28 = vmul.f32 %v5300_v11, %v2845_v3  ;;  %v2848_v7 = vadd.f32 %v3812_v9, %v2751_v57  ;;  %v3749_v16 = vpop.f32.mrb[116].mxu1  ;;  %v3813_v4 = vpop.f32.mrb[116].mxu0 }
 0x1de   :  { %v3750_v18 = vpop.f32.mrb[117].mxu1  ;;  %v3814_v63 = vpop.f32.mrb[117].mxu0 }
 0x1df   :  { %v2937_v61 = vadd.f32 %v5306_v15, %v2914_v28  ;;  %v2915_v22 = vmul.f32 %v5300_v11, %v2848_v7  ;;  %v3751_v26 = vadd.f32 %v3750_v18, %v3749_v16  ;;  %v3815_v6 = vadd.f32 %v3814_v63, %v3813_v4  ;;  %v3752_v13 = vpop.f32.mrb[118].mxu1  ;;  %v3816_v31 = vpop.f32.mrb[118].mxu0 }
 0x1e0   :  { %v3753_v27 = vpop.f32.mrb[119].mxu1  ;;  %v3817_v30 = vpop.f32.mrb[119].mxu0 }
 0x1e1   :  { %v2953_v36 = vmax.f32 %v2937_v61, 0.0  ;;  %v2938_v34 = vadd.f32 %v5306_v15, %v2915_v22  ;;  %v2756_v14 = vadd.f32 %v3751_v26, %v5255_v48  ;;  %v3754_v32 = vadd.f32 %v3753_v27, %v3752_v13 }
 0x1e2   :  { %v3818_v35 = vadd.f32 %v3817_v30, %v3816_v31 }
 0x1e3   :  { %2969 = vst [vmem:[%s5406_s4] sm:$0xff] %v2953_v36  ;;  %v2954_v39 = vmax.f32 %v2938_v34, 0.0  ;;  %v2853_v44 = vadd.f32 %v3815_v6, %v2756_v14  ;;  %v2759_v23 = vadd.f32 %v3754_v32, %v5258_v49 }
 0x1e5   :  { %2970 = vst [vmem:[%s5406_s4 + $0x8] sm:$0xff] %v2954_v39  ;;  %v2916_v40 = vmul.f32 %v5300_v11, %v2853_v44  ;;  %v2856_v42 = vadd.f32 %v3818_v35, %v2759_v23  ;;  %v3755_v25 = vpop.f32.mrb[120].mxu1  ;;  %v3819_v29 = vpop.f32.mrb[120].mxu0 }
 0x1e6   :  { %v3756_v48 = vpop.f32.mrb[121].mxu1  ;;  %v3820_v46 = vpop.f32.mrb[121].mxu0 }
 0x1e7   :  { %v2939_v51 = vadd.f32 %v5306_v15, %v2916_v40  ;;  %v2917_v33 = vmul.f32 %v5300_v11, %v2856_v42  ;;  %v3757_v55 = vadd.f32 %v3756_v48, %v3755_v25  ;;  %v3821_v12 = vadd.f32 %v3820_v46, %v3819_v29  ;;  %v3758_v54 = vpop.f32.mrb[122].mxu1  ;;  %v3822_v56 = vpop.f32.mrb[122].mxu0 }
 0x1e8   :  { %v3759_v49 = vpop.f32.mrb[123].mxu1  ;;  %v3823_v58 = vpop.f32.mrb[123].mxu0 }
 0x1e9   :  { %v2955_v38 = vmax.f32 %v2939_v51, 0.0  ;;  %v2940_v47 = vadd.f32 %v5306_v15, %v2917_v33  ;;  %v2764_v59 = vadd.f32 %v3757_v55, %v5261_v1  ;;  %v3760_v0 = vadd.f32 %v3759_v49, %v3758_v54 }
 0x1ea   :  { %v3824_v60 = vadd.f32 %v3823_v58, %v3822_v56 }
 0x1eb   :  { %2971 = vst [vmem:[%s5406_s4 + $0x10] sm:$0xff] %v2955_v38  ;;  %v2956_v45 = vmax.f32 %v2940_v47, 0.0  ;;  %v2861_v5 = vadd.f32 %v3821_v12, %v2764_v59  ;;  %v2767_v8 = vadd.f32 %v3760_v0, %v5264_v2 }
 0x1ed   :  { %2972 = vst [vmem:[%s5406_s4 + $0x18] sm:$0xff] %v2956_v45  ;;  %v2918_v50 = vmul.f32 %v5300_v11, %v2861_v5  ;;  %v2864_v10 = vadd.f32 %v3824_v60, %v2767_v8  ;;  %v3761_v20 = vpop.f32.mrb[124].mxu1  ;;  %v3825_v9 = vpop.f32.mrb[124].mxu0 }
 0x1ee   :  { %v3762_v1 = vpop.f32.mrb[125].mxu1  ;;  %v3826_v3 = vpop.f32.mrb[125].mxu0 }
 0x1ef   :  { %v2941_v57 = vadd.f32 %v5306_v15, %v2918_v50  ;;  %v2919_v28 = vmul.f32 %v5300_v11, %v2864_v10  ;;  %v3763_v7 = vadd.f32 %v3762_v1, %v3761_v20  ;;  %v3827_v16 = vadd.f32 %v3826_v3, %v3825_v9  ;;  %v3764_v4 = vpop.f32.mrb[126].mxu1  ;;  %v3828_v18 = vpop.f32.mrb[126].mxu0 }
 0x1f0   :  { %v3765_v2 = vpop.f32.mrb[127].mxu1  ;;  %v3829_v63 = vpop.f32.mrb[127].mxu0 }
 0x1f1   :  { %v2957_v61 = vmax.f32 %v2941_v57, 0.0  ;;  %v2942_v22 = vadd.f32 %v5306_v15, %v2919_v28  ;;  %v2772_v26 = vadd.f32 %v3763_v7, %v5267_v21  ;;  %v3766_v6 = vadd.f32 %v3765_v2, %v3764_v4 }
 0x1f2   :  { %v3830_v13 = vadd.f32 %v3829_v63, %v3828_v18 }
 0x1f3   :  { %2973 = vst [vmem:[%s5406_s4 + $0x20] sm:$0xff] %v2957_v61  ;;  %v2958_v31 = vmax.f32 %v2942_v22, 0.0  ;;  %v2869_v27 = vadd.f32 %v3827_v16, %v2772_v26  ;;  %v2775_v30 = vadd.f32 %v3766_v6, %v5270_v24 }
 0x1f5   :  { %2974 = vst [vmem:[%s5406_s4 + $0x28] sm:$0xff] %v2958_v31  ;;  %v2920_v36 = vmul.f32 %v5300_v11, %v2869_v27  ;;  %v2872_v34 = vadd.f32 %v3830_v13, %v2775_v30  ;;  %v3767_v14 = vpop.f32.mrb[128].mxu1  ;;  %v3831_v32 = vpop.f32.mrb[128].mxu0 }
 0x1f6   :  { %v3768_v21 = vpop.f32.mrb[129].mxu1  ;;  %v3832_v35 = vpop.f32.mrb[129].mxu0 }
 0x1f7   :  { %v2943_v39 = vadd.f32 %v5306_v15, %v2920_v36  ;;  %v2921_v44 = vmul.f32 %v5300_v11, %v2872_v34  ;;  %v3769_v23 = vadd.f32 %v3768_v21, %v3767_v14  ;;  %v3833_v40 = vadd.f32 %v3832_v35, %v3831_v32  ;;  %v3770_v42 = vpop.f32.mrb[130].mxu1  ;;  %v3834_v25 = vpop.f32.mrb[130].mxu0 }
 0x1f8   :  { %v3771_v24 = vpop.f32.mrb[131].mxu1  ;;  %v3835_v29 = vpop.f32.mrb[131].mxu0 }
 0x1f9   :  { %v2959_v48 = vmax.f32 %v2943_v39, 0.0  ;;  %v2944_v46 = vadd.f32 %v5306_v15, %v2921_v44  ;;  %v2780_v51 = vadd.f32 %v3769_v23, %v5273_v37  ;;  %v3772_v33 = vadd.f32 %v3771_v24, %v3770_v42 }
 0x1fa   :  { %v3836_v55 = vadd.f32 %v3835_v29, %v3834_v25 }
 0x1fb   :  { %2975 = vst [vmem:[%s5406_s4 + $0x30] sm:$0xff] %v2959_v48  ;;  %v2960_v12 = vmax.f32 %v2944_v46, 0.0  ;;  %v2877_v54 = vadd.f32 %v3833_v40, %v2780_v51  ;;  %v2783_v56 = vadd.f32 %v3772_v33, %v5276_v41 }
 0x1fd   :  { %2976 = vst [vmem:[%s5406_s4 + $0x38] sm:$0xff] %v2960_v12  ;;  %v2922_v49 = vmul.f32 %v5300_v11, %v2877_v54  ;;  %v2880_v58 = vadd.f32 %v3836_v55, %v2783_v56  ;;  %v3773_v38 = vpop.f32.mrb[132].mxu1  ;;  %v3837_v47 = vpop.f32.mrb[132].mxu0 }
 0x1fe   :  { %v3774_v37 = vpop.f32.mrb[133].mxu1  ;;  %v3838_v59 = vpop.f32.mrb[133].mxu0 }
 0x1ff   :  { %v2945_v0 = vadd.f32 %v5306_v15, %v2922_v49  ;;  %v2923_v60 = vmul.f32 %v5300_v11, %v2880_v58  ;;  %v3775_v45 = vadd.f32 %v3774_v37, %v3773_v38  ;;  %v3839_v5 = vadd.f32 %v3838_v59, %v3837_v47  ;;  %v3776_v8 = vpop.f32.mrb[134].mxu1  ;;  %v3840_v50 = vpop.f32.mrb[134].mxu0 }
 0x200   :  { %v3777_v41 = vpop.f32.mrb[135].mxu1  ;;  %v3841_v10 = vpop.f32.mrb[135].mxu0 }
 0x201   :  { %v2961_v20 = vmax.f32 %v2945_v0, 0.0  ;;  %v2946_v9 = vadd.f32 %v5306_v15, %v2923_v60  ;;  %v2788_v1 = vadd.f32 %v3775_v45, %v5279_v53  ;;  %v3778_v3 = vadd.f32 %v3777_v41, %v3776_v8 }
 0x202   :  { %v3842_v57 = vadd.f32 %v3841_v10, %v3840_v50 }
 0x203   :  { %2977 = vst [vmem:[%s5406_s4 + $0x40] sm:$0xff] %v2961_v20  ;;  %v2962_v28 = vmax.f32 %v2946_v9, 0.0  ;;  %v2885_v7 = vadd.f32 %v3839_v5, %v2788_v1  ;;  %v2791_v16 = vadd.f32 %v3778_v3, %v5282_v62 }
 0x205   :  { %2978 = vst [vmem:[%s5406_s4 + $0x48] sm:$0xff] %v2962_v28  ;;  %v2924_v4 = vmul.f32 %v5300_v11, %v2885_v7  ;;  %v2888_v18 = vadd.f32 %v3842_v57, %v2791_v16  ;;  %v3779_v2 = vpop.f32.mrb[136].mxu1  ;;  %v3843_v63 = vpop.f32.mrb[136].mxu0 }
 0x206   :  { %v3780_v53 = vpop.f32.mrb[137].mxu1  ;;  %v3844_v61 = vpop.f32.mrb[137].mxu0 }
 0x207   :  { %v2947_v22 = vadd.f32 %v5306_v15, %v2924_v4  ;;  %v2925_v26 = vmul.f32 %v5300_v11, %v2888_v18  ;;  %v3781_v6 = vadd.f32 %v3780_v53, %v3779_v2  ;;  %v3845_v13 = vadd.f32 %v3844_v61, %v3843_v63  ;;  %v3782_v31 = vpop.f32.mrb[138].mxu1  ;;  %v3846_v27 = vpop.f32.mrb[138].mxu0 }
 0x208   :  { %v3783_v62 = vpop.f32.mrb[139].mxu1  ;;  %v3847_v30 = vpop.f32.mrb[139].mxu0 }
 0x209   :  { %v2963_v36 = vmax.f32 %v2947_v22, 0.0  ;;  %v2948_v34 = vadd.f32 %v5306_v15, %v2925_v26  ;;  %v2796_v14 = vadd.f32 %v3781_v6, %v5285_v19  ;;  %v3784_v32 = vadd.f32 %v3783_v62, %v3782_v31 }
 0x20a   :  { %v3848_v21 = vadd.f32 %v3847_v30, %v3846_v27 }
 0x20b   :  { %2979 = vst [vmem:[%s5406_s4 + $0x50] sm:$0xff] %v2963_v36  ;;  %v2964_v35 = vmax.f32 %v2948_v34, 0.0  ;;  %v2893_v39 = vadd.f32 %v3845_v13, %v2796_v14  ;;  %v2799_v44 = vadd.f32 %v3784_v32, %v5288_v17 }
 0x20d   :  { %2980 = vst [vmem:[%s5406_s4 + $0x58] sm:$0xff] %v2964_v35  ;;  %v2926_v23 = vmul.f32 %v5300_v11, %v2893_v39  ;;  %v2896_v40 = vadd.f32 %v3848_v21, %v2799_v44  ;;  %v3785_v42 = vpop.f32.mrb[140].mxu1  ;;  %v3849_v25 = vpop.f32.mrb[140].mxu0 }
 0x20e   :  { %v3786_v19 = vpop.f32.mrb[141].mxu1  ;;  %v3850_v24 = vpop.f32.mrb[141].mxu0 }
 0x20f   :  { %v2949_v29 = vadd.f32 %v5306_v15, %v2926_v23  ;;  %v2927_v48 = vmul.f32 %v5300_v11, %v2896_v40  ;;  %v3787_v46 = vadd.f32 %v3786_v19, %v3785_v42  ;;  %v3851_v51 = vadd.f32 %v3850_v24, %v3849_v25  ;;  %v3788_v33 = vpop.f32.mrb[142].mxu1  ;;  %v3852_v55 = vpop.f32.mrb[142].mxu0 }
 0x210   :  { %v3789_v17 = vpop.f32.mrb[143].mxu1  ;;  %v3853_v12 = vpop.f32.mrb[143].mxu0 }
 0x211   :  { %v2965_v54 = vmax.f32 %v2949_v29, 0.0  ;;  %v2950_v56 = vadd.f32 %v5306_v15, %v2927_v48  ;;  %v2804_v49 = vadd.f32 %v3787_v46, %v5291_v43  ;;  %v3790_v58 = vadd.f32 %v3789_v17, %v3788_v33 }
 0x212   :  { %v3854_v38 = vadd.f32 %v3853_v12, %v3852_v55 }
 0x213   :  { %2981 = vst [vmem:[%s5406_s4 + $0x60] sm:$0xff] %v2965_v54  ;;  %v2966_v47 = vmax.f32 %v2950_v56, 0.0  ;;  %v2901_v37 = vadd.f32 %v3851_v51, %v2804_v49  ;;  %v2807_v59 = vadd.f32 %v3790_v58, %v5294_v52 }
 0x215   :  { %2982 = vst [vmem:[%s5406_s4 + $0x68] sm:$0xff] %v2966_v47  ;;  %v2928_v0 = vmul.f32 %v5300_v11, %v2901_v37  ;;  %v2904_v60 = vadd.f32 %v3854_v38, %v2807_v59 }
 0x217   :  { %v2951_v45 = vadd.f32 %v5306_v15, %v2928_v0  ;;  %v2929_v43 = vmul.f32 %v5300_v11, %v2904_v60 }
 0x219   :  { %v2967_v5 = vmax.f32 %v2951_v45, 0.0  ;;  %v2952_v8 = vadd.f32 %v5306_v15, %v2929_v43 }
 0x21b   :  { %2983 = vst [vmem:[%s5406_s4 + $0x70] sm:$0xff] %v2967_v5  ;;  %v2968_v50 = vmax.f32 %v2952_v8, 0.0 }
 0x21d   :  { %2984 = vst [vmem:[%s5406_s4 + $0x78] sm:$0xff] %v2968_v50 }

// kernel: _lambda_.9
= control target key start
LH: loop header
LB: loop body
LE: loop exit
PB: predicated region body
PF: predicated region fallthrough
CT: control target
= control target key end

     0   :  { %s3846_s1 = inlined_call_operand.vmem [shape: bf16[1152,256], index: 1, kind: input, shape index: {}]   ;;  %s3847_s0 = inlined_call_operand.vmem [shape: bf16[128,1152], index: 0, kind: input, shape index: {}]   ;;  %s3848_s2 = inlined_call_operand.vmem [shape: f32[1,256], index: 2, kind: input, shape index: {}]   ;;  %s3849_s3 = inlined_call_operand.vmem [shape: f32[1,256], index: 3, kind: input, shape index: {}]   ;;  %s3850_s4 = inlined_call_operand.vmem [shape: f32[128,256], index: 4, kind: output, shape index: {}]  }
   0x1   :  { %v2428_v0 = vld [vmem:[%s3846_s1 + $0x4] ss:$8 sps:$4 sm:$0xff]   ;;  %v2432_v2 = vld [vmem:[%s3846_s1] ss:$8 sps:$4 sm:$0xff]   ;;  %v2434_v4 = vld [vmem:[%s3846_s1 + $0x14] ss:$8 sps:$4 sm:$0xff]  }
   0x2   :  { %v2430_v1 = vld [vmem:[%s3846_s1 + $0x204] ss:$8 sps:$4 sm:$0xff]   ;;  %1330 = vmatprep.subr.bf16.mxu1 %v2428_v0  ;;  %v2433_v3 = vld [vmem:[%s3846_s1 + $0x200] ss:$8 sps:$4 sm:$0xff]   ;;  %v2436_v5 = vld [vmem:[%s3846_s1 + $0x214] ss:$8 sps:$4 sm:$0xff]  }
   0x3   :  { %1556 = vmatprep.subr.bf16.mxu0 %v2430_v1  ;;  %1331 = vmatpush1.bf16.msra.mxu1 %v2432_v2  ;;  %v2438_v6 = vld [vmem:[%s3846_s1 + $0x10] ss:$8 sps:$4 sm:$0xff]   ;;  %v2440_v8 = vld [vmem:[%s3846_s1 + $0x24] ss:$8 sps:$4 sm:$0xff]   ;;  %v2444_v10 = vld [vmem:[%s3846_s1 + $0x20] ss:$8 sps:$4 sm:$0xff]  }
   0x4   :  { %1557 = vmatpush1.bf16.msra.mxu0 %v2433_v3  ;;  %1332 = vmatprep.subr.bf16.mxu1 %v2434_v4  ;;  %v2439_v7 = vld [vmem:[%s3846_s1 + $0x210] ss:$8 sps:$4 sm:$0xff]   ;;  %v2442_v9 = vld [vmem:[%s3846_s1 + $0x224] ss:$8 sps:$4 sm:$0xff]   ;;  %v2445_v11 = vld [vmem:[%s3846_s1 + $0x220] ss:$8 sps:$4 sm:$0xff]  }
   0x5   :  { %1558 = vmatprep.subr.bf16.mxu0 %v2436_v5  ;;  %v2446_v12 = vld [vmem:[%s3846_s1 + $0x34] ss:$8 sps:$4 sm:$0xff]   ;;  %v2450_v14 = vld [vmem:[%s3846_s1 + $0x30] ss:$8 sps:$4 sm:$0xff]   ;;  %v2452_v16 = vld [vmem:[%s3846_s1 + $0x44] ss:$8 sps:$4 sm:$0xff]  }
   0x6   :  { %v2448_v13 = vld [vmem:[%s3846_s1 + $0x234] ss:$8 sps:$4 sm:$0xff]   ;;  %v2451_v15 = vld [vmem:[%s3846_s1 + $0x230] ss:$8 sps:$4 sm:$0xff]   ;;  %v2454_v17 = vld [vmem:[%s3846_s1 + $0x244] ss:$8 sps:$4 sm:$0xff]  }
   0x7   :  { %1333 = vmatpush1.bf16.msra.mxu1 %v2438_v6  ;;  %v2456_v18 = vld [vmem:[%s3846_s1 + $0x40] ss:$8 sps:$4 sm:$0xff]   ;;  %v2458_v20 = vld [vmem:[%s3846_s1 + $0x54] ss:$8 sps:$4 sm:$0xff]   ;;  %v2462_v22 = vld [vmem:[%s3846_s1 + $0x50] ss:$8 sps:$4 sm:$0xff]  }
   0x8   :  { %1559 = vmatpush1.bf16.msra.mxu0 %v2439_v7  ;;  %1334 = vmatprep.subr.bf16.mxu1 %v2440_v8  ;;  %v2457_v19 = vld [vmem:[%s3846_s1 + $0x240] ss:$8 sps:$4 sm:$0xff]   ;;  %v2460_v21 = vld [vmem:[%s3846_s1 + $0x254] ss:$8 sps:$4 sm:$0xff]   ;;  %v2463_v23 = vld [vmem:[%s3846_s1 + $0x250] ss:$8 sps:$4 sm:$0xff]  }
   0x9   :  { %1560 = vmatprep.subr.bf16.mxu0 %v2442_v9  ;;  %v2464_v24 = vld [vmem:[%s3846_s1 + $0x64] ss:$8 sps:$4 sm:$0xff]   ;;  %v2468_v26 = vld [vmem:[%s3846_s1 + $0x60] ss:$8 sps:$4 sm:$0xff]   ;;  %v2470_v28 = vld [vmem:[%s3846_s1 + $0x74] ss:$8 sps:$4 sm:$0xff]  }
   0xa   :  { %v2466_v25 = vld [vmem:[%s3846_s1 + $0x264] ss:$8 sps:$4 sm:$0xff]   ;;  %v2469_v27 = vld [vmem:[%s3846_s1 + $0x260] ss:$8 sps:$4 sm:$0xff]   ;;  %v2472_v29 = vld [vmem:[%s3846_s1 + $0x274] ss:$8 sps:$4 sm:$0xff]  }
   0xb   :  { %1335 = vmatpush1.bf16.msra.mxu1 %v2444_v10  ;;  %v2474_v30 = vld [vmem:[%s3846_s1 + $0x70] ss:$8 sps:$4 sm:$0xff]   ;;  %v2476_v32 = vld [vmem:[%s3846_s1 + $0x84] ss:$8 sps:$4 sm:$0xff]   ;;  %v2480_v34 = vld [vmem:[%s3846_s1 + $0x80] ss:$8 sps:$4 sm:$0xff]  }
   0xc   :  { %1561 = vmatpush1.bf16.msra.mxu0 %v2445_v11  ;;  %1336 = vmatprep.subr.bf16.mxu1 %v2446_v12  ;;  %v2475_v31 = vld [vmem:[%s3846_s1 + $0x270] ss:$8 sps:$4 sm:$0xff]   ;;  %v2478_v33 = vld [vmem:[%s3846_s1 + $0x284] ss:$8 sps:$4 sm:$0xff]   ;;  %v2481_v35 = vld [vmem:[%s3846_s1 + $0x280] ss:$8 sps:$4 sm:$0xff]  }
   0xd   :  { %1562 = vmatprep.subr.bf16.mxu0 %v2448_v13  ;;  %v2482_v36 = vld [vmem:[%s3846_s1 + $0x94] ss:$8 sps:$4 sm:$0xff]   ;;  %v2486_v38 = vld [vmem:[%s3846_s1 + $0x90] ss:$8 sps:$4 sm:$0xff]   ;;  %v2488_v40 = vld [vmem:[%s3846_s1 + $0xa4] ss:$8 sps:$4 sm:$0xff]  }
   0xe   :  { %v2484_v37 = vld [vmem:[%s3846_s1 + $0x294] ss:$8 sps:$4 sm:$0xff]   ;;  %v2487_v39 = vld [vmem:[%s3846_s1 + $0x290] ss:$8 sps:$4 sm:$0xff]   ;;  %v2490_v41 = vld [vmem:[%s3846_s1 + $0x2a4] ss:$8 sps:$4 sm:$0xff]  }
   0xf   :  { %1337 = vmatpush1.bf16.msra.mxu1 %v2450_v14  ;;  %v2492_v42 = vld [vmem:[%s3846_s1 + $0xa0] ss:$8 sps:$4 sm:$0xff]   ;;  %v2494_v44 = vld [vmem:[%s3846_s1 + $0xb4] ss:$8 sps:$4 sm:$0xff]   ;;  %v2498_v46 = vld [vmem:[%s3846_s1 + $0xb0] ss:$8 sps:$4 sm:$0xff]  }
  0x10   :  { %1563 = vmatpush1.bf16.msra.mxu0 %v2451_v15  ;;  %1338 = vmatprep.subr.bf16.mxu1 %v2452_v16  ;;  %v2493_v43 = vld [vmem:[%s3846_s1 + $0x2a0] ss:$8 sps:$4 sm:$0xff]   ;;  %v2496_v45 = vld [vmem:[%s3846_s1 + $0x2b4] ss:$8 sps:$4 sm:$0xff]   ;;  %v2499_v47 = vld [vmem:[%s3846_s1 + $0x2b0] ss:$8 sps:$4 sm:$0xff]  }
  0x11   :  { %1564 = vmatprep.subr.bf16.mxu0 %v2454_v17  ;;  %v2500_v48 = vld [vmem:[%s3846_s1 + $0xc4] ss:$8 sps:$4 sm:$0xff]   ;;  %v2529_v51 = vld [vmem:[%s3847_s0 + $0x14] ss:$36 sps:$4 sm:$0xff]   ;;  %v2504_v52 = vld [vmem:[%s3846_s1 + $0xc0] ss:$8 sps:$4 sm:$0xff]  }
  0x12   :  { %v2526_v49 = vld [vmem:[%s3847_s0 + $0x4] ss:$36 sps:$4 sm:$0xff]   ;;  %1588 = vmatprep.mubr.bf16.mxu0 %v2529_v51  ;;  %v2506_v54 = vld [vmem:[%s3846_s1 + $0xd4] ss:$8 sps:$4 sm:$0xff]   ;;  %v2510_v56 = vld [vmem:[%s3846_s1 + $0xd0] ss:$8 sps:$4 sm:$0xff]  }
  0x13   :  { %1339 = vmatpush1.bf16.msra.mxu1 %v2456_v18  ;;  %v2502_v50 = vld [vmem:[%s3846_s1 + $0x2c4] ss:$8 sps:$4 sm:$0xff]   ;;  %1362 = vmatprep.mubr.bf16.mxu1 %v2526_v49  ;;  %v2505_v53 = vld [vmem:[%s3846_s1 + $0x2c0] ss:$8 sps:$4 sm:$0xff]   ;;  %v2508_v55 = vld [vmem:[%s3846_s1 + $0x2d4] ss:$8 sps:$4 sm:$0xff]  }
  0x14   :  { %1565 = vmatpush1.bf16.msra.mxu0 %v2457_v19  ;;  %1340 = vmatprep.subr.bf16.mxu1 %v2458_v20  ;;  %v2511_v57 = vld [vmem:[%s3846_s1 + $0x2d0] ss:$8 sps:$4 sm:$0xff]   ;;  %v2512_v58 = vld [vmem:[%s3846_s1 + $0xe4] ss:$8 sps:$4 sm:$0xff]   ;;  %v2516_v60 = vld [vmem:[%s3846_s1 + $0xe0] ss:$8 sps:$4 sm:$0xff]  }
  0x15   :  { %1566 = vmatprep.subr.bf16.mxu0 %v2460_v21  ;;  %v2514_v59 = vld [vmem:[%s3846_s1 + $0x2e4] ss:$8 sps:$4 sm:$0xff]   ;;  %v2517_v61 = vld [vmem:[%s3846_s1 + $0x2e0] ss:$8 sps:$4 sm:$0xff]   ;;  %v2518_v62 = vld [vmem:[%s3846_s1 + $0xf4] ss:$8 sps:$4 sm:$0xff]  }
  0x16   :  { %v2520_v63 = vld [vmem:[%s3846_s1 + $0x2f4] ss:$8 sps:$4 sm:$0xff]   ;;  %v2522_v0 = vld [vmem:[%s3846_s1 + $0xf0] ss:$8 sps:$4 sm:$0xff]   ;;  %v2532_v2 = vld [vmem:[%s3846_s1 + $0x104] ss:$8 sps:$4 sm:$0xff]  }
  0x17   :  { %1341 = vmatpush1.bf16.msra.mxu1 %v2462_v22  ;;  %v2523_v1 = vld [vmem:[%s3846_s1 + $0x2f0] ss:$8 sps:$4 sm:$0xff]   ;;  %v2978_v3 = vld [vmem:[%s3846_s1 + $0x304] ss:$8 sps:$4 sm:$0xff]   ;;  %v2530_v6 = vld [vmem:[%s3846_s1 + $0x100] ss:$8 sps:$4 sm:$0xff]  }
  0x18   :  { %1567 = vmatpush1.bf16.msra.mxu0 %v2463_v23  ;;  %1342 = vmatprep.subr.bf16.mxu1 %v2464_v24  ;;  %v2524_v4 = vld [vmem:[%s3847_s0] ss:$36 sps:$4 sm:$0xff]   ;;  %v2527_v5 = vld [vmem:[%s3847_s0 + $0x10] ss:$36 sps:$4 sm:$0xff]   ;;  %v2546_v16 = vld [vmem:[%s3847_s0 + $0x48] ss:$36 sps:$4 sm:$0xff]  }
  0x19   :  { %1568 = vmatprep.subr.bf16.mxu0 %v2466_v25  ;;  %v2992_v7 = vld [vmem:[%s3846_s1 + $0x300] ss:$8 sps:$4 sm:$0xff]   ;;  %v2538_v8 = vld [vmem:[%s3846_s1 + $0x114] ss:$8 sps:$4 sm:$0xff]   ;;  %v2542_v10 = vld [vmem:[%s3847_s0 + $0x4c] ss:$36 sps:$4 sm:$0xff]  }
  0x1a   :  { %v3001_v9 = vld [vmem:[%s3846_s1 + $0x314] ss:$8 sps:$4 sm:$0xff]   ;;  %v2536_v12 = vld [vmem:[%s3846_s1 + $0x110] ss:$8 sps:$4 sm:$0xff]   ;;  %v2549_v14 = vld [vmem:[%s3846_s1 + $0x124] ss:$8 sps:$4 sm:$0xff]  }
  0x1b   :  { %1343 = vmatpush1.bf16.msra.mxu1 %v2468_v26  ;;  %v2544_v11 = vld [vmem:[%s3847_s0 + $0x5c] ss:$36 sps:$4 sm:$0xff]   ;;  %v3016_v13 = vld [vmem:[%s3846_s1 + $0x310] ss:$8 sps:$4 sm:$0xff]   ;;  %v3025_v15 = vld [vmem:[%s3846_s1 + $0x324] ss:$8 sps:$4 sm:$0xff]  }
  0x1c   :  { %1569 = vmatpush1.bf16.msra.mxu0 %v2469_v27  ;;  %1344 = vmatprep.subr.bf16.mxu1 %v2470_v28  ;;  %v2547_v17 = vld [vmem:[%s3846_s1 + $0x120] ss:$8 sps:$4 sm:$0xff]   ;;  %v2550_v18 = vld [vmem:[%s3847_s0 + $0x58] ss:$36 sps:$4 sm:$0xff]   ;;  %v2567_v26 = vld [vmem:[%s3846_s1 + $0x144] ss:$8 sps:$4 sm:$0xff]  }
  0x1d   :  { %1570 = vmatprep.subr.bf16.mxu0 %v2472_v29  ;;  %v3039_v19 = vld [vmem:[%s3846_s1 + $0x320] ss:$8 sps:$4 sm:$0xff]   ;;  %v2556_v20 = vld [vmem:[%s3846_s1 + $0x134] ss:$8 sps:$4 sm:$0xff]   ;;  %v2554_v24 = vld [vmem:[%s3846_s1 + $0x130] ss:$8 sps:$4 sm:$0xff]  }
  0x1e   :  { %v3049_v21 = vld [vmem:[%s3846_s1 + $0x334] ss:$8 sps:$4 sm:$0xff]   ;;  %v2562_v23 = vld [vmem:[%s3847_s0 + $0xa4] ss:$36 sps:$4 sm:$0xff]   ;;  %v3064_v25 = vld [vmem:[%s3846_s1 + $0x330] ss:$8 sps:$4 sm:$0xff]  }
  0x1f   :  { %1345 = vmatpush1.bf16.msra.mxu1 %v2474_v30  ;;  %v2560_v22 = vld [vmem:[%s3847_s0 + $0x94] ss:$36 sps:$4 sm:$0xff]   ;;  %v3073_v27 = vld [vmem:[%s3846_s1 + $0x344] ss:$8 sps:$4 sm:$0xff]   ;;  %v2565_v29 = vld [vmem:[%s3846_s1 + $0x140] ss:$8 sps:$4 sm:$0xff]  }
  0x20   :  { %1571 = vmatpush1.bf16.msra.mxu0 %v2475_v31  ;;  %1346 = vmatprep.subr.bf16.mxu1 %v2476_v32  ;;  %v2564_v28 = vld [vmem:[%s3847_s0 + $0x90] ss:$36 sps:$4 sm:$0xff]   ;;  %v2568_v30 = vld [vmem:[%s3847_s0 + $0xa0] ss:$36 sps:$4 sm:$0xff]  }
  0x21   :  { %1572 = vmatprep.subr.bf16.mxu0 %v2478_v33  ;;  %v3087_v31 = vld [vmem:[%s3846_s1 + $0x340] ss:$8 sps:$4 sm:$0xff]   ;;  %v2574_v32 = vld [vmem:[%s3846_s1 + $0x154] ss:$8 sps:$4 sm:$0xff]   ;;  %v3160_v49 = vld [vmem:[%s3846_s1 + $0x370] ss:$8 sps:$4 sm:$0xff]  }
  0x22   :  { %v3097_v33 = vld [vmem:[%s3846_s1 + $0x354] ss:$8 sps:$4 sm:$0xff]   ;;  %v3169_v51 = vld [vmem:[%s3846_s1 + $0x384] ss:$8 sps:$4 sm:$0xff]  }
  0x23   :  { %1347 = vmatpush1.bf16.msra.mxu1 %v2480_v34  ;;  %v2578_v34 = vld [vmem:[%s3847_s0 + $0xdc] ss:$36 sps:$4 sm:$0xff]  }
  0x24   :  { %1573 = vmatpush1.bf16.msra.mxu0 %v2481_v35  ;;  %1348 = vmatprep.subr.bf16.mxu1 %v2482_v36  ;;  %v2580_v35 = vld [vmem:[%s3847_s0 + $0xec] ss:$36 sps:$4 sm:$0xff]  }
  0x25   :  { %1574 = vmatprep.subr.bf16.mxu0 %v2484_v37  ;;  %v2572_v36 = vld [vmem:[%s3846_s1 + $0x150] ss:$8 sps:$4 sm:$0xff]  }
  0x26   :  { %v3112_v37 = vld [vmem:[%s3846_s1 + $0x350] ss:$8 sps:$4 sm:$0xff]  }
  0x27   :  { %1349 = vmatpush1.bf16.msra.mxu1 %v2486_v38  ;;  %v2585_v38 = vld [vmem:[%s3846_s1 + $0x164] ss:$8 sps:$4 sm:$0xff]  }
  0x28   :  { %1575 = vmatpush1.bf16.msra.mxu0 %v2487_v39  ;;  %1350 = vmatprep.subr.bf16.mxu1 %v2488_v40  ;;  %v3121_v39 = vld [vmem:[%s3846_s1 + $0x364] ss:$8 sps:$4 sm:$0xff]   ;;  %v2582_v40 = vld [vmem:[%s3847_s0 + $0xd8] ss:$36 sps:$4 sm:$0xff]  }
  0x29   :  { %1576 = vmatprep.subr.bf16.mxu0 %v2490_v41  ;;  %v2583_v41 = vld [vmem:[%s3846_s1 + $0x160] ss:$8 sps:$4 sm:$0xff]  }
  0x2b   :  { %1351 = vmatpush1.bf16.msra.mxu1 %v2492_v42  ;;  %v2586_v42 = vld [vmem:[%s3847_s0 + $0xe8] ss:$36 sps:$4 sm:$0xff]  }
  0x2c   :  { %1577 = vmatpush1.bf16.msra.mxu0 %v2493_v43  ;;  %1352 = vmatprep.subr.bf16.mxu1 %v2494_v44  ;;  %v3135_v43 = vld [vmem:[%s3846_s1 + $0x360] ss:$8 sps:$4 sm:$0xff]   ;;  %v2592_v44 = vld [vmem:[%s3846_s1 + $0x174] ss:$8 sps:$4 sm:$0xff]  }
  0x2d   :  { %1578 = vmatprep.subr.bf16.mxu0 %v2496_v45  ;;  %v3145_v45 = vld [vmem:[%s3846_s1 + $0x374] ss:$8 sps:$4 sm:$0xff]  }
  0x2f   :  { %1353 = vmatpush1.bf16.msra.mxu1 %v2498_v46  ;;  %v2596_v46 = vld [vmem:[%s3847_s0 + $0x124] ss:$36 sps:$4 sm:$0xff]  }
  0x30   :  { %1579 = vmatpush1.bf16.msra.mxu0 %v2499_v47  ;;  %1354 = vmatprep.subr.bf16.mxu1 %v2500_v48  ;;  %v2598_v47 = vld [vmem:[%s3847_s0 + $0x134] ss:$36 sps:$4 sm:$0xff]  }
  0x31   :  { %1580 = vmatprep.subr.bf16.mxu0 %v2502_v50  ;;  %v2590_v48 = vld [vmem:[%s3846_s1 + $0x170] ss:$8 sps:$4 sm:$0xff]   ;;  %v2603_v50 = vld [vmem:[%s3846_s1 + $0x184] ss:$8 sps:$4 sm:$0xff]  }
  0x33   :  { %1355 = vmatpush1.bf16.msra.mxu1 %v2504_v52  ;;  %v2600_v52 = vld [vmem:[%s3847_s0 + $0x120] ss:$36 sps:$4 sm:$0xff]  }
  0x34   :  { %1581 = vmatpush1.bf16.msra.mxu0 %v2505_v53  ;;  %1356 = vmatprep.subr.bf16.mxu1 %v2506_v54  ;;  %v2601_v53 = vld [vmem:[%s3846_s1 + $0x180] ss:$8 sps:$4 sm:$0xff]   ;;  %v2604_v54 = vld [vmem:[%s3847_s0 + $0x130] ss:$36 sps:$4 sm:$0xff]  }
  0x35   :  { %1582 = vmatprep.subr.bf16.mxu0 %v2508_v55  ;;  %v3183_v55 = vld [vmem:[%s3846_s1 + $0x380] ss:$8 sps:$4 sm:$0xff]  }
  0x37   :  { %1357 = vmatpush1.bf16.msra.mxu1 %v2510_v56  ;;  %v2610_v56 = vld [vmem:[%s3846_s1 + $0x194] ss:$8 sps:$4 sm:$0xff]  }
  0x38   :  { %1583 = vmatpush1.bf16.msra.mxu0 %v2511_v57  ;;  %1358 = vmatprep.subr.bf16.mxu1 %v2512_v58  ;;  %v3193_v57 = vld [vmem:[%s3846_s1 + $0x394] ss:$8 sps:$4 sm:$0xff]   ;;  %v2614_v58 = vld [vmem:[%s3847_s0 + $0x16c] ss:$36 sps:$4 sm:$0xff]  }
  0x39   :  { %1584 = vmatprep.subr.bf16.mxu0 %v2514_v59  ;;  %v2616_v59 = vld [vmem:[%s3847_s0 + $0x17c] ss:$36 sps:$4 sm:$0xff]  }
  0x3b   :  { %1359 = vmatpush1.bf16.msra.mxu1 %v2516_v60  ;;  %v2608_v60 = vld [vmem:[%s3846_s1 + $0x190] ss:$8 sps:$4 sm:$0xff]  }
  0x3c   :  { %1585 = vmatpush1.bf16.msra.mxu0 %v2517_v61  ;;  %1360 = vmatprep.subr.bf16.mxu1 %v2518_v62  ;;  %v3208_v61 = vld [vmem:[%s3846_s1 + $0x390] ss:$8 sps:$4 sm:$0xff]   ;;  %v2621_v62 = vld [vmem:[%s3846_s1 + $0x1a4] ss:$8 sps:$4 sm:$0xff]  }
  0x3d   :  { %1586 = vmatprep.subr.bf16.mxu0 %v2520_v63  ;;  %v3217_v63 = vld [vmem:[%s3846_s1 + $0x3a4] ss:$8 sps:$4 sm:$0xff]  }
  0x3f   :  { %1361 = vmatpush1.bf16.msra.mxu1 %v2522_v0  ;;  %v2618_v0 = vld [vmem:[%s3847_s0 + $0x168] ss:$36 sps:$4 sm:$0xff]  }
  0x40   :  { %1587 = vmatpush1.bf16.msra.mxu0 %v2523_v1  ;;  %1443 = vmatprep.subr.bf16.mxu1 %v2532_v2  ;;  %v2619_v1 = vld [vmem:[%s3846_s1 + $0x1a0] ss:$8 sps:$4 sm:$0xff]   ;;  %v2622_v2 = vld [vmem:[%s3847_s0 + $0x178] ss:$36 sps:$4 sm:$0xff]  }
  0x41   :  { %1669 = vmatprep.subr.bf16.mxu0 %v2978_v3 }
  0x42   :  { %1363 = vmatmul.mubr.bf16.vlgmr.msra.gmra.mrb[0].mxu1 %v2524_v4  ;;  %v3231_v4 = vld [vmem:[%s3846_s1 + $0x3a0] ss:$8 sps:$4 sm:$0xff]  }
  0x43   :  { %1589 = vmatmul.mubr.bf16.vlgmr.msra.gmra.mrb[0].mxu0 %v2527_v5  ;;  %1444 = vmatpush1.bf16.msra.mxu1 %v2530_v6  ;;  %v2628_v5 = vld [vmem:[%s3846_s1 + $0x1b4] ss:$8 sps:$4 sm:$0xff]  }
  0x44   :  { %1670 = vmatpush1.bf16.msra.mxu0 %v2992_v7  ;;  %1445 = vmatprep.subr.bf16.mxu1 %v2538_v8  ;;  %v3241_v6 = vld [vmem:[%s3846_s1 + $0x3b4] ss:$8 sps:$4 sm:$0xff]  }
  0x45   :  { %1671 = vmatprep.subr.bf16.mxu0 %v3001_v9  ;;  %1372 = vmatprep.mubr.bf16.mxu1 %v2542_v10  ;;  %v2632_v8 = vld [vmem:[%s3847_s0 + $0x1b4] ss:$36 sps:$4 sm:$0xff]   ;;  %v2634_v10 = vld [vmem:[%s3847_s0 + $0x1c4] ss:$36 sps:$4 sm:$0xff]  }
  0x46   :  { %1598 = vmatprep.mubr.bf16.mxu0 %v2544_v11  ;;  %v2626_v11 = vld [vmem:[%s3846_s1 + $0x1b0] ss:$8 sps:$4 sm:$0xff]  }
  0x47   :  { %1446 = vmatpush1.bf16.msra.mxu1 %v2536_v12  ;;  %v3255_v12 = vld [vmem:[%s3846_s1 + $0x3b0] ss:$8 sps:$4 sm:$0xff]  }
  0x48   :  { %1672 = vmatpush1.bf16.msra.mxu0 %v3016_v13  ;;  %1447 = vmatprep.subr.bf16.mxu1 %v2549_v14  ;;  %v2639_v14 = vld [vmem:[%s3846_s1 + $0x1c4] ss:$8 sps:$4 sm:$0xff]  }
  0x49   :  { %1673 = vmatprep.subr.bf16.mxu0 %v3025_v15 }
  0x4a   :  { %1373 = vmatmul.mubr.bf16.gmra.mrb[4].mxu1 %v2546_v16  ;;  %v3265_v16 = vld [vmem:[%s3846_s1 + $0x3c4] ss:$8 sps:$4 sm:$0xff]  }
  0x4b   :  { %1599 = vmatmul.mubr.bf16.gmra.mrb[4].mxu0 %v2550_v18  ;;  %1448 = vmatpush1.bf16.msra.mxu1 %v2547_v17  ;;  %v2636_v17 = vld [vmem:[%s3847_s0 + $0x1b0] ss:$36 sps:$4 sm:$0xff]   ;;  %v2637_v18 = vld [vmem:[%s3846_s1 + $0x1c0] ss:$8 sps:$4 sm:$0xff]  }
  0x4c   :  { %1674 = vmatpush1.bf16.msra.mxu0 %v3039_v19  ;;  %1449 = vmatprep.subr.bf16.mxu1 %v2556_v20  ;;  %v2640_v20 = vld [vmem:[%s3847_s0 + $0x1c0] ss:$36 sps:$4 sm:$0xff]  }
  0x4d   :  { %1675 = vmatprep.subr.bf16.mxu0 %v3049_v21  ;;  %1382 = vmatprep.mubr.bf16.mxu1 %v2560_v22  ;;  %v3279_v22 = vld [vmem:[%s3846_s1 + $0x3c0] ss:$8 sps:$4 sm:$0xff]  }
  0x4e   :  { %1608 = vmatprep.mubr.bf16.mxu0 %v2562_v23  ;;  %v2646_v23 = vld [vmem:[%s3846_s1 + $0x1d4] ss:$8 sps:$4 sm:$0xff]  }
  0x4f   :  { %1450 = vmatpush1.bf16.msra.mxu1 %v2554_v24  ;;  %v3289_v24 = vld [vmem:[%s3846_s1 + $0x3d4] ss:$8 sps:$4 sm:$0xff]  }
  0x50   :  { %1676 = vmatpush1.bf16.msra.mxu0 %v3064_v25  ;;  %1451 = vmatprep.subr.bf16.mxu1 %v2567_v26  ;;  %v2650_v26 = vld [vmem:[%s3847_s0 + $0x1fc] ss:$36 sps:$4 sm:$0xff]  }
  0x51   :  { %1677 = vmatprep.subr.bf16.mxu0 %v3073_v27 }
  0x52   :  { %1383 = vmatmul.mubr.bf16.gmra.mrb[8].mxu1 %v2564_v28  ;;  %v2652_v28 = vld [vmem:[%s3847_s0 + $0x20c] ss:$36 sps:$4 sm:$0xff]  }
  0x53   :  { %1609 = vmatmul.mubr.bf16.gmra.mrb[8].mxu0 %v2568_v30  ;;  %1452 = vmatpush1.bf16.msra.mxu1 %v2565_v29  ;;  %v2644_v29 = vld [vmem:[%s3846_s1 + $0x1d0] ss:$8 sps:$4 sm:$0xff]  }
  0x54   :  { %1678 = vmatpush1.bf16.msra.mxu0 %v3087_v31  ;;  %1453 = vmatprep.subr.bf16.mxu1 %v2574_v32  ;;  %v3303_v30 = vld [vmem:[%s3846_s1 + $0x3d0] ss:$8 sps:$4 sm:$0xff]   ;;  %v2657_v32 = vld [vmem:[%s3846_s1 + $0x1e4] ss:$8 sps:$4 sm:$0xff]  }
  0x55   :  { %1679 = vmatprep.subr.bf16.mxu0 %v3097_v33  ;;  %1392 = vmatprep.mubr.bf16.mxu1 %v2578_v34  ;;  %v3313_v34 = vld [vmem:[%s3846_s1 + $0x3e4] ss:$8 sps:$4 sm:$0xff]  }
  0x56   :  { %1618 = vmatprep.mubr.bf16.mxu0 %v2580_v35  ;;  %v2654_v35 = vld [vmem:[%s3847_s0 + $0x1f8] ss:$36 sps:$4 sm:$0xff]  }
  0x57   :  { %1454 = vmatpush1.bf16.msra.mxu1 %v2572_v36  ;;  %v2655_v36 = vld [vmem:[%s3846_s1 + $0x1e0] ss:$8 sps:$4 sm:$0xff]  }
  0x58   :  { %1680 = vmatpush1.bf16.msra.mxu0 %v3112_v37  ;;  %1455 = vmatprep.subr.bf16.mxu1 %v2585_v38  ;;  %v2658_v38 = vld [vmem:[%s3847_s0 + $0x208] ss:$36 sps:$4 sm:$0xff]  }
  0x59   :  { %1681 = vmatprep.subr.bf16.mxu0 %v3121_v39 }
  0x5a   :  { %1393 = vmatmul.mubr.bf16.gmra.mrb[12].mxu1 %v2582_v40  ;;  %v3327_v40 = vld [vmem:[%s3846_s1 + $0x3e0] ss:$8 sps:$4 sm:$0xff]  }
  0x5b   :  { %1619 = vmatmul.mubr.bf16.gmra.mrb[12].mxu0 %v2586_v42  ;;  %1456 = vmatpush1.bf16.msra.mxu1 %v2583_v41  ;;  %v2664_v41 = vld [vmem:[%s3846_s1 + $0x1f4] ss:$8 sps:$4 sm:$0xff]  }
  0x5c   :  { %1682 = vmatpush1.bf16.msra.mxu0 %v3135_v43  ;;  %1457 = vmatprep.subr.bf16.mxu1 %v2592_v44  ;;  %v3337_v42 = vld [vmem:[%s3846_s1 + $0x3f4] ss:$8 sps:$4 sm:$0xff]   ;;  %v2670_v44 = vld [vmem:[%s3847_s0 + $0xc] ss:$36 sps:$4 sm:$0xff]  }
  0x5d   :  { %1683 = vmatprep.subr.bf16.mxu0 %v3145_v45  ;;  %1402 = vmatprep.mubr.bf16.mxu1 %v2596_v46  ;;  %v2673_v46 = vld [vmem:[%s3847_s0 + $0x1c] ss:$36 sps:$4 sm:$0xff]  }
  0x5e   :  { %1628 = vmatprep.mubr.bf16.mxu0 %v2598_v47  ;;  %v2662_v47 = vld [vmem:[%s3846_s1 + $0x1f0] ss:$8 sps:$4 sm:$0xff]  }
  0x5f   :  { %1458 = vmatpush1.bf16.msra.mxu1 %v2590_v48  ;;  %v3352_v48 = vld [vmem:[%s3846_s1 + $0x3f0] ss:$8 sps:$4 sm:$0xff]  }
  0x60   :  { %1684 = vmatpush1.bf16.msra.mxu0 %v3160_v49  ;;  %1459 = vmatprep.subr.bf16.mxu1 %v2603_v50  ;;  %v2676_v50 = vld [vmem:[%s3846_s1 + $0x404] ss:$8 sps:$4 sm:$0xff]  }
  0x61   :  { %1685 = vmatprep.subr.bf16.mxu0 %v3169_v51 }
  0x62   :  { %1403 = vmatmul.mubr.bf16.gmra.mrb[16].mxu1 %v2600_v52  ;;  %v2668_v52 = vld [vmem:[%s3847_s0 + $0x8] ss:$36 sps:$4 sm:$0xff]  }
  0x63   :  { %1629 = vmatmul.mubr.bf16.gmra.mrb[16].mxu0 %v2604_v54  ;;  %1460 = vmatpush1.bf16.msra.mxu1 %v2601_v53  ;;  %v2671_v53 = vld [vmem:[%s3847_s0 + $0x18] ss:$36 sps:$4 sm:$0xff]   ;;  %v2674_v54 = vld [vmem:[%s3846_s1 + $0x400] ss:$8 sps:$4 sm:$0xff]  }
  0x64   :  { %1686 = vmatpush1.bf16.msra.mxu0 %v3183_v55  ;;  %1461 = vmatprep.subr.bf16.mxu1 %v2610_v56  ;;  %v2679_v56 = vld [vmem:[%s3846_s1 + $0x414] ss:$8 sps:$4 sm:$0xff]  }
  0x65   :  { %1687 = vmatprep.subr.bf16.mxu0 %v3193_v57  ;;  %1412 = vmatprep.mubr.bf16.mxu1 %v2614_v58  ;;  %v2680_v58 = vld [vmem:[%s3847_s0 + $0x54] ss:$36 sps:$4 sm:$0xff]  }
  0x66   :  { %1638 = vmatprep.mubr.bf16.mxu0 %v2616_v59  ;;  %v2682_v59 = vld [vmem:[%s3847_s0 + $0x64] ss:$36 sps:$4 sm:$0xff]  }
  0x67   :  { %1462 = vmatpush1.bf16.msra.mxu1 %v2608_v60  ;;  %v2677_v60 = vld [vmem:[%s3846_s1 + $0x410] ss:$8 sps:$4 sm:$0xff]  }
  0x68   :  { %1688 = vmatpush1.bf16.msra.mxu0 %v3208_v61  ;;  %1463 = vmatprep.subr.bf16.mxu1 %v2621_v62  ;;  %v2684_v62 = vld [vmem:[%s3847_s0 + $0x50] ss:$36 sps:$4 sm:$0xff]  }
  0x69   :  { %1689 = vmatprep.subr.bf16.mxu0 %v3217_v63 }
  0x6a   :  { %1413 = vmatmul.mubr.bf16.gmra.mrb[20].mxu1 %v2618_v0  ;;  %v2691_v0 = vld [vmem:[%s3846_s1 + $0x434] ss:$8 sps:$4 sm:$0xff]  }
  0x6b   :  { %1639 = vmatmul.mubr.bf16.gmra.mrb[20].mxu0 %v2622_v2  ;;  %1464 = vmatpush1.bf16.msra.mxu1 %v2619_v1  ;;  %v2692_v1 = vld [vmem:[%s3847_s0 + $0x9c] ss:$36 sps:$4 sm:$0xff]   ;;  %v2700_v2 = vld [vmem:[%s3846_s1 + $0x444] ss:$8 sps:$4 sm:$0xff]  }
  0x6c   :  { %1690 = vmatpush1.bf16.msra.mxu0 %v3231_v4  ;;  %1465 = vmatprep.subr.bf16.mxu1 %v2628_v5  ;;  %v2696_v5 = vld [vmem:[%s3847_s0 + $0x98] ss:$36 sps:$4 sm:$0xff]  }
  0x6d   :  { %1691 = vmatprep.subr.bf16.mxu0 %v3241_v6  ;;  %1422 = vmatprep.mubr.bf16.mxu1 %v2632_v8  ;;  %v2703_v8 = vld [vmem:[%s3846_s1 + $0x454] ss:$8 sps:$4 sm:$0xff]  }
  0x6e   :  { %1648 = vmatprep.mubr.bf16.mxu0 %v2634_v10  ;;  %v2704_v10 = vld [vmem:[%s3847_s0 + $0xe4] ss:$36 sps:$4 sm:$0xff]  }
  0x6f   :  { %1466 = vmatpush1.bf16.msra.mxu1 %v2626_v11  ;;  %v2712_v11 = vld [vmem:[%s3846_s1 + $0x464] ss:$8 sps:$4 sm:$0xff]  }
  0x70   :  { %1692 = vmatpush1.bf16.msra.mxu0 %v3255_v12  ;;  %1467 = vmatprep.subr.bf16.mxu1 %v2639_v14  ;;  %v2708_v14 = vld [vmem:[%s3847_s0 + $0xe0] ss:$36 sps:$4 sm:$0xff]  }
  0x71   :  { %1693 = vmatprep.subr.bf16.mxu0 %v3265_v16 }
  0x72   :  { %1423 = vmatmul.mubr.bf16.gmra.mrb[24].mxu1 %v2636_v17  ;;  %v2715_v17 = vld [vmem:[%s3846_s1 + $0x474] ss:$8 sps:$4 sm:$0xff]  }
  0x73   :  { %1649 = vmatmul.mubr.bf16.gmra.mrb[24].mxu0 %v2640_v20  ;;  %1468 = vmatpush1.bf16.msra.mxu1 %v2637_v18  ;;  %v2716_v18 = vld [vmem:[%s3847_s0 + $0x12c] ss:$36 sps:$4 sm:$0xff]  }
  0x74   :  { %1694 = vmatpush1.bf16.msra.mxu0 %v3279_v22  ;;  %1469 = vmatprep.subr.bf16.mxu1 %v2646_v23  ;;  %v2718_v20 = vld [vmem:[%s3847_s0 + $0x128] ss:$36 sps:$4 sm:$0xff]  }
  0x75   :  { %1695 = vmatprep.subr.bf16.mxu0 %v3289_v24  ;;  %1432 = vmatprep.mubr.bf16.mxu1 %v2650_v26  ;;  %v2723_v23 = vld [vmem:[%s3847_s0 + $0x68] ss:$36 sps:$4 sm:$0xff]  }
  0x76   :  { %1658 = vmatprep.mubr.bf16.mxu0 %v2652_v28  ;;  %v2739_v26 = vld [vmem:[%s3847_s0 + $0x188] ss:$36 sps:$4 sm:$0xff]  }
  0x77   :  { %1470 = vmatpush1.bf16.msra.mxu1 %v2644_v29  ;;  %v2740_v28 = vld [vmem:[%s3847_s0 + $0x1cc] ss:$36 sps:$4 sm:$0xff]  }
  0x78   :  { %1696 = vmatpush1.bf16.msra.mxu0 %v3303_v30  ;;  %1471 = vmatprep.subr.bf16.mxu1 %v2657_v32  ;;  %v2742_v29 = vld [vmem:[%s3847_s0 + $0x1c8] ss:$36 sps:$4 sm:$0xff]   ;;  %v2744_v32 = vld [vmem:[%s3847_s0 + $0x214] ss:$36 sps:$4 sm:$0xff]  }
  0x79   :  { %1697 = vmatprep.subr.bf16.mxu0 %v3313_v34 }
  0x7a   :  { %1433 = vmatmul.mubr.bf16.gmra.mrb[28].mxu1 %v2654_v35  ;;  %v2747_v35 = vld [vmem:[%s3847_s0 + $0x218] ss:$36 sps:$4 sm:$0xff]  }
  0x7b   :  { %1659 = vmatmul.mubr.bf16.gmra.mrb[28].mxu0 %v2658_v38  ;;  %1472 = vmatpush1.bf16.msra.mxu1 %v2655_v36 }
  0x7c   :  { %1698 = vmatpush1.bf16.msra.mxu0 %v3327_v40  ;;  %1473 = vmatprep.subr.bf16.mxu1 %v2664_v41 }
  0x7d   :  { %1699 = vmatprep.subr.bf16.mxu0 %v3337_v42  ;;  %1475 = vmatprep.mubr.bf16.mxu1 %v2670_v44 }
  0x7e   :  { %1701 = vmatprep.mubr.bf16.mxu0 %v2673_v46 }
  0x7f   :  { %1474 = vmatpush1.bf16.msra.mxu1 %v2662_v47 }
  0x80   :  { %1700 = vmatpush1.bf16.msra.mxu0 %v3352_v48  ;;  %2267 = vmatprep.subr.bf16.mxu1 %v2978_v3  ;;  %v2688_v3 = vld [vmem:[%s3846_s1 + $0x424] ss:$8 sps:$4 sm:$0xff]  }
  0x81   :  { %1782 = vmatprep.subr.bf16.mxu0 %v2676_v50 }
  0x82   :  { %1476 = vmatmul.mubr.bf16.vlgmr.msra.gmra.mrb[0].mxu1 %v2668_v52 }
  0x83   :  { %1702 = vmatmul.mubr.bf16.vlgmr.msra.gmra.mrb[0].mxu0 %v2671_v53  ;;  %2283 = vmatpush1.bf16.msra.mxu1 %v2992_v7  ;;  %v2685_v7 = vld [vmem:[%s3847_s0 + $0x60] ss:$36 sps:$4 sm:$0xff]  }
  0x84   :  { %1783 = vmatpush1.bf16.msra.mxu0 %v2674_v54  ;;  %2268 = vmatprep.subr.bf16.mxu1 %v3001_v9  ;;  %v2686_v9 = vld [vmem:[%s3846_s1 + $0x420] ss:$8 sps:$4 sm:$0xff]  }
  0x85   :  { %1784 = vmatprep.subr.bf16.mxu0 %v2679_v56  ;;  %1485 = vmatprep.mubr.bf16.mxu1 %v2680_v58 }
  0x86   :  { %1711 = vmatprep.mubr.bf16.mxu0 %v2682_v59 }
  0x87   :  { %2284 = vmatpush1.bf16.msra.mxu1 %v3016_v13  ;;  %v2694_v13 = vld [vmem:[%s3847_s0 + $0xac] ss:$36 sps:$4 sm:$0xff]  }
  0x88   :  { %1785 = vmatpush1.bf16.msra.mxu0 %v2677_v60  ;;  %2269 = vmatprep.subr.bf16.mxu1 %v3025_v15  ;;  %v2689_v15 = vld [vmem:[%s3846_s1 + $0x430] ss:$8 sps:$4 sm:$0xff]  }
  0x89   :  { %1786 = vmatprep.subr.bf16.mxu0 %v2688_v3 }
  0x8a   :  { %1486 = vmatmul.mubr.bf16.gmra.mrb[4].mxu1 %v2684_v62 }
  0x8b   :  { %1712 = vmatmul.mubr.bf16.gmra.mrb[4].mxu0 %v2685_v7  ;;  %2285 = vmatpush1.bf16.msra.mxu1 %v3039_v19  ;;  %v2697_v19 = vld [vmem:[%s3847_s0 + $0xa8] ss:$36 sps:$4 sm:$0xff]  }
  0x8c   :  { %1787 = vmatpush1.bf16.msra.mxu0 %v2686_v9  ;;  %2270 = vmatprep.subr.bf16.mxu1 %v3049_v21  ;;  %v2698_v21 = vld [vmem:[%s3846_s1 + $0x440] ss:$8 sps:$4 sm:$0xff]  }
  0x8d   :  { %1788 = vmatprep.subr.bf16.mxu0 %v2691_v0  ;;  %1495 = vmatprep.mubr.bf16.mxu1 %v2692_v1 }
  0x8e   :  { %1721 = vmatprep.mubr.bf16.mxu0 %v2694_v13 }
  0x8f   :  { %2286 = vmatpush1.bf16.msra.mxu1 %v3064_v25  ;;  %v2706_v25 = vld [vmem:[%s3847_s0 + $0xf4] ss:$36 sps:$4 sm:$0xff]  }
  0x90   :  { %1789 = vmatpush1.bf16.msra.mxu0 %v2689_v15  ;;  %2271 = vmatprep.subr.bf16.mxu1 %v3073_v27  ;;  %v2701_v27 = vld [vmem:[%s3846_s1 + $0x450] ss:$8 sps:$4 sm:$0xff]  }
  0x91   :  { %1790 = vmatprep.subr.bf16.mxu0 %v2700_v2 }
  0x92   :  { %1496 = vmatmul.mubr.bf16.gmra.mrb[8].mxu1 %v2696_v5 }
  0x93   :  { %1722 = vmatmul.mubr.bf16.gmra.mrb[8].mxu0 %v2697_v19  ;;  %2287 = vmatpush1.bf16.msra.mxu1 %v3087_v31  ;;  %v2709_v31 = vld [vmem:[%s3847_s0 + $0xf0] ss:$36 sps:$4 sm:$0xff]  }
  0x94   :  { %1791 = vmatpush1.bf16.msra.mxu0 %v2698_v21  ;;  %2272 = vmatprep.subr.bf16.mxu1 %v3097_v33  ;;  %v2710_v33 = vld [vmem:[%s3846_s1 + $0x460] ss:$8 sps:$4 sm:$0xff]   ;;  %v1897_v21 = vlaneseq }
  0x95   :  { %1792 = vmatprep.subr.bf16.mxu0 %v2703_v8  ;;  %1505 = vmatprep.mubr.bf16.mxu1 %v2704_v10 }
  0x96   :  { %1731 = vmatprep.mubr.bf16.mxu0 %v2706_v25  ;;  %v1898_v8 = vshrl.u32 %v1897_v21, 7 }
  0x97   :  { %2288 = vmatpush1.bf16.msra.mxu1 %v3112_v37  ;;  %v2713_v37 = vld [vmem:[%s3846_s1 + $0x470] ss:$8 sps:$4 sm:$0xff]  }
  0x98   :  { %1793 = vmatpush1.bf16.msra.mxu0 %v2701_v27  ;;  %2273 = vmatprep.subr.bf16.mxu1 %v3121_v39  ;;  %v2748_v39 = vmov 0  }
  0x99   :  { %1794 = vmatprep.subr.bf16.mxu0 %v2712_v11 }
  0x9a   :  { %1506 = vmatmul.mubr.bf16.gmra.mrb[12].mxu1 %v2708_v14  ;;  %v1899_v14 = vsub.s32 0, %v1898_v8 }
  0x9b   :  { %1732 = vmatmul.mubr.bf16.gmra.mrb[12].mxu0 %v2709_v31  ;;  %2289 = vmatpush1.bf16.msra.mxu1 %v3135_v43  ;;  %v2719_v43 = vld [vmem:[%s3847_s0 + $0x20] ss:$36 sps:$4 sm:$0xff]  }
  0x9c   :  { %1795 = vmatpush1.bf16.msra.mxu0 %v2710_v33  ;;  %2274 = vmatprep.subr.bf16.mxu1 %v3145_v45  ;;  %v2720_v45 = vld [vmem:[%s3847_s0 + $0x174] ss:$36 sps:$4 sm:$0xff]   ;;  %v1895_v31 = vld [vmem:[%s3848_s2] sm:$0x3]  ;;  %v1903_v33 = vsub.s32 1, %v1898_v8 }
  0x9d   :  { %1796 = vmatprep.subr.bf16.mxu0 %v2715_v17  ;;  %1515 = vmatprep.mubr.bf16.mxu1 %v2716_v18  ;;  %v1939_v17 = vld [vmem:[%s3849_s3] sm:$0x3]  ;;  %v3608_v18 = vrot.slane %v1895_v31, %v1899_v14 }
  0x9e   :  { %1814 = vmatprep.mubr.bf16.mxu0 %v2748_v39 }
  0x9f   :  { %2290 = vmatpush1.bf16.msra.mxu1 %v3160_v49  ;;  %v2722_v49 = vld [vmem:[%s3847_s0 + $0x170] ss:$36 sps:$4 sm:$0xff]  }
  0xa0   :  { %1797 = vmatpush1.bf16.msra.mxu0 %v2713_v37  ;;  %2275 = vmatprep.subr.bf16.mxu1 %v3169_v51  ;;  %v2724_v51 = vld [vmem:[%s3847_s0 + $0x1bc] ss:$36 sps:$4 sm:$0xff]  }
  0xa2   :  { %1516 = vmatmul.mubr.bf16.gmra.mrb[16].mxu1 %v2718_v20  ;;  %v3610_v20 = vrot.slane %v1895_v31, %v1903_v33 }
  0xa3   :  { %1815 = vmatmul.mubr.bf16.vlgmr.msra.gmra.mrb[0].mxu0 %v2719_v43  ;;  %2291 = vmatpush1.bf16.msra.mxu1 %v3183_v55  ;;  %v2726_v55 = vld [vmem:[%s3847_s0 + $0x1b8] ss:$36 sps:$4 sm:$0xff]  }
  0xa4   :  { %1525 = vmatprep.mubr.bf16.mxu1 %v2720_v45  ;;  %2276 = vmatprep.subr.bf16.mxu1 %v3193_v57  ;;  %v2727_v57 = vld [vmem:[%s3847_s0 + $0xb0] ss:$36 sps:$4 sm:$0xff]  }
  0xa5   :  { %1824 = vmatprep.mubr.bf16.mxu0 %v2748_v39 }
  0xa7   :  { %2292 = vmatpush1.bf16.msra.mxu1 %v3208_v61  ;;  %v2728_v61 = vld [vmem:[%s3847_s0 + $0x204] ss:$36 sps:$4 sm:$0xff]  }
  0xa8   :  { %2277 = vmatprep.subr.bf16.mxu1 %v3217_v63  ;;  %v2730_v63 = vld [vmem:[%s3847_s0 + $0x200] ss:$36 sps:$4 sm:$0xff]  }
  0xaa   :  { %1526 = vmatmul.mubr.bf16.gmra.mrb[20].mxu1 %v2722_v49  ;;  %v3614_v49 = vrot.slane %v1939_v17, %v1899_v14 }
  0xab   :  { %1825 = vmatmul.mubr.bf16.gmra.mrb[4].mxu0 %v2723_v23  ;;  %2293 = vmatpush1.bf16.msra.mxu1 %v3231_v4  ;;  %v2731_v4 = vld [vmem:[%s3847_s0 + $0xf8] ss:$36 sps:$4 sm:$0xff]  }
  0xac   :  { %1535 = vmatprep.mubr.bf16.mxu1 %v2724_v51  ;;  %2278 = vmatprep.subr.bf16.mxu1 %v3241_v6  ;;  %v2734_v6 = vld [vmem:[%s3847_s0 + $0x13c] ss:$36 sps:$4 sm:$0xff]  }
  0xad   :  { %1834 = vmatprep.mubr.bf16.mxu0 %v2748_v39 }
  0xaf   :  { %2294 = vmatpush1.bf16.msra.mxu1 %v3255_v12  ;;  %v2732_v12 = vld [vmem:[%s3847_s0 + $0x138] ss:$36 sps:$4 sm:$0xff]  }
  0xb0   :  { %2279 = vmatprep.subr.bf16.mxu1 %v3265_v16  ;;  %v2735_v16 = vld [vmem:[%s3847_s0 + $0x140] ss:$36 sps:$4 sm:$0xff]  }
  0xb2   :  { %1536 = vmatmul.mubr.bf16.gmra.mrb[24].mxu1 %v2726_v55 }
  0xb3   :  { %1835 = vmatmul.mubr.bf16.gmra.mrb[8].mxu0 %v2727_v57  ;;  %2295 = vmatpush1.bf16.msra.mxu1 %v3279_v22  ;;  %v2736_v22 = vld [vmem:[%s3847_s0 + $0x184] ss:$36 sps:$4 sm:$0xff]  }
  0xb4   :  { %1545 = vmatprep.mubr.bf16.mxu1 %v2728_v61  ;;  %2280 = vmatprep.subr.bf16.mxu1 %v3289_v24  ;;  %v2738_v24 = vld [vmem:[%s3847_s0 + $0x180] ss:$36 sps:$4 sm:$0xff]   ;;  %v3618_v61 = vrot.slane %v1939_v17, %v1903_v33 }
  0xb5   :  { %1844 = vmatprep.mubr.bf16.mxu0 %v2748_v39 }
  0xb7   :  { %2296 = vmatpush1.bf16.msra.mxu1 %v3303_v30  ;;  %v2743_v30 = vld [vmem:[%s3847_s0 + $0x1d0] ss:$36 sps:$4 sm:$0xff]  }
  0xb8   :  { %2281 = vmatprep.subr.bf16.mxu1 %v3313_v34  ;;  %v2746_v34 = vld [vmem:[%s3847_s0 + $0x210] ss:$36 sps:$4 sm:$0xff]  }
  0xba   :  { %1546 = vmatmul.mubr.bf16.gmra.mrb[28].mxu1 %v2730_v63 }
  0xbb   :  { %1845 = vmatmul.mubr.bf16.gmra.mrb[12].mxu0 %v2731_v4  ;;  %2297 = vmatpush1.bf16.msra.mxu1 %v3327_v40 }
  0xbc   :  { %1741 = vmatprep.mubr.bf16.mxu1 %v2734_v6  ;;  %2282 = vmatprep.subr.bf16.mxu1 %v3337_v42 }
  0xbd   :  { %1854 = vmatprep.mubr.bf16.mxu0 %v2748_v39 }
  0xbf   :  { %2298 = vmatpush1.bf16.msra.mxu1 %v3352_v48 }
  0xc2   :  { %1742 = vmatmul.mubr.bf16.vlgmr.msra.gmra.mrb[32].mxu1 %v2732_v12 }
  0xc3   :  { %1855 = vmatmul.mubr.bf16.gmra.mrb[32].mxu0 %v2735_v16  ;;  %1751 = vmatprep.mubr.bf16.mxu1 %v2736_v22 }
  0xc4   :  { %1864 = vmatprep.mubr.bf16.mxu0 %v2748_v39 }
  0xca   :  { %1752 = vmatmul.mubr.bf16.gmra.mrb[36].mxu1 %v2738_v24 }
  0xcb   :  { %1865 = vmatmul.mubr.bf16.gmra.mrb[36].mxu0 %v2739_v26  ;;  %1761 = vmatprep.mubr.bf16.mxu1 %v2740_v28 }
  0xcc   :  { %1874 = vmatprep.mubr.bf16.mxu0 %v2748_v39 }
  0xd2   :  { %1762 = vmatmul.mubr.bf16.gmra.mrb[40].mxu1 %v2742_v29 }
  0xd3   :  { %1875 = vmatmul.mubr.bf16.gmra.mrb[40].mxu0 %v2743_v30  ;;  %1771 = vmatprep.mubr.bf16.mxu1 %v2744_v32 }
  0xd4   :  { %1884 = vmatprep.mubr.bf16.mxu0 %v2748_v39 }
  0xda   :  { %1772 = vmatmul.mubr.bf16.gmra.mrb[44].mxu1 %v2746_v34 }
  0xdb   :  { %1885 = vmatmul.mubr.bf16.gmra.mrb[44].mxu0 %v2747_v35 }
 0x136   :  { %v1630_v36 = vpop.f32.mrb[16].mxu0 }
 0x137   :  { %v1632_v38 = vpop.f32.mrb[17].mxu0 }
 0x138   :  { %v1634_v40 = vpop.f32.mrb[18].mxu0 }
 0x139   :  { %v1636_v41 = vpop.f32.mrb[19].mxu0 }
 0x13e   :  { %v3558_v42 = vpop.f32.mrb[20].mxu0 }
 0x13f   :  { %v3560_v44 = vpop.f32.mrb[21].mxu0 }
 0x140   :  { %v3562_v46 = vpop.f32.mrb[22].mxu0 }
 0x141   :  { %v3564_v47 = vpop.f32.mrb[23].mxu0 }
 0x146   :  { %v3566_v48 = vpop.f32.mrb[24].mxu0 }
 0x147   :  { %v3568_v50 = vpop.f32.mrb[25].mxu0 }
 0x148   :  { %v3570_v52 = vpop.f32.mrb[26].mxu0 }
 0x149   :  { %v3572_v53 = vpop.f32.mrb[27].mxu0 }
 0x14e   :  { %v3574_v54 = vpop.f32.mrb[28].mxu0 }
 0x14f   :  { %v3576_v56 = vpop.f32.mrb[29].mxu0 }
 0x150   :  { %v3578_v58 = vpop.f32.mrb[30].mxu0 }
 0x151   :  { %v3580_v59 = vpop.f32.mrb[31].mxu0 }
 0x155   :  { %v1477_v60 = vpop.f32.mrb[0].mxu1 }
 0x156   :  { %v1479_v3 = vpop.f32.mrb[1].mxu1 }
 0x157   :  { %v1481_v62 = vpop.f32.mrb[2].mxu1 }
 0x158   :  { %v1483_v7 = vpop.f32.mrb[3].mxu1 }
 0x15d   :  { %v1487_v9 = vpop.f32.mrb[4].mxu1 }
 0x15e   :  { %v1489_v0 = vpop.f32.mrb[5].mxu1 }
 0x15f   :  { %v3582_v1 = vpop.f32.mrb[6].mxu1 }
 0x160   :  { %v3584_v13 = vpop.f32.mrb[7].mxu1 }
 0x165   :  { %v3586_v15 = vpop.f32.mrb[8].mxu1 }
 0x166   :  { %v3588_v2 = vpop.f32.mrb[9].mxu1 }
 0x167   :  { %v3590_v5 = vpop.f32.mrb[10].mxu1 }
 0x168   :  { %v3592_v19 = vpop.f32.mrb[11].mxu1 }
 0x16d   :  { %v3594_v10 = vpop.f32.mrb[12].mxu1 }
 0x16e   :  { %v3596_v25 = vpop.f32.mrb[13].mxu1 }
 0x16f   :  { %v3598_v27 = vpop.f32.mrb[14].mxu1 }
 0x170   :  { %v3600_v11 = vpop.f32.mrb[15].mxu1 }
 0x175   :  { %v1517_v37 = vpop.f32.mrb[16].mxu1 }
 0x176   :  { %v1816_v39 = vpop.f32.mrb[0].mxu0  ;;  %v3612_v43 = vadd.f32 %v1630_v36, %v1517_v37  ;;  %v1519_v23 = vpop.f32.mrb[17].mxu1 }
 0x177   :  { %v2299_v45 = vadd.f32 %v1816_v39, %v1477_v60  ;;  %v1818_v51 = vpop.f32.mrb[1].mxu0  ;;  %v3616_v55 = vadd.f32 %v1632_v38, %v1519_v23  ;;  %v1521_v63 = vpop.f32.mrb[18].mxu1 }
 0x178   :  { %v2300_v57 = vadd.f32 %v1818_v51, %v1479_v3  ;;  %v1820_v4 = vpop.f32.mrb[2].mxu0  ;;  %v3621_v12 = vadd.f32 %v1634_v40, %v1521_v63  ;;  %v1523_v22 = vpop.f32.mrb[19].mxu1 }
 0x179   :  { %v1907_v6 = vmul.f32 %v2299_v45, %v3608_v18  ;;  %v2301_v16 = vadd.f32 %v1820_v4, %v1481_v62  ;;  %v1822_v24 = vpop.f32.mrb[3].mxu0  ;;  %v3624_v28 = vadd.f32 %v1636_v41, %v1523_v22 }
 0x17a   :  { %v1908_v26 = vmul.f32 %v2300_v57, %v3610_v20  ;;  %v2302_v29 = vadd.f32 %v1822_v24, %v1483_v7 }
 0x17b   :  { %v1951_v30 = vadd.f32 %v3614_v49, %v1907_v6  ;;  %v1909_v32 = vmul.f32 %v2301_v16, %v3608_v18 }
 0x17c   :  { %v1952_v34 = vadd.f32 %v3618_v61, %v1908_v26  ;;  %v1910_v35 = vmul.f32 %v2302_v29, %v3610_v20 }
 0x17d   :  { %v1983_v36 = vmax.f32 %v1951_v30, 0.0  ;;  %v1953_v38 = vadd.f32 %v3614_v49, %v1909_v32  ;;  %v1527_v3 = vpop.f32.mrb[20].mxu1 }
 0x17e   :  { %v1984_v40 = vmax.f32 %v1952_v34, 0.0  ;;  %v1954_v60 = vadd.f32 %v3618_v61, %v1910_v35  ;;  %v1826_v62 = vpop.f32.mrb[4].mxu0  ;;  %v3636_v7 = vadd.f32 %v3558_v42, %v1527_v3  ;;  %v1529_v8 = vpop.f32.mrb[21].mxu1 }
 0x17f   :  { %2015 = vst [vmem:[%s3850_s4] sm:$0xff] %v1983_v36  ;;  %v1985_v41 = vmax.f32 %v1953_v38, 0.0  ;;  %v2303_v21 = vadd.f32 %v1826_v62, %v1487_v9  ;;  %v1828_v14 = vpop.f32.mrb[5].mxu0  ;;  %v3642_v33 = vadd.f32 %v3560_v44, %v1529_v8  ;;  %v1531_v37 = vpop.f32.mrb[22].mxu1 }
 0x180   :  { %2016 = vst [vmem:[%s3850_s4 + $0x8] sm:$0xff] %v1984_v40  ;;  %v1986_v31 = vmax.f32 %v1954_v60, 0.0  ;;  %v2304_v17 = vadd.f32 %v1828_v14, %v1489_v0  ;;  %v1830_v39 = vpop.f32.mrb[6].mxu0  ;;  %v3649_v9 = vadd.f32 %v3562_v46, %v1531_v37  ;;  %v1533_v23 = vpop.f32.mrb[23].mxu1 }
 0x181   :  { %2017 = vst [vmem:[%s3850_s4 + $0x10] sm:$0xff] %v1985_v41  ;;  %v1911_v42 = vmul.f32 %v2303_v21, %v3608_v18  ;;  %v2305_v45 = vadd.f32 %v1830_v39, %v3582_v1  ;;  %v1832_v51 = vpop.f32.mrb[7].mxu0  ;;  %v3657_v0 = vadd.f32 %v3564_v47, %v1533_v23 }
 0x182   :  { %2018 = vst [vmem:[%s3850_s4 + $0x18] sm:$0xff] %v1986_v31  ;;  %v1912_v44 = vmul.f32 %v2304_v17, %v3610_v20  ;;  %v2306_v57 = vadd.f32 %v1832_v51, %v3584_v13 }
 0x183   :  { %v1955_v63 = vadd.f32 %v3614_v49, %v1911_v42  ;;  %v1913_v46 = vmul.f32 %v2305_v45, %v3608_v18 }
 0x184   :  { %v1956_v4 = vadd.f32 %v3618_v61, %v1912_v44  ;;  %v1914_v1 = vmul.f32 %v2306_v57, %v3610_v20 }
 0x185   :  { %v1987_v6 = vmax.f32 %v1955_v63, 0.0  ;;  %v1957_v16 = vadd.f32 %v3614_v49, %v1913_v46  ;;  %v1537_v26 = vpop.f32.mrb[24].mxu1 }
 0x186   :  { %v1988_v22 = vmax.f32 %v1956_v4, 0.0  ;;  %v1958_v24 = vadd.f32 %v3618_v61, %v1914_v1  ;;  %v1836_v29 = vpop.f32.mrb[8].mxu0  ;;  %v3670_v13 = vadd.f32 %v3566_v48, %v1537_v26  ;;  %v1539_v32 = vpop.f32.mrb[25].mxu1 }
 0x187   :  { %2019 = vst [vmem:[%s3850_s4 + $0x20] sm:$0xff] %v1987_v6  ;;  %v1989_v47 = vmax.f32 %v1957_v16, 0.0  ;;  %v2307_v30 = vadd.f32 %v1836_v29, %v3586_v15  ;;  %v1838_v34 = vpop.f32.mrb[9].mxu0  ;;  %v3677_v36 = vadd.f32 %v3568_v50, %v1539_v32  ;;  %v1541_v40 = vpop.f32.mrb[26].mxu1 }
 0x188   :  { %2020 = vst [vmem:[%s3850_s4 + $0x28] sm:$0xff] %v1988_v22  ;;  %v1990_v35 = vmax.f32 %v1958_v24, 0.0  ;;  %v2308_v38 = vadd.f32 %v1838_v34, %v3588_v2  ;;  %v1840_v60 = vpop.f32.mrb[10].mxu0  ;;  %v3685_v15 = vadd.f32 %v3570_v52, %v1541_v40  ;;  %v1543_v62 = vpop.f32.mrb[27].mxu1 }
 0x189   :  { %2021 = vst [vmem:[%s3850_s4 + $0x30] sm:$0xff] %v1989_v47  ;;  %v1915_v48 = vmul.f32 %v2307_v30, %v3608_v18  ;;  %v2309_v3 = vadd.f32 %v1840_v60, %v3590_v5  ;;  %v1842_v41 = vpop.f32.mrb[11].mxu0  ;;  %v3693_v2 = vadd.f32 %v3572_v53, %v1543_v62 }
 0x18a   :  { %2022 = vst [vmem:[%s3850_s4 + $0x38] sm:$0xff] %v1990_v35  ;;  %v1916_v50 = vmul.f32 %v2308_v38, %v3610_v20  ;;  %v2310_v21 = vadd.f32 %v1842_v41, %v3592_v19 }
 0x18b   :  { %v1959_v8 = vadd.f32 %v3614_v49, %v1915_v48  ;;  %v1917_v52 = vmul.f32 %v2309_v3, %v3608_v18 }
 0x18c   :  { %v1960_v14 = vadd.f32 %v3618_v61, %v1916_v50  ;;  %v1918_v5 = vmul.f32 %v2310_v21, %v3610_v20 }
 0x18d   :  { %v1991_v31 = vmax.f32 %v1959_v8, 0.0  ;;  %v1961_v17 = vadd.f32 %v3614_v49, %v1917_v52  ;;  %v1547_v42 = vpop.f32.mrb[28].mxu1 }
 0x18e   :  { %v1992_v37 = vmax.f32 %v1960_v14, 0.0  ;;  %v1962_v39 = vadd.f32 %v3618_v61, %v1918_v5  ;;  %v1846_v45 = vpop.f32.mrb[12].mxu0  ;;  %v3706_v19 = vadd.f32 %v3574_v54, %v1547_v42  ;;  %v1549_v51 = vpop.f32.mrb[29].mxu1 }
 0x18f   :  { %2023 = vst [vmem:[%s3850_s4 + $0x40] sm:$0xff] %v1991_v31  ;;  %v1993_v53 = vmax.f32 %v1961_v17, 0.0  ;;  %v2311_v23 = vadd.f32 %v1846_v45, %v3594_v10  ;;  %v1848_v44 = vpop.f32.mrb[13].mxu0  ;;  %v3713_v63 = vadd.f32 %v3576_v56, %v1549_v51  ;;  %v1551_v4 = vpop.f32.mrb[30].mxu1 }
 0x190   :  { %2024 = vst [vmem:[%s3850_s4 + $0x48] sm:$0xff] %v1992_v37  ;;  %v1994_v57 = vmax.f32 %v1962_v39, 0.0  ;;  %v2312_v46 = vadd.f32 %v1848_v44, %v3596_v25  ;;  %v1850_v1 = vpop.f32.mrb[14].mxu0  ;;  %v3721_v10 = vadd.f32 %v3578_v58, %v1551_v4  ;;  %v1553_v16 = vpop.f32.mrb[31].mxu1 }
 0x191   :  { %2025 = vst [vmem:[%s3850_s4 + $0x50] sm:$0xff] %v1993_v53  ;;  %v1919_v54 = vmul.f32 %v2311_v23, %v3608_v18  ;;  %v2313_v6 = vadd.f32 %v1850_v1, %v3598_v27  ;;  %v1852_v22 = vpop.f32.mrb[15].mxu0  ;;  %v3729_v25 = vadd.f32 %v3580_v59, %v1553_v16 }
 0x192   :  { %2026 = vst [vmem:[%s3850_s4 + $0x58] sm:$0xff] %v1994_v57  ;;  %v1920_v56 = vmul.f32 %v2312_v46, %v3610_v20  ;;  %v2314_v24 = vadd.f32 %v1852_v22, %v3600_v11 }
 0x193   :  { %v1963_v26 = vadd.f32 %v3614_v49, %v1919_v54  ;;  %v1921_v58 = vmul.f32 %v2313_v6, %v3608_v18 }
 0x194   :  { %v1964_v29 = vadd.f32 %v3618_v61, %v1920_v56  ;;  %v1922_v27 = vmul.f32 %v2314_v24, %v3610_v20 }
 0x195   :  { %v1995_v47 = vmax.f32 %v1963_v26, 0.0  ;;  %v1965_v30 = vadd.f32 %v3614_v49, %v1921_v58  ;;  %v1743_v35 = vpop.f32.mrb[32].mxu1 }
 0x196   :  { %v1996_v32 = vmax.f32 %v1964_v29, 0.0  ;;  %v1966_v34 = vadd.f32 %v3618_v61, %v1922_v27  ;;  %v1856_v38 = vpop.f32.mrb[32].mxu0  ;;  %v2316_v11 = vadd.f32 %v3612_v43, %v1743_v35  ;;  %v1745_v40 = vpop.f32.mrb[33].mxu1 }
 0x197   :  { %2027 = vst [vmem:[%s3850_s4 + $0x60] sm:$0xff] %v1995_v47  ;;  %v1997_v59 = vmax.f32 %v1965_v30, 0.0  ;;  %v1858_v60 = vpop.f32.mrb[33].mxu0  ;;  %v2319_v3 = vadd.f32 %v3616_v55, %v1745_v40  ;;  %v1747_v62 = vpop.f32.mrb[34].mxu1 }
 0x198   :  { %2028 = vst [vmem:[%s3850_s4 + $0x68] sm:$0xff] %v1996_v32  ;;  %v1998_v48 = vmax.f32 %v1966_v34, 0.0  ;;  %v1860_v41 = vpop.f32.mrb[34].mxu0  ;;  %v2317_v50 = vadd.f32 %v2316_v11, %v1856_v38  ;;  %v2322_v21 = vadd.f32 %v3621_v12, %v1747_v62  ;;  %v1749_v8 = vpop.f32.mrb[35].mxu1 }
 0x199   :  { %2029 = vst [vmem:[%s3850_s4 + $0x70] sm:$0xff] %v1997_v59  ;;  %v1862_v43 = vpop.f32.mrb[35].mxu0  ;;  %v2320_v52 = vadd.f32 %v2319_v3, %v1858_v60  ;;  %v2325_v14 = vadd.f32 %v3624_v28, %v1749_v8 }
 0x19a   :  { %2030 = vst [vmem:[%s3850_s4 + $0x78] sm:$0xff] %v1998_v48  ;;  %v1923_v55 = vmul.f32 %v2317_v50, %v3608_v18  ;;  %v2323_v5 = vadd.f32 %v2322_v21, %v1860_v41 }
 0x19b   :  { %v1924_v31 = vmul.f32 %v2320_v52, %v3610_v20  ;;  %v2326_v17 = vadd.f32 %v2325_v14, %v1862_v43 }
 0x19c   :  { %v1967_v37 = vadd.f32 %v3614_v49, %v1923_v55  ;;  %v1925_v39 = vmul.f32 %v2323_v5, %v3608_v18 }
 0x19d   :  { %v1968_v12 = vadd.f32 %v3618_v61, %v1924_v31  ;;  %v1926_v42 = vmul.f32 %v2326_v17, %v3610_v20  ;;  %v1753_v45 = vpop.f32.mrb[36].mxu1 }
 0x19e   :  { %v1866_v53 = vpop.f32.mrb[36].mxu0  ;;  %v1999_v23 = vmax.f32 %v1967_v37, 0.0  ;;  %v1969_v51 = vadd.f32 %v3614_v49, %v1925_v39  ;;  %v2328_v28 = vadd.f32 %v3636_v7, %v1753_v45  ;;  %v1755_v44 = vpop.f32.mrb[37].mxu1 }
 0x19f   :  { %v1868_v57 = vpop.f32.mrb[37].mxu0  ;;  %v2000_v46 = vmax.f32 %v1968_v12, 0.0  ;;  %v1970_v4 = vadd.f32 %v3618_v61, %v1926_v42  ;;  %v2331_v1 = vadd.f32 %v3642_v33, %v1755_v44  ;;  %v1757_v54 = vpop.f32.mrb[38].mxu1 }
 0x1a0   :  { %v1870_v6 = vpop.f32.mrb[38].mxu0  ;;  %2031 = vst [vmem:[%s3850_s4 + $0x80] sm:$0xff] %v1999_v23  ;;  %v2001_v16 = vmax.f32 %v1969_v51, 0.0  ;;  %v2329_v22 = vadd.f32 %v2328_v28, %v1866_v53  ;;  %v2334_v56 = vadd.f32 %v3649_v9, %v1757_v54  ;;  %v1759_v24 = vpop.f32.mrb[39].mxu1 }
 0x1a1   :  { %v1872_v26 = vpop.f32.mrb[39].mxu0  ;;  %2032 = vst [vmem:[%s3850_s4 + $0x88] sm:$0xff] %v2000_v46  ;;  %v2002_v7 = vmax.f32 %v1970_v4, 0.0  ;;  %v2332_v58 = vadd.f32 %v2331_v1, %v1868_v57  ;;  %v2337_v33 = vadd.f32 %v3657_v0, %v1759_v24 }
 0x1a2   :  { %2033 = vst [vmem:[%s3850_s4 + $0x90] sm:$0xff] %v2001_v16  ;;  %v1927_v29 = vmul.f32 %v2329_v22, %v3608_v18  ;;  %v2335_v27 = vadd.f32 %v2334_v56, %v1870_v6 }
 0x1a3   :  { %2034 = vst [vmem:[%s3850_s4 + $0x98] sm:$0xff] %v2002_v7  ;;  %v1928_v9 = vmul.f32 %v2332_v58, %v3610_v20  ;;  %v2338_v47 = vadd.f32 %v2337_v33, %v1872_v26 }
 0x1a4   :  { %v1971_v30 = vadd.f32 %v3614_v49, %v1927_v29  ;;  %v1929_v32 = vmul.f32 %v2335_v27, %v3608_v18 }
 0x1a5   :  { %v1972_v0 = vadd.f32 %v3618_v61, %v1928_v9  ;;  %v1930_v34 = vmul.f32 %v2338_v47, %v3610_v20  ;;  %v1763_v35 = vpop.f32.mrb[40].mxu1 }
 0x1a6   :  { %v1876_v38 = vpop.f32.mrb[40].mxu0  ;;  %v2003_v59 = vmax.f32 %v1971_v30, 0.0  ;;  %v1973_v11 = vadd.f32 %v3614_v49, %v1929_v32  ;;  %v2340_v40 = vadd.f32 %v3670_v13, %v1763_v35  ;;  %v1765_v60 = vpop.f32.mrb[41].mxu1 }
 0x1a7   :  { %v1878_v48 = vpop.f32.mrb[41].mxu0  ;;  %v2004_v3 = vmax.f32 %v1972_v0, 0.0  ;;  %v1974_v62 = vadd.f32 %v3618_v61, %v1930_v34  ;;  %v2343_v41 = vadd.f32 %v3677_v36, %v1765_v60  ;;  %v1767_v50 = vpop.f32.mrb[42].mxu1 }
 0x1a8   :  { %v1880_v21 = vpop.f32.mrb[42].mxu0  ;;  %2035 = vst [vmem:[%s3850_s4 + $0xa0] sm:$0xff] %v2003_v59  ;;  %v2005_v8 = vmax.f32 %v1973_v11, 0.0  ;;  %v2341_v43 = vadd.f32 %v2340_v40, %v1876_v38  ;;  %v2346_v52 = vadd.f32 %v3685_v15, %v1767_v50  ;;  %v1769_v14 = vpop.f32.mrb[43].mxu1 }
 0x1a9   :  { %v1882_v55 = vpop.f32.mrb[43].mxu0  ;;  %2036 = vst [vmem:[%s3850_s4 + $0xa8] sm:$0xff] %v2004_v3  ;;  %v2006_v13 = vmax.f32 %v1974_v62, 0.0  ;;  %v2344_v5 = vadd.f32 %v2343_v41, %v1878_v48  ;;  %v2349_v36 = vadd.f32 %v3693_v2, %v1769_v14 }
 0x1aa   :  { %2037 = vst [vmem:[%s3850_s4 + $0xb0] sm:$0xff] %v2005_v8  ;;  %v1931_v31 = vmul.f32 %v2341_v43, %v3608_v18  ;;  %v2347_v17 = vadd.f32 %v2346_v52, %v1880_v21 }
 0x1ab   :  { %2038 = vst [vmem:[%s3850_s4 + $0xb8] sm:$0xff] %v2006_v13  ;;  %v1932_v15 = vmul.f32 %v2344_v5, %v3610_v20  ;;  %v2350_v37 = vadd.f32 %v2349_v36, %v1882_v55 }
 0x1ac   :  { %v1975_v39 = vadd.f32 %v3614_v49, %v1931_v31  ;;  %v1933_v12 = vmul.f32 %v2347_v17, %v3608_v18 }
 0x1ad   :  { %v1976_v2 = vadd.f32 %v3618_v61, %v1932_v15  ;;  %v1934_v42 = vmul.f32 %v2350_v37, %v3610_v20  ;;  %v1773_v45 = vpop.f32.mrb[44].mxu1 }
 0x1ae   :  { %v1886_v53 = vpop.f32.mrb[44].mxu0  ;;  %v2007_v23 = vmax.f32 %v1975_v39, 0.0  ;;  %v1977_v51 = vadd.f32 %v3614_v49, %v1933_v12  ;;  %v2352_v28 = vadd.f32 %v3706_v19, %v1773_v45  ;;  %v1775_v44 = vpop.f32.mrb[45].mxu1 }
 0x1af   :  { %v1888_v57 = vpop.f32.mrb[45].mxu0  ;;  %v2008_v46 = vmax.f32 %v1976_v2, 0.0  ;;  %v1978_v4 = vadd.f32 %v3618_v61, %v1934_v42  ;;  %v2355_v1 = vadd.f32 %v3713_v63, %v1775_v44  ;;  %v1777_v54 = vpop.f32.mrb[46].mxu1 }
 0x1b0   :  { %v1890_v6 = vpop.f32.mrb[46].mxu0  ;;  %2039 = vst [vmem:[%s3850_s4 + $0xc0] sm:$0xff] %v2007_v23  ;;  %v2009_v16 = vmax.f32 %v1977_v51, 0.0  ;;  %v2353_v22 = vadd.f32 %v2352_v28, %v1886_v53  ;;  %v2358_v56 = vadd.f32 %v3721_v10, %v1777_v54  ;;  %v1779_v24 = vpop.f32.mrb[47].mxu1 }
 0x1b1   :  { %v1892_v26 = vpop.f32.mrb[47].mxu0  ;;  %2040 = vst [vmem:[%s3850_s4 + $0xc8] sm:$0xff] %v2008_v46  ;;  %v2010_v19 = vmax.f32 %v1978_v4, 0.0  ;;  %v2356_v7 = vadd.f32 %v2355_v1, %v1888_v57  ;;  %v2361_v63 = vadd.f32 %v3729_v25, %v1779_v24 }
 0x1b2   :  { %2041 = vst [vmem:[%s3850_s4 + $0xd0] sm:$0xff] %v2009_v16  ;;  %v1935_v58 = vmul.f32 %v2353_v22, %v3608_v18  ;;  %v2359_v33 = vadd.f32 %v2358_v56, %v1890_v6 }
 0x1b3   :  { %2042 = vst [vmem:[%s3850_s4 + $0xd8] sm:$0xff] %v2010_v19  ;;  %v1936_v10 = vmul.f32 %v2356_v7, %v3610_v20  ;;  %v2362_v29 = vadd.f32 %v2361_v63, %v1892_v26 }
 0x1b4   :  { %v1979_v27 = vadd.f32 %v3614_v49, %v1935_v58  ;;  %v1937_v9 = vmul.f32 %v2359_v33, %v3608_v18 }
 0x1b5   :  { %v1980_v25 = vadd.f32 %v3618_v61, %v1936_v10  ;;  %v1938_v47 = vmul.f32 %v2362_v29, %v3610_v20 }
 0x1b6   :  { %v2011_v30 = vmax.f32 %v1979_v27, 0.0  ;;  %v1981_v32 = vadd.f32 %v3614_v49, %v1937_v9 }
 0x1b7   :  { %v2012_v0 = vmax.f32 %v1980_v25, 0.0  ;;  %v1982_v34 = vadd.f32 %v3618_v61, %v1938_v47 }
 0x1b8   :  { %2043 = vst [vmem:[%s3850_s4 + $0xe0] sm:$0xff] %v2011_v30  ;;  %v2013_v35 = vmax.f32 %v1981_v32, 0.0 }
 0x1b9   :  { %2044 = vst [vmem:[%s3850_s4 + $0xe8] sm:$0xff] %v2012_v0  ;;  %v2014_v18 = vmax.f32 %v1982_v34, 0.0 }
 0x1ba   :  { %2045 = vst [vmem:[%s3850_s4 + $0xf0] sm:$0xff] %v2013_v35 }
 0x1bb   :  { %2046 = vst [vmem:[%s3850_s4 + $0xf8] sm:$0xff] %v2014_v18 }

// kernel: _lambda_.11
= control target key start
LH: loop header
LB: loop body
LE: loop exit
PB: predicated region body
PF: predicated region fallthrough
CT: control target
= control target key end

     0   :  { %9 = vsyncpa [#allocation4], 0  ;;  %s8422_s0 = inlined_call_operand.vmem [shape: bf16[128,2304], index: 0, kind: input, shape index: {}]   ;;  %s8423_s1 = inlined_call_operand.vmem [shape: bf16[2304,1024], index: 1, kind: input, shape index: {}]   ;;  %s8424_s2 = inlined_call_operand.vmem [shape: f32[1,1024], index: 2, kind: input, shape index: {}]   ;;  %s8425_s3 = inlined_call_operand.vmem [shape: f32[1,1024], index: 3, kind: input, shape index: {}]   ;;  %s8426_s4 = inlined_call_operand.hbm [shape: f32[128,1024], index: 4, kind: output, shape index: {}]  }
   0x1   :  { %11 = vsyncpa [#allocation4 + $0x1], 0  ;;  %s6801_s15 = smov 0   ;;  %s6803_s16 = smov 0  }
   0x2   :  { %s6805_s17 = smov 0   ;;  %s6807_s18 = smov 0  }
   0x3 LB: > { %s6822_s19 = sadd.s32 4294967295, %s6770_s18   ;;  %s5280_s20 = sadd.s32 4294967294, %s6770_s18   ;;  %s6770_s18 = sphi %s6807_s18, %s8432_s18   ;;  %s6766_s17 = sphi %s6805_s17, %s8431_s17   ;;  %s6762_s16 = sphi %s6803_s16, %s8430_s16   ;;  %s6758_s15 = sphi %s6801_s15, %s8429_s15  }
   0x4   : > { %s6826_s21 = sadd.s32 1, %s6770_s18   ;;  %s45_s22 = sadd.s32 1, %s6766_s17 }
   0x5   : > { %s42_s23 = ssub.s32 %s6770_s18, %s6826_s21  ;;  %p52_p0 = scmp.ne.s32.totalorder %s6766_s17, %s6762_s16 }
   0x6   : > { %p43_p1 = scmp.eq.s32.totalorder %s42_s23, 0  ;;  %p53_p2 = scmp.eq.s32.totalorder %s6770_s18, 0 }
   0x7   : > { %p134_p3 = scmp.eq.s32.totalorder %s6822_s19, 3  ;;  %p139_p4 = scmp.ne.s32.totalorder %s6762_s16, %s6758_s15 }
   0x8   : > { %s6838_s24 = scalar_select %p43_p1, %s6766_s17, %s45_s22  }
   0x9   : > { %p54_p5 = por %p53_p2, %p52_p0  ;;  %p6840_p6 = por %p134_p3, %p52_p0 }
   0xa   : > { %p140_p7 = scmp.eq.s32.totalorder %s5280_s20, 3  ;;  %p5282_p9 = scmp.ge.s32.totalorder %s6770_s18, 4 }
   0xc   : > { %p6844_p8 = por %p140_p7, %p139_p4  ;;  %159 = sbr.rel (%p5282_p9) target bundleno = 311 (0x137), region = 20 }
  0x13   : > { %162 = sbr.rel (!%p54_p5) target bundleno = 311 (0x137), region = 24  ;;  %s164_s27 = sand.u32 (%p54_p5), 1, %s6766_s17  }
  0x14   : > { %s5726_s28 = sshll.u32 (%p54_p5), %s6770_s18, 3  ;;  %s6016_s29 = smul.u32 (%p54_p5), 2304, %s164_s27 }
  0x15   : > { %s6854_s6 = scalar_lea.vmem (%p54_p5), %s8423_s1, %s5726_s28 }
  0x16   : > { %v771_v0 = vld [vmem:[%s6854_s6] sm:$0xff] (%p54_p5)  ;;  %s6862_s7 = scalar_lea.vmem (%p54_p5), [#allocation2], %s6016_s29 }
  0x17   : > { %v773_v1 = vld [vmem:[%s6854_s6 + $0x20] sm:$0xff] (%p54_p5)  ;;  %772 = vst [vmem:[%s6862_s7] sm:$0xff] (%p54_p5), %v771_v0 }
  0x18   : > { %v775_v2 = vld [vmem:[%s6854_s6 + $0x40] sm:$0xff] (%p54_p5)  ;;  %774 = vst [vmem:[%s6862_s7 + $0x8] sm:$0xff] (%p54_p5), %v773_v1 }
  0x19   : > { %v777_v3 = vld [vmem:[%s6854_s6 + $0x60] sm:$0xff] (%p54_p5)  ;;  %776 = vst [vmem:[%s6862_s7 + $0x10] sm:$0xff] (%p54_p5), %v775_v2 }
  0x1a   : > { %v779_v4 = vld [vmem:[%s6854_s6 + $0x80] sm:$0xff]  ;;  %778 = vst [vmem:[%s6862_s7 + $0x18] sm:$0xff] %v777_v3 }
  0x1b   : > { %v781_v5 = vld [vmem:[%s6854_s6 + $0xa0] sm:$0xff]  ;;  %780 = vst [vmem:[%s6862_s7 + $0x20] sm:$0xff] %v779_v4 }
  0x1c   : > { %782 = vst [vmem:[%s6862_s7 + $0x28] sm:$0xff] %v781_v5  ;;  %v783_v6 = vld [vmem:[%s6854_s6 + $0xc0] sm:$0xff] }
  0x1d   : > { %v785_v7 = vld [vmem:[%s6854_s6 + $0xe0] sm:$0xff]  ;;  %784 = vst [vmem:[%s6862_s7 + $0x30] sm:$0xff] %v783_v6 }
  0x1e   : > { %v787_v8 = vld [vmem:[%s6854_s6 + $0x100] sm:$0xff]  ;;  %786 = vst [vmem:[%s6862_s7 + $0x38] sm:$0xff] %v785_v7 }
  0x1f   : > { %788 = vst [vmem:[%s6862_s7 + $0x40] sm:$0xff] %v787_v8  ;;  %v789_v9 = vld [vmem:[%s6854_s6 + $0x120] sm:$0xff] }
  0x20   : > { %v791_v10 = vld [vmem:[%s6854_s6 + $0x140] sm:$0xff]  ;;  %790 = vst [vmem:[%s6862_s7 + $0x48] sm:$0xff] %v789_v9 }
  0x21   : > { %v793_v11 = vld [vmem:[%s6854_s6 + $0x160] sm:$0xff]  ;;  %792 = vst [vmem:[%s6862_s7 + $0x50] sm:$0xff] %v791_v10 }
  0x22   : > { %794 = vst [vmem:[%s6862_s7 + $0x58] sm:$0xff] %v793_v11  ;;  %v795_v12 = vld [vmem:[%s6854_s6 + $0x180] sm:$0xff] }
  0x23   : > { %v797_v13 = vld [vmem:[%s6854_s6 + $0x1a0] sm:$0xff]  ;;  %796 = vst [vmem:[%s6862_s7 + $0x60] sm:$0xff] %v795_v12 }
  0x24   : > { %v799_v14 = vld [vmem:[%s6854_s6 + $0x1c0] sm:$0xff]  ;;  %798 = vst [vmem:[%s6862_s7 + $0x68] sm:$0xff] %v797_v13 }
  0x25   : > { %800 = vst [vmem:[%s6862_s7 + $0x70] sm:$0xff] %v799_v14  ;;  %v801_v15 = vld [vmem:[%s6854_s6 + $0x1e0] sm:$0xff] }
  0x26   : > { %v803_v16 = vld [vmem:[%s6854_s6 + $0x200] sm:$0xff]  ;;  %802 = vst [vmem:[%s6862_s7 + $0x78] sm:$0xff] %v801_v15 }
  0x27   : > { %v805_v17 = vld [vmem:[%s6854_s6 + $0x220] sm:$0xff]  ;;  %804 = vst [vmem:[%s6862_s7 + $0x80] sm:$0xff] %v803_v16 }
  0x28   : > { %806 = vst [vmem:[%s6862_s7 + $0x88] sm:$0xff] %v805_v17  ;;  %v807_v18 = vld [vmem:[%s6854_s6 + $0x240] sm:$0xff] }
  0x29   : > { %v809_v19 = vld [vmem:[%s6854_s6 + $0x260] sm:$0xff]  ;;  %808 = vst [vmem:[%s6862_s7 + $0x90] sm:$0xff] %v807_v18 }
  0x2a   : > { %v811_v20 = vld [vmem:[%s6854_s6 + $0x280] sm:$0xff]  ;;  %810 = vst [vmem:[%s6862_s7 + $0x98] sm:$0xff] %v809_v19 }
  0x2b   : > { %812 = vst [vmem:[%s6862_s7 + $0xa0] sm:$0xff] %v811_v20  ;;  %v813_v21 = vld [vmem:[%s6854_s6 + $0x2a0] sm:$0xff] }
  0x2c   : > { %v815_v22 = vld [vmem:[%s6854_s6 + $0x2c0] sm:$0xff]  ;;  %814 = vst [vmem:[%s6862_s7 + $0xa8] sm:$0xff] %v813_v21 }
  0x2d   : > { %v817_v23 = vld [vmem:[%s6854_s6 + $0x2e0] sm:$0xff]  ;;  %816 = vst [vmem:[%s6862_s7 + $0xb0] sm:$0xff] %v815_v22 }
  0x2e   : > { %818 = vst [vmem:[%s6862_s7 + $0xb8] sm:$0xff] %v817_v23  ;;  %v819_v24 = vld [vmem:[%s6854_s6 + $0x300] sm:$0xff] }
  0x2f   : > { %v821_v25 = vld [vmem:[%s6854_s6 + $0x320] sm:$0xff]  ;;  %820 = vst [vmem:[%s6862_s7 + $0xc0] sm:$0xff] %v819_v24 }
  0x30   : > { %v823_v26 = vld [vmem:[%s6854_s6 + $0x340] sm:$0xff]  ;;  %822 = vst [vmem:[%s6862_s7 + $0xc8] sm:$0xff] %v821_v25 }
  0x31   : > { %824 = vst [vmem:[%s6862_s7 + $0xd0] sm:$0xff] %v823_v26  ;;  %v825_v27 = vld [vmem:[%s6854_s6 + $0x360] sm:$0xff] }
  0x32   : > { %v827_v28 = vld [vmem:[%s6854_s6 + $0x380] sm:$0xff]  ;;  %826 = vst [vmem:[%s6862_s7 + $0xd8] sm:$0xff] %v825_v27 }
  0x33   : > { %v829_v29 = vld [vmem:[%s6854_s6 + $0x3a0] sm:$0xff]  ;;  %828 = vst [vmem:[%s6862_s7 + $0xe0] sm:$0xff] %v827_v28 }
  0x34   : > { %830 = vst [vmem:[%s6862_s7 + $0xe8] sm:$0xff] %v829_v29  ;;  %v831_v30 = vld [vmem:[%s6854_s6 + $0x3c0] sm:$0xff] }
  0x35   : > { %v833_v31 = vld [vmem:[%s6854_s6 + $0x3e0] sm:$0xff]  ;;  %832 = vst [vmem:[%s6862_s7 + $0xf0] sm:$0xff] %v831_v30 }
  0x36   : > { %v835_v32 = vld [vmem:[%s6854_s6 + $0x400] sm:$0xff]  ;;  %834 = vst [vmem:[%s6862_s7 + $0xf8] sm:$0xff] %v833_v31 }
  0x37   : > { %836 = vst [vmem:[%s6862_s7 + $0x100] sm:$0xff] %v835_v32  ;;  %v837_v33 = vld [vmem:[%s6854_s6 + $0x420] sm:$0xff] }
  0x38   : > { %v839_v34 = vld [vmem:[%s6854_s6 + $0x440] sm:$0xff]  ;;  %838 = vst [vmem:[%s6862_s7 + $0x108] sm:$0xff] %v837_v33 }
  0x39   : > { %v841_v35 = vld [vmem:[%s6854_s6 + $0x460] sm:$0xff]  ;;  %840 = vst [vmem:[%s6862_s7 + $0x110] sm:$0xff] %v839_v34 }
  0x3a   : > { %842 = vst [vmem:[%s6862_s7 + $0x118] sm:$0xff] %v841_v35  ;;  %v843_v36 = vld [vmem:[%s6854_s6 + $0x480] sm:$0xff] }
  0x3b   : > { %v845_v37 = vld [vmem:[%s6854_s6 + $0x4a0] sm:$0xff]  ;;  %844 = vst [vmem:[%s6862_s7 + $0x120] sm:$0xff] %v843_v36 }
  0x3c   : > { %v847_v38 = vld [vmem:[%s6854_s6 + $0x4c0] sm:$0xff]  ;;  %846 = vst [vmem:[%s6862_s7 + $0x128] sm:$0xff] %v845_v37 }
  0x3d   : > { %848 = vst [vmem:[%s6862_s7 + $0x130] sm:$0xff] %v847_v38  ;;  %v849_v39 = vld [vmem:[%s6854_s6 + $0x4e0] sm:$0xff] }
  0x3e   : > { %v851_v40 = vld [vmem:[%s6854_s6 + $0x500] sm:$0xff]  ;;  %850 = vst [vmem:[%s6862_s7 + $0x138] sm:$0xff] %v849_v39 }
  0x3f   : > { %v853_v41 = vld [vmem:[%s6854_s6 + $0x520] sm:$0xff]  ;;  %852 = vst [vmem:[%s6862_s7 + $0x140] sm:$0xff] %v851_v40 }
  0x40   : > { %854 = vst [vmem:[%s6862_s7 + $0x148] sm:$0xff] %v853_v41  ;;  %v855_v42 = vld [vmem:[%s6854_s6 + $0x540] sm:$0xff] }
  0x41   : > { %v857_v43 = vld [vmem:[%s6854_s6 + $0x560] sm:$0xff]  ;;  %856 = vst [vmem:[%s6862_s7 + $0x150] sm:$0xff] %v855_v42 }
  0x42   : > { %v859_v44 = vld [vmem:[%s6854_s6 + $0x580] sm:$0xff]  ;;  %858 = vst [vmem:[%s6862_s7 + $0x158] sm:$0xff] %v857_v43 }
  0x43   : > { %860 = vst [vmem:[%s6862_s7 + $0x160] sm:$0xff] %v859_v44  ;;  %v861_v45 = vld [vmem:[%s6854_s6 + $0x5a0] sm:$0xff] }
  0x44   : > { %v863_v46 = vld [vmem:[%s6854_s6 + $0x5c0] sm:$0xff]  ;;  %862 = vst [vmem:[%s6862_s7 + $0x168] sm:$0xff] %v861_v45 }
  0x45   : > { %v865_v47 = vld [vmem:[%s6854_s6 + $0x5e0] sm:$0xff]  ;;  %864 = vst [vmem:[%s6862_s7 + $0x170] sm:$0xff] %v863_v46 }
  0x46   : > { %866 = vst [vmem:[%s6862_s7 + $0x178] sm:$0xff] %v865_v47  ;;  %v867_v48 = vld [vmem:[%s6854_s6 + $0x600] sm:$0xff] }
  0x47   : > { %v869_v49 = vld [vmem:[%s6854_s6 + $0x620] sm:$0xff]  ;;  %868 = vst [vmem:[%s6862_s7 + $0x180] sm:$0xff] %v867_v48 }
  0x48   : > { %v871_v50 = vld [vmem:[%s6854_s6 + $0x640] sm:$0xff]  ;;  %870 = vst [vmem:[%s6862_s7 + $0x188] sm:$0xff] %v869_v49 }
  0x49   : > { %872 = vst [vmem:[%s6862_s7 + $0x190] sm:$0xff] %v871_v50  ;;  %v873_v51 = vld [vmem:[%s6854_s6 + $0x660] sm:$0xff] }
  0x4a   : > { %v875_v52 = vld [vmem:[%s6854_s6 + $0x680] sm:$0xff]  ;;  %874 = vst [vmem:[%s6862_s7 + $0x198] sm:$0xff] %v873_v51 }
  0x4b   : > { %v877_v53 = vld [vmem:[%s6854_s6 + $0x6a0] sm:$0xff]  ;;  %876 = vst [vmem:[%s6862_s7 + $0x1a0] sm:$0xff] %v875_v52 }
  0x4c   : > { %878 = vst [vmem:[%s6862_s7 + $0x1a8] sm:$0xff] %v877_v53  ;;  %v879_v54 = vld [vmem:[%s6854_s6 + $0x6c0] sm:$0xff] }
  0x4d   : > { %v881_v55 = vld [vmem:[%s6854_s6 + $0x6e0] sm:$0xff]  ;;  %880 = vst [vmem:[%s6862_s7 + $0x1b0] sm:$0xff] %v879_v54 }
  0x4e   : > { %v883_v56 = vld [vmem:[%s6854_s6 + $0x700] sm:$0xff]  ;;  %882 = vst [vmem:[%s6862_s7 + $0x1b8] sm:$0xff] %v881_v55 }
  0x4f   : > { %884 = vst [vmem:[%s6862_s7 + $0x1c0] sm:$0xff] %v883_v56  ;;  %v885_v57 = vld [vmem:[%s6854_s6 + $0x720] sm:$0xff] }
  0x50   : > { %v887_v58 = vld [vmem:[%s6854_s6 + $0x740] sm:$0xff]  ;;  %886 = vst [vmem:[%s6862_s7 + $0x1c8] sm:$0xff] %v885_v57 }
  0x51   : > { %v889_v59 = vld [vmem:[%s6854_s6 + $0x760] sm:$0xff]  ;;  %888 = vst [vmem:[%s6862_s7 + $0x1d0] sm:$0xff] %v887_v58 }
  0x52   : > { %890 = vst [vmem:[%s6862_s7 + $0x1d8] sm:$0xff] %v889_v59  ;;  %v891_v60 = vld [vmem:[%s6854_s6 + $0x780] sm:$0xff] }
  0x53   : > { %v893_v61 = vld [vmem:[%s6854_s6 + $0x7a0] sm:$0xff]  ;;  %892 = vst [vmem:[%s6862_s7 + $0x1e0] sm:$0xff] %v891_v60 }
  0x54   : > { %v895_v62 = vld [vmem:[%s6854_s6 + $0x7c0] sm:$0xff]  ;;  %894 = vst [vmem:[%s6862_s7 + $0x1e8] sm:$0xff] %v893_v61 }
  0x55   : > { %896 = vst [vmem:[%s6862_s7 + $0x1f0] sm:$0xff] %v895_v62  ;;  %v897_v63 = vld [vmem:[%s6854_s6 + $0x7e0] sm:$0xff] }
  0x56   : > { %v899_v0 = vld [vmem:[%s6854_s6 + $0x800] sm:$0xff]  ;;  %898 = vst [vmem:[%s6862_s7 + $0x1f8] sm:$0xff] %v897_v63 }
  0x57   : > { %v901_v1 = vld [vmem:[%s6854_s6 + $0x820] sm:$0xff]  ;;  %900 = vst [vmem:[%s6862_s7 + $0x200] sm:$0xff] %v899_v0 }
  0x58   : > { %902 = vst [vmem:[%s6862_s7 + $0x208] sm:$0xff] %v901_v1  ;;  %v903_v2 = vld [vmem:[%s6854_s6 + $0x840] sm:$0xff] }
  0x59   : > { %v905_v3 = vld [vmem:[%s6854_s6 + $0x860] sm:$0xff]  ;;  %904 = vst [vmem:[%s6862_s7 + $0x210] sm:$0xff] %v903_v2 }
  0x5a   : > { %v907_v4 = vld [vmem:[%s6854_s6 + $0x880] sm:$0xff]  ;;  %906 = vst [vmem:[%s6862_s7 + $0x218] sm:$0xff] %v905_v3 }
  0x5b   : > { %908 = vst [vmem:[%s6862_s7 + $0x220] sm:$0xff] %v907_v4  ;;  %v909_v5 = vld [vmem:[%s6854_s6 + $0x8a0] sm:$0xff] }
  0x5c   : > { %v911_v6 = vld [vmem:[%s6854_s6 + $0x8c0] sm:$0xff]  ;;  %910 = vst [vmem:[%s6862_s7 + $0x228] sm:$0xff] %v909_v5 }
  0x5d   : > { %v913_v7 = vld [vmem:[%s6854_s6 + $0x8e0] sm:$0xff]  ;;  %912 = vst [vmem:[%s6862_s7 + $0x230] sm:$0xff] %v911_v6 }
  0x5e   : > { %914 = vst [vmem:[%s6862_s7 + $0x238] sm:$0xff] %v913_v7  ;;  %v915_v8 = vld [vmem:[%s6854_s6 + $0x900] sm:$0xff] }
  0x5f   : > { %v917_v9 = vld [vmem:[%s6854_s6 + $0x920] sm:$0xff]  ;;  %916 = vst [vmem:[%s6862_s7 + $0x240] sm:$0xff] %v915_v8 }
  0x60   : > { %v919_v10 = vld [vmem:[%s6854_s6 + $0x940] sm:$0xff]  ;;  %918 = vst [vmem:[%s6862_s7 + $0x248] sm:$0xff] %v917_v9 }
  0x61   : > { %920 = vst [vmem:[%s6862_s7 + $0x250] sm:$0xff] %v919_v10  ;;  %v921_v11 = vld [vmem:[%s6854_s6 + $0x960] sm:$0xff] }
  0x62   : > { %v923_v12 = vld [vmem:[%s6854_s6 + $0x980] sm:$0xff]  ;;  %922 = vst [vmem:[%s6862_s7 + $0x258] sm:$0xff] %v921_v11 }
  0x63   : > { %v925_v13 = vld [vmem:[%s6854_s6 + $0x9a0] sm:$0xff]  ;;  %924 = vst [vmem:[%s6862_s7 + $0x260] sm:$0xff] %v923_v12 }
  0x64   : > { %926 = vst [vmem:[%s6862_s7 + $0x268] sm:$0xff] %v925_v13  ;;  %v927_v14 = vld [vmem:[%s6854_s6 + $0x9c0] sm:$0xff] }
  0x65   : > { %v929_v15 = vld [vmem:[%s6854_s6 + $0x9e0] sm:$0xff]  ;;  %928 = vst [vmem:[%s6862_s7 + $0x270] sm:$0xff] %v927_v14 }
  0x66   : > { %v931_v16 = vld [vmem:[%s6854_s6 + $0xa00] sm:$0xff]  ;;  %930 = vst [vmem:[%s6862_s7 + $0x278] sm:$0xff] %v929_v15 }
  0x67   : > { %932 = vst [vmem:[%s6862_s7 + $0x280] sm:$0xff] %v931_v16  ;;  %v933_v17 = vld [vmem:[%s6854_s6 + $0xa20] sm:$0xff] }
  0x68   : > { %v935_v18 = vld [vmem:[%s6854_s6 + $0xa40] sm:$0xff]  ;;  %934 = vst [vmem:[%s6862_s7 + $0x288] sm:$0xff] %v933_v17 }
  0x69   : > { %v937_v19 = vld [vmem:[%s6854_s6 + $0xa60] sm:$0xff]  ;;  %936 = vst [vmem:[%s6862_s7 + $0x290] sm:$0xff] %v935_v18 }
  0x6a   : > { %938 = vst [vmem:[%s6862_s7 + $0x298] sm:$0xff] %v937_v19  ;;  %v939_v20 = vld [vmem:[%s6854_s6 + $0xa80] sm:$0xff] }
  0x6b   : > { %v941_v21 = vld [vmem:[%s6854_s6 + $0xaa0] sm:$0xff]  ;;  %940 = vst [vmem:[%s6862_s7 + $0x2a0] sm:$0xff] %v939_v20 }
  0x6c   : > { %v943_v22 = vld [vmem:[%s6854_s6 + $0xac0] sm:$0xff]  ;;  %942 = vst [vmem:[%s6862_s7 + $0x2a8] sm:$0xff] %v941_v21 }
  0x6d   : > { %944 = vst [vmem:[%s6862_s7 + $0x2b0] sm:$0xff] %v943_v22  ;;  %v945_v23 = vld [vmem:[%s6854_s6 + $0xae0] sm:$0xff] }
  0x6e   : > { %v947_v24 = vld [vmem:[%s6854_s6 + $0xb00] sm:$0xff]  ;;  %946 = vst [vmem:[%s6862_s7 + $0x2b8] sm:$0xff] %v945_v23 }
  0x6f   : > { %v949_v25 = vld [vmem:[%s6854_s6 + $0xb20] sm:$0xff]  ;;  %948 = vst [vmem:[%s6862_s7 + $0x2c0] sm:$0xff] %v947_v24 }
  0x70   : > { %950 = vst [vmem:[%s6862_s7 + $0x2c8] sm:$0xff] %v949_v25  ;;  %v951_v26 = vld [vmem:[%s6854_s6 + $0xb40] sm:$0xff] }
  0x71   : > { %v953_v27 = vld [vmem:[%s6854_s6 + $0xb60] sm:$0xff]  ;;  %952 = vst [vmem:[%s6862_s7 + $0x2d0] sm:$0xff] %v951_v26 }
  0x72   : > { %v955_v28 = vld [vmem:[%s6854_s6 + $0xb80] sm:$0xff]  ;;  %954 = vst [vmem:[%s6862_s7 + $0x2d8] sm:$0xff] %v953_v27 }
  0x73   : > { %956 = vst [vmem:[%s6862_s7 + $0x2e0] sm:$0xff] %v955_v28  ;;  %v957_v29 = vld [vmem:[%s6854_s6 + $0xba0] sm:$0xff] }
  0x74   : > { %v959_v30 = vld [vmem:[%s6854_s6 + $0xbc0] sm:$0xff]  ;;  %958 = vst [vmem:[%s6862_s7 + $0x2e8] sm:$0xff] %v957_v29 }
  0x75   : > { %v961_v31 = vld [vmem:[%s6854_s6 + $0xbe0] sm:$0xff]  ;;  %960 = vst [vmem:[%s6862_s7 + $0x2f0] sm:$0xff] %v959_v30 }
  0x76   : > { %962 = vst [vmem:[%s6862_s7 + $0x2f8] sm:$0xff] %v961_v31  ;;  %v963_v32 = vld [vmem:[%s6854_s6 + $0xc00] sm:$0xff] }
  0x77   : > { %v965_v33 = vld [vmem:[%s6854_s6 + $0xc20] sm:$0xff]  ;;  %964 = vst [vmem:[%s6862_s7 + $0x300] sm:$0xff] %v963_v32 }
  0x78   : > { %v967_v34 = vld [vmem:[%s6854_s6 + $0xc40] sm:$0xff]  ;;  %966 = vst [vmem:[%s6862_s7 + $0x308] sm:$0xff] %v965_v33 }
  0x79   : > { %968 = vst [vmem:[%s6862_s7 + $0x310] sm:$0xff] %v967_v34  ;;  %v969_v35 = vld [vmem:[%s6854_s6 + $0xc60] sm:$0xff] }
  0x7a   : > { %v971_v36 = vld [vmem:[%s6854_s6 + $0xc80] sm:$0xff]  ;;  %970 = vst [vmem:[%s6862_s7 + $0x318] sm:$0xff] %v969_v35 }
  0x7b   : > { %v973_v37 = vld [vmem:[%s6854_s6 + $0xca0] sm:$0xff]  ;;  %972 = vst [vmem:[%s6862_s7 + $0x320] sm:$0xff] %v971_v36 }
  0x7c   : > { %974 = vst [vmem:[%s6862_s7 + $0x328] sm:$0xff] %v973_v37  ;;  %v975_v38 = vld [vmem:[%s6854_s6 + $0xcc0] sm:$0xff] }
  0x7d   : > { %v977_v39 = vld [vmem:[%s6854_s6 + $0xce0] sm:$0xff]  ;;  %976 = vst [vmem:[%s6862_s7 + $0x330] sm:$0xff] %v975_v38 }
  0x7e   : > { %v979_v40 = vld [vmem:[%s6854_s6 + $0xd00] sm:$0xff]  ;;  %978 = vst [vmem:[%s6862_s7 + $0x338] sm:$0xff] %v977_v39 }
  0x7f   : > { %980 = vst [vmem:[%s6862_s7 + $0x340] sm:$0xff] %v979_v40  ;;  %v981_v41 = vld [vmem:[%s6854_s6 + $0xd20] sm:$0xff] }
  0x80   : > { %v983_v42 = vld [vmem:[%s6854_s6 + $0xd40] sm:$0xff]  ;;  %982 = vst [vmem:[%s6862_s7 + $0x348] sm:$0xff] %v981_v41 }
  0x81   : > { %v985_v43 = vld [vmem:[%s6854_s6 + $0xd60] sm:$0xff]  ;;  %984 = vst [vmem:[%s6862_s7 + $0x350] sm:$0xff] %v983_v42 }
  0x82   : > { %986 = vst [vmem:[%s6862_s7 + $0x358] sm:$0xff] %v985_v43  ;;  %v987_v44 = vld [vmem:[%s6854_s6 + $0xd80] sm:$0xff] }
  0x83   : > { %v989_v45 = vld [vmem:[%s6854_s6 + $0xda0] sm:$0xff]  ;;  %988 = vst [vmem:[%s6862_s7 + $0x360] sm:$0xff] %v987_v44 }
  0x84   : > { %v991_v46 = vld [vmem:[%s6854_s6 + $0xdc0] sm:$0xff]  ;;  %990 = vst [vmem:[%s6862_s7 + $0x368] sm:$0xff] %v989_v45 }
  0x85   : > { %992 = vst [vmem:[%s6862_s7 + $0x370] sm:$0xff] %v991_v46  ;;  %v993_v47 = vld [vmem:[%s6854_s6 + $0xde0] sm:$0xff] }
  0x86   : > { %v995_v48 = vld [vmem:[%s6854_s6 + $0xe00] sm:$0xff]  ;;  %994 = vst [vmem:[%s6862_s7 + $0x378] sm:$0xff] %v993_v47 }
  0x87   : > { %v997_v49 = vld [vmem:[%s6854_s6 + $0xe20] sm:$0xff]  ;;  %996 = vst [vmem:[%s6862_s7 + $0x380] sm:$0xff] %v995_v48 }
  0x88   : > { %998 = vst [vmem:[%s6862_s7 + $0x388] sm:$0xff] %v997_v49  ;;  %v999_v50 = vld [vmem:[%s6854_s6 + $0xe40] sm:$0xff] }
  0x89   : > { %v1001_v51 = vld [vmem:[%s6854_s6 + $0xe60] sm:$0xff]  ;;  %1000 = vst [vmem:[%s6862_s7 + $0x390] sm:$0xff] %v999_v50 }
  0x8a   : > { %v1003_v52 = vld [vmem:[%s6854_s6 + $0xe80] sm:$0xff]  ;;  %1002 = vst [vmem:[%s6862_s7 + $0x398] sm:$0xff] %v1001_v51 }
  0x8b   : > { %1004 = vst [vmem:[%s6862_s7 + $0x3a0] sm:$0xff] %v1003_v52  ;;  %v1005_v53 = vld [vmem:[%s6854_s6 + $0xea0] sm:$0xff] }
  0x8c   : > { %v1007_v54 = vld [vmem:[%s6854_s6 + $0xec0] sm:$0xff]  ;;  %1006 = vst [vmem:[%s6862_s7 + $0x3a8] sm:$0xff] %v1005_v53 }
  0x8d   : > { %v1009_v55 = vld [vmem:[%s6854_s6 + $0xee0] sm:$0xff]  ;;  %1008 = vst [vmem:[%s6862_s7 + $0x3b0] sm:$0xff] %v1007_v54 }
  0x8e   : > { %1010 = vst [vmem:[%s6862_s7 + $0x3b8] sm:$0xff] %v1009_v55  ;;  %v1011_v56 = vld [vmem:[%s6854_s6 + $0xf00] sm:$0xff] }
  0x8f   : > { %v1013_v57 = vld [vmem:[%s6854_s6 + $0xf20] sm:$0xff]  ;;  %1012 = vst [vmem:[%s6862_s7 + $0x3c0] sm:$0xff] %v1011_v56 }
  0x90   : > { %v1015_v58 = vld [vmem:[%s6854_s6 + $0xf40] sm:$0xff]  ;;  %1014 = vst [vmem:[%s6862_s7 + $0x3c8] sm:$0xff] %v1013_v57 }
  0x91   : > { %1016 = vst [vmem:[%s6862_s7 + $0x3d0] sm:$0xff] %v1015_v58  ;;  %v1017_v59 = vld [vmem:[%s6854_s6 + $0xf60] sm:$0xff] }
  0x92   : > { %v1019_v60 = vld [vmem:[%s6854_s6 + $0xf80] sm:$0xff]  ;;  %1018 = vst [vmem:[%s6862_s7 + $0x3d8] sm:$0xff] %v1017_v59 }
  0x93   : > { %v1021_v61 = vld [vmem:[%s6854_s6 + $0xfa0] sm:$0xff]  ;;  %1020 = vst [vmem:[%s6862_s7 + $0x3e0] sm:$0xff] %v1019_v60 }
  0x94   : > { %1022 = vst [vmem:[%s6862_s7 + $0x3e8] sm:$0xff] %v1021_v61  ;;  %v1023_v62 = vld [vmem:[%s6854_s6 + $0xfc0] sm:$0xff] }
  0x95   : > { %v1025_v63 = vld [vmem:[%s6854_s6 + $0xfe0] sm:$0xff]  ;;  %1024 = vst [vmem:[%s6862_s7 + $0x3f0] sm:$0xff] %v1023_v62 }
  0x96   : > { %v1027_v0 = vld [vmem:[%s6854_s6 + $0x1000] sm:$0xff]  ;;  %1026 = vst [vmem:[%s6862_s7 + $0x3f8] sm:$0xff] %v1025_v63 }
  0x97   : > { %1028 = vst [vmem:[%s6862_s7 + $0x400] sm:$0xff] %v1027_v0  ;;  %v1029_v1 = vld [vmem:[%s6854_s6 + $0x1020] sm:$0xff] }
  0x98   : > { %v1031_v2 = vld [vmem:[%s6854_s6 + $0x1040] sm:$0xff]  ;;  %1030 = vst [vmem:[%s6862_s7 + $0x408] sm:$0xff] %v1029_v1 }
  0x99   : > { %v1033_v3 = vld [vmem:[%s6854_s6 + $0x1060] sm:$0xff]  ;;  %1032 = vst [vmem:[%s6862_s7 + $0x410] sm:$0xff] %v1031_v2 }
  0x9a   : > { %1034 = vst [vmem:[%s6862_s7 + $0x418] sm:$0xff] %v1033_v3  ;;  %v1035_v4 = vld [vmem:[%s6854_s6 + $0x1080] sm:$0xff] }
  0x9b   : > { %v1037_v5 = vld [vmem:[%s6854_s6 + $0x10a0] sm:$0xff]  ;;  %1036 = vst [vmem:[%s6862_s7 + $0x420] sm:$0xff] %v1035_v4 }
  0x9c   : > { %v1039_v6 = vld [vmem:[%s6854_s6 + $0x10c0] sm:$0xff]  ;;  %1038 = vst [vmem:[%s6862_s7 + $0x428] sm:$0xff] %v1037_v5 }
  0x9d   : > { %1040 = vst [vmem:[%s6862_s7 + $0x430] sm:$0xff] %v1039_v6  ;;  %v1041_v7 = vld [vmem:[%s6854_s6 + $0x10e0] sm:$0xff] }
  0x9e   : > { %v1043_v8 = vld [vmem:[%s6854_s6 + $0x1100] sm:$0xff]  ;;  %1042 = vst [vmem:[%s6862_s7 + $0x438] sm:$0xff] %v1041_v7 }
  0x9f   : > { %v1045_v9 = vld [vmem:[%s6854_s6 + $0x1120] sm:$0xff]  ;;  %1044 = vst [vmem:[%s6862_s7 + $0x440] sm:$0xff] %v1043_v8 }
  0xa0   : > { %1046 = vst [vmem:[%s6862_s7 + $0x448] sm:$0xff] %v1045_v9  ;;  %v1047_v10 = vld [vmem:[%s6854_s6 + $0x1140] sm:$0xff] }
  0xa1   : > { %v1049_v11 = vld [vmem:[%s6854_s6 + $0x1160] sm:$0xff]  ;;  %1048 = vst [vmem:[%s6862_s7 + $0x450] sm:$0xff] %v1047_v10 }
  0xa2   : > { %v1051_v12 = vld [vmem:[%s6854_s6 + $0x1180] sm:$0xff]  ;;  %1050 = vst [vmem:[%s6862_s7 + $0x458] sm:$0xff] %v1049_v11 }
  0xa3   : > { %1052 = vst [vmem:[%s6862_s7 + $0x460] sm:$0xff] %v1051_v12  ;;  %v1053_v13 = vld [vmem:[%s6854_s6 + $0x11a0] sm:$0xff] }
  0xa4   : > { %v1055_v14 = vld [vmem:[%s6854_s6 + $0x11c0] sm:$0xff]  ;;  %1054 = vst [vmem:[%s6862_s7 + $0x468] sm:$0xff] %v1053_v13 }
  0xa5   : > { %v1057_v15 = vld [vmem:[%s6854_s6 + $0x11e0] sm:$0xff]  ;;  %1056 = vst [vmem:[%s6862_s7 + $0x470] sm:$0xff] %v1055_v14 }
  0xa6   : > { %1058 = vst [vmem:[%s6862_s7 + $0x478] sm:$0xff] %v1057_v15  ;;  %v1059_v16 = vld [vmem:[%s6854_s6 + $0x1200] sm:$0xff] }
  0xa7   : > { %v1061_v17 = vld [vmem:[%s6854_s6 + $0x1220] sm:$0xff]  ;;  %1060 = vst [vmem:[%s6862_s7 + $0x480] sm:$0xff] %v1059_v16 }
  0xa8   : > { %v1063_v18 = vld [vmem:[%s6854_s6 + $0x1240] sm:$0xff]  ;;  %1062 = vst [vmem:[%s6862_s7 + $0x488] sm:$0xff] %v1061_v17 }
  0xa9   : > { %1064 = vst [vmem:[%s6862_s7 + $0x490] sm:$0xff] %v1063_v18  ;;  %v1065_v19 = vld [vmem:[%s6854_s6 + $0x1260] sm:$0xff] }
  0xaa   : > { %v1067_v20 = vld [vmem:[%s6854_s6 + $0x1280] sm:$0xff]  ;;  %1066 = vst [vmem:[%s6862_s7 + $0x498] sm:$0xff] %v1065_v19 }
  0xab   : > { %v1069_v21 = vld [vmem:[%s6854_s6 + $0x12a0] sm:$0xff]  ;;  %1068 = vst [vmem:[%s6862_s7 + $0x4a0] sm:$0xff] %v1067_v20 }
  0xac   : > { %1070 = vst [vmem:[%s6862_s7 + $0x4a8] sm:$0xff] %v1069_v21  ;;  %v1071_v22 = vld [vmem:[%s6854_s6 + $0x12c0] sm:$0xff] }
  0xad   : > { %v1073_v23 = vld [vmem:[%s6854_s6 + $0x12e0] sm:$0xff]  ;;  %1072 = vst [vmem:[%s6862_s7 + $0x4b0] sm:$0xff] %v1071_v22 }
  0xae   : > { %v1075_v24 = vld [vmem:[%s6854_s6 + $0x1300] sm:$0xff]  ;;  %1074 = vst [vmem:[%s6862_s7 + $0x4b8] sm:$0xff] %v1073_v23 }
  0xaf   : > { %1076 = vst [vmem:[%s6862_s7 + $0x4c0] sm:$0xff] %v1075_v24  ;;  %v1077_v25 = vld [vmem:[%s6854_s6 + $0x1320] sm:$0xff] }
  0xb0   : > { %v1079_v26 = vld [vmem:[%s6854_s6 + $0x1340] sm:$0xff]  ;;  %1078 = vst [vmem:[%s6862_s7 + $0x4c8] sm:$0xff] %v1077_v25 }
  0xb1   : > { %v1081_v27 = vld [vmem:[%s6854_s6 + $0x1360] sm:$0xff]  ;;  %1080 = vst [vmem:[%s6862_s7 + $0x4d0] sm:$0xff] %v1079_v26 }
  0xb2   : > { %1082 = vst [vmem:[%s6862_s7 + $0x4d8] sm:$0xff] %v1081_v27  ;;  %v1083_v28 = vld [vmem:[%s6854_s6 + $0x1380] sm:$0xff] }
  0xb3   : > { %v1085_v29 = vld [vmem:[%s6854_s6 + $0x13a0] sm:$0xff]  ;;  %1084 = vst [vmem:[%s6862_s7 + $0x4e0] sm:$0xff] %v1083_v28 }
  0xb4   : > { %v1087_v30 = vld [vmem:[%s6854_s6 + $0x13c0] sm:$0xff]  ;;  %1086 = vst [vmem:[%s6862_s7 + $0x4e8] sm:$0xff] %v1085_v29 }
  0xb5   : > { %1088 = vst [vmem:[%s6862_s7 + $0x4f0] sm:$0xff] %v1087_v30  ;;  %v1089_v31 = vld [vmem:[%s6854_s6 + $0x13e0] sm:$0xff] }
  0xb6   : > { %v1091_v32 = vld [vmem:[%s6854_s6 + $0x1400] sm:$0xff]  ;;  %1090 = vst [vmem:[%s6862_s7 + $0x4f8] sm:$0xff] %v1089_v31 }
  0xb7   : > { %v1093_v33 = vld [vmem:[%s6854_s6 + $0x1420] sm:$0xff]  ;;  %1092 = vst [vmem:[%s6862_s7 + $0x500] sm:$0xff] %v1091_v32 }
  0xb8   : > { %1094 = vst [vmem:[%s6862_s7 + $0x508] sm:$0xff] %v1093_v33  ;;  %v1095_v34 = vld [vmem:[%s6854_s6 + $0x1440] sm:$0xff] }
  0xb9   : > { %v1097_v35 = vld [vmem:[%s6854_s6 + $0x1460] sm:$0xff]  ;;  %1096 = vst [vmem:[%s6862_s7 + $0x510] sm:$0xff] %v1095_v34 }
  0xba   : > { %v1099_v36 = vld [vmem:[%s6854_s6 + $0x1480] sm:$0xff]  ;;  %1098 = vst [vmem:[%s6862_s7 + $0x518] sm:$0xff] %v1097_v35 }
  0xbb   : > { %1100 = vst [vmem:[%s6862_s7 + $0x520] sm:$0xff] %v1099_v36  ;;  %v1101_v37 = vld [vmem:[%s6854_s6 + $0x14a0] sm:$0xff] }
  0xbc   : > { %v1103_v38 = vld [vmem:[%s6854_s6 + $0x14c0] sm:$0xff]  ;;  %1102 = vst [vmem:[%s6862_s7 + $0x528] sm:$0xff] %v1101_v37 }
  0xbd   : > { %v1105_v39 = vld [vmem:[%s6854_s6 + $0x14e0] sm:$0xff]  ;;  %1104 = vst [vmem:[%s6862_s7 + $0x530] sm:$0xff] %v1103_v38 }
  0xbe   : > { %1106 = vst [vmem:[%s6862_s7 + $0x538] sm:$0xff] %v1105_v39  ;;  %v1107_v40 = vld [vmem:[%s6854_s6 + $0x1500] sm:$0xff] }
  0xbf   : > { %v1109_v41 = vld [vmem:[%s6854_s6 + $0x1520] sm:$0xff]  ;;  %1108 = vst [vmem:[%s6862_s7 + $0x540] sm:$0xff] %v1107_v40 }
  0xc0   : > { %v1111_v42 = vld [vmem:[%s6854_s6 + $0x1540] sm:$0xff]  ;;  %1110 = vst [vmem:[%s6862_s7 + $0x548] sm:$0xff] %v1109_v41 }
  0xc1   : > { %1112 = vst [vmem:[%s6862_s7 + $0x550] sm:$0xff] %v1111_v42  ;;  %v1113_v43 = vld [vmem:[%s6854_s6 + $0x1560] sm:$0xff] }
  0xc2   : > { %v1115_v44 = vld [vmem:[%s6854_s6 + $0x1580] sm:$0xff]  ;;  %1114 = vst [vmem:[%s6862_s7 + $0x558] sm:$0xff] %v1113_v43 }
  0xc3   : > { %v1117_v45 = vld [vmem:[%s6854_s6 + $0x15a0] sm:$0xff]  ;;  %1116 = vst [vmem:[%s6862_s7 + $0x560] sm:$0xff] %v1115_v44 }
  0xc4   : > { %1118 = vst [vmem:[%s6862_s7 + $0x568] sm:$0xff] %v1117_v45  ;;  %v1119_v46 = vld [vmem:[%s6854_s6 + $0x15c0] sm:$0xff] }
  0xc5   : > { %v1121_v47 = vld [vmem:[%s6854_s6 + $0x15e0] sm:$0xff]  ;;  %1120 = vst [vmem:[%s6862_s7 + $0x570] sm:$0xff] %v1119_v46 }
  0xc6   : > { %v1123_v48 = vld [vmem:[%s6854_s6 + $0x1600] sm:$0xff]  ;;  %1122 = vst [vmem:[%s6862_s7 + $0x578] sm:$0xff] %v1121_v47 }
  0xc7   : > { %1124 = vst [vmem:[%s6862_s7 + $0x580] sm:$0xff] %v1123_v48  ;;  %v1125_v49 = vld [vmem:[%s6854_s6 + $0x1620] sm:$0xff] }
  0xc8   : > { %v1127_v50 = vld [vmem:[%s6854_s6 + $0x1640] sm:$0xff]  ;;  %1126 = vst [vmem:[%s6862_s7 + $0x588] sm:$0xff] %v1125_v49 }
  0xc9   : > { %v1129_v51 = vld [vmem:[%s6854_s6 + $0x1660] sm:$0xff]  ;;  %1128 = vst [vmem:[%s6862_s7 + $0x590] sm:$0xff] %v1127_v50 }
  0xca   : > { %1130 = vst [vmem:[%s6862_s7 + $0x598] sm:$0xff] %v1129_v51  ;;  %v1131_v52 = vld [vmem:[%s6854_s6 + $0x1680] sm:$0xff] }
  0xcb   : > { %v1133_v53 = vld [vmem:[%s6854_s6 + $0x16a0] sm:$0xff]  ;;  %1132 = vst [vmem:[%s6862_s7 + $0x5a0] sm:$0xff] %v1131_v52 }
  0xcc   : > { %v1135_v54 = vld [vmem:[%s6854_s6 + $0x16c0] sm:$0xff]  ;;  %1134 = vst [vmem:[%s6862_s7 + $0x5a8] sm:$0xff] %v1133_v53 }
  0xcd   : > { %1136 = vst [vmem:[%s6862_s7 + $0x5b0] sm:$0xff] %v1135_v54  ;;  %v1137_v55 = vld [vmem:[%s6854_s6 + $0x16e0] sm:$0xff] }
  0xce   : > { %v1139_v56 = vld [vmem:[%s6854_s6 + $0x1700] sm:$0xff]  ;;  %1138 = vst [vmem:[%s6862_s7 + $0x5b8] sm:$0xff] %v1137_v55 }
  0xcf   : > { %v1141_v57 = vld [vmem:[%s6854_s6 + $0x1720] sm:$0xff]  ;;  %1140 = vst [vmem:[%s6862_s7 + $0x5c0] sm:$0xff] %v1139_v56 }
  0xd0   : > { %1142 = vst [vmem:[%s6862_s7 + $0x5c8] sm:$0xff] %v1141_v57  ;;  %v1143_v58 = vld [vmem:[%s6854_s6 + $0x1740] sm:$0xff] }
  0xd1   : > { %v1145_v59 = vld [vmem:[%s6854_s6 + $0x1760] sm:$0xff]  ;;  %1144 = vst [vmem:[%s6862_s7 + $0x5d0] sm:$0xff] %v1143_v58 }
  0xd2   : > { %v1147_v60 = vld [vmem:[%s6854_s6 + $0x1780] sm:$0xff]  ;;  %1146 = vst [vmem:[%s6862_s7 + $0x5d8] sm:$0xff] %v1145_v59 }
  0xd3   : > { %1148 = vst [vmem:[%s6862_s7 + $0x5e0] sm:$0xff] %v1147_v60  ;;  %v1149_v61 = vld [vmem:[%s6854_s6 + $0x17a0] sm:$0xff] }
  0xd4   : > { %v1151_v62 = vld [vmem:[%s6854_s6 + $0x17c0] sm:$0xff]  ;;  %1150 = vst [vmem:[%s6862_s7 + $0x5e8] sm:$0xff] %v1149_v61 }
  0xd5   : > { %v1153_v63 = vld [vmem:[%s6854_s6 + $0x17e0] sm:$0xff]  ;;  %1152 = vst [vmem:[%s6862_s7 + $0x5f0] sm:$0xff] %v1151_v62 }
  0xd6   : > { %1154 = vst [vmem:[%s6862_s7 + $0x5f8] sm:$0xff] %v1153_v63  ;;  %v1155_v0 = vld [vmem:[%s6854_s6 + $0x1800] sm:$0xff] }
  0xd7   : > { %v1157_v1 = vld [vmem:[%s6854_s6 + $0x1820] sm:$0xff]  ;;  %1156 = vst [vmem:[%s6862_s7 + $0x600] sm:$0xff] %v1155_v0 }
  0xd8   : > { %v1159_v2 = vld [vmem:[%s6854_s6 + $0x1840] sm:$0xff]  ;;  %1158 = vst [vmem:[%s6862_s7 + $0x608] sm:$0xff] %v1157_v1 }
  0xd9   : > { %1160 = vst [vmem:[%s6862_s7 + $0x610] sm:$0xff] %v1159_v2  ;;  %v1161_v3 = vld [vmem:[%s6854_s6 + $0x1860] sm:$0xff] }
  0xda   : > { %v1163_v4 = vld [vmem:[%s6854_s6 + $0x1880] sm:$0xff]  ;;  %1162 = vst [vmem:[%s6862_s7 + $0x618] sm:$0xff] %v1161_v3 }
  0xdb   : > { %v1165_v5 = vld [vmem:[%s6854_s6 + $0x18a0] sm:$0xff]  ;;  %1164 = vst [vmem:[%s6862_s7 + $0x620] sm:$0xff] %v1163_v4 }
  0xdc   : > { %1166 = vst [vmem:[%s6862_s7 + $0x628] sm:$0xff] %v1165_v5  ;;  %v1167_v6 = vld [vmem:[%s6854_s6 + $0x18c0] sm:$0xff] }
  0xdd   : > { %v1169_v7 = vld [vmem:[%s6854_s6 + $0x18e0] sm:$0xff]  ;;  %1168 = vst [vmem:[%s6862_s7 + $0x630] sm:$0xff] %v1167_v6 }
  0xde   : > { %v1171_v8 = vld [vmem:[%s6854_s6 + $0x1900] sm:$0xff]  ;;  %1170 = vst [vmem:[%s6862_s7 + $0x638] sm:$0xff] %v1169_v7 }
  0xdf   : > { %1172 = vst [vmem:[%s6862_s7 + $0x640] sm:$0xff] %v1171_v8  ;;  %v1173_v9 = vld [vmem:[%s6854_s6 + $0x1920] sm:$0xff] }
  0xe0   : > { %v1175_v10 = vld [vmem:[%s6854_s6 + $0x1940] sm:$0xff]  ;;  %1174 = vst [vmem:[%s6862_s7 + $0x648] sm:$0xff] %v1173_v9 }
  0xe1   : > { %v1177_v11 = vld [vmem:[%s6854_s6 + $0x1960] sm:$0xff]  ;;  %1176 = vst [vmem:[%s6862_s7 + $0x650] sm:$0xff] %v1175_v10 }
  0xe2   : > { %1178 = vst [vmem:[%s6862_s7 + $0x658] sm:$0xff] %v1177_v11  ;;  %v1179_v12 = vld [vmem:[%s6854_s6 + $0x1980] sm:$0xff] }
  0xe3   : > { %v1181_v13 = vld [vmem:[%s6854_s6 + $0x19a0] sm:$0xff]  ;;  %1180 = vst [vmem:[%s6862_s7 + $0x660] sm:$0xff] %v1179_v12 }
  0xe4   : > { %v1183_v14 = vld [vmem:[%s6854_s6 + $0x19c0] sm:$0xff]  ;;  %1182 = vst [vmem:[%s6862_s7 + $0x668] sm:$0xff] %v1181_v13 }
  0xe5   : > { %1184 = vst [vmem:[%s6862_s7 + $0x670] sm:$0xff] %v1183_v14  ;;  %v1185_v15 = vld [vmem:[%s6854_s6 + $0x19e0] sm:$0xff] }
  0xe6   : > { %v1187_v16 = vld [vmem:[%s6854_s6 + $0x1a00] sm:$0xff]  ;;  %1186 = vst [vmem:[%s6862_s7 + $0x678] sm:$0xff] %v1185_v15 }
  0xe7   : > { %v1189_v17 = vld [vmem:[%s6854_s6 + $0x1a20] sm:$0xff]  ;;  %1188 = vst [vmem:[%s6862_s7 + $0x680] sm:$0xff] %v1187_v16 }
  0xe8   : > { %1190 = vst [vmem:[%s6862_s7 + $0x688] sm:$0xff] %v1189_v17  ;;  %v1191_v18 = vld [vmem:[%s6854_s6 + $0x1a40] sm:$0xff] }
  0xe9   : > { %v1193_v19 = vld [vmem:[%s6854_s6 + $0x1a60] sm:$0xff]  ;;  %1192 = vst [vmem:[%s6862_s7 + $0x690] sm:$0xff] %v1191_v18 }
  0xea   : > { %v1195_v20 = vld [vmem:[%s6854_s6 + $0x1a80] sm:$0xff]  ;;  %1194 = vst [vmem:[%s6862_s7 + $0x698] sm:$0xff] %v1193_v19 }
  0xeb   : > { %1196 = vst [vmem:[%s6862_s7 + $0x6a0] sm:$0xff] %v1195_v20  ;;  %v1197_v21 = vld [vmem:[%s6854_s6 + $0x1aa0] sm:$0xff] }
  0xec   : > { %v1199_v22 = vld [vmem:[%s6854_s6 + $0x1ac0] sm:$0xff]  ;;  %1198 = vst [vmem:[%s6862_s7 + $0x6a8] sm:$0xff] %v1197_v21 }
  0xed   : > { %v1201_v23 = vld [vmem:[%s6854_s6 + $0x1ae0] sm:$0xff]  ;;  %1200 = vst [vmem:[%s6862_s7 + $0x6b0] sm:$0xff] %v1199_v22 }
  0xee   : > { %1202 = vst [vmem:[%s6862_s7 + $0x6b8] sm:$0xff] %v1201_v23  ;;  %v1203_v24 = vld [vmem:[%s6854_s6 + $0x1b00] sm:$0xff] }
  0xef   : > { %v1205_v25 = vld [vmem:[%s6854_s6 + $0x1b20] sm:$0xff]  ;;  %1204 = vst [vmem:[%s6862_s7 + $0x6c0] sm:$0xff] %v1203_v24 }
  0xf0   : > { %v1207_v26 = vld [vmem:[%s6854_s6 + $0x1b40] sm:$0xff]  ;;  %1206 = vst [vmem:[%s6862_s7 + $0x6c8] sm:$0xff] %v1205_v25 }
  0xf1   : > { %1208 = vst [vmem:[%s6862_s7 + $0x6d0] sm:$0xff] %v1207_v26  ;;  %v1209_v27 = vld [vmem:[%s6854_s6 + $0x1b60] sm:$0xff] }
  0xf2   : > { %v1211_v28 = vld [vmem:[%s6854_s6 + $0x1b80] sm:$0xff]  ;;  %1210 = vst [vmem:[%s6862_s7 + $0x6d8] sm:$0xff] %v1209_v27 }
  0xf3   : > { %v1213_v29 = vld [vmem:[%s6854_s6 + $0x1ba0] sm:$0xff]  ;;  %1212 = vst [vmem:[%s6862_s7 + $0x6e0] sm:$0xff] %v1211_v28 }
  0xf4   : > { %1214 = vst [vmem:[%s6862_s7 + $0x6e8] sm:$0xff] %v1213_v29  ;;  %v1215_v30 = vld [vmem:[%s6854_s6 + $0x1bc0] sm:$0xff] }
  0xf5   : > { %v1217_v31 = vld [vmem:[%s6854_s6 + $0x1be0] sm:$0xff]  ;;  %1216 = vst [vmem:[%s6862_s7 + $0x6f0] sm:$0xff] %v1215_v30 }
  0xf6   : > { %v1219_v32 = vld [vmem:[%s6854_s6 + $0x1c00] sm:$0xff]  ;;  %1218 = vst [vmem:[%s6862_s7 + $0x6f8] sm:$0xff] %v1217_v31 }
  0xf7   : > { %1220 = vst [vmem:[%s6862_s7 + $0x700] sm:$0xff] %v1219_v32  ;;  %v1221_v33 = vld [vmem:[%s6854_s6 + $0x1c20] sm:$0xff] }
  0xf8   : > { %v1223_v34 = vld [vmem:[%s6854_s6 + $0x1c40] sm:$0xff]  ;;  %1222 = vst [vmem:[%s6862_s7 + $0x708] sm:$0xff] %v1221_v33 }
  0xf9   : > { %v1225_v35 = vld [vmem:[%s6854_s6 + $0x1c60] sm:$0xff]  ;;  %1224 = vst [vmem:[%s6862_s7 + $0x710] sm:$0xff] %v1223_v34 }
  0xfa   : > { %1226 = vst [vmem:[%s6862_s7 + $0x718] sm:$0xff] %v1225_v35  ;;  %v1227_v36 = vld [vmem:[%s6854_s6 + $0x1c80] sm:$0xff] }
  0xfb   : > { %v1229_v37 = vld [vmem:[%s6854_s6 + $0x1ca0] sm:$0xff]  ;;  %1228 = vst [vmem:[%s6862_s7 + $0x720] sm:$0xff] %v1227_v36 }
  0xfc   : > { %v1231_v38 = vld [vmem:[%s6854_s6 + $0x1cc0] sm:$0xff]  ;;  %1230 = vst [vmem:[%s6862_s7 + $0x728] sm:$0xff] %v1229_v37 }
  0xfd   : > { %1232 = vst [vmem:[%s6862_s7 + $0x730] sm:$0xff] %v1231_v38  ;;  %v1233_v39 = vld [vmem:[%s6854_s6 + $0x1ce0] sm:$0xff] }
  0xfe   : > { %v1235_v40 = vld [vmem:[%s6854_s6 + $0x1d00] sm:$0xff]  ;;  %1234 = vst [vmem:[%s6862_s7 + $0x738] sm:$0xff] %v1233_v39 }
  0xff   : > { %v1237_v41 = vld [vmem:[%s6854_s6 + $0x1d20] sm:$0xff]  ;;  %1236 = vst [vmem:[%s6862_s7 + $0x740] sm:$0xff] %v1235_v40 }
 0x100   : > { %1238 = vst [vmem:[%s6862_s7 + $0x748] sm:$0xff] %v1237_v41  ;;  %v1239_v42 = vld [vmem:[%s6854_s6 + $0x1d40] sm:$0xff] }
 0x101   : > { %v1241_v43 = vld [vmem:[%s6854_s6 + $0x1d60] sm:$0xff]  ;;  %1240 = vst [vmem:[%s6862_s7 + $0x750] sm:$0xff] %v1239_v42 }
 0x102   : > { %v1243_v44 = vld [vmem:[%s6854_s6 + $0x1d80] sm:$0xff]  ;;  %1242 = vst [vmem:[%s6862_s7 + $0x758] sm:$0xff] %v1241_v43 }
 0x103   : > { %1244 = vst [vmem:[%s6862_s7 + $0x760] sm:$0xff] %v1243_v44  ;;  %v1245_v45 = vld [vmem:[%s6854_s6 + $0x1da0] sm:$0xff] }
 0x104   : > { %v1247_v46 = vld [vmem:[%s6854_s6 + $0x1dc0] sm:$0xff]  ;;  %1246 = vst [vmem:[%s6862_s7 + $0x768] sm:$0xff] %v1245_v45 }
 0x105   : > { %v1249_v47 = vld [vmem:[%s6854_s6 + $0x1de0] sm:$0xff]  ;;  %1248 = vst [vmem:[%s6862_s7 + $0x770] sm:$0xff] %v1247_v46 }
 0x106   : > { %1250 = vst [vmem:[%s6862_s7 + $0x778] sm:$0xff] %v1249_v47  ;;  %v1251_v48 = vld [vmem:[%s6854_s6 + $0x1e00] sm:$0xff] }
 0x107   : > { %v1253_v49 = vld [vmem:[%s6854_s6 + $0x1e20] sm:$0xff]  ;;  %1252 = vst [vmem:[%s6862_s7 + $0x780] sm:$0xff] %v1251_v48 }
 0x108   : > { %v1255_v50 = vld [vmem:[%s6854_s6 + $0x1e40] sm:$0xff]  ;;  %1254 = vst [vmem:[%s6862_s7 + $0x788] sm:$0xff] %v1253_v49 }
 0x109   : > { %1256 = vst [vmem:[%s6862_s7 + $0x790] sm:$0xff] %v1255_v50  ;;  %v1257_v51 = vld [vmem:[%s6854_s6 + $0x1e60] sm:$0xff] }
 0x10a   : > { %v1259_v52 = vld [vmem:[%s6854_s6 + $0x1e80] sm:$0xff]  ;;  %1258 = vst [vmem:[%s6862_s7 + $0x798] sm:$0xff] %v1257_v51 }
 0x10b   : > { %v1261_v53 = vld [vmem:[%s6854_s6 + $0x1ea0] sm:$0xff]  ;;  %1260 = vst [vmem:[%s6862_s7 + $0x7a0] sm:$0xff] %v1259_v52 }
 0x10c   : > { %1262 = vst [vmem:[%s6862_s7 + $0x7a8] sm:$0xff] %v1261_v53  ;;  %v1263_v54 = vld [vmem:[%s6854_s6 + $0x1ec0] sm:$0xff] }
 0x10d   : > { %v1265_v55 = vld [vmem:[%s6854_s6 + $0x1ee0] sm:$0xff]  ;;  %1264 = vst [vmem:[%s6862_s7 + $0x7b0] sm:$0xff] %v1263_v54 }
 0x10e   : > { %v1267_v56 = vld [vmem:[%s6854_s6 + $0x1f00] sm:$0xff]  ;;  %1266 = vst [vmem:[%s6862_s7 + $0x7b8] sm:$0xff] %v1265_v55 }
 0x10f   : > { %1268 = vst [vmem:[%s6862_s7 + $0x7c0] sm:$0xff] %v1267_v56  ;;  %v1269_v57 = vld [vmem:[%s6854_s6 + $0x1f20] sm:$0xff] }
 0x110   : > { %v1271_v58 = vld [vmem:[%s6854_s6 + $0x1f40] sm:$0xff]  ;;  %1270 = vst [vmem:[%s6862_s7 + $0x7c8] sm:$0xff] %v1269_v57 }
 0x111   : > { %v1273_v59 = vld [vmem:[%s6854_s6 + $0x1f60] sm:$0xff]  ;;  %1272 = vst [vmem:[%s6862_s7 + $0x7d0] sm:$0xff] %v1271_v58 }
 0x112   : > { %1274 = vst [vmem:[%s6862_s7 + $0x7d8] sm:$0xff] %v1273_v59  ;;  %v1275_v60 = vld [vmem:[%s6854_s6 + $0x1f80] sm:$0xff] }
 0x113   : > { %v1277_v61 = vld [vmem:[%s6854_s6 + $0x1fa0] sm:$0xff]  ;;  %1276 = vst [vmem:[%s6862_s7 + $0x7e0] sm:$0xff] %v1275_v60 }
 0x114   : > { %v1279_v62 = vld [vmem:[%s6854_s6 + $0x1fc0] sm:$0xff]  ;;  %1278 = vst [vmem:[%s6862_s7 + $0x7e8] sm:$0xff] %v1277_v61 }
 0x115   : > { %1280 = vst [vmem:[%s6862_s7 + $0x7f0] sm:$0xff] %v1279_v62  ;;  %v1281_v63 = vld [vmem:[%s6854_s6 + $0x1fe0] sm:$0xff] }
 0x116   : > { %v1283_v0 = vld [vmem:[%s6854_s6 + $0x2000] sm:$0xff]  ;;  %1282 = vst [vmem:[%s6862_s7 + $0x7f8] sm:$0xff] %v1281_v63 }
 0x117   : > { %v1285_v1 = vld [vmem:[%s6854_s6 + $0x2020] sm:$0xff]  ;;  %1284 = vst [vmem:[%s6862_s7 + $0x800] sm:$0xff] %v1283_v0 }
 0x118   : > { %1286 = vst [vmem:[%s6862_s7 + $0x808] sm:$0xff] %v1285_v1  ;;  %v1287_v2 = vld [vmem:[%s6854_s6 + $0x2040] sm:$0xff] }
 0x119   : > { %v1289_v3 = vld [vmem:[%s6854_s6 + $0x2060] sm:$0xff]  ;;  %1288 = vst [vmem:[%s6862_s7 + $0x810] sm:$0xff] %v1287_v2 }
 0x11a   : > { %v1291_v4 = vld [vmem:[%s6854_s6 + $0x2080] sm:$0xff]  ;;  %1290 = vst [vmem:[%s6862_s7 + $0x818] sm:$0xff] %v1289_v3 }
 0x11b   : > { %1292 = vst [vmem:[%s6862_s7 + $0x820] sm:$0xff] %v1291_v4  ;;  %v1293_v5 = vld [vmem:[%s6854_s6 + $0x20a0] sm:$0xff] }
 0x11c   : > { %v1295_v6 = vld [vmem:[%s6854_s6 + $0x20c0] sm:$0xff]  ;;  %1294 = vst [vmem:[%s6862_s7 + $0x828] sm:$0xff] %v1293_v5 }
 0x11d   : > { %v1297_v7 = vld [vmem:[%s6854_s6 + $0x20e0] sm:$0xff]  ;;  %1296 = vst [vmem:[%s6862_s7 + $0x830] sm:$0xff] %v1295_v6 }
 0x11e   : > { %1298 = vst [vmem:[%s6862_s7 + $0x838] sm:$0xff] %v1297_v7  ;;  %v1299_v8 = vld [vmem:[%s6854_s6 + $0x2100] sm:$0xff] }
 0x11f   : > { %v1301_v9 = vld [vmem:[%s6854_s6 + $0x2120] sm:$0xff]  ;;  %1300 = vst [vmem:[%s6862_s7 + $0x840] sm:$0xff] %v1299_v8 }
 0x120   : > { %v1303_v10 = vld [vmem:[%s6854_s6 + $0x2140] sm:$0xff]  ;;  %1302 = vst [vmem:[%s6862_s7 + $0x848] sm:$0xff] %v1301_v9 }
 0x121   : > { %1304 = vst [vmem:[%s6862_s7 + $0x850] sm:$0xff] %v1303_v10  ;;  %v1305_v11 = vld [vmem:[%s6854_s6 + $0x2160] sm:$0xff] }
 0x122   : > { %v1307_v12 = vld [vmem:[%s6854_s6 + $0x2180] sm:$0xff]  ;;  %1306 = vst [vmem:[%s6862_s7 + $0x858] sm:$0xff] %v1305_v11 }
 0x123   : > { %v1309_v13 = vld [vmem:[%s6854_s6 + $0x21a0] sm:$0xff]  ;;  %1308 = vst [vmem:[%s6862_s7 + $0x860] sm:$0xff] %v1307_v12 }
 0x124   : > { %1310 = vst [vmem:[%s6862_s7 + $0x868] sm:$0xff] %v1309_v13  ;;  %v1311_v14 = vld [vmem:[%s6854_s6 + $0x21c0] sm:$0xff] }
 0x125   : > { %v1313_v15 = vld [vmem:[%s6854_s6 + $0x21e0] sm:$0xff]  ;;  %1312 = vst [vmem:[%s6862_s7 + $0x870] sm:$0xff] %v1311_v14 }
 0x126   : > { %v1315_v16 = vld [vmem:[%s6854_s6 + $0x2200] sm:$0xff]  ;;  %1314 = vst [vmem:[%s6862_s7 + $0x878] sm:$0xff] %v1313_v15 }
 0x127   : > { %1316 = vst [vmem:[%s6862_s7 + $0x880] sm:$0xff] %v1315_v16  ;;  %v1317_v17 = vld [vmem:[%s6854_s6 + $0x2220] sm:$0xff] }
 0x128   : > { %v1319_v18 = vld [vmem:[%s6854_s6 + $0x2240] sm:$0xff]  ;;  %1318 = vst [vmem:[%s6862_s7 + $0x888] sm:$0xff] %v1317_v17 }
 0x129   : > { %v1321_v19 = vld [vmem:[%s6854_s6 + $0x2260] sm:$0xff]  ;;  %1320 = vst [vmem:[%s6862_s7 + $0x890] sm:$0xff] %v1319_v18 }
 0x12a   : > { %1322 = vst [vmem:[%s6862_s7 + $0x898] sm:$0xff] %v1321_v19  ;;  %v1323_v20 = vld [vmem:[%s6854_s6 + $0x2280] sm:$0xff] }
 0x12b   : > { %v1325_v21 = vld [vmem:[%s6854_s6 + $0x22a0] sm:$0xff]  ;;  %1324 = vst [vmem:[%s6862_s7 + $0x8a0] sm:$0xff] %v1323_v20 }
 0x12c   : > { %v1327_v22 = vld [vmem:[%s6854_s6 + $0x22c0] sm:$0xff]  ;;  %1326 = vst [vmem:[%s6862_s7 + $0x8a8] sm:$0xff] %v1325_v21 }
 0x12d   : > { %1328 = vst [vmem:[%s6862_s7 + $0x8b0] sm:$0xff] %v1327_v22  ;;  %v1329_v23 = vld [vmem:[%s6854_s6 + $0x22e0] sm:$0xff] }
 0x12e   : > { %v1331_v24 = vld [vmem:[%s6854_s6 + $0x2300] sm:$0xff]  ;;  %1330 = vst [vmem:[%s6862_s7 + $0x8b8] sm:$0xff] %v1329_v23 }
 0x12f   : > { %v1333_v25 = vld [vmem:[%s6854_s6 + $0x2320] sm:$0xff]  ;;  %1332 = vst [vmem:[%s6862_s7 + $0x8c0] sm:$0xff] %v1331_v24 }
 0x130   : > { %1334 = vst [vmem:[%s6862_s7 + $0x8c8] sm:$0xff] %v1333_v25  ;;  %v1335_v26 = vld [vmem:[%s6854_s6 + $0x2340] sm:$0xff] }
 0x131   : > { %v1337_v27 = vld [vmem:[%s6854_s6 + $0x2360] sm:$0xff]  ;;  %1336 = vst [vmem:[%s6862_s7 + $0x8d0] sm:$0xff] %v1335_v26 }
 0x132   : > { %v1339_v28 = vld [vmem:[%s6854_s6 + $0x2380] sm:$0xff]  ;;  %1338 = vst [vmem:[%s6862_s7 + $0x8d8] sm:$0xff] %v1337_v27 }
 0x133   : > { %1340 = vst [vmem:[%s6862_s7 + $0x8e0] sm:$0xff] %v1339_v28  ;;  %v1341_v29 = vld [vmem:[%s6854_s6 + $0x23a0] sm:$0xff] }
 0x134   : > { %v1343_v30 = vld [vmem:[%s6854_s6 + $0x23c0] sm:$0xff]  ;;  %1342 = vst [vmem:[%s6862_s7 + $0x8e8] sm:$0xff] %v1341_v29 }
 0x135   : > { %v1345_v31 = vld [vmem:[%s6854_s6 + $0x23e0] sm:$0xff]  ;;  %1344 = vst [vmem:[%s6862_s7 + $0x8f0] sm:$0xff] %v1343_v30 }
 0x136   : > { %1346 = vst [vmem:[%s6862_s7 + $0x8f8] sm:$0xff] %v1345_v31 }
 0x137 PF: > { %p5285_p10 = scmp.ge.s32.totalorder %s6770_s18, 1  ;;  %p1367_p11 = scmp.lt.s32.totalorder %s6770_s18, 5 }
 0x139   : > { %p1368_p12 = pnand %p5285_p10, %p1367_p11 }
 0x13a   : > { %s7437_s8 = sand.u32 (!%p1368_p12), 1, %s6762_s16   ;;  %v6158_v32 = vld [vmem:[%s8422_s0 + $0x4] ss:$72 sps:$4 sm:$0xff] (!%p1368_p12)   ;;  %s5287_s11 = sshll.u32 (!%p1368_p12), %s6822_s19, 1 }
 0x13b   : > { %1371 = sbr.rel (%p1368_p12) target bundleno = 905 (0x389), region = 70  ;;  %v6161_v33 = vld [vmem:[%s8422_s0 + $0x24] ss:$72 sps:$4 sm:$0xff] (!%p1368_p12)   ;;  %4043 = vmatprep.mubr.bf16.mxu1 (!%p1368_p12), %v6158_v32  ;;  %p1409_p13 = scmp.lt.s32.totalorder (!%p1368_p12), %s5287_s11, 7 }
 0x13c   : > { %s6017_s9 = smul.u32 (!%p1368_p12), 2304, %s7437_s8  ;;  %4495 = vmatprep.mubr.bf16.mxu0 (!%p1368_p12), %v6161_v33  ;;  %s5286_s28 = sshll.u32 (!%p1368_p12), %s7437_s8, 8 }
 0x13d   : > { %s8266_s29 = scalar_lea.vmem (!%p1368_p12), [#allocation3], %s5286_s28  ;;  %s5727_s30 = sshll.u32 (!%p1368_p12), %s6822_s19, 8 }
 0x13e   : > { %s7446_s14 = scalar_lea.vmem (!%p1368_p12), [#allocation2], %s6017_s9  ;;  %s5194_s5 = sshll.u32 (!%p1368_p12), %s8266_s29, 4  ;;  %s8373_s5 = int_to_ptr.vmem [resolvable:$true] %s5194_s5 }
 0x13f   : > { %v6060_v34 = vld [vmem:[%s7446_s14 + $0x4] ss:$8 sps:$4 sm:$0xff] (!%p1368_p12)   ;;  %v6064_v36 = vld [vmem:[%s7446_s14] ss:$8 sps:$4 sm:$0xff] (!%p1368_p12)   ;;  %v6066_v38 = vld [vmem:[%s7446_s14 + $0x14] ss:$8 sps:$4 sm:$0xff] (!%p1368_p12)   ;;  %s8369_s6 = scalar_lea.hbm (!%p1368_p12), %s8426_s4, %s5727_s30 }
 0x140   : > { %v6062_v35 = vld [vmem:[%s7446_s14 + $0x404] ss:$8 sps:$4 sm:$0xff] (!%p1368_p12)   ;;  %4011 = vmatprep.subr.bf16.mxu1 (!%p1368_p12), %v6060_v34  ;;  %v6065_v37 = vld [vmem:[%s7446_s14 + $0x400] ss:$8 sps:$4 sm:$0xff] (!%p1368_p12)   ;;  %v6068_v39 = vld [vmem:[%s7446_s14 + $0x414] ss:$8 sps:$4 sm:$0xff] (!%p1368_p12)  }
 0x141   : > { %4463 = vmatprep.subr.bf16.mxu0 (!%p1368_p12), %v6062_v35  ;;  %4012 = vmatpush1.bf16.msra.mxu1 (!%p1368_p12), %v6064_v36  ;;  %v6070_v40 = vld [vmem:[%s7446_s14 + $0x10] ss:$8 sps:$4 sm:$0xff] (!%p1368_p12)   ;;  %v6072_v42 = vld [vmem:[%s7446_s14 + $0x24] ss:$8 sps:$4 sm:$0xff] (!%p1368_p12)   ;;  %v6076_v44 = vld [vmem:[%s7446_s14 + $0x20] ss:$8 sps:$4 sm:$0xff] (!%p1368_p12)  }
 0x142   : > { %4464 = vmatpush1.bf16.msra.mxu0 %v6065_v37  ;;  %4013 = vmatprep.subr.bf16.mxu1 %v6066_v38  ;;  %v6071_v41 = vld [vmem:[%s7446_s14 + $0x410] ss:$8 sps:$4 sm:$0xff]   ;;  %v6074_v43 = vld [vmem:[%s7446_s14 + $0x424] ss:$8 sps:$4 sm:$0xff]   ;;  %v6077_v45 = vld [vmem:[%s7446_s14 + $0x420] ss:$8 sps:$4 sm:$0xff]  }
 0x143   : > { %4465 = vmatprep.subr.bf16.mxu0 %v6068_v39  ;;  %v6078_v46 = vld [vmem:[%s7446_s14 + $0x34] ss:$8 sps:$4 sm:$0xff]   ;;  %v6082_v48 = vld [vmem:[%s7446_s14 + $0x30] ss:$8 sps:$4 sm:$0xff]   ;;  %v6084_v50 = vld [vmem:[%s7446_s14 + $0x44] ss:$8 sps:$4 sm:$0xff]  }
 0x144   : > { %v6080_v47 = vld [vmem:[%s7446_s14 + $0x434] ss:$8 sps:$4 sm:$0xff]   ;;  %v6083_v49 = vld [vmem:[%s7446_s14 + $0x430] ss:$8 sps:$4 sm:$0xff]   ;;  %v6086_v51 = vld [vmem:[%s7446_s14 + $0x444] ss:$8 sps:$4 sm:$0xff]  }
 0x145   : > { %4014 = vmatpush1.bf16.msra.mxu1 %v6070_v40  ;;  %v6088_v52 = vld [vmem:[%s7446_s14 + $0x40] ss:$8 sps:$4 sm:$0xff]   ;;  %v6090_v54 = vld [vmem:[%s7446_s14 + $0x54] ss:$8 sps:$4 sm:$0xff]   ;;  %v6094_v56 = vld [vmem:[%s7446_s14 + $0x50] ss:$8 sps:$4 sm:$0xff]  }
 0x146   : > { %4466 = vmatpush1.bf16.msra.mxu0 %v6071_v41  ;;  %4015 = vmatprep.subr.bf16.mxu1 %v6072_v42  ;;  %v6089_v53 = vld [vmem:[%s7446_s14 + $0x440] ss:$8 sps:$4 sm:$0xff]   ;;  %v6092_v55 = vld [vmem:[%s7446_s14 + $0x454] ss:$8 sps:$4 sm:$0xff]   ;;  %v6095_v57 = vld [vmem:[%s7446_s14 + $0x450] ss:$8 sps:$4 sm:$0xff]  }
 0x147   : > { %4467 = vmatprep.subr.bf16.mxu0 %v6074_v43  ;;  %v6096_v58 = vld [vmem:[%s7446_s14 + $0x64] ss:$8 sps:$4 sm:$0xff]   ;;  %v6100_v60 = vld [vmem:[%s7446_s14 + $0x60] ss:$8 sps:$4 sm:$0xff]   ;;  %v6102_v62 = vld [vmem:[%s7446_s14 + $0x74] ss:$8 sps:$4 sm:$0xff]  }
 0x148   : > { %v6098_v59 = vld [vmem:[%s7446_s14 + $0x464] ss:$8 sps:$4 sm:$0xff]   ;;  %v6101_v61 = vld [vmem:[%s7446_s14 + $0x460] ss:$8 sps:$4 sm:$0xff]   ;;  %v6104_v63 = vld [vmem:[%s7446_s14 + $0x474] ss:$8 sps:$4 sm:$0xff]  }
 0x149   : > { %4016 = vmatpush1.bf16.msra.mxu1 %v6076_v44  ;;  %v6106_v0 = vld [vmem:[%s7446_s14 + $0x70] ss:$8 sps:$4 sm:$0xff]   ;;  %v6108_v2 = vld [vmem:[%s7446_s14 + $0x84] ss:$8 sps:$4 sm:$0xff]   ;;  %v6112_v4 = vld [vmem:[%s7446_s14 + $0x80] ss:$8 sps:$4 sm:$0xff]  }
 0x14a   : > { %4468 = vmatpush1.bf16.msra.mxu0 %v6077_v45  ;;  %4017 = vmatprep.subr.bf16.mxu1 %v6078_v46  ;;  %v6107_v1 = vld [vmem:[%s7446_s14 + $0x470] ss:$8 sps:$4 sm:$0xff]   ;;  %v6110_v3 = vld [vmem:[%s7446_s14 + $0x484] ss:$8 sps:$4 sm:$0xff]   ;;  %v6113_v5 = vld [vmem:[%s7446_s14 + $0x480] ss:$8 sps:$4 sm:$0xff]  }
 0x14b   : > { %4469 = vmatprep.subr.bf16.mxu0 %v6080_v47  ;;  %v6114_v6 = vld [vmem:[%s7446_s14 + $0x94] ss:$8 sps:$4 sm:$0xff]   ;;  %v6118_v8 = vld [vmem:[%s7446_s14 + $0x90] ss:$8 sps:$4 sm:$0xff]   ;;  %v6120_v10 = vld [vmem:[%s7446_s14 + $0xa4] ss:$8 sps:$4 sm:$0xff]  }
 0x14c   : > { %v6116_v7 = vld [vmem:[%s7446_s14 + $0x494] ss:$8 sps:$4 sm:$0xff]   ;;  %v6119_v9 = vld [vmem:[%s7446_s14 + $0x490] ss:$8 sps:$4 sm:$0xff]   ;;  %v6122_v11 = vld [vmem:[%s7446_s14 + $0x4a4] ss:$8 sps:$4 sm:$0xff]  }
 0x14d   : > { %4018 = vmatpush1.bf16.msra.mxu1 %v6082_v48  ;;  %v6124_v12 = vld [vmem:[%s7446_s14 + $0xa0] ss:$8 sps:$4 sm:$0xff]   ;;  %v6126_v14 = vld [vmem:[%s7446_s14 + $0xb4] ss:$8 sps:$4 sm:$0xff]   ;;  %v6130_v16 = vld [vmem:[%s7446_s14 + $0xb0] ss:$8 sps:$4 sm:$0xff]  }
 0x14e   : > { %4470 = vmatpush1.bf16.msra.mxu0 %v6083_v49  ;;  %4019 = vmatprep.subr.bf16.mxu1 %v6084_v50  ;;  %v6125_v13 = vld [vmem:[%s7446_s14 + $0x4a0] ss:$8 sps:$4 sm:$0xff]   ;;  %v6128_v15 = vld [vmem:[%s7446_s14 + $0x4b4] ss:$8 sps:$4 sm:$0xff]   ;;  %v6131_v17 = vld [vmem:[%s7446_s14 + $0x4b0] ss:$8 sps:$4 sm:$0xff]  }
 0x14f   : > { %4471 = vmatprep.subr.bf16.mxu0 %v6086_v51  ;;  %v6132_v18 = vld [vmem:[%s7446_s14 + $0xc4] ss:$8 sps:$4 sm:$0xff]   ;;  %v6136_v20 = vld [vmem:[%s7446_s14 + $0xc0] ss:$8 sps:$4 sm:$0xff]   ;;  %v6138_v22 = vld [vmem:[%s7446_s14 + $0xd4] ss:$8 sps:$4 sm:$0xff]  }
 0x150   : > { %v6134_v19 = vld [vmem:[%s7446_s14 + $0x4c4] ss:$8 sps:$4 sm:$0xff]   ;;  %v6137_v21 = vld [vmem:[%s7446_s14 + $0x4c0] ss:$8 sps:$4 sm:$0xff]   ;;  %v6140_v23 = vld [vmem:[%s7446_s14 + $0x4d4] ss:$8 sps:$4 sm:$0xff]  }
 0x151   : > { %4020 = vmatpush1.bf16.msra.mxu1 %v6088_v52  ;;  %v6142_v24 = vld [vmem:[%s7446_s14 + $0xd0] ss:$8 sps:$4 sm:$0xff]   ;;  %v6144_v26 = vld [vmem:[%s7446_s14 + $0xe4] ss:$8 sps:$4 sm:$0xff]   ;;  %v6148_v28 = vld [vmem:[%s7446_s14 + $0xe0] ss:$8 sps:$4 sm:$0xff]  }
 0x152   : > { %4472 = vmatpush1.bf16.msra.mxu0 %v6089_v53  ;;  %4021 = vmatprep.subr.bf16.mxu1 %v6090_v54  ;;  %v6143_v25 = vld [vmem:[%s7446_s14 + $0x4d0] ss:$8 sps:$4 sm:$0xff]   ;;  %v6146_v27 = vld [vmem:[%s7446_s14 + $0x4e4] ss:$8 sps:$4 sm:$0xff]   ;;  %v6149_v29 = vld [vmem:[%s7446_s14 + $0x4e0] ss:$8 sps:$4 sm:$0xff]  }
 0x153   : > { %4473 = vmatprep.subr.bf16.mxu0 %v6092_v55  ;;  %v6150_v30 = vld [vmem:[%s7446_s14 + $0xf4] ss:$8 sps:$4 sm:$0xff]   ;;  %v6154_v32 = vld [vmem:[%s7446_s14 + $0xf0] ss:$8 sps:$4 sm:$0xff]   ;;  %v6164_v34 = vld [vmem:[%s7446_s14 + $0x104] ss:$8 sps:$4 sm:$0xff]  }
 0x154   : > { %v6152_v31 = vld [vmem:[%s7446_s14 + $0x4f4] ss:$8 sps:$4 sm:$0xff]   ;;  %v6155_v33 = vld [vmem:[%s7446_s14 + $0x4f0] ss:$8 sps:$4 sm:$0xff]   ;;  %v6167_v35 = vld [vmem:[%s7446_s14 + $0x504] ss:$8 sps:$4 sm:$0xff]  }
 0x155   : > { %4022 = vmatpush1.bf16.msra.mxu1 %v6094_v56  ;;  %v6156_v36 = vld [vmem:[%s8422_s0] ss:$72 sps:$4 sm:$0xff]   ;;  %v6170_v40 = vld [vmem:[%s7446_s14 + $0x114] ss:$8 sps:$4 sm:$0xff]   ;;  %v6168_v44 = vld [vmem:[%s7446_s14 + $0x110] ss:$8 sps:$4 sm:$0xff]  }
 0x156   : > { %4474 = vmatpush1.bf16.msra.mxu0 %v6095_v57  ;;  %4023 = vmatprep.subr.bf16.mxu1 %v6096_v58  ;;  %v6159_v37 = vld [vmem:[%s8422_s0 + $0x20] ss:$72 sps:$4 sm:$0xff]   ;;  %v6173_v41 = vld [vmem:[%s7446_s14 + $0x514] ss:$8 sps:$4 sm:$0xff]   ;;  %v6171_v45 = vld [vmem:[%s7446_s14 + $0x510] ss:$8 sps:$4 sm:$0xff]  }
 0x157   : > { %4475 = vmatprep.subr.bf16.mxu0 %v6098_v59  ;;  %v6162_v38 = vld [vmem:[%s7446_s14 + $0x100] ss:$8 sps:$4 sm:$0xff]   ;;  %v6174_v42 = vld [vmem:[%s8422_s0 + $0x94] ss:$72 sps:$4 sm:$0xff]   ;;  %v6181_v46 = vld [vmem:[%s7446_s14 + $0x124] ss:$8 sps:$4 sm:$0xff]  }
 0x158   : > { %v6165_v39 = vld [vmem:[%s7446_s14 + $0x500] ss:$8 sps:$4 sm:$0xff]   ;;  %v6176_v43 = vld [vmem:[%s8422_s0 + $0xb4] ss:$72 sps:$4 sm:$0xff]   ;;  %v6185_v47 = vld [vmem:[%s7446_s14 + $0x524] ss:$8 sps:$4 sm:$0xff]  }
 0x159   : > { %4024 = vmatpush1.bf16.msra.mxu1 %v6100_v60  ;;  %v6178_v48 = vld [vmem:[%s8422_s0 + $0x90] ss:$72 sps:$4 sm:$0xff]   ;;  %v6179_v49 = vld [vmem:[%s7446_s14 + $0x120] ss:$8 sps:$4 sm:$0xff]   ;;  %v6188_v52 = vld [vmem:[%s7446_s14 + $0x134] ss:$8 sps:$4 sm:$0xff]  }
 0x15a   : > { %4476 = vmatpush1.bf16.msra.mxu0 %v6101_v61  ;;  %4025 = vmatprep.subr.bf16.mxu1 %v6102_v62  ;;  %v6182_v50 = vld [vmem:[%s8422_s0 + $0xb0] ss:$72 sps:$4 sm:$0xff]   ;;  %v6183_v51 = vld [vmem:[%s7446_s14 + $0x520] ss:$8 sps:$4 sm:$0xff]   ;;  %v6191_v53 = vld [vmem:[%s7446_s14 + $0x534] ss:$8 sps:$4 sm:$0xff]  }
 0x15b   : > { %4477 = vmatprep.subr.bf16.mxu0 %v6104_v63  ;;  %v6192_v54 = vld [vmem:[%s8422_s0 + $0x124] ss:$72 sps:$4 sm:$0xff]   ;;  %v6186_v56 = vld [vmem:[%s7446_s14 + $0x130] ss:$8 sps:$4 sm:$0xff]   ;;  %v6196_v60 = vld [vmem:[%s8422_s0 + $0x120] ss:$72 sps:$4 sm:$0xff]  }
 0x15c   : > { %v6194_v55 = vld [vmem:[%s8422_s0 + $0x144] ss:$72 sps:$4 sm:$0xff]   ;;  %v6189_v57 = vld [vmem:[%s7446_s14 + $0x530] ss:$8 sps:$4 sm:$0xff]   ;;  %v6197_v61 = vld [vmem:[%s7446_s14 + $0x140] ss:$8 sps:$4 sm:$0xff]  }
 0x15d   : > { %4026 = vmatpush1.bf16.msra.mxu1 %v6106_v0  ;;  %v6199_v58 = vld [vmem:[%s7446_s14 + $0x144] ss:$8 sps:$4 sm:$0xff]   ;;  %v6200_v62 = vld [vmem:[%s8422_s0 + $0x140] ss:$72 sps:$4 sm:$0xff]   ;;  %v6206_v0 = vld [vmem:[%s7446_s14 + $0x154] ss:$8 sps:$4 sm:$0xff]  }
 0x15e   : > { %4478 = vmatpush1.bf16.msra.mxu0 %v6107_v1  ;;  %4027 = vmatprep.subr.bf16.mxu1 %v6108_v2  ;;  %v6203_v59 = vld [vmem:[%s7446_s14 + $0x544] ss:$8 sps:$4 sm:$0xff]   ;;  %v6201_v63 = vld [vmem:[%s7446_s14 + $0x540] ss:$8 sps:$4 sm:$0xff]   ;;  %v6209_v1 = vld [vmem:[%s7446_s14 + $0x554] ss:$8 sps:$4 sm:$0xff]  }
 0x15f   : > { %4479 = vmatprep.subr.bf16.mxu0 %v6110_v3  ;;  %v6210_v2 = vld [vmem:[%s8422_s0 + $0x1b4] ss:$72 sps:$4 sm:$0xff]   ;;  %s8434_s11 = smov (!%p1409_p13, %s5287_s11), 7  ;;  %s5181_s7 = scalar_lea.sflag [#allocation4], %s7437_s8 }
 0x160   : > { %v6212_v3 = vld [vmem:[%s8422_s0 + $0x1d4] ss:$72 sps:$4 sm:$0xff]   ;;  %s1411_s20 = scalar_lea.vmem %s8424_s2, %s8434_s11  ;;  %s1416_s27 = scalar_lea.vmem %s8425_s3, %s8434_s11 }
 0x161   : > { %4028 = vmatpush1.bf16.msra.mxu1 %v6112_v4  ;;  %v6204_v4 = vld [vmem:[%s7446_s14 + $0x150] ss:$8 sps:$4 sm:$0xff]   ;;  %s6708_s9 = scalar_lea.vmem %s8373_s5, 4096  ;;  %s6772_s10 = smov [#allocation3]  }
 0x162   : > { %4480 = vmatpush1.bf16.msra.mxu0 %v6113_v5  ;;  %4029 = vmatprep.subr.bf16.mxu1 %v6114_v6  ;;  %v6207_v5 = vld [vmem:[%s7446_s14 + $0x550] ss:$8 sps:$4 sm:$0xff]   ;;  %v6217_v6 = vld [vmem:[%s7446_s14 + $0x164] ss:$8 sps:$4 sm:$0xff]   ;;  %p6709_p0 = scmp.ne.s32.totalorder %s8373_s5, %s6708_s9  ;;  %s6712_s11 = sshll.u32 %s6772_s10, 4  ;;  %s6713_s11 = int_to_ptr.vmem [resolvable:$false] %s6712_s11 }
 0x163   : > { %4481 = vmatprep.subr.bf16.mxu0 %v6116_v7  ;;  %v6221_v7 = vld [vmem:[%s7446_s14 + $0x564] ss:$8 sps:$4 sm:$0xff]   ;;  %s6714_s12 = scalar_lea.vmem %s6713_s11, 8192  ;;  %p6715_p3 = scmp.lt.s32.totalorder %s8373_s5, %s6713_s11 }
 0x164   : > { %p6710_p1 = pnand %p6709_p0, %p6840_p6  ;;  %p6716_p4 = scmp.lt.s32.totalorder %s6714_s12, %s6708_s9 }
 0x165   : > { %4030 = vmatpush1.bf16.msra.mxu1 %v6118_v8  ;;  %v6214_v8 = vld [vmem:[%s8422_s0 + $0x1b0] ss:$72 sps:$4 sm:$0xff]  }
 0x166   : > { %4482 = vmatpush1.bf16.msra.mxu0 %v6119_v9  ;;  %4031 = vmatprep.subr.bf16.mxu1 %v6120_v10  ;;  %v6215_v9 = vld [vmem:[%s7446_s14 + $0x160] ss:$8 sps:$4 sm:$0xff]   ;;  %v6218_v10 = vld [vmem:[%s8422_s0 + $0x1d0] ss:$72 sps:$4 sm:$0xff]   ;;  %p6711_p2 = pneg %p6710_p1  ;;  %p6717_p5 = por %p6716_p4, %p6715_p3 }
 0x167   : > { %4483 = vmatprep.subr.bf16.mxu0 %v6122_v11  ;;  %v6219_v11 = vld [vmem:[%s7446_s14 + $0x560] ss:$8 sps:$4 sm:$0xff]  }
 0x168   : > { %p6718_p7 = pnand %p6717_p5, %p6711_p2 }
 0x169   : > { %4032 = vmatpush1.bf16.msra.mxu1 %v6124_v12  ;;  %v6224_v12 = vld [vmem:[%s7446_s14 + $0x174] ss:$8 sps:$4 sm:$0xff]  }
 0x16a   : > { %4484 = vmatpush1.bf16.msra.mxu0 %v6125_v13  ;;  %4033 = vmatprep.subr.bf16.mxu1 %v6126_v14  ;;  %v6227_v13 = vld [vmem:[%s7446_s14 + $0x574] ss:$8 sps:$4 sm:$0xff]   ;;  %v6228_v14 = vld [vmem:[%s8422_s0 + $0x244] ss:$72 sps:$4 sm:$0xff]  }
 0x16b   : > { %4485 = vmatprep.subr.bf16.mxu0 %v6128_v15  ;;  %v6230_v15 = vld [vmem:[%s8422_s0 + $0x264] ss:$72 sps:$4 sm:$0xff]  }
 0x16d   : > { %4034 = vmatpush1.bf16.msra.mxu1 %v6130_v16  ;;  %v6222_v16 = vld [vmem:[%s7446_s14 + $0x170] ss:$8 sps:$4 sm:$0xff]  }
 0x16e   : > { %4486 = vmatpush1.bf16.msra.mxu0 %v6131_v17  ;;  %4035 = vmatprep.subr.bf16.mxu1 %v6132_v18  ;;  %v6225_v17 = vld [vmem:[%s7446_s14 + $0x570] ss:$8 sps:$4 sm:$0xff]   ;;  %v6235_v18 = vld [vmem:[%s7446_s14 + $0x184] ss:$8 sps:$4 sm:$0xff]  }
 0x16f   : > { %4487 = vmatprep.subr.bf16.mxu0 %v6134_v19  ;;  %v6239_v19 = vld [vmem:[%s7446_s14 + $0x584] ss:$8 sps:$4 sm:$0xff]  }
 0x171   : > { %4036 = vmatpush1.bf16.msra.mxu1 %v6136_v20  ;;  %v6232_v20 = vld [vmem:[%s8422_s0 + $0x240] ss:$72 sps:$4 sm:$0xff]  }
 0x172   : > { %4488 = vmatpush1.bf16.msra.mxu0 %v6137_v21  ;;  %4037 = vmatprep.subr.bf16.mxu1 %v6138_v22  ;;  %v6233_v21 = vld [vmem:[%s7446_s14 + $0x180] ss:$8 sps:$4 sm:$0xff]  }
 0x173   : > { %4489 = vmatprep.subr.bf16.mxu0 %v6140_v23  ;;  %v6236_v22 = vld [vmem:[%s8422_s0 + $0x260] ss:$72 sps:$4 sm:$0xff]  }
 0x174   : > { %v6237_v23 = vld [vmem:[%s7446_s14 + $0x580] ss:$8 sps:$4 sm:$0xff]  }
 0x175   : > { %4038 = vmatpush1.bf16.msra.mxu1 %v6142_v24  ;;  %v6242_v24 = vld [vmem:[%s7446_s14 + $0x194] ss:$8 sps:$4 sm:$0xff]  }
 0x176   : > { %4490 = vmatpush1.bf16.msra.mxu0 %v6143_v25  ;;  %4039 = vmatprep.subr.bf16.mxu1 %v6144_v26  ;;  %v6245_v25 = vld [vmem:[%s7446_s14 + $0x594] ss:$8 sps:$4 sm:$0xff]  }
 0x177   : > { %4491 = vmatprep.subr.bf16.mxu0 %v6146_v27  ;;  %v6246_v26 = vld [vmem:[%s8422_s0 + $0x2d4] ss:$72 sps:$4 sm:$0xff]  }
 0x178   : > { %v6248_v27 = vld [vmem:[%s8422_s0 + $0x2f4] ss:$72 sps:$4 sm:$0xff]  }
 0x179   : > { %4040 = vmatpush1.bf16.msra.mxu1 %v6148_v28  ;;  %v6240_v28 = vld [vmem:[%s7446_s14 + $0x190] ss:$8 sps:$4 sm:$0xff]  }
 0x17a   : > { %4492 = vmatpush1.bf16.msra.mxu0 %v6149_v29  ;;  %4041 = vmatprep.subr.bf16.mxu1 %v6150_v30  ;;  %v6243_v29 = vld [vmem:[%s7446_s14 + $0x590] ss:$8 sps:$4 sm:$0xff]   ;;  %v6253_v30 = vld [vmem:[%s7446_s14 + $0x1a4] ss:$8 sps:$4 sm:$0xff]  }
 0x17b   : > { %4493 = vmatprep.subr.bf16.mxu0 %v6152_v31  ;;  %v6257_v31 = vld [vmem:[%s7446_s14 + $0x5a4] ss:$8 sps:$4 sm:$0xff]  }
 0x17d   : > { %4042 = vmatpush1.bf16.msra.mxu1 %v6154_v32  ;;  %v6250_v32 = vld [vmem:[%s8422_s0 + $0x2d0] ss:$72 sps:$4 sm:$0xff]  }
 0x17e   : > { %4494 = vmatpush1.bf16.msra.mxu0 %v6155_v33  ;;  %4124 = vmatprep.subr.bf16.mxu1 %v6164_v34  ;;  %v6251_v33 = vld [vmem:[%s7446_s14 + $0x1a0] ss:$8 sps:$4 sm:$0xff]   ;;  %v6254_v34 = vld [vmem:[%s8422_s0 + $0x2f0] ss:$72 sps:$4 sm:$0xff]  }
 0x17f   : > { %4576 = vmatprep.subr.bf16.mxu0 %v6167_v35  ;;  %v6255_v35 = vld [vmem:[%s7446_s14 + $0x5a0] ss:$8 sps:$4 sm:$0xff]  }
 0x180   : > { %4044 = vmatmul.mubr.bf16.vlgmr.msra.gmra.mrb[0].mxu1 %v6156_v36  ;;  %v6260_v36 = vld [vmem:[%s7446_s14 + $0x1b4] ss:$8 sps:$4 sm:$0xff]  }
 0x181   : > { %4496 = vmatmul.mubr.bf16.vlgmr.msra.gmra.mrb[0].mxu0 %v6159_v37  ;;  %4125 = vmatpush1.bf16.msra.mxu1 %v6162_v38  ;;  %v6263_v37 = vld [vmem:[%s7446_s14 + $0x5b4] ss:$8 sps:$4 sm:$0xff]   ;;  %v6264_v38 = vld [vmem:[%s8422_s0 + $0x364] ss:$72 sps:$4 sm:$0xff]  }
 0x182   : > { %4577 = vmatpush1.bf16.msra.mxu0 %v6165_v39  ;;  %4126 = vmatprep.subr.bf16.mxu1 %v6170_v40  ;;  %v6266_v39 = vld [vmem:[%s8422_s0 + $0x384] ss:$72 sps:$4 sm:$0xff]   ;;  %v6258_v40 = vld [vmem:[%s7446_s14 + $0x1b0] ss:$8 sps:$4 sm:$0xff]  }
 0x183   : > { %4578 = vmatprep.subr.bf16.mxu0 %v6173_v41  ;;  %4053 = vmatprep.mubr.bf16.mxu1 %v6174_v42  ;;  %v6261_v41 = vld [vmem:[%s7446_s14 + $0x5b0] ss:$8 sps:$4 sm:$0xff]   ;;  %v6271_v42 = vld [vmem:[%s7446_s14 + $0x1c4] ss:$8 sps:$4 sm:$0xff]  }
 0x184   : > { %4505 = vmatprep.mubr.bf16.mxu0 %v6176_v43  ;;  %v6275_v43 = vld [vmem:[%s7446_s14 + $0x5c4] ss:$8 sps:$4 sm:$0xff]  }
 0x185   : > { %4127 = vmatpush1.bf16.msra.mxu1 %v6168_v44  ;;  %v6268_v44 = vld [vmem:[%s8422_s0 + $0x360] ss:$72 sps:$4 sm:$0xff]  }
 0x186   : > { %4579 = vmatpush1.bf16.msra.mxu0 %v6171_v45  ;;  %4128 = vmatprep.subr.bf16.mxu1 %v6181_v46  ;;  %v6269_v45 = vld [vmem:[%s7446_s14 + $0x1c0] ss:$8 sps:$4 sm:$0xff]  }
 0x187   : > { %4580 = vmatprep.subr.bf16.mxu0 %v6185_v47  ;;  %v6272_v46 = vld [vmem:[%s8422_s0 + $0x380] ss:$72 sps:$4 sm:$0xff]  }
 0x188   : > { %4054 = vmatmul.mubr.bf16.gmra.mrb[4].mxu1 %v6178_v48  ;;  %v6273_v47 = vld [vmem:[%s7446_s14 + $0x5c0] ss:$8 sps:$4 sm:$0xff]   ;;  %v6278_v48 = vld [vmem:[%s7446_s14 + $0x1d4] ss:$8 sps:$4 sm:$0xff]  }
 0x189   : > { %4506 = vmatmul.mubr.bf16.gmra.mrb[4].mxu0 %v6182_v50  ;;  %4129 = vmatpush1.bf16.msra.mxu1 %v6179_v49  ;;  %v6281_v49 = vld [vmem:[%s7446_s14 + $0x5d4] ss:$8 sps:$4 sm:$0xff]  }
 0x18a   : > { %4581 = vmatpush1.bf16.msra.mxu0 %v6183_v51  ;;  %4130 = vmatprep.subr.bf16.mxu1 %v6188_v52  ;;  %v6282_v50 = vld [vmem:[%s8422_s0 + $0x3f4] ss:$72 sps:$4 sm:$0xff]   ;;  %v6276_v52 = vld [vmem:[%s7446_s14 + $0x1d0] ss:$8 sps:$4 sm:$0xff]  }
 0x18b   : > { %4582 = vmatprep.subr.bf16.mxu0 %v6191_v53  ;;  %4063 = vmatprep.mubr.bf16.mxu1 %v6192_v54  ;;  %v6284_v51 = vld [vmem:[%s8422_s0 + $0x414] ss:$72 sps:$4 sm:$0xff]   ;;  %v6279_v53 = vld [vmem:[%s7446_s14 + $0x5d0] ss:$8 sps:$4 sm:$0xff]   ;;  %v6289_v54 = vld [vmem:[%s7446_s14 + $0x1e4] ss:$8 sps:$4 sm:$0xff]  }
 0x18c   : > { %4515 = vmatprep.mubr.bf16.mxu0 %v6194_v55  ;;  %v6293_v55 = vld [vmem:[%s7446_s14 + $0x5e4] ss:$8 sps:$4 sm:$0xff]  }
 0x18d   : > { %4131 = vmatpush1.bf16.msra.mxu1 %v6186_v56  ;;  %v6286_v56 = vld [vmem:[%s8422_s0 + $0x3f0] ss:$72 sps:$4 sm:$0xff]  }
 0x18e   : > { %4583 = vmatpush1.bf16.msra.mxu0 %v6189_v57  ;;  %4132 = vmatprep.subr.bf16.mxu1 %v6199_v58  ;;  %v6287_v57 = vld [vmem:[%s7446_s14 + $0x1e0] ss:$8 sps:$4 sm:$0xff]   ;;  %v6290_v58 = vld [vmem:[%s8422_s0 + $0x410] ss:$72 sps:$4 sm:$0xff]  }
 0x18f   : > { %4584 = vmatprep.subr.bf16.mxu0 %v6203_v59  ;;  %v6291_v59 = vld [vmem:[%s7446_s14 + $0x5e0] ss:$8 sps:$4 sm:$0xff]  }
 0x190   : > { %4064 = vmatmul.mubr.bf16.gmra.mrb[8].mxu1 %v6196_v60  ;;  %v6296_v60 = vld [vmem:[%s7446_s14 + $0x1f4] ss:$8 sps:$4 sm:$0xff]  }
 0x191   : > { %4516 = vmatmul.mubr.bf16.gmra.mrb[8].mxu0 %v6200_v62  ;;  %4133 = vmatpush1.bf16.msra.mxu1 %v6197_v61  ;;  %v6299_v61 = vld [vmem:[%s7446_s14 + $0x5f4] ss:$8 sps:$4 sm:$0xff]  }
 0x192   : > { %4585 = vmatpush1.bf16.msra.mxu0 %v6201_v63  ;;  %4134 = vmatprep.subr.bf16.mxu1 %v6206_v0  ;;  %v6302_v62 = vld [vmem:[%s8422_s0 + $0xc] ss:$72 sps:$4 sm:$0xff]   ;;  %v6294_v0 = vld [vmem:[%s7446_s14 + $0x1f0] ss:$8 sps:$4 sm:$0xff]  }
 0x193   : > { %4586 = vmatprep.subr.bf16.mxu0 %v6209_v1  ;;  %4073 = vmatprep.mubr.bf16.mxu1 %v6210_v2  ;;  %v6305_v63 = vld [vmem:[%s8422_s0 + $0x2c] ss:$72 sps:$4 sm:$0xff]   ;;  %v6297_v1 = vld [vmem:[%s7446_s14 + $0x5f0] ss:$8 sps:$4 sm:$0xff]  }
 0x194   : > { %4525 = vmatprep.mubr.bf16.mxu0 %v6212_v3  ;;  %v6308_v2 = vld [vmem:[%s7446_s14 + $0x204] ss:$8 sps:$4 sm:$0xff]  }
 0x195   : > { %4135 = vmatpush1.bf16.msra.mxu1 %v6204_v4  ;;  %v6311_v3 = vld [vmem:[%s7446_s14 + $0x604] ss:$8 sps:$4 sm:$0xff]   ;;  %v6300_v4 = vld [vmem:[%s8422_s0 + $0x8] ss:$72 sps:$4 sm:$0xff]  }
 0x196   : > { %4587 = vmatpush1.bf16.msra.mxu0 %v6207_v5  ;;  %4136 = vmatprep.subr.bf16.mxu1 %v6217_v6  ;;  %v6303_v5 = vld [vmem:[%s8422_s0 + $0x28] ss:$72 sps:$4 sm:$0xff]  }
 0x197   : > { %4588 = vmatprep.subr.bf16.mxu0 %v6221_v7  ;;  %v6306_v6 = vld [vmem:[%s7446_s14 + $0x200] ss:$8 sps:$4 sm:$0xff]  }
 0x198   : > { %4074 = vmatmul.mubr.bf16.gmra.mrb[12].mxu1 %v6214_v8  ;;  %v6309_v7 = vld [vmem:[%s7446_s14 + $0x600] ss:$8 sps:$4 sm:$0xff]   ;;  %v6314_v8 = vld [vmem:[%s7446_s14 + $0x214] ss:$8 sps:$4 sm:$0xff]  }
 0x199   : > { %4526 = vmatmul.mubr.bf16.gmra.mrb[12].mxu0 %v6218_v10  ;;  %4137 = vmatpush1.bf16.msra.mxu1 %v6215_v9  ;;  %v6317_v9 = vld [vmem:[%s7446_s14 + $0x614] ss:$8 sps:$4 sm:$0xff]  }
 0x19a   : > { %4589 = vmatpush1.bf16.msra.mxu0 %v6219_v11  ;;  %4138 = vmatprep.subr.bf16.mxu1 %v6224_v12  ;;  %v6318_v10 = vld [vmem:[%s8422_s0 + $0x9c] ss:$72 sps:$4 sm:$0xff]   ;;  %v6312_v12 = vld [vmem:[%s7446_s14 + $0x210] ss:$8 sps:$4 sm:$0xff]  }
 0x19b   : > { %4590 = vmatprep.subr.bf16.mxu0 %v6227_v13  ;;  %4083 = vmatprep.mubr.bf16.mxu1 %v6228_v14  ;;  %v6320_v11 = vld [vmem:[%s8422_s0 + $0xbc] ss:$72 sps:$4 sm:$0xff]   ;;  %v6315_v13 = vld [vmem:[%s7446_s14 + $0x610] ss:$8 sps:$4 sm:$0xff]  }
 0x19c   : > { %4535 = vmatprep.mubr.bf16.mxu0 %v6230_v15  ;;  %v6325_v14 = vld [vmem:[%s7446_s14 + $0x224] ss:$8 sps:$4 sm:$0xff]  }
 0x19d   : > { %4139 = vmatpush1.bf16.msra.mxu1 %v6222_v16  ;;  %v6329_v15 = vld [vmem:[%s7446_s14 + $0x624] ss:$8 sps:$4 sm:$0xff]   ;;  %v6322_v16 = vld [vmem:[%s8422_s0 + $0x98] ss:$72 sps:$4 sm:$0xff]  }
 0x19e   : > { %4591 = vmatpush1.bf16.msra.mxu0 %v6225_v17  ;;  %4140 = vmatprep.subr.bf16.mxu1 %v6235_v18  ;;  %v6323_v17 = vld [vmem:[%s7446_s14 + $0x220] ss:$8 sps:$4 sm:$0xff]  }
 0x19f   : > { %4592 = vmatprep.subr.bf16.mxu0 %v6239_v19  ;;  %v6326_v18 = vld [vmem:[%s8422_s0 + $0xb8] ss:$72 sps:$4 sm:$0xff]  }
 0x1a0   : > { %4084 = vmatmul.mubr.bf16.gmra.mrb[16].mxu1 %v6232_v20  ;;  %v6327_v19 = vld [vmem:[%s7446_s14 + $0x620] ss:$8 sps:$4 sm:$0xff]   ;;  %v6332_v20 = vld [vmem:[%s7446_s14 + $0x234] ss:$8 sps:$4 sm:$0xff]  }
 0x1a1   : > { %4536 = vmatmul.mubr.bf16.gmra.mrb[16].mxu0 %v6236_v22  ;;  %4141 = vmatpush1.bf16.msra.mxu1 %v6233_v21  ;;  %v6335_v21 = vld [vmem:[%s7446_s14 + $0x634] ss:$8 sps:$4 sm:$0xff]  }
 0x1a2   : > { %4593 = vmatpush1.bf16.msra.mxu0 %v6237_v23  ;;  %4142 = vmatprep.subr.bf16.mxu1 %v6242_v24  ;;  %v6336_v22 = vld [vmem:[%s8422_s0 + $0x12c] ss:$72 sps:$4 sm:$0xff]   ;;  %v6330_v24 = vld [vmem:[%s7446_s14 + $0x230] ss:$8 sps:$4 sm:$0xff]  }
 0x1a3   : > { %4594 = vmatprep.subr.bf16.mxu0 %v6245_v25  ;;  %4093 = vmatprep.mubr.bf16.mxu1 %v6246_v26  ;;  %v6338_v23 = vld [vmem:[%s8422_s0 + $0x14c] ss:$72 sps:$4 sm:$0xff]   ;;  %v6333_v25 = vld [vmem:[%s7446_s14 + $0x630] ss:$8 sps:$4 sm:$0xff]  }
 0x1a4   : > { %4545 = vmatprep.mubr.bf16.mxu0 %v6248_v27  ;;  %v6343_v26 = vld [vmem:[%s7446_s14 + $0x244] ss:$8 sps:$4 sm:$0xff]  }
 0x1a5   : > { %4143 = vmatpush1.bf16.msra.mxu1 %v6240_v28  ;;  %v6347_v27 = vld [vmem:[%s7446_s14 + $0x644] ss:$8 sps:$4 sm:$0xff]   ;;  %v6340_v28 = vld [vmem:[%s8422_s0 + $0x128] ss:$72 sps:$4 sm:$0xff]  }
 0x1a6   : > { %4595 = vmatpush1.bf16.msra.mxu0 %v6243_v29  ;;  %4144 = vmatprep.subr.bf16.mxu1 %v6253_v30  ;;  %v6341_v29 = vld [vmem:[%s7446_s14 + $0x240] ss:$8 sps:$4 sm:$0xff]  }
 0x1a7   : > { %4596 = vmatprep.subr.bf16.mxu0 %v6257_v31  ;;  %v6344_v30 = vld [vmem:[%s8422_s0 + $0x148] ss:$72 sps:$4 sm:$0xff]  }
 0x1a8   : > { %4094 = vmatmul.mubr.bf16.gmra.mrb[20].mxu1 %v6250_v32  ;;  %v6345_v31 = vld [vmem:[%s7446_s14 + $0x640] ss:$8 sps:$4 sm:$0xff]   ;;  %v6350_v32 = vld [vmem:[%s7446_s14 + $0x254] ss:$8 sps:$4 sm:$0xff]  }
 0x1a9   : > { %4546 = vmatmul.mubr.bf16.gmra.mrb[20].mxu0 %v6254_v34  ;;  %4145 = vmatpush1.bf16.msra.mxu1 %v6251_v33  ;;  %v6353_v33 = vld [vmem:[%s7446_s14 + $0x654] ss:$8 sps:$4 sm:$0xff]  }
 0x1aa   : > { %4597 = vmatpush1.bf16.msra.mxu0 %v6255_v35  ;;  %4146 = vmatprep.subr.bf16.mxu1 %v6260_v36  ;;  %v6354_v34 = vld [vmem:[%s8422_s0 + $0x1bc] ss:$72 sps:$4 sm:$0xff]   ;;  %v6348_v36 = vld [vmem:[%s7446_s14 + $0x250] ss:$8 sps:$4 sm:$0xff]  }
 0x1ab   : > { %4598 = vmatprep.subr.bf16.mxu0 %v6263_v37  ;;  %4103 = vmatprep.mubr.bf16.mxu1 %v6264_v38  ;;  %v6356_v35 = vld [vmem:[%s8422_s0 + $0x1dc] ss:$72 sps:$4 sm:$0xff]   ;;  %v6351_v37 = vld [vmem:[%s7446_s14 + $0x650] ss:$8 sps:$4 sm:$0xff]  }
 0x1ac   : > { %4555 = vmatprep.mubr.bf16.mxu0 %v6266_v39  ;;  %v6361_v38 = vld [vmem:[%s7446_s14 + $0x264] ss:$8 sps:$4 sm:$0xff]  }
 0x1ad   : > { %4147 = vmatpush1.bf16.msra.mxu1 %v6258_v40  ;;  %v6365_v39 = vld [vmem:[%s7446_s14 + $0x664] ss:$8 sps:$4 sm:$0xff]   ;;  %v6358_v40 = vld [vmem:[%s8422_s0 + $0x1b8] ss:$72 sps:$4 sm:$0xff]  }
 0x1ae   : > { %4599 = vmatpush1.bf16.msra.mxu0 %v6261_v41  ;;  %4148 = vmatprep.subr.bf16.mxu1 %v6271_v42  ;;  %v6359_v41 = vld [vmem:[%s7446_s14 + $0x260] ss:$8 sps:$4 sm:$0xff]  }
 0x1af   : > { %4600 = vmatprep.subr.bf16.mxu0 %v6275_v43  ;;  %v6362_v42 = vld [vmem:[%s8422_s0 + $0x1d8] ss:$72 sps:$4 sm:$0xff]  }
 0x1b0   : > { %4104 = vmatmul.mubr.bf16.gmra.mrb[24].mxu1 %v6268_v44  ;;  %v6363_v43 = vld [vmem:[%s7446_s14 + $0x660] ss:$8 sps:$4 sm:$0xff]   ;;  %v6368_v44 = vld [vmem:[%s7446_s14 + $0x274] ss:$8 sps:$4 sm:$0xff]  }
 0x1b1   : > { %4556 = vmatmul.mubr.bf16.gmra.mrb[24].mxu0 %v6272_v46  ;;  %4149 = vmatpush1.bf16.msra.mxu1 %v6269_v45  ;;  %v6371_v45 = vld [vmem:[%s7446_s14 + $0x674] ss:$8 sps:$4 sm:$0xff]  }
 0x1b2   : > { %4601 = vmatpush1.bf16.msra.mxu0 %v6273_v47  ;;  %4150 = vmatprep.subr.bf16.mxu1 %v6278_v48  ;;  %v6372_v46 = vld [vmem:[%s8422_s0 + $0x24c] ss:$72 sps:$4 sm:$0xff]   ;;  %v6366_v48 = vld [vmem:[%s7446_s14 + $0x270] ss:$8 sps:$4 sm:$0xff]  }
 0x1b3   : > { %4602 = vmatprep.subr.bf16.mxu0 %v6281_v49  ;;  %4113 = vmatprep.mubr.bf16.mxu1 %v6282_v50  ;;  %v6374_v47 = vld [vmem:[%s8422_s0 + $0x26c] ss:$72 sps:$4 sm:$0xff]   ;;  %v6369_v49 = vld [vmem:[%s7446_s14 + $0x670] ss:$8 sps:$4 sm:$0xff]  }
 0x1b4   : > { %4565 = vmatprep.mubr.bf16.mxu0 %v6284_v51  ;;  %v6379_v50 = vld [vmem:[%s7446_s14 + $0x284] ss:$8 sps:$4 sm:$0xff]  }
 0x1b5   : > { %4151 = vmatpush1.bf16.msra.mxu1 %v6276_v52  ;;  %v6383_v51 = vld [vmem:[%s7446_s14 + $0x684] ss:$8 sps:$4 sm:$0xff]   ;;  %v6376_v52 = vld [vmem:[%s8422_s0 + $0x248] ss:$72 sps:$4 sm:$0xff]  }
 0x1b6   : > { %4603 = vmatpush1.bf16.msra.mxu0 %v6279_v53  ;;  %4152 = vmatprep.subr.bf16.mxu1 %v6289_v54  ;;  %v6377_v53 = vld [vmem:[%s7446_s14 + $0x280] ss:$8 sps:$4 sm:$0xff]  }
 0x1b7   : > { %4604 = vmatprep.subr.bf16.mxu0 %v6293_v55  ;;  %v6380_v54 = vld [vmem:[%s8422_s0 + $0x268] ss:$72 sps:$4 sm:$0xff]  }
 0x1b8   : > { %4114 = vmatmul.mubr.bf16.gmra.mrb[28].mxu1 %v6286_v56  ;;  %v6381_v55 = vld [vmem:[%s7446_s14 + $0x680] ss:$8 sps:$4 sm:$0xff]   ;;  %v6386_v56 = vld [vmem:[%s7446_s14 + $0x294] ss:$8 sps:$4 sm:$0xff]  }
 0x1b9   : > { %4566 = vmatmul.mubr.bf16.gmra.mrb[28].mxu0 %v6290_v58  ;;  %4153 = vmatpush1.bf16.msra.mxu1 %v6287_v57  ;;  %v6389_v57 = vld [vmem:[%s7446_s14 + $0x694] ss:$8 sps:$4 sm:$0xff]  }
 0x1ba   : > { %4605 = vmatpush1.bf16.msra.mxu0 %v6291_v59  ;;  %4154 = vmatprep.subr.bf16.mxu1 %v6296_v60  ;;  %v6390_v58 = vld [vmem:[%s8422_s0 + $0x2dc] ss:$72 sps:$4 sm:$0xff]   ;;  %v6384_v60 = vld [vmem:[%s7446_s14 + $0x290] ss:$8 sps:$4 sm:$0xff]  }
 0x1bb   : > { %4606 = vmatprep.subr.bf16.mxu0 %v6299_v61  ;;  %4156 = vmatprep.mubr.bf16.mxu1 %v6302_v62  ;;  %v6392_v59 = vld [vmem:[%s8422_s0 + $0x2fc] ss:$72 sps:$4 sm:$0xff]   ;;  %v6387_v61 = vld [vmem:[%s7446_s14 + $0x690] ss:$8 sps:$4 sm:$0xff]  }
 0x1bc   : > { %4608 = vmatprep.mubr.bf16.mxu0 %v6305_v63  ;;  %v6397_v62 = vld [vmem:[%s7446_s14 + $0x2a4] ss:$8 sps:$4 sm:$0xff]  }
 0x1bd   : > { %4155 = vmatpush1.bf16.msra.mxu1 %v6294_v0  ;;  %v6401_v63 = vld [vmem:[%s7446_s14 + $0x6a4] ss:$8 sps:$4 sm:$0xff]   ;;  %v6394_v0 = vld [vmem:[%s8422_s0 + $0x2d8] ss:$72 sps:$4 sm:$0xff]  }
 0x1be   : > { %4607 = vmatpush1.bf16.msra.mxu0 %v6297_v1  ;;  %4237 = vmatprep.subr.bf16.mxu1 %v6308_v2  ;;  %v6395_v1 = vld [vmem:[%s7446_s14 + $0x2a0] ss:$8 sps:$4 sm:$0xff]  }
 0x1bf   : > { %4689 = vmatprep.subr.bf16.mxu0 %v6311_v3  ;;  %v6398_v2 = vld [vmem:[%s8422_s0 + $0x2f8] ss:$72 sps:$4 sm:$0xff]  }
 0x1c0   : > { %4157 = vmatmul.mubr.bf16.vlgmr.msra.gmra.mrb[0].mxu1 %v6300_v4  ;;  %v6399_v3 = vld [vmem:[%s7446_s14 + $0x6a0] ss:$8 sps:$4 sm:$0xff]   ;;  %v6404_v4 = vld [vmem:[%s7446_s14 + $0x2b4] ss:$8 sps:$4 sm:$0xff]  }
 0x1c1   : > { %4609 = vmatmul.mubr.bf16.vlgmr.msra.gmra.mrb[0].mxu0 %v6303_v5  ;;  %4238 = vmatpush1.bf16.msra.mxu1 %v6306_v6  ;;  %v6407_v5 = vld [vmem:[%s7446_s14 + $0x6b4] ss:$8 sps:$4 sm:$0xff]  }
 0x1c2   : > { %4690 = vmatpush1.bf16.msra.mxu0 %v6309_v7  ;;  %4239 = vmatprep.subr.bf16.mxu1 %v6314_v8  ;;  %v6408_v6 = vld [vmem:[%s8422_s0 + $0x36c] ss:$72 sps:$4 sm:$0xff]   ;;  %v6402_v8 = vld [vmem:[%s7446_s14 + $0x2b0] ss:$8 sps:$4 sm:$0xff]  }
 0x1c3   : > { %4691 = vmatprep.subr.bf16.mxu0 %v6317_v9  ;;  %4166 = vmatprep.mubr.bf16.mxu1 %v6318_v10  ;;  %v6410_v7 = vld [vmem:[%s8422_s0 + $0x38c] ss:$72 sps:$4 sm:$0xff]   ;;  %v6405_v9 = vld [vmem:[%s7446_s14 + $0x6b0] ss:$8 sps:$4 sm:$0xff]  }
 0x1c4   : > { %4618 = vmatprep.mubr.bf16.mxu0 %v6320_v11  ;;  %v6415_v10 = vld [vmem:[%s7446_s14 + $0x2c4] ss:$8 sps:$4 sm:$0xff]  }
 0x1c5   : > { %4240 = vmatpush1.bf16.msra.mxu1 %v6312_v12  ;;  %v6419_v11 = vld [vmem:[%s7446_s14 + $0x6c4] ss:$8 sps:$4 sm:$0xff]   ;;  %v6412_v12 = vld [vmem:[%s8422_s0 + $0x368] ss:$72 sps:$4 sm:$0xff]  }
 0x1c6   : > { %4692 = vmatpush1.bf16.msra.mxu0 %v6315_v13  ;;  %4241 = vmatprep.subr.bf16.mxu1 %v6325_v14  ;;  %v6413_v13 = vld [vmem:[%s7446_s14 + $0x2c0] ss:$8 sps:$4 sm:$0xff]  }
 0x1c7   : > { %4693 = vmatprep.subr.bf16.mxu0 %v6329_v15  ;;  %v6416_v14 = vld [vmem:[%s8422_s0 + $0x388] ss:$72 sps:$4 sm:$0xff]  }
 0x1c8   : > { %4167 = vmatmul.mubr.bf16.gmra.mrb[4].mxu1 %v6322_v16  ;;  %v6417_v15 = vld [vmem:[%s7446_s14 + $0x6c0] ss:$8 sps:$4 sm:$0xff]   ;;  %v6422_v16 = vld [vmem:[%s7446_s14 + $0x2d4] ss:$8 sps:$4 sm:$0xff]  }
 0x1c9   : > { %4619 = vmatmul.mubr.bf16.gmra.mrb[4].mxu0 %v6326_v18  ;;  %4242 = vmatpush1.bf16.msra.mxu1 %v6323_v17  ;;  %v6425_v17 = vld [vmem:[%s7446_s14 + $0x6d4] ss:$8 sps:$4 sm:$0xff]  }
 0x1ca   : > { %4694 = vmatpush1.bf16.msra.mxu0 %v6327_v19  ;;  %4243 = vmatprep.subr.bf16.mxu1 %v6332_v20  ;;  %v6426_v18 = vld [vmem:[%s8422_s0 + $0x3fc] ss:$72 sps:$4 sm:$0xff]   ;;  %v6420_v20 = vld [vmem:[%s7446_s14 + $0x2d0] ss:$8 sps:$4 sm:$0xff]  }
 0x1cb   : > { %4695 = vmatprep.subr.bf16.mxu0 %v6335_v21  ;;  %4176 = vmatprep.mubr.bf16.mxu1 %v6336_v22  ;;  %v6428_v19 = vld [vmem:[%s8422_s0 + $0x41c] ss:$72 sps:$4 sm:$0xff]   ;;  %v6423_v21 = vld [vmem:[%s7446_s14 + $0x6d0] ss:$8 sps:$4 sm:$0xff]  }
 0x1cc   : > { %4628 = vmatprep.mubr.bf16.mxu0 %v6338_v23  ;;  %v6433_v22 = vld [vmem:[%s7446_s14 + $0x2e4] ss:$8 sps:$4 sm:$0xff]  }
 0x1cd   : > { %4244 = vmatpush1.bf16.msra.mxu1 %v6330_v24  ;;  %v6437_v23 = vld [vmem:[%s7446_s14 + $0x6e4] ss:$8 sps:$4 sm:$0xff]   ;;  %v6430_v24 = vld [vmem:[%s8422_s0 + $0x3f8] ss:$72 sps:$4 sm:$0xff]  }
 0x1ce   : > { %4696 = vmatpush1.bf16.msra.mxu0 %v6333_v25  ;;  %4245 = vmatprep.subr.bf16.mxu1 %v6343_v26  ;;  %v6431_v25 = vld [vmem:[%s7446_s14 + $0x2e0] ss:$8 sps:$4 sm:$0xff]  }
 0x1cf   : > { %4697 = vmatprep.subr.bf16.mxu0 %v6347_v27  ;;  %v6434_v26 = vld [vmem:[%s8422_s0 + $0x418] ss:$72 sps:$4 sm:$0xff]  }
 0x1d0   : > { %4177 = vmatmul.mubr.bf16.gmra.mrb[8].mxu1 %v6340_v28  ;;  %v6435_v27 = vld [vmem:[%s7446_s14 + $0x6e0] ss:$8 sps:$4 sm:$0xff]   ;;  %v6440_v28 = vld [vmem:[%s7446_s14 + $0x2f4] ss:$8 sps:$4 sm:$0xff]  }
 0x1d1   : > { %4629 = vmatmul.mubr.bf16.gmra.mrb[8].mxu0 %v6344_v30  ;;  %4246 = vmatpush1.bf16.msra.mxu1 %v6341_v29  ;;  %v6443_v29 = vld [vmem:[%s7446_s14 + $0x6f4] ss:$8 sps:$4 sm:$0xff]  }
 0x1d2   : > { %4698 = vmatpush1.bf16.msra.mxu0 %v6345_v31  ;;  %4247 = vmatprep.subr.bf16.mxu1 %v6350_v32  ;;  %v6446_v30 = vld [vmem:[%s8422_s0 + $0x14] ss:$72 sps:$4 sm:$0xff]   ;;  %v6438_v32 = vld [vmem:[%s7446_s14 + $0x2f0] ss:$8 sps:$4 sm:$0xff]  }
 0x1d3   : > { %4699 = vmatprep.subr.bf16.mxu0 %v6353_v33  ;;  %4186 = vmatprep.mubr.bf16.mxu1 %v6354_v34  ;;  %v6449_v31 = vld [vmem:[%s8422_s0 + $0x34] ss:$72 sps:$4 sm:$0xff]   ;;  %v6441_v33 = vld [vmem:[%s7446_s14 + $0x6f0] ss:$8 sps:$4 sm:$0xff]   ;;  %v6452_v34 = vld [vmem:[%s7446_s14 + $0x304] ss:$8 sps:$4 sm:$0xff]  }
 0x1d4   : > { %4638 = vmatprep.mubr.bf16.mxu0 %v6356_v35  ;;  %v6455_v35 = vld [vmem:[%s7446_s14 + $0x704] ss:$8 sps:$4 sm:$0xff]  }
 0x1d5   : > { %4248 = vmatpush1.bf16.msra.mxu1 %v6348_v36  ;;  %v6444_v36 = vld [vmem:[%s8422_s0 + $0x10] ss:$72 sps:$4 sm:$0xff]  }
 0x1d6   : > { %4700 = vmatpush1.bf16.msra.mxu0 %v6351_v37  ;;  %4249 = vmatprep.subr.bf16.mxu1 %v6361_v38  ;;  %v6447_v37 = vld [vmem:[%s8422_s0 + $0x30] ss:$72 sps:$4 sm:$0xff]   ;;  %v6450_v38 = vld [vmem:[%s7446_s14 + $0x300] ss:$8 sps:$4 sm:$0xff]  }
 0x1d7   : > { %4701 = vmatprep.subr.bf16.mxu0 %v6365_v39  ;;  %v6453_v39 = vld [vmem:[%s7446_s14 + $0x700] ss:$8 sps:$4 sm:$0xff]  }
 0x1d8   : > { %4187 = vmatmul.mubr.bf16.gmra.mrb[12].mxu1 %v6358_v40  ;;  %v6458_v40 = vld [vmem:[%s7446_s14 + $0x314] ss:$8 sps:$4 sm:$0xff]  }
 0x1d9   : > { %4639 = vmatmul.mubr.bf16.gmra.mrb[12].mxu0 %v6362_v42  ;;  %4250 = vmatpush1.bf16.msra.mxu1 %v6359_v41  ;;  %v6461_v41 = vld [vmem:[%s7446_s14 + $0x714] ss:$8 sps:$4 sm:$0xff]   ;;  %v6462_v42 = vld [vmem:[%s8422_s0 + $0xa4] ss:$72 sps:$4 sm:$0xff]  }
 0x1da   : > { %4702 = vmatpush1.bf16.msra.mxu0 %v6363_v43  ;;  %4251 = vmatprep.subr.bf16.mxu1 %v6368_v44  ;;  %v6464_v43 = vld [vmem:[%s8422_s0 + $0xc4] ss:$72 sps:$4 sm:$0xff]   ;;  %v6456_v44 = vld [vmem:[%s7446_s14 + $0x310] ss:$8 sps:$4 sm:$0xff]  }
 0x1db   : > { %4703 = vmatprep.subr.bf16.mxu0 %v6371_v45  ;;  %4196 = vmatprep.mubr.bf16.mxu1 %v6372_v46  ;;  %v6459_v45 = vld [vmem:[%s7446_s14 + $0x710] ss:$8 sps:$4 sm:$0xff]   ;;  %v6469_v46 = vld [vmem:[%s7446_s14 + $0x324] ss:$8 sps:$4 sm:$0xff]  }
 0x1dc   : > { %4648 = vmatprep.mubr.bf16.mxu0 %v6374_v47  ;;  %v6473_v47 = vld [vmem:[%s7446_s14 + $0x724] ss:$8 sps:$4 sm:$0xff]  }
 0x1dd   : > { %4252 = vmatpush1.bf16.msra.mxu1 %v6366_v48  ;;  %v6466_v48 = vld [vmem:[%s8422_s0 + $0xa0] ss:$72 sps:$4 sm:$0xff]  }
 0x1de   : > { %4704 = vmatpush1.bf16.msra.mxu0 %v6369_v49  ;;  %4253 = vmatprep.subr.bf16.mxu1 %v6379_v50  ;;  %v6467_v49 = vld [vmem:[%s7446_s14 + $0x320] ss:$8 sps:$4 sm:$0xff]  }
 0x1df   : > { %4705 = vmatprep.subr.bf16.mxu0 %v6383_v51  ;;  %v6470_v50 = vld [vmem:[%s8422_s0 + $0xc0] ss:$72 sps:$4 sm:$0xff]  }
 0x1e0   : > { %4197 = vmatmul.mubr.bf16.gmra.mrb[16].mxu1 %v6376_v52  ;;  %v6471_v51 = vld [vmem:[%s7446_s14 + $0x720] ss:$8 sps:$4 sm:$0xff]   ;;  %v6476_v52 = vld [vmem:[%s7446_s14 + $0x334] ss:$8 sps:$4 sm:$0xff]  }
 0x1e1   : > { %4649 = vmatmul.mubr.bf16.gmra.mrb[16].mxu0 %v6380_v54  ;;  %4254 = vmatpush1.bf16.msra.mxu1 %v6377_v53  ;;  %v6479_v53 = vld [vmem:[%s7446_s14 + $0x734] ss:$8 sps:$4 sm:$0xff]  }
 0x1e2   : > { %4706 = vmatpush1.bf16.msra.mxu0 %v6381_v55  ;;  %4255 = vmatprep.subr.bf16.mxu1 %v6386_v56  ;;  %v6480_v54 = vld [vmem:[%s8422_s0 + $0x134] ss:$72 sps:$4 sm:$0xff]   ;;  %v6474_v56 = vld [vmem:[%s7446_s14 + $0x330] ss:$8 sps:$4 sm:$0xff]  }
 0x1e3   : > { %4707 = vmatprep.subr.bf16.mxu0 %v6389_v57  ;;  %4206 = vmatprep.mubr.bf16.mxu1 %v6390_v58  ;;  %v6482_v55 = vld [vmem:[%s8422_s0 + $0x154] ss:$72 sps:$4 sm:$0xff]   ;;  %v6477_v57 = vld [vmem:[%s7446_s14 + $0x730] ss:$8 sps:$4 sm:$0xff]   ;;  %v6487_v58 = vld [vmem:[%s7446_s14 + $0x344] ss:$8 sps:$4 sm:$0xff]  }
 0x1e4   : > { %4658 = vmatprep.mubr.bf16.mxu0 %v6392_v59  ;;  %v6491_v59 = vld [vmem:[%s7446_s14 + $0x744] ss:$8 sps:$4 sm:$0xff]  }
 0x1e5   : > { %4256 = vmatpush1.bf16.msra.mxu1 %v6384_v60  ;;  %v6484_v60 = vld [vmem:[%s8422_s0 + $0x130] ss:$72 sps:$4 sm:$0xff]  }
 0x1e6   : > { %4708 = vmatpush1.bf16.msra.mxu0 %v6387_v61  ;;  %4257 = vmatprep.subr.bf16.mxu1 %v6397_v62  ;;  %v6485_v61 = vld [vmem:[%s7446_s14 + $0x340] ss:$8 sps:$4 sm:$0xff]   ;;  %v6488_v62 = vld [vmem:[%s8422_s0 + $0x150] ss:$72 sps:$4 sm:$0xff]  }
 0x1e7   : > { %4709 = vmatprep.subr.bf16.mxu0 %v6401_v63  ;;  %v6489_v63 = vld [vmem:[%s7446_s14 + $0x740] ss:$8 sps:$4 sm:$0xff]  }
 0x1e8   : > { %4207 = vmatmul.mubr.bf16.gmra.mrb[20].mxu1 %v6394_v0  ;;  %v6494_v0 = vld [vmem:[%s7446_s14 + $0x354] ss:$8 sps:$4 sm:$0xff]  }
 0x1e9   : > { %4659 = vmatmul.mubr.bf16.gmra.mrb[20].mxu0 %v6398_v2  ;;  %4258 = vmatpush1.bf16.msra.mxu1 %v6395_v1  ;;  %v6497_v1 = vld [vmem:[%s7446_s14 + $0x754] ss:$8 sps:$4 sm:$0xff]   ;;  %v6498_v2 = vld [vmem:[%s8422_s0 + $0x1c4] ss:$72 sps:$4 sm:$0xff]  }
 0x1ea   : > { %4710 = vmatpush1.bf16.msra.mxu0 %v6399_v3  ;;  %4259 = vmatprep.subr.bf16.mxu1 %v6404_v4  ;;  %v6500_v3 = vld [vmem:[%s8422_s0 + $0x1e4] ss:$72 sps:$4 sm:$0xff]   ;;  %v6492_v4 = vld [vmem:[%s7446_s14 + $0x350] ss:$8 sps:$4 sm:$0xff]  }
 0x1eb   : > { %4711 = vmatprep.subr.bf16.mxu0 %v6407_v5  ;;  %4216 = vmatprep.mubr.bf16.mxu1 %v6408_v6  ;;  %v6495_v5 = vld [vmem:[%s7446_s14 + $0x750] ss:$8 sps:$4 sm:$0xff]   ;;  %v6505_v6 = vld [vmem:[%s7446_s14 + $0x364] ss:$8 sps:$4 sm:$0xff]  }
 0x1ec   : > { %4668 = vmatprep.mubr.bf16.mxu0 %v6410_v7  ;;  %v6509_v7 = vld [vmem:[%s7446_s14 + $0x764] ss:$8 sps:$4 sm:$0xff]  }
 0x1ed   : > { %4260 = vmatpush1.bf16.msra.mxu1 %v6402_v8  ;;  %v6502_v8 = vld [vmem:[%s8422_s0 + $0x1c0] ss:$72 sps:$4 sm:$0xff]  }
 0x1ee   : > { %4712 = vmatpush1.bf16.msra.mxu0 %v6405_v9  ;;  %4261 = vmatprep.subr.bf16.mxu1 %v6415_v10  ;;  %v6503_v9 = vld [vmem:[%s7446_s14 + $0x360] ss:$8 sps:$4 sm:$0xff]  }
 0x1ef   : > { %4713 = vmatprep.subr.bf16.mxu0 %v6419_v11  ;;  %v6506_v10 = vld [vmem:[%s8422_s0 + $0x1e0] ss:$72 sps:$4 sm:$0xff]  }
 0x1f0   : > { %4217 = vmatmul.mubr.bf16.gmra.mrb[24].mxu1 %v6412_v12  ;;  %v6507_v11 = vld [vmem:[%s7446_s14 + $0x760] ss:$8 sps:$4 sm:$0xff]   ;;  %v6512_v12 = vld [vmem:[%s7446_s14 + $0x374] ss:$8 sps:$4 sm:$0xff]  }
 0x1f1   : > { %4669 = vmatmul.mubr.bf16.gmra.mrb[24].mxu0 %v6416_v14  ;;  %4262 = vmatpush1.bf16.msra.mxu1 %v6413_v13  ;;  %v6515_v13 = vld [vmem:[%s7446_s14 + $0x774] ss:$8 sps:$4 sm:$0xff]  }
 0x1f2   : > { %4714 = vmatpush1.bf16.msra.mxu0 %v6417_v15  ;;  %4263 = vmatprep.subr.bf16.mxu1 %v6422_v16  ;;  %v6516_v14 = vld [vmem:[%s8422_s0 + $0x254] ss:$72 sps:$4 sm:$0xff]   ;;  %v6510_v16 = vld [vmem:[%s7446_s14 + $0x370] ss:$8 sps:$4 sm:$0xff]  }
 0x1f3   : > { %4715 = vmatprep.subr.bf16.mxu0 %v6425_v17  ;;  %4226 = vmatprep.mubr.bf16.mxu1 %v6426_v18  ;;  %v6518_v15 = vld [vmem:[%s8422_s0 + $0x274] ss:$72 sps:$4 sm:$0xff]   ;;  %v6513_v17 = vld [vmem:[%s7446_s14 + $0x770] ss:$8 sps:$4 sm:$0xff]   ;;  %v6523_v18 = vld [vmem:[%s7446_s14 + $0x384] ss:$8 sps:$4 sm:$0xff]  }
 0x1f4   : > { %4678 = vmatprep.mubr.bf16.mxu0 %v6428_v19  ;;  %v6527_v19 = vld [vmem:[%s7446_s14 + $0x784] ss:$8 sps:$4 sm:$0xff]  }
 0x1f5   : > { %4264 = vmatpush1.bf16.msra.mxu1 %v6420_v20  ;;  %v6520_v20 = vld [vmem:[%s8422_s0 + $0x250] ss:$72 sps:$4 sm:$0xff]  }
 0x1f6   : > { %4716 = vmatpush1.bf16.msra.mxu0 %v6423_v21  ;;  %4265 = vmatprep.subr.bf16.mxu1 %v6433_v22  ;;  %v6521_v21 = vld [vmem:[%s7446_s14 + $0x380] ss:$8 sps:$4 sm:$0xff]   ;;  %v6524_v22 = vld [vmem:[%s8422_s0 + $0x270] ss:$72 sps:$4 sm:$0xff]  }
 0x1f7   : > { %4717 = vmatprep.subr.bf16.mxu0 %v6437_v23  ;;  %v6525_v23 = vld [vmem:[%s7446_s14 + $0x780] ss:$8 sps:$4 sm:$0xff]  }
 0x1f8   : > { %4227 = vmatmul.mubr.bf16.gmra.mrb[28].mxu1 %v6430_v24  ;;  %v6530_v24 = vld [vmem:[%s7446_s14 + $0x394] ss:$8 sps:$4 sm:$0xff]  }
 0x1f9   : > { %4679 = vmatmul.mubr.bf16.gmra.mrb[28].mxu0 %v6434_v26  ;;  %4266 = vmatpush1.bf16.msra.mxu1 %v6431_v25  ;;  %v6533_v25 = vld [vmem:[%s7446_s14 + $0x794] ss:$8 sps:$4 sm:$0xff]   ;;  %v6534_v26 = vld [vmem:[%s8422_s0 + $0x2e4] ss:$72 sps:$4 sm:$0xff]  }
 0x1fa   : > { %4718 = vmatpush1.bf16.msra.mxu0 %v6435_v27  ;;  %4267 = vmatprep.subr.bf16.mxu1 %v6440_v28  ;;  %v6536_v27 = vld [vmem:[%s8422_s0 + $0x304] ss:$72 sps:$4 sm:$0xff]   ;;  %v6528_v28 = vld [vmem:[%s7446_s14 + $0x390] ss:$8 sps:$4 sm:$0xff]  }
 0x1fb   : > { %4719 = vmatprep.subr.bf16.mxu0 %v6443_v29  ;;  %4269 = vmatprep.mubr.bf16.mxu1 %v6446_v30  ;;  %v6531_v29 = vld [vmem:[%s7446_s14 + $0x790] ss:$8 sps:$4 sm:$0xff]   ;;  %v6541_v30 = vld [vmem:[%s7446_s14 + $0x3a4] ss:$8 sps:$4 sm:$0xff]  }
 0x1fc   : > { %4721 = vmatprep.mubr.bf16.mxu0 %v6449_v31  ;;  %v6545_v31 = vld [vmem:[%s7446_s14 + $0x7a4] ss:$8 sps:$4 sm:$0xff]  }
 0x1fd   : > { %4268 = vmatpush1.bf16.msra.mxu1 %v6438_v32  ;;  %v6538_v32 = vld [vmem:[%s8422_s0 + $0x2e0] ss:$72 sps:$4 sm:$0xff]  }
 0x1fe   : > { %4720 = vmatpush1.bf16.msra.mxu0 %v6441_v33  ;;  %4350 = vmatprep.subr.bf16.mxu1 %v6452_v34  ;;  %v6539_v33 = vld [vmem:[%s7446_s14 + $0x3a0] ss:$8 sps:$4 sm:$0xff]  }
 0x1ff   : > { %4802 = vmatprep.subr.bf16.mxu0 %v6455_v35  ;;  %v6542_v34 = vld [vmem:[%s8422_s0 + $0x300] ss:$72 sps:$4 sm:$0xff]  }
 0x200   : > { %4270 = vmatmul.mubr.bf16.vlgmr.msra.gmra.mrb[0].mxu1 %v6444_v36  ;;  %v6543_v35 = vld [vmem:[%s7446_s14 + $0x7a0] ss:$8 sps:$4 sm:$0xff]   ;;  %v6548_v36 = vld [vmem:[%s7446_s14 + $0x3b4] ss:$8 sps:$4 sm:$0xff]  }
 0x201   : > { %4722 = vmatmul.mubr.bf16.vlgmr.msra.gmra.mrb[0].mxu0 %v6447_v37  ;;  %4351 = vmatpush1.bf16.msra.mxu1 %v6450_v38  ;;  %v6551_v37 = vld [vmem:[%s7446_s14 + $0x7b4] ss:$8 sps:$4 sm:$0xff]  }
 0x202   : > { %4803 = vmatpush1.bf16.msra.mxu0 %v6453_v39  ;;  %4352 = vmatprep.subr.bf16.mxu1 %v6458_v40  ;;  %v6552_v38 = vld [vmem:[%s8422_s0 + $0x374] ss:$72 sps:$4 sm:$0xff]   ;;  %v6546_v40 = vld [vmem:[%s7446_s14 + $0x3b0] ss:$8 sps:$4 sm:$0xff]  }
 0x203   : > { %4804 = vmatprep.subr.bf16.mxu0 %v6461_v41  ;;  %4279 = vmatprep.mubr.bf16.mxu1 %v6462_v42  ;;  %v6554_v39 = vld [vmem:[%s8422_s0 + $0x394] ss:$72 sps:$4 sm:$0xff]   ;;  %v6549_v41 = vld [vmem:[%s7446_s14 + $0x7b0] ss:$8 sps:$4 sm:$0xff]   ;;  %v6559_v42 = vld [vmem:[%s7446_s14 + $0x3c4] ss:$8 sps:$4 sm:$0xff]  }
 0x204   : > { %4731 = vmatprep.mubr.bf16.mxu0 %v6464_v43  ;;  %v6556_v43 = vld [vmem:[%s8422_s0 + $0x370] ss:$72 sps:$4 sm:$0xff]  }
 0x205   : > { %4353 = vmatpush1.bf16.msra.mxu1 %v6456_v44  ;;  %v6563_v44 = vld [vmem:[%s7446_s14 + $0x7c4] ss:$8 sps:$4 sm:$0xff]  }
 0x206   : > { %4805 = vmatpush1.bf16.msra.mxu0 %v6459_v45  ;;  %4354 = vmatprep.subr.bf16.mxu1 %v6469_v46  ;;  %v6557_v45 = vld [vmem:[%s7446_s14 + $0x3c0] ss:$8 sps:$4 sm:$0xff]   ;;  %v6560_v46 = vld [vmem:[%s8422_s0 + $0x390] ss:$72 sps:$4 sm:$0xff]  }
 0x207   : > { %4806 = vmatprep.subr.bf16.mxu0 %v6473_v47  ;;  %v6561_v47 = vld [vmem:[%s7446_s14 + $0x7c0] ss:$8 sps:$4 sm:$0xff]  }
 0x208   : > { %4280 = vmatmul.mubr.bf16.gmra.mrb[4].mxu1 %v6466_v48  ;;  %v6566_v48 = vld [vmem:[%s7446_s14 + $0x3d4] ss:$8 sps:$4 sm:$0xff]  }
 0x209   : > { %4732 = vmatmul.mubr.bf16.gmra.mrb[4].mxu0 %v6470_v50  ;;  %4355 = vmatpush1.bf16.msra.mxu1 %v6467_v49  ;;  %v6569_v49 = vld [vmem:[%s7446_s14 + $0x7d4] ss:$8 sps:$4 sm:$0xff]   ;;  %v6570_v50 = vld [vmem:[%s8422_s0 + $0x404] ss:$72 sps:$4 sm:$0xff]  }
 0x20a   : > { %4807 = vmatpush1.bf16.msra.mxu0 %v6471_v51  ;;  %4356 = vmatprep.subr.bf16.mxu1 %v6476_v52  ;;  %v6572_v51 = vld [vmem:[%s8422_s0 + $0x424] ss:$72 sps:$4 sm:$0xff]   ;;  %v6564_v52 = vld [vmem:[%s7446_s14 + $0x3d0] ss:$8 sps:$4 sm:$0xff]  }
 0x20b   : > { %4808 = vmatprep.subr.bf16.mxu0 %v6479_v53  ;;  %4289 = vmatprep.mubr.bf16.mxu1 %v6480_v54  ;;  %v6567_v53 = vld [vmem:[%s7446_s14 + $0x7d0] ss:$8 sps:$4 sm:$0xff]   ;;  %v6577_v54 = vld [vmem:[%s7446_s14 + $0x3e4] ss:$8 sps:$4 sm:$0xff]  }
 0x20c   : > { %4741 = vmatprep.mubr.bf16.mxu0 %v6482_v55  ;;  %v6581_v55 = vld [vmem:[%s7446_s14 + $0x7e4] ss:$8 sps:$4 sm:$0xff]  }
 0x20d   : > { %4357 = vmatpush1.bf16.msra.mxu1 %v6474_v56  ;;  %v6574_v56 = vld [vmem:[%s8422_s0 + $0x400] ss:$72 sps:$4 sm:$0xff]  }
 0x20e   : > { %4809 = vmatpush1.bf16.msra.mxu0 %v6477_v57  ;;  %4358 = vmatprep.subr.bf16.mxu1 %v6487_v58  ;;  %v6575_v57 = vld [vmem:[%s7446_s14 + $0x3e0] ss:$8 sps:$4 sm:$0xff]  }
 0x20f   : > { %4810 = vmatprep.subr.bf16.mxu0 %v6491_v59  ;;  %v6578_v58 = vld [vmem:[%s8422_s0 + $0x420] ss:$72 sps:$4 sm:$0xff]  }
 0x210   : > { %4290 = vmatmul.mubr.bf16.gmra.mrb[8].mxu1 %v6484_v60  ;;  %v6579_v59 = vld [vmem:[%s7446_s14 + $0x7e0] ss:$8 sps:$4 sm:$0xff]   ;;  %v6584_v60 = vld [vmem:[%s7446_s14 + $0x3f4] ss:$8 sps:$4 sm:$0xff]  }
 0x211   : > { %4742 = vmatmul.mubr.bf16.gmra.mrb[8].mxu0 %v6488_v62  ;;  %4359 = vmatpush1.bf16.msra.mxu1 %v6485_v61  ;;  %v6587_v61 = vld [vmem:[%s7446_s14 + $0x7f4] ss:$8 sps:$4 sm:$0xff]  }
 0x212   : > { %4811 = vmatpush1.bf16.msra.mxu0 %v6489_v63  ;;  %4360 = vmatprep.subr.bf16.mxu1 %v6494_v0  ;;  %v6590_v62 = vld [vmem:[%s8422_s0 + $0x1c] ss:$72 sps:$4 sm:$0xff]   ;;  %v6582_v0 = vld [vmem:[%s7446_s14 + $0x3f0] ss:$8 sps:$4 sm:$0xff]  }
 0x213   : > { %4812 = vmatprep.subr.bf16.mxu0 %v6497_v1  ;;  %4299 = vmatprep.mubr.bf16.mxu1 %v6498_v2  ;;  %v6593_v63 = vld [vmem:[%s8422_s0 + $0x3c] ss:$72 sps:$4 sm:$0xff]   ;;  %v6585_v1 = vld [vmem:[%s7446_s14 + $0x7f0] ss:$8 sps:$4 sm:$0xff]  }
 0x214   : > { %4751 = vmatprep.mubr.bf16.mxu0 %v6500_v3  ;;  %v6596_v2 = vld [vmem:[%s7446_s14 + $0x804] ss:$8 sps:$4 sm:$0xff]   ;;  %v6588_v3 = vld [vmem:[%s8422_s0 + $0x18] ss:$72 sps:$4 sm:$0xff]  }
 0x215   : > { %4361 = vmatpush1.bf16.msra.mxu1 %v6492_v4  ;;  %v6591_v4 = vld [vmem:[%s8422_s0 + $0x38] ss:$72 sps:$4 sm:$0xff]  }
 0x216   : > { %4813 = vmatpush1.bf16.msra.mxu0 %v6495_v5  ;;  %4362 = vmatprep.subr.bf16.mxu1 %v6505_v6  ;;  %v6594_v5 = vld [vmem:[%s7446_s14 + $0x800] ss:$8 sps:$4 sm:$0xff]   ;;  %v6599_v6 = vld [vmem:[%s7446_s14 + $0x814] ss:$8 sps:$4 sm:$0xff]  }
 0x217   : > { %4814 = vmatprep.subr.bf16.mxu0 %v6509_v7  ;;  %v6600_v7 = vld [vmem:[%s8422_s0 + $0xac] ss:$72 sps:$4 sm:$0xff]  }
 0x218   : > { %4300 = vmatmul.mubr.bf16.gmra.mrb[12].mxu1 %v6502_v8  ;;  %v6602_v8 = vld [vmem:[%s8422_s0 + $0xcc] ss:$72 sps:$4 sm:$0xff]  }
 0x219   : > { %4752 = vmatmul.mubr.bf16.gmra.mrb[12].mxu0 %v6506_v10  ;;  %4363 = vmatpush1.bf16.msra.mxu1 %v6503_v9  ;;  %v6597_v9 = vld [vmem:[%s7446_s14 + $0x810] ss:$8 sps:$4 sm:$0xff]   ;;  %v6608_v10 = vld [vmem:[%s7446_s14 + $0x824] ss:$8 sps:$4 sm:$0xff]  }
 0x21a   : > { %4815 = vmatpush1.bf16.msra.mxu0 %v6507_v11  ;;  %4364 = vmatprep.subr.bf16.mxu1 %v6512_v12  ;;  %v6604_v11 = vld [vmem:[%s8422_s0 + $0xa8] ss:$72 sps:$4 sm:$0xff]  }
 0x21b   : > { %4816 = vmatprep.subr.bf16.mxu0 %v6515_v13  ;;  %4309 = vmatprep.mubr.bf16.mxu1 %v6516_v14  ;;  %v6605_v12 = vld [vmem:[%s8422_s0 + $0xc8] ss:$72 sps:$4 sm:$0xff]   ;;  %v6611_v14 = vld [vmem:[%s7446_s14 + $0x834] ss:$8 sps:$4 sm:$0xff]  }
 0x21c   : > { %4761 = vmatprep.mubr.bf16.mxu0 %v6518_v15  ;;  %v6606_v13 = vld [vmem:[%s7446_s14 + $0x820] ss:$8 sps:$4 sm:$0xff]   ;;  %v6612_v15 = vld [vmem:[%s8422_s0 + $0x13c] ss:$72 sps:$4 sm:$0xff]  }
 0x21d   : > { %4365 = vmatpush1.bf16.msra.mxu1 %v6510_v16  ;;  %v6614_v16 = vld [vmem:[%s8422_s0 + $0x15c] ss:$72 sps:$4 sm:$0xff]  }
 0x21e   : > { %4817 = vmatpush1.bf16.msra.mxu0 %v6513_v17  ;;  %4366 = vmatprep.subr.bf16.mxu1 %v6523_v18  ;;  %v6609_v17 = vld [vmem:[%s7446_s14 + $0x830] ss:$8 sps:$4 sm:$0xff]   ;;  %v6620_v18 = vld [vmem:[%s7446_s14 + $0x844] ss:$8 sps:$4 sm:$0xff]  }
 0x21f   : > { %4818 = vmatprep.subr.bf16.mxu0 %v6527_v19  ;;  %v6616_v19 = vld [vmem:[%s8422_s0 + $0x138] ss:$72 sps:$4 sm:$0xff]  }
 0x220   : > { %4310 = vmatmul.mubr.bf16.gmra.mrb[16].mxu1 %v6520_v20  ;;  %v6617_v20 = vld [vmem:[%s8422_s0 + $0x158] ss:$72 sps:$4 sm:$0xff]  }
 0x221   : > { %4762 = vmatmul.mubr.bf16.gmra.mrb[16].mxu0 %v6524_v22  ;;  %4367 = vmatpush1.bf16.msra.mxu1 %v6521_v21  ;;  %v6618_v21 = vld [vmem:[%s7446_s14 + $0x840] ss:$8 sps:$4 sm:$0xff]   ;;  %v6623_v22 = vld [vmem:[%s7446_s14 + $0x854] ss:$8 sps:$4 sm:$0xff]  }
 0x222   : > { %4819 = vmatpush1.bf16.msra.mxu0 %v6525_v23  ;;  %4368 = vmatprep.subr.bf16.mxu1 %v6530_v24  ;;  %v6624_v23 = vld [vmem:[%s8422_s0 + $0x1cc] ss:$72 sps:$4 sm:$0xff]  }
 0x223   : > { %4820 = vmatprep.subr.bf16.mxu0 %v6533_v25  ;;  %4319 = vmatprep.mubr.bf16.mxu1 %v6534_v26  ;;  %v6626_v24 = vld [vmem:[%s8422_s0 + $0x1ec] ss:$72 sps:$4 sm:$0xff]   ;;  %v6621_v25 = vld [vmem:[%s7446_s14 + $0x850] ss:$8 sps:$4 sm:$0xff]  }
 0x224   : > { %4771 = vmatprep.mubr.bf16.mxu0 %v6536_v27  ;;  %v6632_v26 = vld [vmem:[%s7446_s14 + $0x864] ss:$8 sps:$4 sm:$0xff]   ;;  %v6628_v27 = vld [vmem:[%s8422_s0 + $0x1c8] ss:$72 sps:$4 sm:$0xff]  }
 0x225   : > { %4369 = vmatpush1.bf16.msra.mxu1 %v6528_v28  ;;  %v6629_v28 = vld [vmem:[%s8422_s0 + $0x1e8] ss:$72 sps:$4 sm:$0xff]  }
 0x226   : > { %4821 = vmatpush1.bf16.msra.mxu0 %v6531_v29  ;;  %4370 = vmatprep.subr.bf16.mxu1 %v6541_v30  ;;  %v6630_v29 = vld [vmem:[%s7446_s14 + $0x860] ss:$8 sps:$4 sm:$0xff]   ;;  %v6635_v30 = vld [vmem:[%s7446_s14 + $0x874] ss:$8 sps:$4 sm:$0xff]  }
 0x227   : > { %4822 = vmatprep.subr.bf16.mxu0 %v6545_v31  ;;  %v6636_v31 = vld [vmem:[%s8422_s0 + $0x25c] ss:$72 sps:$4 sm:$0xff]  }
 0x228   : > { %4320 = vmatmul.mubr.bf16.gmra.mrb[20].mxu1 %v6538_v32  ;;  %v6638_v32 = vld [vmem:[%s8422_s0 + $0x27c] ss:$72 sps:$4 sm:$0xff]  }
 0x229   : > { %4772 = vmatmul.mubr.bf16.gmra.mrb[20].mxu0 %v6542_v34  ;;  %4371 = vmatpush1.bf16.msra.mxu1 %v6539_v33  ;;  %v6633_v33 = vld [vmem:[%s7446_s14 + $0x870] ss:$8 sps:$4 sm:$0xff]   ;;  %v6644_v34 = vld [vmem:[%s7446_s14 + $0x884] ss:$8 sps:$4 sm:$0xff]  }
 0x22a   : > { %4823 = vmatpush1.bf16.msra.mxu0 %v6543_v35  ;;  %4372 = vmatprep.subr.bf16.mxu1 %v6548_v36  ;;  %v6640_v35 = vld [vmem:[%s8422_s0 + $0x258] ss:$72 sps:$4 sm:$0xff]  }
 0x22b   : > { %4824 = vmatprep.subr.bf16.mxu0 %v6551_v37  ;;  %4329 = vmatprep.mubr.bf16.mxu1 %v6552_v38  ;;  %v6641_v36 = vld [vmem:[%s8422_s0 + $0x278] ss:$72 sps:$4 sm:$0xff]   ;;  %v6647_v38 = vld [vmem:[%s7446_s14 + $0x894] ss:$8 sps:$4 sm:$0xff]  }
 0x22c   : > { %4781 = vmatprep.mubr.bf16.mxu0 %v6554_v39  ;;  %v6642_v37 = vld [vmem:[%s7446_s14 + $0x880] ss:$8 sps:$4 sm:$0xff]   ;;  %v6648_v39 = vld [vmem:[%s8422_s0 + $0x2ec] ss:$72 sps:$4 sm:$0xff]  }
 0x22d   : > { %4373 = vmatpush1.bf16.msra.mxu1 %v6546_v40  ;;  %v6650_v40 = vld [vmem:[%s8422_s0 + $0x30c] ss:$72 sps:$4 sm:$0xff]  }
 0x22e   : > { %4825 = vmatpush1.bf16.msra.mxu0 %v6549_v41  ;;  %4374 = vmatprep.subr.bf16.mxu1 %v6559_v42  ;;  %v6645_v41 = vld [vmem:[%s7446_s14 + $0x890] ss:$8 sps:$4 sm:$0xff]   ;;  %v6656_v42 = vld [vmem:[%s7446_s14 + $0x8a4] ss:$8 sps:$4 sm:$0xff]  }
 0x22f   : > { %4826 = vmatprep.subr.bf16.mxu0 %v6563_v44  ;;  %v6653_v44 = vld [vmem:[%s8422_s0 + $0x308] ss:$72 sps:$4 sm:$0xff]  }
 0x230   : > { %4330 = vmatmul.mubr.bf16.gmra.mrb[24].mxu1 %v6556_v43  ;;  %v6652_v43 = vld [vmem:[%s8422_s0 + $0x2e8] ss:$72 sps:$4 sm:$0xff]  }
 0x231   : > { %4782 = vmatmul.mubr.bf16.gmra.mrb[24].mxu0 %v6560_v46  ;;  %4375 = vmatpush1.bf16.msra.mxu1 %v6557_v45  ;;  %v6654_v45 = vld [vmem:[%s7446_s14 + $0x8a0] ss:$8 sps:$4 sm:$0xff]   ;;  %v6659_v46 = vld [vmem:[%s7446_s14 + $0x8b4] ss:$8 sps:$4 sm:$0xff]  }
 0x232   : > { %4827 = vmatpush1.bf16.msra.mxu0 %v6561_v47  ;;  %4376 = vmatprep.subr.bf16.mxu1 %v6566_v48  ;;  %v6660_v47 = vld [vmem:[%s8422_s0 + $0x37c] ss:$72 sps:$4 sm:$0xff]  }
 0x233   : > { %4828 = vmatprep.subr.bf16.mxu0 %v6569_v49  ;;  %4339 = vmatprep.mubr.bf16.mxu1 %v6570_v50  ;;  %v6662_v48 = vld [vmem:[%s8422_s0 + $0x39c] ss:$72 sps:$4 sm:$0xff]   ;;  %v6657_v49 = vld [vmem:[%s7446_s14 + $0x8b0] ss:$8 sps:$4 sm:$0xff]  }
 0x234   : > { %4791 = vmatprep.mubr.bf16.mxu0 %v6572_v51  ;;  %v6668_v50 = vld [vmem:[%s7446_s14 + $0x8c4] ss:$8 sps:$4 sm:$0xff]   ;;  %v6664_v51 = vld [vmem:[%s8422_s0 + $0x378] ss:$72 sps:$4 sm:$0xff]  }
 0x235   : > { %4377 = vmatpush1.bf16.msra.mxu1 %v6564_v52  ;;  %v6665_v52 = vld [vmem:[%s8422_s0 + $0x398] ss:$72 sps:$4 sm:$0xff]  }
 0x236   : > { %4829 = vmatpush1.bf16.msra.mxu0 %v6567_v53  ;;  %4378 = vmatprep.subr.bf16.mxu1 %v6577_v54  ;;  %v6666_v53 = vld [vmem:[%s7446_s14 + $0x8c0] ss:$8 sps:$4 sm:$0xff]   ;;  %v6671_v54 = vld [vmem:[%s7446_s14 + $0x8d4] ss:$8 sps:$4 sm:$0xff]  }
 0x237   : > { %4830 = vmatprep.subr.bf16.mxu0 %v6581_v55  ;;  %v6672_v55 = vld [vmem:[%s8422_s0 + $0x40c] ss:$72 sps:$4 sm:$0xff]  }
 0x238   : > { %4340 = vmatmul.mubr.bf16.gmra.mrb[28].mxu1 %v6574_v56  ;;  %v6674_v56 = vld [vmem:[%s8422_s0 + $0x42c] ss:$72 sps:$4 sm:$0xff]  }
 0x239   : > { %4792 = vmatmul.mubr.bf16.gmra.mrb[28].mxu0 %v6578_v58  ;;  %4379 = vmatpush1.bf16.msra.mxu1 %v6575_v57  ;;  %v6669_v57 = vld [vmem:[%s7446_s14 + $0x8d0] ss:$8 sps:$4 sm:$0xff]   ;;  %v6680_v58 = vld [vmem:[%s7446_s14 + $0x8e4] ss:$8 sps:$4 sm:$0xff]  }
 0x23a   : > { %4831 = vmatpush1.bf16.msra.mxu0 %v6579_v59  ;;  %4380 = vmatprep.subr.bf16.mxu1 %v6584_v60  ;;  %v6676_v59 = vld [vmem:[%s8422_s0 + $0x408] ss:$72 sps:$4 sm:$0xff]  }
 0x23b   : > { %4832 = vmatprep.subr.bf16.mxu0 %v6587_v61  ;;  %4382 = vmatprep.mubr.bf16.mxu1 %v6590_v62  ;;  %v6677_v60 = vld [vmem:[%s8422_s0 + $0x428] ss:$72 sps:$4 sm:$0xff]   ;;  %v6683_v62 = vld [vmem:[%s7446_s14 + $0x8f4] ss:$8 sps:$4 sm:$0xff]  }
 0x23c   : > { %4834 = vmatprep.mubr.bf16.mxu0 %v6593_v63  ;;  %v6678_v61 = vld [vmem:[%s7446_s14 + $0x8e0] ss:$8 sps:$4 sm:$0xff]   ;;  %v6686_v63 = vld [vmem:[%s8422_s0 + $0x44] ss:$72 sps:$4 sm:$0xff]  }
 0x23d   : > { %4381 = vmatpush1.bf16.msra.mxu1 %v6582_v0  ;;  %v6689_v0 = vld [vmem:[%s8422_s0 + $0x284] ss:$72 sps:$4 sm:$0xff]  }
 0x23e   : > { %4833 = vmatpush1.bf16.msra.mxu0 %v6585_v1  ;;  %5728 = vmatprep.subr.bf16.mxu1 %v6596_v2  ;;  %v6681_v1 = vld [vmem:[%s7446_s14 + $0x8f0] ss:$8 sps:$4 sm:$0xff]  }
 0x23f   : > { %4915 = vmatprep.subr.bf16.mxu0 %v6596_v2  ;;  %v6684_v2 = vld [vmem:[%s8422_s0 + $0x40] ss:$72 sps:$4 sm:$0xff]  }
 0x240   : > { %4383 = vmatmul.mubr.bf16.vlgmr.msra.gmra.mrb[0].mxu1 %v6588_v3  ;;  %v6687_v3 = vld [vmem:[%s8422_s0 + $0x280] ss:$72 sps:$4 sm:$0xff]  }
 0x241   : > { %4835 = vmatmul.mubr.bf16.vlgmr.msra.gmra.mrb[0].mxu0 %v6591_v4  ;;  %5744 = vmatpush1.bf16.msra.mxu1 %v6594_v5  ;;  %v6690_v4 = vld [vmem:[%s8422_s0 + $0xd4] ss:$72 sps:$4 sm:$0xff]  }
 0x242   : > { %4916 = vmatpush1.bf16.msra.mxu0 %v6594_v5  ;;  %5729 = vmatprep.subr.bf16.mxu1 %v6599_v6  ;;  %v6692_v5 = vld [vmem:[%s8422_s0 + $0x314] ss:$72 sps:$4 sm:$0xff]  }
 0x243   : > { %4917 = vmatprep.subr.bf16.mxu0 %v6599_v6  ;;  %4392 = vmatprep.mubr.bf16.mxu1 %v6600_v7  ;;  %v6694_v6 = vld [vmem:[%s8422_s0 + $0xd0] ss:$72 sps:$4 sm:$0xff]  }
 0x244   : > { %4844 = vmatprep.mubr.bf16.mxu0 %v6602_v8  ;;  %v6695_v7 = vld [vmem:[%s8422_s0 + $0x310] ss:$72 sps:$4 sm:$0xff]   ;;  %v6696_v8 = vld [vmem:[%s8422_s0 + $0x164] ss:$72 sps:$4 sm:$0xff]  }
 0x245   : > { %5745 = vmatpush1.bf16.msra.mxu1 %v6597_v9 }
 0x246   : > { %4918 = vmatpush1.bf16.msra.mxu0 %v6597_v9  ;;  %5730 = vmatprep.subr.bf16.mxu1 %v6608_v10  ;;  %v6698_v9 = vld [vmem:[%s8422_s0 + $0x3a4] ss:$72 sps:$4 sm:$0xff]  }
 0x247   : > { %4919 = vmatprep.subr.bf16.mxu0 %v6608_v10  ;;  %v6700_v10 = vld [vmem:[%s8422_s0 + $0x160] ss:$72 sps:$4 sm:$0xff]  }
 0x248   : > { %4393 = vmatmul.mubr.bf16.gmra.mrb[4].mxu1 %v6604_v11  ;;  %v6701_v11 = vld [vmem:[%s8422_s0 + $0x3a0] ss:$72 sps:$4 sm:$0xff]  }
 0x249   : > { %4845 = vmatmul.mubr.bf16.gmra.mrb[4].mxu0 %v6605_v12  ;;  %5746 = vmatpush1.bf16.msra.mxu1 %v6606_v13  ;;  %v6702_v12 = vld [vmem:[%s8422_s0 + $0x1f4] ss:$72 sps:$4 sm:$0xff]  }
 0x24a   : > { %4920 = vmatpush1.bf16.msra.mxu0 %v6606_v13  ;;  %5731 = vmatprep.subr.bf16.mxu1 %v6611_v14  ;;  %v6704_v13 = vld [vmem:[%s8422_s0 + $0x434] ss:$72 sps:$4 sm:$0xff]  }
 0x24b   : > { %4921 = vmatprep.subr.bf16.mxu0 %v6611_v14  ;;  %4402 = vmatprep.mubr.bf16.mxu1 %v6612_v15  ;;  %v6706_v14 = vld [vmem:[%s8422_s0 + $0x1f0] ss:$72 sps:$4 sm:$0xff]  }
 0x24c   : > { %4854 = vmatprep.mubr.bf16.mxu0 %v6614_v16  ;;  %v6707_v15 = vld [vmem:[%s8422_s0 + $0x430] ss:$72 sps:$4 sm:$0xff]  }
 0x24d   : > { %5747 = vmatpush1.bf16.msra.mxu1 %v6609_v17 }
 0x24e   : > { %4922 = vmatpush1.bf16.msra.mxu0 %v6609_v17  ;;  %5732 = vmatprep.subr.bf16.mxu1 %v6620_v18 }
 0x24f   : > { %4923 = vmatprep.subr.bf16.mxu0 %v6620_v18 }
 0x250   : > { %4403 = vmatmul.mubr.bf16.gmra.mrb[8].mxu1 %v6616_v19 }
 0x251   : > { %4855 = vmatmul.mubr.bf16.gmra.mrb[8].mxu0 %v6617_v20  ;;  %5748 = vmatpush1.bf16.msra.mxu1 %v6618_v21 }
 0x252   : > { %4924 = vmatpush1.bf16.msra.mxu0 %v6618_v21  ;;  %5733 = vmatprep.subr.bf16.mxu1 %v6623_v22 }
 0x253   : > { %4925 = vmatprep.subr.bf16.mxu0 %v6623_v22  ;;  %4412 = vmatprep.mubr.bf16.mxu1 %v6624_v23 }
 0x254   : > { %4864 = vmatprep.mubr.bf16.mxu0 %v6626_v24 }
 0x255   : > { %5749 = vmatpush1.bf16.msra.mxu1 %v6621_v25 }
 0x256   : > { %4926 = vmatpush1.bf16.msra.mxu0 %v6621_v25  ;;  %5734 = vmatprep.subr.bf16.mxu1 %v6632_v26 }
 0x257   : > { %4927 = vmatprep.subr.bf16.mxu0 %v6632_v26 }
 0x258   : > { %4413 = vmatmul.mubr.bf16.gmra.mrb[12].mxu1 %v6628_v27 }
 0x259   : > { %4865 = vmatmul.mubr.bf16.gmra.mrb[12].mxu0 %v6629_v28  ;;  %5750 = vmatpush1.bf16.msra.mxu1 %v6630_v29 }
 0x25a   : > { %4928 = vmatpush1.bf16.msra.mxu0 %v6630_v29  ;;  %5735 = vmatprep.subr.bf16.mxu1 %v6635_v30 }
 0x25b   : > { %4929 = vmatprep.subr.bf16.mxu0 %v6635_v30  ;;  %4422 = vmatprep.mubr.bf16.mxu1 %v6636_v31 }
 0x25c   : > { %4874 = vmatprep.mubr.bf16.mxu0 %v6638_v32 }
 0x25d   : > { %5751 = vmatpush1.bf16.msra.mxu1 %v6633_v33 }
 0x25e   : > { %4930 = vmatpush1.bf16.msra.mxu0 %v6633_v33  ;;  %5736 = vmatprep.subr.bf16.mxu1 %v6644_v34 }
 0x25f   : > { %4931 = vmatprep.subr.bf16.mxu0 %v6644_v34 }
 0x260   : > { %4423 = vmatmul.mubr.bf16.gmra.mrb[16].mxu1 %v6640_v35 }
 0x261   : > { %4875 = vmatmul.mubr.bf16.gmra.mrb[16].mxu0 %v6641_v36  ;;  %5752 = vmatpush1.bf16.msra.mxu1 %v6642_v37 }
 0x262   : > { %4932 = vmatpush1.bf16.msra.mxu0 %v6642_v37  ;;  %5737 = vmatprep.subr.bf16.mxu1 %v6647_v38 }
 0x263   : > { %4933 = vmatprep.subr.bf16.mxu0 %v6647_v38  ;;  %4432 = vmatprep.mubr.bf16.mxu1 %v6648_v39 }
 0x264   : > { %4884 = vmatprep.mubr.bf16.mxu0 %v6650_v40 }
 0x265   : > { %5753 = vmatpush1.bf16.msra.mxu1 %v6645_v41 }
 0x266   : > { %4934 = vmatpush1.bf16.msra.mxu0 %v6645_v41  ;;  %5738 = vmatprep.subr.bf16.mxu1 %v6656_v42 }
 0x267   : > { %4935 = vmatprep.subr.bf16.mxu0 %v6656_v42 }
 0x268   : > { %4433 = vmatmul.mubr.bf16.gmra.mrb[20].mxu1 %v6652_v43 }
 0x269   : > { %4885 = vmatmul.mubr.bf16.gmra.mrb[20].mxu0 %v6653_v44  ;;  %5754 = vmatpush1.bf16.msra.mxu1 %v6654_v45 }
 0x26a   : > { %4936 = vmatpush1.bf16.msra.mxu0 %v6654_v45  ;;  %5739 = vmatprep.subr.bf16.mxu1 %v6659_v46 }
 0x26b   : > { %4937 = vmatprep.subr.bf16.mxu0 %v6659_v46  ;;  %4442 = vmatprep.mubr.bf16.mxu1 %v6660_v47 }
 0x26c   : > { %4894 = vmatprep.mubr.bf16.mxu0 %v6662_v48 }
 0x26d   : > { %5755 = vmatpush1.bf16.msra.mxu1 %v6657_v49 }
 0x26e   : > { %4938 = vmatpush1.bf16.msra.mxu0 %v6657_v49  ;;  %5740 = vmatprep.subr.bf16.mxu1 %v6668_v50 }
 0x26f   : > { %4939 = vmatprep.subr.bf16.mxu0 %v6668_v50 }
 0x270   : > { %4443 = vmatmul.mubr.bf16.gmra.mrb[24].mxu1 %v6664_v51 }
 0x271   : > { %4895 = vmatmul.mubr.bf16.gmra.mrb[24].mxu0 %v6665_v52  ;;  %5756 = vmatpush1.bf16.msra.mxu1 %v6666_v53 }
 0x272   : > { %4940 = vmatpush1.bf16.msra.mxu0 %v6666_v53  ;;  %5741 = vmatprep.subr.bf16.mxu1 %v6671_v54 }
 0x273   : > { %4941 = vmatprep.subr.bf16.mxu0 %v6671_v54  ;;  %4452 = vmatprep.mubr.bf16.mxu1 %v6672_v55 }
 0x274   : > { %4904 = vmatprep.mubr.bf16.mxu0 %v6674_v56 }
 0x275   : > { %5757 = vmatpush1.bf16.msra.mxu1 %v6669_v57 }
 0x276   : > { %4942 = vmatpush1.bf16.msra.mxu0 %v6669_v57  ;;  %5742 = vmatprep.subr.bf16.mxu1 %v6680_v58 }
 0x277   : > { %4943 = vmatprep.subr.bf16.mxu0 %v6680_v58 }
 0x278   : > { %4453 = vmatmul.mubr.bf16.gmra.mrb[28].mxu1 %v6676_v59 }
 0x279   : > { %4905 = vmatmul.mubr.bf16.gmra.mrb[28].mxu0 %v6677_v60  ;;  %5758 = vmatpush1.bf16.msra.mxu1 %v6678_v61 }
 0x27a   : > { %4944 = vmatpush1.bf16.msra.mxu0 %v6678_v61  ;;  %5743 = vmatprep.subr.bf16.mxu1 %v6683_v62 }
 0x27b   : > { %4945 = vmatprep.subr.bf16.mxu0 %v6683_v62  ;;  %4947 = vmatprep.mubr.bf16.mxu0 %v6686_v63 }
 0x27c   : > { %4987 = vmatprep.mubr.bf16.mxu1 %v6689_v0 }
 0x27d   : > { %5759 = vmatpush1.bf16.msra.mxu1 %v6681_v1 }
 0x27e   : > { %4946 = vmatpush1.bf16.msra.mxu0 %v6681_v1 }
 0x280   : > { %4988 = vmatmul.mubr.bf16.vlgmr.msra.gmra.mrb[32].mxu1 %v6687_v3  ;;  %v5030_v3 = vlaneseq }
 0x281   : > { %4948 = vmatmul.mubr.bf16.vlgmr.msra.gmra.mrb[0].mxu0 %v6684_v2  ;;  %4997 = vmatprep.mubr.bf16.mxu1 %v6692_v5 }
 0x282   : > { %4957 = vmatprep.mubr.bf16.mxu0 %v6690_v4  ;;  %v5031_v5 = vshrl.u32 %v5030_v3, 7 }
 0x288   : > { %4998 = vmatmul.mubr.bf16.gmra.mrb[36].mxu1 %v6695_v7 }
 0x289   : > { %4958 = vmatmul.mubr.bf16.gmra.mrb[4].mxu0 %v6694_v6  ;;  %5007 = vmatprep.mubr.bf16.mxu1 %v6698_v9 }
 0x28a   : > { %4967 = vmatprep.mubr.bf16.mxu0 %v6696_v8 }
 0x290   : > { %5008 = vmatmul.mubr.bf16.gmra.mrb[40].mxu1 %v6701_v11 }
 0x291   : > { %4968 = vmatmul.mubr.bf16.gmra.mrb[8].mxu0 %v6700_v10  ;;  %5017 = vmatprep.mubr.bf16.mxu1 %v6704_v13 }
 0x292   : > { %4977 = vmatprep.mubr.bf16.mxu0 %v6702_v12 }
 0x298   : > { %5018 = vmatmul.mubr.bf16.gmra.mrb[44].mxu1 %v6707_v15 }
 0x299   : > { %4978 = vmatmul.mubr.bf16.gmra.mrb[12].mxu0 %v6706_v14 }
 0x313   : > { %v8162_v16 = vpop.f32.mrb[0].mxu1 }
 0x314   : > { %v8164_v17 = vpop.f32.mrb[1].mxu1 }
 0x315   : > { %v8166_v18 = vpop.f32.mrb[2].mxu1 }
 0x316   : > { %v8168_v19 = vpop.f32.mrb[3].mxu1 }
 0x31b   : > { %v8170_v20 = vpop.f32.mrb[4].mxu1 }
 0x31c   : > { %v8172_v21 = vpop.f32.mrb[5].mxu1 }
 0x31d   : > { %v8174_v22 = vpop.f32.mrb[6].mxu1 }
 0x31e   : > { %v8176_v23 = vpop.f32.mrb[7].mxu1 }
 0x323   : > { %v8178_v24 = vpop.f32.mrb[8].mxu1 }
 0x324   : > { %v8180_v25 = vpop.f32.mrb[9].mxu1 }
 0x325   : > { %v8182_v26 = vpop.f32.mrb[10].mxu1 }
 0x326   : > { %v8184_v27 = vpop.f32.mrb[11].mxu1 }
 0x32b   : > { %v8186_v28 = vpop.f32.mrb[12].mxu1 }
 0x32c   : > { %v8188_v29 = vpop.f32.mrb[13].mxu1 }
 0x32d   : > { %v8190_v30 = vpop.f32.mrb[14].mxu1 }
 0x32e   : > { %v8192_v31 = vpop.f32.mrb[15].mxu1 }
 0x333   : > { %v4424_v32 = vpop.f32.mrb[16].mxu1 }
 0x334   : > { %v4876_v33 = vpop.f32.mrb[16].mxu0  ;;  %v4426_v35 = vpop.f32.mrb[17].mxu1 }
 0x335   : > { %v8194_v34 = vadd.f32 %v4876_v33, %v4424_v32  ;;  %v4878_v36 = vpop.f32.mrb[17].mxu0  ;;  %v4428_v38 = vpop.f32.mrb[18].mxu1  ;;  %v5032_v33 = vsub.s32 0, %v5031_v5 }
 0x336   : > { %v8196_v37 = vadd.f32 %v4878_v36, %v4426_v35  ;;  %v4880_v39 = vpop.f32.mrb[18].mxu0  ;;  %v4430_v41 = vpop.f32.mrb[19].mxu1  ;;  %v5028_v36 = vld [vmem:[%s1411_s20] sm:$0x3] }
 0x337   : > { %v8198_v40 = vadd.f32 %v4880_v39, %v4428_v38  ;;  %v4882_v42 = vpop.f32.mrb[19].mxu0  ;;  %v5036_v38 = vsub.s32 1, %v5031_v5  ;;  %v5072_v39 = vld [vmem:[%s1416_s27] sm:$0x3] }
 0x338   : > { %v8200_v43 = vadd.f32 %v4882_v42, %v4430_v41  ;;  %v8233_v41 = vrot.slane %v5028_v36, %v5032_v33 }
 0x33b   : > { %v4434_v44 = vpop.f32.mrb[20].mxu1 }
 0x33c   : > { %v4886_v45 = vpop.f32.mrb[20].mxu0  ;;  %v4436_v47 = vpop.f32.mrb[21].mxu1 }
 0x33d   : > { %v8202_v46 = vadd.f32 %v4886_v45, %v4434_v44  ;;  %v4888_v48 = vpop.f32.mrb[21].mxu0  ;;  %v4438_v50 = vpop.f32.mrb[22].mxu1  ;;  %v8235_v45 = vrot.slane %v5028_v36, %v5036_v38 }
 0x33e   : > { %v8204_v49 = vadd.f32 %v4888_v48, %v4436_v47  ;;  %v4890_v51 = vpop.f32.mrb[22].mxu0  ;;  %v4440_v53 = vpop.f32.mrb[23].mxu1  ;;  %v8238_v48 = vrot.slane %v5072_v39, %v5032_v33 }
 0x33f   : > { %v8206_v52 = vadd.f32 %v4890_v51, %v4438_v50  ;;  %v4892_v54 = vpop.f32.mrb[23].mxu0 }
 0x340   : > { %v8208_v55 = vadd.f32 %v4892_v54, %v4440_v53 }
 0x343   : > { %v4444_v56 = vpop.f32.mrb[24].mxu1 }
 0x344   : > { %v4896_v57 = vpop.f32.mrb[24].mxu0  ;;  %v4446_v59 = vpop.f32.mrb[25].mxu1 }
 0x345   : > { %v8211_v58 = vadd.f32 %v4896_v57, %v4444_v56  ;;  %v4898_v60 = vpop.f32.mrb[25].mxu0  ;;  %v4448_v62 = vpop.f32.mrb[26].mxu1  ;;  %v8242_v56 = vrot.slane %v5072_v39, %v5036_v38 }
 0x346   : > { %v8213_v61 = vadd.f32 %v4898_v60, %v4446_v59  ;;  %v4900_v63 = vpop.f32.mrb[26].mxu0  ;;  %v4450_v1 = vpop.f32.mrb[27].mxu1 }
 0x347   : > { %v8215_v0 = vadd.f32 %v4900_v63, %v4448_v62  ;;  %v4902_v2 = vpop.f32.mrb[27].mxu0 }
 0x348   : > { %v8217_v4 = vadd.f32 %v4902_v2, %v4450_v1 }
 0x34b   : > { %v4454_v6 = vpop.f32.mrb[28].mxu1 }
 0x34c   : > { %v4906_v7 = vpop.f32.mrb[28].mxu0  ;;  %v4456_v9 = vpop.f32.mrb[29].mxu1 }
 0x34d   : > { %v8219_v8 = vadd.f32 %v4906_v7, %v4454_v6  ;;  %v4908_v10 = vpop.f32.mrb[29].mxu0  ;;  %v4458_v12 = vpop.f32.mrb[30].mxu1 }
 0x34e   : > { %v8224_v11 = vadd.f32 %v4908_v10, %v4456_v9  ;;  %v4910_v13 = vpop.f32.mrb[30].mxu0  ;;  %v4460_v15 = vpop.f32.mrb[31].mxu1 }
 0x34f   : > { %v8226_v14 = vadd.f32 %v4910_v13, %v4458_v12  ;;  %v4912_v32 = vpop.f32.mrb[31].mxu0 }
 0x350   : > { %v8231_v35 = vadd.f32 %v4912_v32, %v4460_v15 }
 0x353   : > { %v4989_v44 = vpop.f32.mrb[32].mxu1 }
 0x354   : > { %v4949_v42 = vpop.f32.mrb[0].mxu0  ;;  %v5777_v50 = vadd.f32 %v8194_v34, %v4989_v44  ;;  %v4991_v53 = vpop.f32.mrb[33].mxu1 }
 0x355   : > { %v5760_v47 = vadd.f32 %v4949_v42, %v8162_v16  ;;  %v4951_v51 = vpop.f32.mrb[1].mxu0  ;;  %v5779_v57 = vadd.f32 %v8196_v37, %v4991_v53  ;;  %v4993_v60 = vpop.f32.mrb[34].mxu1 }
 0x356   : > { %v5761_v54 = vadd.f32 %v4951_v51, %v8164_v17  ;;  %v4953_v59 = vpop.f32.mrb[2].mxu0  ;;  %v5056_v63 = vmul.f32 %v5777_v50, %v8233_v41  ;;  %v5781_v1 = vadd.f32 %v8198_v40, %v4993_v60  ;;  %v4995_v2 = vpop.f32.mrb[35].mxu1 }
 0x357   : > { %v5040_v62 = vmul.f32 %v5760_v47, %v8233_v41  ;;  %v5762_v16 = vadd.f32 %v4953_v59, %v8166_v18  ;;  %v4955_v34 = vpop.f32.mrb[3].mxu0  ;;  %v5057_v17 = vmul.f32 %v5779_v57, %v8235_v45  ;;  %v5783_v37 = vadd.f32 %v8200_v43, %v4995_v2 }
 0x358   : > { %v5041_v3 = vmul.f32 %v5761_v54, %v8235_v45  ;;  %v5763_v5 = vadd.f32 %v4955_v34, %v8168_v19  ;;  %v5100_v7 = vadd.f32 %v8238_v48, %v5056_v63  ;;  %v5058_v18 = vmul.f32 %v5781_v1, %v8233_v41 }
 0x359   : > { %v5084_v6 = vadd.f32 %v8238_v48, %v5040_v62  ;;  %v5042_v9 = vmul.f32 %v5762_v16, %v8233_v41  ;;  %v5101_v10 = vadd.f32 %v8242_v56, %v5057_v17  ;;  %v5059_v13 = vmul.f32 %v5783_v37, %v8235_v45 }
 0x35a   : > { %v5085_v40 = vadd.f32 %v8242_v56, %v5041_v3  ;;  %v5043_v12 = vmul.f32 %v5763_v5, %v8235_v45  ;;  %v5132_v19 = vmax.f32 %v5100_v7, 0.0  ;;  %v5102_v32 = vadd.f32 %v8238_v48, %v5058_v18 }
 0x35b   : > { %v5116_v15 = vmax.f32 %v5084_v6, 0.0  ;;  %v5086_v43 = vadd.f32 %v8238_v48, %v5042_v9  ;;  %v5133_v36 = vmax.f32 %v5101_v10, 0.0  ;;  %v5103_v39 = vadd.f32 %v8242_v56, %v5059_v13  ;;  %v4999_v44 = vpop.f32.mrb[36].mxu1 }
 0x35c   : > { %v5117_v33 = vmax.f32 %v5085_v40, 0.0  ;;  %v5087_v38 = vadd.f32 %v8242_v56, %v5043_v12  ;;  %v4959_v42 = vpop.f32.mrb[4].mxu0  ;;  %5164 = vst [vmem:[%s8266_s29 + $0x80] sm:$0xff] %v5132_v19  ;;  %v5134_v50 = vmax.f32 %v5102_v32, 0.0  ;;  %v5785_v53 = vadd.f32 %v8202_v46, %v4999_v44  ;;  %v5001_v57 = vpop.f32.mrb[37].mxu1 }
 0x35d   : > { %5148 = vst [vmem:[%s8266_s29] sm:$0xff] %v5116_v15  ;;  %v5118_v47 = vmax.f32 %v5086_v43, 0.0  ;;  %v5764_v51 = vadd.f32 %v4959_v42, %v8170_v20  ;;  %v4961_v54 = vpop.f32.mrb[5].mxu0  ;;  %5165 = vst [vmem:[%s8266_s29 + $0x88] sm:$0xff] %v5133_v36  ;;  %v5135_v60 = vmax.f32 %v5103_v39, 0.0  ;;  %v5787_v63 = vadd.f32 %v8204_v49, %v5001_v57  ;;  %v5003_v1 = vpop.f32.mrb[38].mxu1 }
 0x35e   : > { %5149 = vst [vmem:[%s8266_s29 + $0x8] sm:$0xff] %v5117_v33  ;;  %v5119_v59 = vmax.f32 %v5087_v38, 0.0  ;;  %v5765_v62 = vadd.f32 %v4961_v54, %v8172_v21  ;;  %v4963_v16 = vpop.f32.mrb[6].mxu0  ;;  %5166 = vst [vmem:[%s8266_s29 + $0x90] sm:$0xff] %v5134_v50  ;;  %v5060_v46 = vmul.f32 %v5785_v53, %v8233_v41  ;;  %v5789_v2 = vadd.f32 %v8206_v52, %v5003_v1  ;;  %v5005_v17 = vpop.f32.mrb[39].mxu1 }
 0x35f   : > { %5150 = vst [vmem:[%s8266_s29 + $0x10] sm:$0xff] %v5118_v47  ;;  %v5044_v20 = vmul.f32 %v5764_v51, %v8233_v41  ;;  %v5766_v34 = vadd.f32 %v4963_v16, %v8174_v22  ;;  %v4965_v3 = vpop.f32.mrb[7].mxu0  ;;  %5167 = vst [vmem:[%s8266_s29 + $0x98] sm:$0xff] %v5135_v60  ;;  %v5061_v49 = vmul.f32 %v5787_v63, %v8235_v45 }
 0x360   : > { %5151 = vst [vmem:[%s8266_s29 + $0x18] sm:$0xff] %v5119_v59  ;;  %v5045_v21 = vmul.f32 %v5765_v62, %v8235_v45  ;;  %v5767_v5 = vadd.f32 %v4965_v3, %v8176_v23  ;;  %v5791_v37 = vadd.f32 %v8208_v55, %v5005_v17  ;;  %v5104_v7 = vadd.f32 %v8238_v48, %v5060_v46 }
 0x361   : > { %v5088_v6 = vadd.f32 %v8238_v48, %v5044_v20  ;;  %v5046_v22 = vmul.f32 %v5766_v34, %v8233_v41  ;;  %v5062_v52 = vmul.f32 %v5789_v2, %v8233_v41  ;;  %v5105_v18 = vadd.f32 %v8242_v56, %v5061_v49 }
 0x362   : > { %v5089_v9 = vadd.f32 %v8242_v56, %v5045_v21  ;;  %v5047_v40 = vmul.f32 %v5767_v5, %v8235_v45  ;;  %v5063_v23 = vmul.f32 %v5791_v37, %v8235_v45  ;;  %v5136_v55 = vmax.f32 %v5104_v7, 0.0 }
 0x363   : > { %v5120_v10 = vmax.f32 %v5088_v6, 0.0  ;;  %v5090_v12 = vadd.f32 %v8238_v48, %v5046_v22  ;;  %v5106_v13 = vadd.f32 %v8238_v48, %v5062_v52  ;;  %v5137_v19 = vmax.f32 %v5105_v18, 0.0  ;;  %v5009_v36 = vpop.f32.mrb[40].mxu1 }
 0x364   : > { %v5121_v15 = vmax.f32 %v5089_v9, 0.0  ;;  %v5091_v43 = vadd.f32 %v8242_v56, %v5047_v40  ;;  %v5107_v32 = vadd.f32 %v8242_v56, %v5063_v23  ;;  %v4969_v33 = vpop.f32.mrb[8].mxu0  ;;  %5168 = vst [vmem:[%s8266_s29 + $0xa0] sm:$0xff] %v5136_v55  ;;  %v5793_v44 = vadd.f32 %v8211_v58, %v5009_v36  ;;  %v5011_v50 = vpop.f32.mrb[41].mxu1 }
 0x365   : > { %5152 = vst [vmem:[%s8266_s29 + $0x20] sm:$0xff] %v5120_v10  ;;  %v5122_v38 = vmax.f32 %v5090_v12, 0.0  ;;  %v5138_v39 = vmax.f32 %v5106_v13, 0.0  ;;  %v5768_v42 = vadd.f32 %v4969_v33, %v8178_v24  ;;  %v4971_v47 = vpop.f32.mrb[9].mxu0  ;;  %5169 = vst [vmem:[%s8266_s29 + $0xa8] sm:$0xff] %v5137_v19  ;;  %v5795_v57 = vadd.f32 %v8213_v61, %v5011_v50  ;;  %v5013_v60 = vpop.f32.mrb[42].mxu1 }
 0x366   : > { %5153 = vst [vmem:[%s8266_s29 + $0x28] sm:$0xff] %v5121_v15  ;;  %v5123_v51 = vmax.f32 %v5091_v43, 0.0  ;;  %v5139_v53 = vmax.f32 %v5107_v32, 0.0  ;;  %v5769_v54 = vadd.f32 %v4971_v47, %v8180_v25  ;;  %v4973_v59 = vpop.f32.mrb[10].mxu0  ;;  %v5064_v58 = vmul.f32 %v5793_v44, %v8233_v41  ;;  %v5015_v1 = vpop.f32.mrb[43].mxu1 }
 0x367   : > { %5154 = vst [vmem:[%s8266_s29 + $0x30] sm:$0xff] %v5122_v38  ;;  %5170 = vst [vmem:[%s8266_s29 + $0xb0] sm:$0xff] %v5138_v39  ;;  %v5048_v24 = vmul.f32 %v5768_v42, %v8233_v41  ;;  %v5770_v62 = vadd.f32 %v4973_v59, %v8182_v26  ;;  %v5797_v63 = vadd.f32 %v8215_v0, %v5013_v60  ;;  %v4975_v16 = vpop.f32.mrb[11].mxu0 }
 0x368   : > { %5155 = vst [vmem:[%s8266_s29 + $0x38] sm:$0xff] %v5123_v51  ;;  %5171 = vst [vmem:[%s8266_s29 + $0xb8] sm:$0xff] %v5139_v53  ;;  %v5049_v25 = vmul.f32 %v5769_v54, %v8235_v45  ;;  %v5065_v61 = vmul.f32 %v5795_v57, %v8235_v45  ;;  %v5771_v20 = vadd.f32 %v4975_v16, %v8184_v27 }
 0x369   : > { %v5799_v46 = vadd.f32 %v8217_v4, %v5015_v1  ;;  %v5092_v34 = vadd.f32 %v8238_v48, %v5048_v24  ;;  %v5108_v2 = vadd.f32 %v8238_v48, %v5064_v58  ;;  %v5050_v26 = vmul.f32 %v5770_v62, %v8233_v41 }
 0x36a   : > { %v5066_v0 = vmul.f32 %v5797_v63, %v8233_v41  ;;  %v5093_v3 = vadd.f32 %v8242_v56, %v5049_v25  ;;  %v5109_v17 = vadd.f32 %v8242_v56, %v5065_v61  ;;  %v5051_v21 = vmul.f32 %v5771_v20, %v8235_v45 }
 0x36b   : > { %v5067_v27 = vmul.f32 %v5799_v46, %v8235_v45  ;;  %v5124_v49 = vmax.f32 %v5092_v34, 0.0  ;;  %v5140_v4 = vmax.f32 %v5108_v2, 0.0  ;;  %v5094_v5 = vadd.f32 %v8238_v48, %v5050_v26  ;;  %v5019_v18 = vpop.f32.mrb[44].mxu1 }
 0x36c   : > { %v5110_v37 = vadd.f32 %v8238_v48, %v5066_v0  ;;  %v5125_v6 = vmax.f32 %v5093_v3, 0.0  ;;  %v5141_v7 = vmax.f32 %v5109_v17, 0.0  ;;  %v5095_v22 = vadd.f32 %v8242_v56, %v5051_v21  ;;  %v4979_v9 = vpop.f32.mrb[12].mxu0  ;;  %v5021_v13 = vpop.f32.mrb[45].mxu1 }
 0x36d   : > { %v5111_v52 = vadd.f32 %v8242_v56, %v5067_v27  ;;  %5156 = vst [vmem:[%s8266_s29 + $0x40] sm:$0xff] %v5124_v49  ;;  %5172 = vst [vmem:[%s8266_s29 + $0xc0] sm:$0xff] %v5140_v4  ;;  %v5126_v40 = vmax.f32 %v5094_v5, 0.0  ;;  %v5772_v10 = vadd.f32 %v4979_v9, %v8186_v28  ;;  %v5801_v55 = vadd.f32 %v8219_v8, %v5019_v18  ;;  %v4981_v12 = vpop.f32.mrb[13].mxu0  ;;  %v5023_v36 = vpop.f32.mrb[46].mxu1 }
 0x36e   : > { %v5142_v23 = vmax.f32 %v5110_v37, 0.0  ;;  %5157 = vst [vmem:[%s8266_s29 + $0x48] sm:$0xff] %v5125_v6  ;;  %5173 = vst [vmem:[%s8266_s29 + $0xc8] sm:$0xff] %v5141_v7  ;;  %v5127_v15 = vmax.f32 %v5095_v22, 0.0  ;;  %v5773_v43 = vadd.f32 %v4981_v12, %v8188_v29  ;;  %v5803_v32 = vadd.f32 %v8224_v11, %v5021_v13  ;;  %v4983_v33 = vpop.f32.mrb[14].mxu0  ;;  %v5025_v44 = vpop.f32.mrb[47].mxu1 }
 0x36f   : > { %v5143_v19 = vmax.f32 %v5111_v52, 0.0  ;;  %5158 = vst [vmem:[%s8266_s29 + $0x50] sm:$0xff] %v5126_v40  ;;  %v5052_v28 = vmul.f32 %v5772_v10, %v8233_v41  ;;  %v5068_v8 = vmul.f32 %v5801_v55, %v8233_v41  ;;  %v5774_v38 = vadd.f32 %v4983_v33, %v8190_v30  ;;  %v4985_v42 = vpop.f32.mrb[15].mxu0 }
 0x370   : > { %5174 = vst [vmem:[%s8266_s29 + $0xd0] sm:$0xff] %v5142_v23  ;;  %v5805_v39 = vadd.f32 %v8226_v14, %v5023_v36  ;;  %5159 = vst [vmem:[%s8266_s29 + $0x58] sm:$0xff] %v5127_v15  ;;  %v5053_v29 = vmul.f32 %v5773_v43, %v8235_v45  ;;  %v5069_v11 = vmul.f32 %v5803_v32, %v8235_v45 }
 0x371   : > { %5175 = vst [vmem:[%s8266_s29 + $0xd8] sm:$0xff] %v5143_v19  ;;  %v5775_v47 = vadd.f32 %v4985_v42, %v8192_v31  ;;  %v5807_v50 = vadd.f32 %v8231_v35, %v5025_v44  ;;  %v5096_v51 = vadd.f32 %v8238_v48, %v5052_v28  ;;  %v5112_v53 = vadd.f32 %v8238_v48, %v5068_v8 }
 0x372   : > { %v5054_v30 = vmul.f32 %v5774_v38, %v8233_v41  ;;  %v5070_v14 = vmul.f32 %v5805_v39, %v8233_v41  ;;  %v5097_v54 = vadd.f32 %v8242_v56, %v5053_v29  ;;  %v5113_v57 = vadd.f32 %v8242_v56, %v5069_v11 }
 0x373   : > { %v5055_v59 = vmul.f32 %v5775_v47, %v8235_v45  ;;  %v5071_v31 = vmul.f32 %v5807_v50, %v8235_v45  ;;  %v5128_v35 = vmax.f32 %v5096_v51, 0.0  ;;  %v5144_v60 = vmax.f32 %v5112_v53, 0.0 }
 0x374   : > { %v5098_v24 = vadd.f32 %v8238_v48, %v5054_v30  ;;  %v5114_v41 = vadd.f32 %v8238_v48, %v5070_v14  ;;  %v5129_v58 = vmax.f32 %v5097_v54, 0.0  ;;  %v5145_v62 = vmax.f32 %v5113_v57, 0.0 }
 0x375   : > { %v5099_v63 = vadd.f32 %v8242_v56, %v5055_v59  ;;  %v5115_v45 = vadd.f32 %v8242_v56, %v5071_v31  ;;  %5160 = vst [vmem:[%s8266_s29 + $0x60] sm:$0xff] %v5128_v35  ;;  %5176 = vst [vmem:[%s8266_s29 + $0xe0] sm:$0xff] %v5144_v60 }
 0x376   : > { %v5130_v16 = vmax.f32 %v5098_v24, 0.0  ;;  %v5146_v48 = vmax.f32 %v5114_v41, 0.0  ;;  %5161 = vst [vmem:[%s8266_s29 + $0x68] sm:$0xff] %v5129_v58  ;;  %5177 = vst [vmem:[%s8266_s29 + $0xe8] sm:$0xff] %v5145_v62 }
 0x377   : > { %v5131_v1 = vmax.f32 %v5099_v63, 0.0  ;;  %v5147_v25 = vmax.f32 %v5115_v45, 0.0 }
 0x378   : > { %5162 = vst [vmem:[%s8266_s29 + $0x70] sm:$0xff] %v5130_v16  ;;  %5178 = vst [vmem:[%s8266_s29 + $0xf0] sm:$0xff] %v5146_v48 }
 0x379   : > { %5163 = vst [vmem:[%s8266_s29 + $0x78] sm:$0xff] %v5131_v1  ;;  %5179 = vst [vmem:[%s8266_s29 + $0xf8] sm:$0xff] %v5147_v25 }
 0x37a   : > { %6721 = shalt.err (!%p6718_p7)
}
 0x37b   : > { %s6722_s13 = scalar_lea.hbm %s8369_s6, 4096  ;;  %s6726_s23 = scalar_lea.hbm %s8426_s4, 16384 }
 0x37c   : > { %p6723_p9 = scmp.ne.s32.totalorder %s8369_s6, %s6722_s13  ;;  %p6727_p12 = scmp.lt.u32.totalorder %s8369_s6, %s8426_s4 }
 0x37d   : > { %p6728_p13 = scmp.lt.u32.totalorder %s6726_s23, %s6722_s13  ;;  %p6730_p1 = scmp.lt.u32.totalorder %s6722_s13, %s8369_s6 }
 0x37e   : > { %p6724_p10 = pnand %p6723_p9, %p6840_p6 }
 0x37f   : > { %p6729_p0 = por %p6728_p13, %p6727_p12 }
 0x380   : > { %p6725_p11 = pneg %p6724_p10 }
 0x381   : > { %p6731_p2 = por %p6730_p1, %p6729_p0 }
 0x383   : > { %p6732_p3 = pnand %p6731_p2, %p6725_p11 }
 0x385   : > { %6735 = shalt.err (!%p6732_p3)
}
 0x386   : > { %s6773_s29 = smov 256   ;;  %s6774_s30 = smov 1024  }
 0x387   : > { %s6775_s19 = smov 16  }
 0x388   : > { %6018 = dma.vmem_to_hbm [thread:$0]  (%p6840_p6), %s8373_s5, 4096, %s8369_s6, %s5181_s7, %s6773_s29, %s6774_s30, %s6775_s19  }
 0x389 PF: > { %p6024_p4 = scmp.ge.s32.totalorder %s6770_s18, 2  ;;  %s5209_s14 = sand.u32 1, %s6758_s15  }
 0x38a   : > { %s5210_s9 = scalar_lea.sflag [#allocation4], %s5209_s14 }
 0x38b   : > { %p6021_p5 = pnand %p6024_p4, %p6844_p8 }
 0x38d   : > { %6753 = dma.done.wait (!%p6021_p5), %s5210_s9, 4096  }
 0x38e   : > { %6755 = vsyncadd (!%p6021_p5), %s5210_s9, 4294963200  ;;  %p14_p7 = scmp.ge.s32.totalorder %s6826_s21, 6   ;;  %s8429_s15 = smov %s6762_s16 }
 0x38f   : > { %s8430_s16 = smov %s6766_s17  ;;  %s8431_s17 = smov %s6838_s24 }
 0x390   : > { %s8432_s18 = smov %s6826_s21  ;;  %16 = sbr.rel (!%p14_p7) target bundleno = 3 (0x3), region = 120 }
 0x397   :  { %5215 = vsyncpa [#allocation4], 1 }
 0x398   :  { %5217 = vsyncpa [#allocation4 + $0x1], 1 }

// kernel: _lambda_.10
= control target key start
LH: loop header
LB: loop body
LE: loop exit
PB: predicated region body
PF: predicated region fallthrough
CT: control target
= control target key end

     0   :  { %s9837_s1 = inlined_call_operand.vmem [shape: bf16[3456,256], index: 1, kind: input, shape index: {}]   ;;  %s9838_s0 = inlined_call_operand.vmem [shape: bf16[128,3456], index: 0, kind: input, shape index: {}]   ;;  %s9839_s2 = inlined_call_operand.vmem [shape: f32[1,256], index: 2, kind: input, shape index: {}]   ;;  %s9840_s3 = inlined_call_operand.vmem [shape: f32[1,256], index: 3, kind: input, shape index: {}]   ;;  %s9841_s4 = inlined_call_operand.vmem [shape: f32[128,256], index: 4, kind: output, shape index: {}]  }
   0x1   :  { %v6725_v0 = vld [vmem:[%s9837_s1 + $0x4] ss:$8 sps:$4 sm:$0xff]   ;;  %v6729_v2 = vld [vmem:[%s9837_s1] ss:$8 sps:$4 sm:$0xff]   ;;  %v6731_v4 = vld [vmem:[%s9837_s1 + $0x14] ss:$8 sps:$4 sm:$0xff]  }
   0x2   :  { %v6727_v1 = vld [vmem:[%s9837_s1 + $0x704] ss:$8 sps:$4 sm:$0xff]   ;;  %3922 = vmatprep.subr.bf16.mxu1 %v6725_v0  ;;  %v6730_v3 = vld [vmem:[%s9837_s1 + $0x700] ss:$8 sps:$4 sm:$0xff]   ;;  %v6733_v5 = vld [vmem:[%s9837_s1 + $0x714] ss:$8 sps:$4 sm:$0xff]  }
   0x3   :  { %4713 = vmatprep.subr.bf16.mxu0 %v6727_v1  ;;  %3923 = vmatpush1.bf16.msra.mxu1 %v6729_v2  ;;  %v6735_v6 = vld [vmem:[%s9837_s1 + $0x10] ss:$8 sps:$4 sm:$0xff]   ;;  %v6737_v8 = vld [vmem:[%s9837_s1 + $0x24] ss:$8 sps:$4 sm:$0xff]   ;;  %v6741_v10 = vld [vmem:[%s9837_s1 + $0x20] ss:$8 sps:$4 sm:$0xff]  }
   0x4   :  { %4714 = vmatpush1.bf16.msra.mxu0 %v6730_v3  ;;  %3924 = vmatprep.subr.bf16.mxu1 %v6731_v4  ;;  %v6736_v7 = vld [vmem:[%s9837_s1 + $0x710] ss:$8 sps:$4 sm:$0xff]   ;;  %v6739_v9 = vld [vmem:[%s9837_s1 + $0x724] ss:$8 sps:$4 sm:$0xff]   ;;  %v6742_v11 = vld [vmem:[%s9837_s1 + $0x720] ss:$8 sps:$4 sm:$0xff]  }
   0x5   :  { %4715 = vmatprep.subr.bf16.mxu0 %v6733_v5  ;;  %v6743_v12 = vld [vmem:[%s9837_s1 + $0x34] ss:$8 sps:$4 sm:$0xff]   ;;  %v6747_v14 = vld [vmem:[%s9837_s1 + $0x30] ss:$8 sps:$4 sm:$0xff]   ;;  %v6749_v16 = vld [vmem:[%s9837_s1 + $0x44] ss:$8 sps:$4 sm:$0xff]  }
   0x6   :  { %v6745_v13 = vld [vmem:[%s9837_s1 + $0x734] ss:$8 sps:$4 sm:$0xff]   ;;  %v6748_v15 = vld [vmem:[%s9837_s1 + $0x730] ss:$8 sps:$4 sm:$0xff]   ;;  %v6751_v17 = vld [vmem:[%s9837_s1 + $0x744] ss:$8 sps:$4 sm:$0xff]  }
   0x7   :  { %3925 = vmatpush1.bf16.msra.mxu1 %v6735_v6  ;;  %v6753_v18 = vld [vmem:[%s9837_s1 + $0x40] ss:$8 sps:$4 sm:$0xff]   ;;  %v6755_v20 = vld [vmem:[%s9837_s1 + $0x54] ss:$8 sps:$4 sm:$0xff]   ;;  %v6759_v22 = vld [vmem:[%s9837_s1 + $0x50] ss:$8 sps:$4 sm:$0xff]  }
   0x8   :  { %4716 = vmatpush1.bf16.msra.mxu0 %v6736_v7  ;;  %3926 = vmatprep.subr.bf16.mxu1 %v6737_v8  ;;  %v6754_v19 = vld [vmem:[%s9837_s1 + $0x740] ss:$8 sps:$4 sm:$0xff]   ;;  %v6757_v21 = vld [vmem:[%s9837_s1 + $0x754] ss:$8 sps:$4 sm:$0xff]   ;;  %v6760_v23 = vld [vmem:[%s9837_s1 + $0x750] ss:$8 sps:$4 sm:$0xff]  }
   0x9   :  { %4717 = vmatprep.subr.bf16.mxu0 %v6739_v9  ;;  %v6761_v24 = vld [vmem:[%s9837_s1 + $0x64] ss:$8 sps:$4 sm:$0xff]   ;;  %v6765_v26 = vld [vmem:[%s9837_s1 + $0x60] ss:$8 sps:$4 sm:$0xff]   ;;  %v6767_v28 = vld [vmem:[%s9837_s1 + $0x74] ss:$8 sps:$4 sm:$0xff]  }
   0xa   :  { %v6763_v25 = vld [vmem:[%s9837_s1 + $0x764] ss:$8 sps:$4 sm:$0xff]   ;;  %v6766_v27 = vld [vmem:[%s9837_s1 + $0x760] ss:$8 sps:$4 sm:$0xff]   ;;  %v6769_v29 = vld [vmem:[%s9837_s1 + $0x774] ss:$8 sps:$4 sm:$0xff]  }
   0xb   :  { %3927 = vmatpush1.bf16.msra.mxu1 %v6741_v10  ;;  %v6771_v30 = vld [vmem:[%s9837_s1 + $0x70] ss:$8 sps:$4 sm:$0xff]   ;;  %v6773_v32 = vld [vmem:[%s9837_s1 + $0x84] ss:$8 sps:$4 sm:$0xff]   ;;  %v6777_v34 = vld [vmem:[%s9837_s1 + $0x80] ss:$8 sps:$4 sm:$0xff]  }
   0xc   :  { %4718 = vmatpush1.bf16.msra.mxu0 %v6742_v11  ;;  %3928 = vmatprep.subr.bf16.mxu1 %v6743_v12  ;;  %v6772_v31 = vld [vmem:[%s9837_s1 + $0x770] ss:$8 sps:$4 sm:$0xff]   ;;  %v6775_v33 = vld [vmem:[%s9837_s1 + $0x784] ss:$8 sps:$4 sm:$0xff]   ;;  %v6778_v35 = vld [vmem:[%s9837_s1 + $0x780] ss:$8 sps:$4 sm:$0xff]  }
   0xd   :  { %4719 = vmatprep.subr.bf16.mxu0 %v6745_v13  ;;  %v6779_v36 = vld [vmem:[%s9837_s1 + $0x94] ss:$8 sps:$4 sm:$0xff]   ;;  %v6783_v38 = vld [vmem:[%s9837_s1 + $0x90] ss:$8 sps:$4 sm:$0xff]   ;;  %v6785_v40 = vld [vmem:[%s9837_s1 + $0xa4] ss:$8 sps:$4 sm:$0xff]  }
   0xe   :  { %v6781_v37 = vld [vmem:[%s9837_s1 + $0x794] ss:$8 sps:$4 sm:$0xff]   ;;  %v6784_v39 = vld [vmem:[%s9837_s1 + $0x790] ss:$8 sps:$4 sm:$0xff]   ;;  %v6787_v41 = vld [vmem:[%s9837_s1 + $0x7a4] ss:$8 sps:$4 sm:$0xff]  }
   0xf   :  { %3929 = vmatpush1.bf16.msra.mxu1 %v6747_v14  ;;  %v6789_v42 = vld [vmem:[%s9837_s1 + $0xa0] ss:$8 sps:$4 sm:$0xff]   ;;  %v6791_v44 = vld [vmem:[%s9837_s1 + $0xb4] ss:$8 sps:$4 sm:$0xff]   ;;  %v6795_v46 = vld [vmem:[%s9837_s1 + $0xb0] ss:$8 sps:$4 sm:$0xff]  }
  0x10   :  { %4720 = vmatpush1.bf16.msra.mxu0 %v6748_v15  ;;  %3930 = vmatprep.subr.bf16.mxu1 %v6749_v16  ;;  %v6790_v43 = vld [vmem:[%s9837_s1 + $0x7a0] ss:$8 sps:$4 sm:$0xff]   ;;  %v6793_v45 = vld [vmem:[%s9837_s1 + $0x7b4] ss:$8 sps:$4 sm:$0xff]   ;;  %v6796_v47 = vld [vmem:[%s9837_s1 + $0x7b0] ss:$8 sps:$4 sm:$0xff]  }
  0x11   :  { %4721 = vmatprep.subr.bf16.mxu0 %v6751_v17  ;;  %v6797_v48 = vld [vmem:[%s9837_s1 + $0xc4] ss:$8 sps:$4 sm:$0xff]   ;;  %v6826_v51 = vld [vmem:[%s9838_s0 + $0x3c] ss:$108 sps:$4 sm:$0xff]   ;;  %v6807_v56 = vld [vmem:[%s9837_s1 + $0xd0] ss:$8 sps:$4 sm:$0xff]  }
  0x12   :  { %v6823_v49 = vld [vmem:[%s9838_s0 + $0x4] ss:$108 sps:$4 sm:$0xff]   ;;  %v6801_v52 = vld [vmem:[%s9837_s1 + $0xc0] ss:$8 sps:$4 sm:$0xff]   ;;  %4745 = vmatprep.mubr.bf16.mxu0 %v6826_v51  ;;  %v6803_v54 = vld [vmem:[%s9837_s1 + $0xd4] ss:$8 sps:$4 sm:$0xff]  }
  0x13   :  { %3931 = vmatpush1.bf16.msra.mxu1 %v6753_v18  ;;  %v6799_v50 = vld [vmem:[%s9837_s1 + $0x7c4] ss:$8 sps:$4 sm:$0xff]   ;;  %3954 = vmatprep.mubr.bf16.mxu1 %v6823_v49  ;;  %v6802_v53 = vld [vmem:[%s9837_s1 + $0x7c0] ss:$8 sps:$4 sm:$0xff]   ;;  %v6805_v55 = vld [vmem:[%s9837_s1 + $0x7d4] ss:$8 sps:$4 sm:$0xff]  }
  0x14   :  { %4722 = vmatpush1.bf16.msra.mxu0 %v6754_v19  ;;  %3932 = vmatprep.subr.bf16.mxu1 %v6755_v20  ;;  %v6808_v57 = vld [vmem:[%s9837_s1 + $0x7d0] ss:$8 sps:$4 sm:$0xff]   ;;  %v6809_v58 = vld [vmem:[%s9837_s1 + $0xe4] ss:$8 sps:$4 sm:$0xff]   ;;  %v6813_v60 = vld [vmem:[%s9837_s1 + $0xe0] ss:$8 sps:$4 sm:$0xff]  }
  0x15   :  { %4723 = vmatprep.subr.bf16.mxu0 %v6757_v21  ;;  %v6811_v59 = vld [vmem:[%s9837_s1 + $0x7e4] ss:$8 sps:$4 sm:$0xff]   ;;  %v6814_v61 = vld [vmem:[%s9837_s1 + $0x7e0] ss:$8 sps:$4 sm:$0xff]   ;;  %v6815_v62 = vld [vmem:[%s9837_s1 + $0xf4] ss:$8 sps:$4 sm:$0xff]  }
  0x16   :  { %v6817_v63 = vld [vmem:[%s9837_s1 + $0x7f4] ss:$8 sps:$4 sm:$0xff]   ;;  %v6819_v0 = vld [vmem:[%s9837_s1 + $0xf0] ss:$8 sps:$4 sm:$0xff]   ;;  %v6829_v2 = vld [vmem:[%s9837_s1 + $0x104] ss:$8 sps:$4 sm:$0xff]  }
  0x17   :  { %3933 = vmatpush1.bf16.msra.mxu1 %v6759_v22  ;;  %v6820_v1 = vld [vmem:[%s9837_s1 + $0x7f0] ss:$8 sps:$4 sm:$0xff]   ;;  %v6832_v3 = vld [vmem:[%s9837_s1 + $0x804] ss:$8 sps:$4 sm:$0xff]   ;;  %v6827_v6 = vld [vmem:[%s9837_s1 + $0x100] ss:$8 sps:$4 sm:$0xff]  }
  0x18   :  { %4724 = vmatpush1.bf16.msra.mxu0 %v6760_v23  ;;  %3934 = vmatprep.subr.bf16.mxu1 %v6761_v24  ;;  %v6821_v4 = vld [vmem:[%s9838_s0] ss:$108 sps:$4 sm:$0xff]   ;;  %v6824_v5 = vld [vmem:[%s9838_s0 + $0x38] ss:$108 sps:$4 sm:$0xff]   ;;  %v6835_v8 = vld [vmem:[%s9837_s1 + $0x114] ss:$8 sps:$4 sm:$0xff]  }
  0x19   :  { %4725 = vmatprep.subr.bf16.mxu0 %v6763_v25  ;;  %v6830_v7 = vld [vmem:[%s9837_s1 + $0x800] ss:$8 sps:$4 sm:$0xff]   ;;  %v6838_v9 = vld [vmem:[%s9837_s1 + $0x814] ss:$8 sps:$4 sm:$0xff]   ;;  %v6833_v12 = vld [vmem:[%s9837_s1 + $0x110] ss:$8 sps:$4 sm:$0xff]  }
  0x1a   :  { %v6839_v10 = vld [vmem:[%s9838_s0 + $0xdc] ss:$108 sps:$4 sm:$0xff]   ;;  %v6841_v11 = vld [vmem:[%s9838_s0 + $0x114] ss:$108 sps:$4 sm:$0xff]   ;;  %v6836_v13 = vld [vmem:[%s9837_s1 + $0x810] ss:$8 sps:$4 sm:$0xff]  }
  0x1b   :  { %3935 = vmatpush1.bf16.msra.mxu1 %v6765_v26  ;;  %v6846_v14 = vld [vmem:[%s9837_s1 + $0x124] ss:$8 sps:$4 sm:$0xff]   ;;  %v6844_v17 = vld [vmem:[%s9837_s1 + $0x120] ss:$8 sps:$4 sm:$0xff]   ;;  %v6847_v18 = vld [vmem:[%s9838_s0 + $0x110] ss:$108 sps:$4 sm:$0xff]  }
  0x1c   :  { %4726 = vmatpush1.bf16.msra.mxu0 %v6766_v27  ;;  %3936 = vmatprep.subr.bf16.mxu1 %v6767_v28  ;;  %v6850_v15 = vld [vmem:[%s9837_s1 + $0x824] ss:$8 sps:$4 sm:$0xff]   ;;  %v6848_v19 = vld [vmem:[%s9837_s1 + $0x820] ss:$8 sps:$4 sm:$0xff]   ;;  %v6853_v20 = vld [vmem:[%s9837_s1 + $0x134] ss:$8 sps:$4 sm:$0xff]  }
  0x1d   :  { %4727 = vmatprep.subr.bf16.mxu0 %v6769_v29  ;;  %v6843_v16 = vld [vmem:[%s9838_s0 + $0xd8] ss:$108 sps:$4 sm:$0xff]   ;;  %v6856_v21 = vld [vmem:[%s9837_s1 + $0x834] ss:$8 sps:$4 sm:$0xff]   ;;  %v6862_v29 = vld [vmem:[%s9837_s1 + $0x140] ss:$8 sps:$4 sm:$0xff]  }
  0x1e   :  { %v6857_v22 = vld [vmem:[%s9838_s0 + $0x1b4] ss:$108 sps:$4 sm:$0xff]   ;;  %v6859_v23 = vld [vmem:[%s9838_s0 + $0x1ec] ss:$108 sps:$4 sm:$0xff]   ;;  %v6861_v28 = vld [vmem:[%s9838_s0 + $0x1b0] ss:$108 sps:$4 sm:$0xff]  }
  0x1f   :  { %3937 = vmatpush1.bf16.msra.mxu1 %v6771_v30  ;;  %v6851_v24 = vld [vmem:[%s9837_s1 + $0x130] ss:$8 sps:$4 sm:$0xff]   ;;  %v6864_v26 = vld [vmem:[%s9837_s1 + $0x144] ss:$8 sps:$4 sm:$0xff]   ;;  %v6865_v30 = vld [vmem:[%s9838_s0 + $0x1e8] ss:$108 sps:$4 sm:$0xff]  }
  0x20   :  { %4728 = vmatpush1.bf16.msra.mxu0 %v6772_v31  ;;  %3938 = vmatprep.subr.bf16.mxu1 %v6773_v32  ;;  %v6854_v25 = vld [vmem:[%s9837_s1 + $0x830] ss:$8 sps:$4 sm:$0xff]   ;;  %v6868_v27 = vld [vmem:[%s9837_s1 + $0x844] ss:$8 sps:$4 sm:$0xff]   ;;  %v6866_v31 = vld [vmem:[%s9837_s1 + $0x840] ss:$8 sps:$4 sm:$0xff]  }
  0x21   :  { %4729 = vmatprep.subr.bf16.mxu0 %v6775_v33  ;;  %v6871_v32 = vld [vmem:[%s9837_s1 + $0x154] ss:$8 sps:$4 sm:$0xff]   ;;  %v6890_v49 = vld [vmem:[%s9837_s1 + $0x870] ss:$8 sps:$4 sm:$0xff]   ;;  %v6904_v51 = vld [vmem:[%s9837_s1 + $0x884] ss:$8 sps:$4 sm:$0xff]  }
  0x22   :  { %v6874_v33 = vld [vmem:[%s9837_s1 + $0x854] ss:$8 sps:$4 sm:$0xff]  }
  0x23   :  { %3939 = vmatpush1.bf16.msra.mxu1 %v6777_v34  ;;  %v6875_v34 = vld [vmem:[%s9838_s0 + $0x28c] ss:$108 sps:$4 sm:$0xff]  }
  0x24   :  { %4730 = vmatpush1.bf16.msra.mxu0 %v6778_v35  ;;  %3940 = vmatprep.subr.bf16.mxu1 %v6779_v36  ;;  %v6877_v35 = vld [vmem:[%s9838_s0 + $0x2c4] ss:$108 sps:$4 sm:$0xff]  }
  0x25   :  { %4731 = vmatprep.subr.bf16.mxu0 %v6781_v37  ;;  %v6869_v36 = vld [vmem:[%s9837_s1 + $0x150] ss:$8 sps:$4 sm:$0xff]  }
  0x26   :  { %v6872_v37 = vld [vmem:[%s9837_s1 + $0x850] ss:$8 sps:$4 sm:$0xff]  }
  0x27   :  { %3941 = vmatpush1.bf16.msra.mxu1 %v6783_v38  ;;  %v6882_v38 = vld [vmem:[%s9837_s1 + $0x164] ss:$8 sps:$4 sm:$0xff]  }
  0x28   :  { %4732 = vmatpush1.bf16.msra.mxu0 %v6784_v39  ;;  %3942 = vmatprep.subr.bf16.mxu1 %v6785_v40  ;;  %v6886_v39 = vld [vmem:[%s9837_s1 + $0x864] ss:$8 sps:$4 sm:$0xff]   ;;  %v6879_v40 = vld [vmem:[%s9838_s0 + $0x288] ss:$108 sps:$4 sm:$0xff]  }
  0x29   :  { %4733 = vmatprep.subr.bf16.mxu0 %v6787_v41  ;;  %v6880_v41 = vld [vmem:[%s9837_s1 + $0x160] ss:$8 sps:$4 sm:$0xff]  }
  0x2b   :  { %3943 = vmatpush1.bf16.msra.mxu1 %v6789_v42  ;;  %v6883_v42 = vld [vmem:[%s9838_s0 + $0x2c0] ss:$108 sps:$4 sm:$0xff]  }
  0x2c   :  { %4734 = vmatpush1.bf16.msra.mxu0 %v6790_v43  ;;  %3944 = vmatprep.subr.bf16.mxu1 %v6791_v44  ;;  %v6884_v43 = vld [vmem:[%s9837_s1 + $0x860] ss:$8 sps:$4 sm:$0xff]   ;;  %v6889_v44 = vld [vmem:[%s9837_s1 + $0x174] ss:$8 sps:$4 sm:$0xff]  }
  0x2d   :  { %4735 = vmatprep.subr.bf16.mxu0 %v6793_v45  ;;  %v6892_v45 = vld [vmem:[%s9837_s1 + $0x874] ss:$8 sps:$4 sm:$0xff]  }
  0x2f   :  { %3945 = vmatpush1.bf16.msra.mxu1 %v6795_v46  ;;  %v6893_v46 = vld [vmem:[%s9838_s0 + $0x364] ss:$108 sps:$4 sm:$0xff]  }
  0x30   :  { %4736 = vmatpush1.bf16.msra.mxu0 %v6796_v47  ;;  %3946 = vmatprep.subr.bf16.mxu1 %v6797_v48  ;;  %v6895_v47 = vld [vmem:[%s9838_s0 + $0x39c] ss:$108 sps:$4 sm:$0xff]   ;;  %v6887_v48 = vld [vmem:[%s9837_s1 + $0x170] ss:$8 sps:$4 sm:$0xff]  }
  0x31   :  { %4737 = vmatprep.subr.bf16.mxu0 %v6799_v50  ;;  %v6900_v50 = vld [vmem:[%s9837_s1 + $0x184] ss:$8 sps:$4 sm:$0xff]  }
  0x33   :  { %3947 = vmatpush1.bf16.msra.mxu1 %v6801_v52  ;;  %v6897_v52 = vld [vmem:[%s9838_s0 + $0x360] ss:$108 sps:$4 sm:$0xff]  }
  0x34   :  { %4738 = vmatpush1.bf16.msra.mxu0 %v6802_v53  ;;  %3948 = vmatprep.subr.bf16.mxu1 %v6803_v54  ;;  %v6898_v53 = vld [vmem:[%s9837_s1 + $0x180] ss:$8 sps:$4 sm:$0xff]   ;;  %v6901_v54 = vld [vmem:[%s9838_s0 + $0x398] ss:$108 sps:$4 sm:$0xff]  }
  0x35   :  { %4739 = vmatprep.subr.bf16.mxu0 %v6805_v55  ;;  %v6902_v55 = vld [vmem:[%s9837_s1 + $0x880] ss:$8 sps:$4 sm:$0xff]  }
  0x37   :  { %3949 = vmatpush1.bf16.msra.mxu1 %v6807_v56  ;;  %v6907_v56 = vld [vmem:[%s9837_s1 + $0x194] ss:$8 sps:$4 sm:$0xff]  }
  0x38   :  { %4740 = vmatpush1.bf16.msra.mxu0 %v6808_v57  ;;  %3950 = vmatprep.subr.bf16.mxu1 %v6809_v58  ;;  %v6910_v57 = vld [vmem:[%s9837_s1 + $0x894] ss:$8 sps:$4 sm:$0xff]  }
  0x39   :  { %4741 = vmatprep.subr.bf16.mxu0 %v6811_v59  ;;  %v6911_v58 = vld [vmem:[%s9838_s0 + $0x43c] ss:$108 sps:$4 sm:$0xff]   ;;  %v6913_v59 = vld [vmem:[%s9838_s0 + $0x474] ss:$108 sps:$4 sm:$0xff]  }
  0x3b   :  { %3951 = vmatpush1.bf16.msra.mxu1 %v6813_v60  ;;  %v6905_v60 = vld [vmem:[%s9837_s1 + $0x190] ss:$8 sps:$4 sm:$0xff]  }
  0x3c   :  { %4742 = vmatpush1.bf16.msra.mxu0 %v6814_v61  ;;  %3952 = vmatprep.subr.bf16.mxu1 %v6815_v62  ;;  %v6908_v61 = vld [vmem:[%s9837_s1 + $0x890] ss:$8 sps:$4 sm:$0xff]   ;;  %v6918_v62 = vld [vmem:[%s9837_s1 + $0x1a4] ss:$8 sps:$4 sm:$0xff]  }
  0x3d   :  { %4743 = vmatprep.subr.bf16.mxu0 %v6817_v63  ;;  %v6922_v63 = vld [vmem:[%s9837_s1 + $0x8a4] ss:$8 sps:$4 sm:$0xff]  }
  0x3f   :  { %3953 = vmatpush1.bf16.msra.mxu1 %v6819_v0  ;;  %v6915_v0 = vld [vmem:[%s9838_s0 + $0x438] ss:$108 sps:$4 sm:$0xff]  }
  0x40   :  { %4744 = vmatpush1.bf16.msra.mxu0 %v6820_v1  ;;  %4035 = vmatprep.subr.bf16.mxu1 %v6829_v2  ;;  %v6916_v1 = vld [vmem:[%s9837_s1 + $0x1a0] ss:$8 sps:$4 sm:$0xff]   ;;  %v6919_v2 = vld [vmem:[%s9838_s0 + $0x470] ss:$108 sps:$4 sm:$0xff]  }
  0x41   :  { %4826 = vmatprep.subr.bf16.mxu0 %v6832_v3  ;;  %v6920_v3 = vld [vmem:[%s9837_s1 + $0x8a0] ss:$8 sps:$4 sm:$0xff]  }
  0x42   :  { %3955 = vmatmul.mubr.bf16.vlgmr.msra.gmra.mrb[0].mxu1 %v6821_v4  ;;  %v6925_v4 = vld [vmem:[%s9837_s1 + $0x1b4] ss:$8 sps:$4 sm:$0xff]  }
  0x43   :  { %4746 = vmatmul.mubr.bf16.vlgmr.msra.gmra.mrb[0].mxu0 %v6824_v5  ;;  %4036 = vmatpush1.bf16.msra.mxu1 %v6827_v6  ;;  %v6928_v5 = vld [vmem:[%s9837_s1 + $0x8b4] ss:$8 sps:$4 sm:$0xff]  }
  0x44   :  { %4827 = vmatpush1.bf16.msra.mxu0 %v6830_v7  ;;  %4037 = vmatprep.subr.bf16.mxu1 %v6835_v8  ;;  %v6929_v6 = vld [vmem:[%s9838_s0 + $0x514] ss:$108 sps:$4 sm:$0xff]   ;;  %v6931_v7 = vld [vmem:[%s9838_s0 + $0x54c] ss:$108 sps:$4 sm:$0xff]  }
  0x45   :  { %4828 = vmatprep.subr.bf16.mxu0 %v6838_v9  ;;  %3964 = vmatprep.mubr.bf16.mxu1 %v6839_v10  ;;  %v6923_v8 = vld [vmem:[%s9837_s1 + $0x1b0] ss:$8 sps:$4 sm:$0xff]   ;;  %v6936_v10 = vld [vmem:[%s9837_s1 + $0x1c4] ss:$8 sps:$4 sm:$0xff]  }
  0x46   :  { %4755 = vmatprep.mubr.bf16.mxu0 %v6841_v11  ;;  %v6926_v9 = vld [vmem:[%s9837_s1 + $0x8b0] ss:$8 sps:$4 sm:$0xff]   ;;  %v6940_v11 = vld [vmem:[%s9837_s1 + $0x8c4] ss:$8 sps:$4 sm:$0xff]  }
  0x47   :  { %4038 = vmatpush1.bf16.msra.mxu1 %v6833_v12  ;;  %v6933_v12 = vld [vmem:[%s9838_s0 + $0x510] ss:$108 sps:$4 sm:$0xff]  }
  0x48   :  { %4829 = vmatpush1.bf16.msra.mxu0 %v6836_v13  ;;  %4039 = vmatprep.subr.bf16.mxu1 %v6846_v14  ;;  %v6934_v13 = vld [vmem:[%s9837_s1 + $0x1c0] ss:$8 sps:$4 sm:$0xff]  }
  0x49   :  { %4830 = vmatprep.subr.bf16.mxu0 %v6850_v15  ;;  %v6937_v14 = vld [vmem:[%s9838_s0 + $0x548] ss:$108 sps:$4 sm:$0xff]  }
  0x4a   :  { %3965 = vmatmul.mubr.bf16.gmra.mrb[4].mxu1 %v6843_v16  ;;  %v6938_v15 = vld [vmem:[%s9837_s1 + $0x8c0] ss:$8 sps:$4 sm:$0xff]   ;;  %v6943_v16 = vld [vmem:[%s9837_s1 + $0x1d4] ss:$8 sps:$4 sm:$0xff]  }
  0x4b   :  { %4756 = vmatmul.mubr.bf16.gmra.mrb[4].mxu0 %v6847_v18  ;;  %4040 = vmatpush1.bf16.msra.mxu1 %v6844_v17  ;;  %v6946_v17 = vld [vmem:[%s9837_s1 + $0x8d4] ss:$8 sps:$4 sm:$0xff]   ;;  %v6947_v18 = vld [vmem:[%s9838_s0 + $0x5ec] ss:$108 sps:$4 sm:$0xff]  }
  0x4c   :  { %4831 = vmatpush1.bf16.msra.mxu0 %v6848_v19  ;;  %4041 = vmatprep.subr.bf16.mxu1 %v6853_v20  ;;  %v6949_v19 = vld [vmem:[%s9838_s0 + $0x624] ss:$108 sps:$4 sm:$0xff]  }
  0x4d   :  { %4832 = vmatprep.subr.bf16.mxu0 %v6856_v21  ;;  %3974 = vmatprep.mubr.bf16.mxu1 %v6857_v22  ;;  %v6941_v20 = vld [vmem:[%s9837_s1 + $0x1d0] ss:$8 sps:$4 sm:$0xff]   ;;  %v6954_v22 = vld [vmem:[%s9837_s1 + $0x1e4] ss:$8 sps:$4 sm:$0xff]  }
  0x4e   :  { %4765 = vmatprep.mubr.bf16.mxu0 %v6859_v23  ;;  %v6944_v21 = vld [vmem:[%s9837_s1 + $0x8d0] ss:$8 sps:$4 sm:$0xff]   ;;  %v6958_v23 = vld [vmem:[%s9837_s1 + $0x8e4] ss:$8 sps:$4 sm:$0xff]  }
  0x4f   :  { %4042 = vmatpush1.bf16.msra.mxu1 %v6851_v24  ;;  %v6951_v24 = vld [vmem:[%s9838_s0 + $0x5e8] ss:$108 sps:$4 sm:$0xff]  }
  0x50   :  { %4833 = vmatpush1.bf16.msra.mxu0 %v6854_v25  ;;  %4043 = vmatprep.subr.bf16.mxu1 %v6864_v26  ;;  %v6952_v25 = vld [vmem:[%s9837_s1 + $0x1e0] ss:$8 sps:$4 sm:$0xff]  }
  0x51   :  { %4834 = vmatprep.subr.bf16.mxu0 %v6868_v27  ;;  %v6955_v26 = vld [vmem:[%s9838_s0 + $0x620] ss:$108 sps:$4 sm:$0xff]  }
  0x52   :  { %3975 = vmatmul.mubr.bf16.gmra.mrb[8].mxu1 %v6861_v28  ;;  %v6956_v27 = vld [vmem:[%s9837_s1 + $0x8e0] ss:$8 sps:$4 sm:$0xff]   ;;  %v6961_v28 = vld [vmem:[%s9837_s1 + $0x1f4] ss:$8 sps:$4 sm:$0xff]  }
  0x53   :  { %4766 = vmatmul.mubr.bf16.gmra.mrb[8].mxu0 %v6865_v30  ;;  %4044 = vmatpush1.bf16.msra.mxu1 %v6862_v29  ;;  %v6964_v29 = vld [vmem:[%s9837_s1 + $0x8f4] ss:$8 sps:$4 sm:$0xff]   ;;  %v6967_v30 = vld [vmem:[%s9838_s0 + $0xc] ss:$108 sps:$4 sm:$0xff]  }
  0x54   :  { %4835 = vmatpush1.bf16.msra.mxu0 %v6866_v31  ;;  %4045 = vmatprep.subr.bf16.mxu1 %v6871_v32  ;;  %v6970_v31 = vld [vmem:[%s9838_s0 + $0x44] ss:$108 sps:$4 sm:$0xff]  }
  0x55   :  { %4836 = vmatprep.subr.bf16.mxu0 %v6874_v33  ;;  %3984 = vmatprep.mubr.bf16.mxu1 %v6875_v34  ;;  %v6959_v32 = vld [vmem:[%s9837_s1 + $0x1f0] ss:$8 sps:$4 sm:$0xff]   ;;  %v6973_v34 = vld [vmem:[%s9837_s1 + $0x204] ss:$8 sps:$4 sm:$0xff]  }
  0x56   :  { %4775 = vmatprep.mubr.bf16.mxu0 %v6877_v35  ;;  %v6962_v33 = vld [vmem:[%s9837_s1 + $0x8f0] ss:$8 sps:$4 sm:$0xff]   ;;  %v6976_v35 = vld [vmem:[%s9837_s1 + $0x904] ss:$8 sps:$4 sm:$0xff]  }
  0x57   :  { %4046 = vmatpush1.bf16.msra.mxu1 %v6869_v36  ;;  %v6965_v36 = vld [vmem:[%s9838_s0 + $0x8] ss:$108 sps:$4 sm:$0xff]  }
  0x58   :  { %4837 = vmatpush1.bf16.msra.mxu0 %v6872_v37  ;;  %4047 = vmatprep.subr.bf16.mxu1 %v6882_v38  ;;  %v6968_v37 = vld [vmem:[%s9838_s0 + $0x40] ss:$108 sps:$4 sm:$0xff]  }
  0x59   :  { %4838 = vmatprep.subr.bf16.mxu0 %v6886_v39  ;;  %v6971_v38 = vld [vmem:[%s9837_s1 + $0x200] ss:$8 sps:$4 sm:$0xff]  }
  0x5a   :  { %3985 = vmatmul.mubr.bf16.gmra.mrb[12].mxu1 %v6879_v40  ;;  %v6974_v39 = vld [vmem:[%s9837_s1 + $0x900] ss:$8 sps:$4 sm:$0xff]   ;;  %v6979_v40 = vld [vmem:[%s9837_s1 + $0x214] ss:$8 sps:$4 sm:$0xff]  }
  0x5b   :  { %4776 = vmatmul.mubr.bf16.gmra.mrb[12].mxu0 %v6883_v42  ;;  %4048 = vmatpush1.bf16.msra.mxu1 %v6880_v41  ;;  %v6982_v41 = vld [vmem:[%s9837_s1 + $0x914] ss:$8 sps:$4 sm:$0xff]   ;;  %v6983_v42 = vld [vmem:[%s9838_s0 + $0xe4] ss:$108 sps:$4 sm:$0xff]  }
  0x5c   :  { %4839 = vmatpush1.bf16.msra.mxu0 %v6884_v43  ;;  %4049 = vmatprep.subr.bf16.mxu1 %v6889_v44  ;;  %v6985_v43 = vld [vmem:[%s9838_s0 + $0x11c] ss:$108 sps:$4 sm:$0xff]   ;;  %v6977_v44 = vld [vmem:[%s9837_s1 + $0x210] ss:$8 sps:$4 sm:$0xff]  }
  0x5d   :  { %4840 = vmatprep.subr.bf16.mxu0 %v6892_v45  ;;  %3994 = vmatprep.mubr.bf16.mxu1 %v6893_v46  ;;  %v6980_v45 = vld [vmem:[%s9837_s1 + $0x910] ss:$8 sps:$4 sm:$0xff]   ;;  %v6990_v46 = vld [vmem:[%s9837_s1 + $0x224] ss:$8 sps:$4 sm:$0xff]  }
  0x5e   :  { %4785 = vmatprep.mubr.bf16.mxu0 %v6895_v47  ;;  %v6994_v47 = vld [vmem:[%s9837_s1 + $0x924] ss:$8 sps:$4 sm:$0xff]  }
  0x5f   :  { %4050 = vmatpush1.bf16.msra.mxu1 %v6887_v48  ;;  %v6987_v48 = vld [vmem:[%s9838_s0 + $0xe0] ss:$108 sps:$4 sm:$0xff]  }
  0x60   :  { %4841 = vmatpush1.bf16.msra.mxu0 %v6890_v49  ;;  %4051 = vmatprep.subr.bf16.mxu1 %v6900_v50  ;;  %v6988_v49 = vld [vmem:[%s9837_s1 + $0x220] ss:$8 sps:$4 sm:$0xff]   ;;  %v6991_v50 = vld [vmem:[%s9838_s0 + $0x118] ss:$108 sps:$4 sm:$0xff]  }
  0x61   :  { %4842 = vmatprep.subr.bf16.mxu0 %v6904_v51  ;;  %v6992_v51 = vld [vmem:[%s9837_s1 + $0x920] ss:$8 sps:$4 sm:$0xff]  }
  0x62   :  { %3995 = vmatmul.mubr.bf16.gmra.mrb[16].mxu1 %v6897_v52  ;;  %v6997_v52 = vld [vmem:[%s9837_s1 + $0x234] ss:$8 sps:$4 sm:$0xff]  }
  0x63   :  { %4786 = vmatmul.mubr.bf16.gmra.mrb[16].mxu0 %v6901_v54  ;;  %4052 = vmatpush1.bf16.msra.mxu1 %v6898_v53  ;;  %v7000_v53 = vld [vmem:[%s9837_s1 + $0x934] ss:$8 sps:$4 sm:$0xff]  }
  0x64   :  { %4843 = vmatpush1.bf16.msra.mxu0 %v6902_v55  ;;  %4053 = vmatprep.subr.bf16.mxu1 %v6907_v56  ;;  %v7001_v54 = vld [vmem:[%s9838_s0 + $0x1bc] ss:$108 sps:$4 sm:$0xff]   ;;  %v7003_v55 = vld [vmem:[%s9838_s0 + $0x1f4] ss:$108 sps:$4 sm:$0xff]   ;;  %v6995_v56 = vld [vmem:[%s9837_s1 + $0x230] ss:$8 sps:$4 sm:$0xff]  }
  0x65   :  { %4844 = vmatprep.subr.bf16.mxu0 %v6910_v57  ;;  %4004 = vmatprep.mubr.bf16.mxu1 %v6911_v58  ;;  %v6998_v57 = vld [vmem:[%s9837_s1 + $0x930] ss:$8 sps:$4 sm:$0xff]   ;;  %v7008_v58 = vld [vmem:[%s9837_s1 + $0x244] ss:$8 sps:$4 sm:$0xff]  }
  0x66   :  { %4795 = vmatprep.mubr.bf16.mxu0 %v6913_v59  ;;  %v7012_v59 = vld [vmem:[%s9837_s1 + $0x944] ss:$8 sps:$4 sm:$0xff]  }
  0x67   :  { %4054 = vmatpush1.bf16.msra.mxu1 %v6905_v60  ;;  %v7005_v60 = vld [vmem:[%s9838_s0 + $0x1b8] ss:$108 sps:$4 sm:$0xff]  }
  0x68   :  { %4845 = vmatpush1.bf16.msra.mxu0 %v6908_v61  ;;  %4055 = vmatprep.subr.bf16.mxu1 %v6918_v62  ;;  %v7006_v61 = vld [vmem:[%s9837_s1 + $0x240] ss:$8 sps:$4 sm:$0xff]   ;;  %v7009_v62 = vld [vmem:[%s9838_s0 + $0x1f0] ss:$108 sps:$4 sm:$0xff]  }
  0x69   :  { %4846 = vmatprep.subr.bf16.mxu0 %v6922_v63  ;;  %v7010_v63 = vld [vmem:[%s9837_s1 + $0x940] ss:$8 sps:$4 sm:$0xff]  }
  0x6a   :  { %4005 = vmatmul.mubr.bf16.gmra.mrb[20].mxu1 %v6915_v0  ;;  %v7015_v0 = vld [vmem:[%s9837_s1 + $0x254] ss:$8 sps:$4 sm:$0xff]  }
  0x6b   :  { %4796 = vmatmul.mubr.bf16.gmra.mrb[20].mxu0 %v6919_v2  ;;  %4056 = vmatpush1.bf16.msra.mxu1 %v6916_v1  ;;  %v7018_v1 = vld [vmem:[%s9837_s1 + $0x954] ss:$8 sps:$4 sm:$0xff]  }
  0x6c   :  { %4847 = vmatpush1.bf16.msra.mxu0 %v6920_v3  ;;  %4057 = vmatprep.subr.bf16.mxu1 %v6925_v4  ;;  %v7019_v2 = vld [vmem:[%s9838_s0 + $0x294] ss:$108 sps:$4 sm:$0xff]   ;;  %v7021_v3 = vld [vmem:[%s9838_s0 + $0x2cc] ss:$108 sps:$4 sm:$0xff]  }
  0x6d   :  { %4848 = vmatprep.subr.bf16.mxu0 %v6928_v5  ;;  %4014 = vmatprep.mubr.bf16.mxu1 %v6929_v6  ;;  %v7013_v4 = vld [vmem:[%s9837_s1 + $0x250] ss:$8 sps:$4 sm:$0xff]   ;;  %v7026_v6 = vld [vmem:[%s9837_s1 + $0x264] ss:$8 sps:$4 sm:$0xff]  }
  0x6e   :  { %4805 = vmatprep.mubr.bf16.mxu0 %v6931_v7  ;;  %v7016_v5 = vld [vmem:[%s9837_s1 + $0x950] ss:$8 sps:$4 sm:$0xff]   ;;  %v7030_v7 = vld [vmem:[%s9837_s1 + $0x964] ss:$8 sps:$4 sm:$0xff]  }
  0x6f   :  { %4058 = vmatpush1.bf16.msra.mxu1 %v6923_v8  ;;  %v7023_v8 = vld [vmem:[%s9838_s0 + $0x290] ss:$108 sps:$4 sm:$0xff]  }
  0x70   :  { %4849 = vmatpush1.bf16.msra.mxu0 %v6926_v9  ;;  %4059 = vmatprep.subr.bf16.mxu1 %v6936_v10  ;;  %v7024_v9 = vld [vmem:[%s9837_s1 + $0x260] ss:$8 sps:$4 sm:$0xff]  }
  0x71   :  { %4850 = vmatprep.subr.bf16.mxu0 %v6940_v11  ;;  %v7027_v10 = vld [vmem:[%s9838_s0 + $0x2c8] ss:$108 sps:$4 sm:$0xff]  }
  0x72   :  { %4015 = vmatmul.mubr.bf16.gmra.mrb[24].mxu1 %v6933_v12  ;;  %v7028_v11 = vld [vmem:[%s9837_s1 + $0x960] ss:$8 sps:$4 sm:$0xff]   ;;  %v7033_v12 = vld [vmem:[%s9837_s1 + $0x274] ss:$8 sps:$4 sm:$0xff]  }
  0x73   :  { %4806 = vmatmul.mubr.bf16.gmra.mrb[24].mxu0 %v6937_v14  ;;  %4060 = vmatpush1.bf16.msra.mxu1 %v6934_v13  ;;  %v7036_v13 = vld [vmem:[%s9837_s1 + $0x974] ss:$8 sps:$4 sm:$0xff]   ;;  %v7037_v14 = vld [vmem:[%s9838_s0 + $0x36c] ss:$108 sps:$4 sm:$0xff]  }
  0x74   :  { %4851 = vmatpush1.bf16.msra.mxu0 %v6938_v15  ;;  %4061 = vmatprep.subr.bf16.mxu1 %v6943_v16  ;;  %v7039_v15 = vld [vmem:[%s9838_s0 + $0x3a4] ss:$108 sps:$4 sm:$0xff]  }
  0x75   :  { %4852 = vmatprep.subr.bf16.mxu0 %v6946_v17  ;;  %4024 = vmatprep.mubr.bf16.mxu1 %v6947_v18  ;;  %v7031_v16 = vld [vmem:[%s9837_s1 + $0x270] ss:$8 sps:$4 sm:$0xff]   ;;  %v7044_v18 = vld [vmem:[%s9837_s1 + $0x284] ss:$8 sps:$4 sm:$0xff]  }
  0x76   :  { %4815 = vmatprep.mubr.bf16.mxu0 %v6949_v19  ;;  %v7034_v17 = vld [vmem:[%s9837_s1 + $0x970] ss:$8 sps:$4 sm:$0xff]   ;;  %v7048_v19 = vld [vmem:[%s9837_s1 + $0x984] ss:$8 sps:$4 sm:$0xff]  }
  0x77   :  { %4062 = vmatpush1.bf16.msra.mxu1 %v6941_v20  ;;  %v7041_v20 = vld [vmem:[%s9838_s0 + $0x368] ss:$108 sps:$4 sm:$0xff]  }
  0x78   :  { %4853 = vmatpush1.bf16.msra.mxu0 %v6944_v21  ;;  %4063 = vmatprep.subr.bf16.mxu1 %v6954_v22  ;;  %v7042_v21 = vld [vmem:[%s9837_s1 + $0x280] ss:$8 sps:$4 sm:$0xff]  }
  0x79   :  { %4854 = vmatprep.subr.bf16.mxu0 %v6958_v23  ;;  %v7045_v22 = vld [vmem:[%s9838_s0 + $0x3a0] ss:$108 sps:$4 sm:$0xff]  }
  0x7a   :  { %4025 = vmatmul.mubr.bf16.gmra.mrb[28].mxu1 %v6951_v24  ;;  %v7046_v23 = vld [vmem:[%s9837_s1 + $0x980] ss:$8 sps:$4 sm:$0xff]   ;;  %v7051_v24 = vld [vmem:[%s9837_s1 + $0x294] ss:$8 sps:$4 sm:$0xff]  }
  0x7b   :  { %4816 = vmatmul.mubr.bf16.gmra.mrb[28].mxu0 %v6955_v26  ;;  %4064 = vmatpush1.bf16.msra.mxu1 %v6952_v25  ;;  %v7054_v25 = vld [vmem:[%s9837_s1 + $0x994] ss:$8 sps:$4 sm:$0xff]   ;;  %v7055_v26 = vld [vmem:[%s9838_s0 + $0x444] ss:$108 sps:$4 sm:$0xff]  }
  0x7c   :  { %4855 = vmatpush1.bf16.msra.mxu0 %v6956_v27  ;;  %4065 = vmatprep.subr.bf16.mxu1 %v6961_v28  ;;  %v7057_v27 = vld [vmem:[%s9838_s0 + $0x47c] ss:$108 sps:$4 sm:$0xff]   ;;  %v7049_v28 = vld [vmem:[%s9837_s1 + $0x290] ss:$8 sps:$4 sm:$0xff]  }
  0x7d   :  { %4856 = vmatprep.subr.bf16.mxu0 %v6964_v29  ;;  %4067 = vmatprep.mubr.bf16.mxu1 %v6967_v30  ;;  %v7052_v29 = vld [vmem:[%s9837_s1 + $0x990] ss:$8 sps:$4 sm:$0xff]   ;;  %v7062_v30 = vld [vmem:[%s9837_s1 + $0x2a4] ss:$8 sps:$4 sm:$0xff]  }
  0x7e   :  { %4858 = vmatprep.mubr.bf16.mxu0 %v6970_v31  ;;  %v7066_v31 = vld [vmem:[%s9837_s1 + $0x9a4] ss:$8 sps:$4 sm:$0xff]  }
  0x7f   :  { %4066 = vmatpush1.bf16.msra.mxu1 %v6959_v32  ;;  %v7059_v32 = vld [vmem:[%s9838_s0 + $0x440] ss:$108 sps:$4 sm:$0xff]  }
  0x80   :  { %4857 = vmatpush1.bf16.msra.mxu0 %v6962_v33  ;;  %4148 = vmatprep.subr.bf16.mxu1 %v6973_v34  ;;  %v7060_v33 = vld [vmem:[%s9837_s1 + $0x2a0] ss:$8 sps:$4 sm:$0xff]   ;;  %v7063_v34 = vld [vmem:[%s9838_s0 + $0x478] ss:$108 sps:$4 sm:$0xff]  }
  0x81   :  { %4939 = vmatprep.subr.bf16.mxu0 %v6976_v35  ;;  %v7064_v35 = vld [vmem:[%s9837_s1 + $0x9a0] ss:$8 sps:$4 sm:$0xff]  }
  0x82   :  { %4068 = vmatmul.mubr.bf16.vlgmr.msra.gmra.mrb[0].mxu1 %v6965_v36  ;;  %v7069_v36 = vld [vmem:[%s9837_s1 + $0x2b4] ss:$8 sps:$4 sm:$0xff]  }
  0x83   :  { %4859 = vmatmul.mubr.bf16.vlgmr.msra.gmra.mrb[0].mxu0 %v6968_v37  ;;  %4149 = vmatpush1.bf16.msra.mxu1 %v6971_v38  ;;  %v7072_v37 = vld [vmem:[%s9837_s1 + $0x9b4] ss:$8 sps:$4 sm:$0xff]  }
  0x84   :  { %4940 = vmatpush1.bf16.msra.mxu0 %v6974_v39  ;;  %4150 = vmatprep.subr.bf16.mxu1 %v6979_v40  ;;  %v7073_v38 = vld [vmem:[%s9838_s0 + $0x51c] ss:$108 sps:$4 sm:$0xff]   ;;  %v7075_v39 = vld [vmem:[%s9838_s0 + $0x554] ss:$108 sps:$4 sm:$0xff]   ;;  %v7067_v40 = vld [vmem:[%s9837_s1 + $0x2b0] ss:$8 sps:$4 sm:$0xff]  }
  0x85   :  { %4941 = vmatprep.subr.bf16.mxu0 %v6982_v41  ;;  %4077 = vmatprep.mubr.bf16.mxu1 %v6983_v42  ;;  %v7070_v41 = vld [vmem:[%s9837_s1 + $0x9b0] ss:$8 sps:$4 sm:$0xff]   ;;  %v7080_v42 = vld [vmem:[%s9837_s1 + $0x2c4] ss:$8 sps:$4 sm:$0xff]  }
  0x86   :  { %4868 = vmatprep.mubr.bf16.mxu0 %v6985_v43  ;;  %v7084_v43 = vld [vmem:[%s9837_s1 + $0x9c4] ss:$8 sps:$4 sm:$0xff]  }
  0x87   :  { %4151 = vmatpush1.bf16.msra.mxu1 %v6977_v44  ;;  %v7077_v44 = vld [vmem:[%s9838_s0 + $0x518] ss:$108 sps:$4 sm:$0xff]  }
  0x88   :  { %4942 = vmatpush1.bf16.msra.mxu0 %v6980_v45  ;;  %4152 = vmatprep.subr.bf16.mxu1 %v6990_v46  ;;  %v7078_v45 = vld [vmem:[%s9837_s1 + $0x2c0] ss:$8 sps:$4 sm:$0xff]   ;;  %v7081_v46 = vld [vmem:[%s9838_s0 + $0x550] ss:$108 sps:$4 sm:$0xff]  }
  0x89   :  { %4943 = vmatprep.subr.bf16.mxu0 %v6994_v47  ;;  %v7082_v47 = vld [vmem:[%s9837_s1 + $0x9c0] ss:$8 sps:$4 sm:$0xff]  }
  0x8a   :  { %4078 = vmatmul.mubr.bf16.gmra.mrb[4].mxu1 %v6987_v48  ;;  %v7087_v48 = vld [vmem:[%s9837_s1 + $0x2d4] ss:$8 sps:$4 sm:$0xff]  }
  0x8b   :  { %4869 = vmatmul.mubr.bf16.gmra.mrb[4].mxu0 %v6991_v50  ;;  %4153 = vmatpush1.bf16.msra.mxu1 %v6988_v49  ;;  %v7090_v49 = vld [vmem:[%s9837_s1 + $0x9d4] ss:$8 sps:$4 sm:$0xff]  }
  0x8c   :  { %4944 = vmatpush1.bf16.msra.mxu0 %v6992_v51  ;;  %4154 = vmatprep.subr.bf16.mxu1 %v6997_v52  ;;  %v7091_v50 = vld [vmem:[%s9838_s0 + $0x5f4] ss:$108 sps:$4 sm:$0xff]   ;;  %v7093_v51 = vld [vmem:[%s9838_s0 + $0x62c] ss:$108 sps:$4 sm:$0xff]  }
  0x8d   :  { %4945 = vmatprep.subr.bf16.mxu0 %v7000_v53  ;;  %4087 = vmatprep.mubr.bf16.mxu1 %v7001_v54  ;;  %v7085_v52 = vld [vmem:[%s9837_s1 + $0x2d0] ss:$8 sps:$4 sm:$0xff]   ;;  %v7098_v54 = vld [vmem:[%s9837_s1 + $0x2e4] ss:$8 sps:$4 sm:$0xff]  }
  0x8e   :  { %4878 = vmatprep.mubr.bf16.mxu0 %v7003_v55  ;;  %v7088_v53 = vld [vmem:[%s9837_s1 + $0x9d0] ss:$8 sps:$4 sm:$0xff]   ;;  %v7102_v55 = vld [vmem:[%s9837_s1 + $0x9e4] ss:$8 sps:$4 sm:$0xff]  }
  0x8f   :  { %4155 = vmatpush1.bf16.msra.mxu1 %v6995_v56  ;;  %v7095_v56 = vld [vmem:[%s9838_s0 + $0x5f0] ss:$108 sps:$4 sm:$0xff]  }
  0x90   :  { %4946 = vmatpush1.bf16.msra.mxu0 %v6998_v57  ;;  %4156 = vmatprep.subr.bf16.mxu1 %v7008_v58  ;;  %v7096_v57 = vld [vmem:[%s9837_s1 + $0x2e0] ss:$8 sps:$4 sm:$0xff]  }
  0x91   :  { %4947 = vmatprep.subr.bf16.mxu0 %v7012_v59  ;;  %v7099_v58 = vld [vmem:[%s9838_s0 + $0x628] ss:$108 sps:$4 sm:$0xff]  }
  0x92   :  { %4088 = vmatmul.mubr.bf16.gmra.mrb[8].mxu1 %v7005_v60  ;;  %v7100_v59 = vld [vmem:[%s9837_s1 + $0x9e0] ss:$8 sps:$4 sm:$0xff]   ;;  %v7105_v60 = vld [vmem:[%s9837_s1 + $0x2f4] ss:$8 sps:$4 sm:$0xff]  }
  0x93   :  { %4879 = vmatmul.mubr.bf16.gmra.mrb[8].mxu0 %v7009_v62  ;;  %4157 = vmatpush1.bf16.msra.mxu1 %v7006_v61  ;;  %v7108_v61 = vld [vmem:[%s9837_s1 + $0x9f4] ss:$8 sps:$4 sm:$0xff]  }
  0x94   :  { %4948 = vmatpush1.bf16.msra.mxu0 %v7010_v63  ;;  %4158 = vmatprep.subr.bf16.mxu1 %v7015_v0  ;;  %v7111_v62 = vld [vmem:[%s9838_s0 + $0x14] ss:$108 sps:$4 sm:$0xff]   ;;  %v7114_v63 = vld [vmem:[%s9838_s0 + $0x4c] ss:$108 sps:$4 sm:$0xff]  }
  0x95   :  { %4949 = vmatprep.subr.bf16.mxu0 %v7018_v1  ;;  %4097 = vmatprep.mubr.bf16.mxu1 %v7019_v2  ;;  %v7103_v0 = vld [vmem:[%s9837_s1 + $0x2f0] ss:$8 sps:$4 sm:$0xff]   ;;  %v7117_v2 = vld [vmem:[%s9837_s1 + $0x304] ss:$8 sps:$4 sm:$0xff]  }
  0x96   :  { %4888 = vmatprep.mubr.bf16.mxu0 %v7021_v3  ;;  %v7106_v1 = vld [vmem:[%s9837_s1 + $0x9f0] ss:$8 sps:$4 sm:$0xff]   ;;  %v7120_v3 = vld [vmem:[%s9837_s1 + $0xa04] ss:$8 sps:$4 sm:$0xff]  }
  0x97   :  { %4159 = vmatpush1.bf16.msra.mxu1 %v7013_v4  ;;  %v7109_v4 = vld [vmem:[%s9838_s0 + $0x10] ss:$108 sps:$4 sm:$0xff]  }
  0x98   :  { %4950 = vmatpush1.bf16.msra.mxu0 %v7016_v5  ;;  %4160 = vmatprep.subr.bf16.mxu1 %v7026_v6  ;;  %v7112_v5 = vld [vmem:[%s9838_s0 + $0x48] ss:$108 sps:$4 sm:$0xff]  }
  0x99   :  { %4951 = vmatprep.subr.bf16.mxu0 %v7030_v7  ;;  %v7115_v6 = vld [vmem:[%s9837_s1 + $0x300] ss:$8 sps:$4 sm:$0xff]  }
  0x9a   :  { %4098 = vmatmul.mubr.bf16.gmra.mrb[12].mxu1 %v7023_v8  ;;  %v7118_v7 = vld [vmem:[%s9837_s1 + $0xa00] ss:$8 sps:$4 sm:$0xff]   ;;  %v7123_v8 = vld [vmem:[%s9837_s1 + $0x314] ss:$8 sps:$4 sm:$0xff]  }
  0x9b   :  { %4889 = vmatmul.mubr.bf16.gmra.mrb[12].mxu0 %v7027_v10  ;;  %4161 = vmatpush1.bf16.msra.mxu1 %v7024_v9  ;;  %v7126_v9 = vld [vmem:[%s9837_s1 + $0xa14] ss:$8 sps:$4 sm:$0xff]   ;;  %v7127_v10 = vld [vmem:[%s9838_s0 + $0xec] ss:$108 sps:$4 sm:$0xff]  }
  0x9c   :  { %4952 = vmatpush1.bf16.msra.mxu0 %v7028_v11  ;;  %4162 = vmatprep.subr.bf16.mxu1 %v7033_v12  ;;  %v7129_v11 = vld [vmem:[%s9838_s0 + $0x124] ss:$108 sps:$4 sm:$0xff]  }
  0x9d   :  { %4953 = vmatprep.subr.bf16.mxu0 %v7036_v13  ;;  %4107 = vmatprep.mubr.bf16.mxu1 %v7037_v14  ;;  %v7121_v12 = vld [vmem:[%s9837_s1 + $0x310] ss:$8 sps:$4 sm:$0xff]   ;;  %v7134_v14 = vld [vmem:[%s9837_s1 + $0x324] ss:$8 sps:$4 sm:$0xff]  }
  0x9e   :  { %4898 = vmatprep.mubr.bf16.mxu0 %v7039_v15  ;;  %v7124_v13 = vld [vmem:[%s9837_s1 + $0xa10] ss:$8 sps:$4 sm:$0xff]   ;;  %v7138_v15 = vld [vmem:[%s9837_s1 + $0xa24] ss:$8 sps:$4 sm:$0xff]  }
  0x9f   :  { %4163 = vmatpush1.bf16.msra.mxu1 %v7031_v16  ;;  %v7131_v16 = vld [vmem:[%s9838_s0 + $0xe8] ss:$108 sps:$4 sm:$0xff]  }
  0xa0   :  { %4954 = vmatpush1.bf16.msra.mxu0 %v7034_v17  ;;  %4164 = vmatprep.subr.bf16.mxu1 %v7044_v18  ;;  %v7132_v17 = vld [vmem:[%s9837_s1 + $0x320] ss:$8 sps:$4 sm:$0xff]  }
  0xa1   :  { %4955 = vmatprep.subr.bf16.mxu0 %v7048_v19  ;;  %v7135_v18 = vld [vmem:[%s9838_s0 + $0x120] ss:$108 sps:$4 sm:$0xff]  }
  0xa2   :  { %4108 = vmatmul.mubr.bf16.gmra.mrb[16].mxu1 %v7041_v20  ;;  %v7136_v19 = vld [vmem:[%s9837_s1 + $0xa20] ss:$8 sps:$4 sm:$0xff]   ;;  %v7141_v20 = vld [vmem:[%s9837_s1 + $0x334] ss:$8 sps:$4 sm:$0xff]  }
  0xa3   :  { %4899 = vmatmul.mubr.bf16.gmra.mrb[16].mxu0 %v7045_v22  ;;  %4165 = vmatpush1.bf16.msra.mxu1 %v7042_v21  ;;  %v7144_v21 = vld [vmem:[%s9837_s1 + $0xa34] ss:$8 sps:$4 sm:$0xff]   ;;  %v7145_v22 = vld [vmem:[%s9838_s0 + $0x1c4] ss:$108 sps:$4 sm:$0xff]  }
  0xa4   :  { %4956 = vmatpush1.bf16.msra.mxu0 %v7046_v23  ;;  %4166 = vmatprep.subr.bf16.mxu1 %v7051_v24  ;;  %v7147_v23 = vld [vmem:[%s9838_s0 + $0x1fc] ss:$108 sps:$4 sm:$0xff]   ;;  %v7139_v24 = vld [vmem:[%s9837_s1 + $0x330] ss:$8 sps:$4 sm:$0xff]  }
  0xa5   :  { %4957 = vmatprep.subr.bf16.mxu0 %v7054_v25  ;;  %4117 = vmatprep.mubr.bf16.mxu1 %v7055_v26  ;;  %v7142_v25 = vld [vmem:[%s9837_s1 + $0xa30] ss:$8 sps:$4 sm:$0xff]   ;;  %v7152_v26 = vld [vmem:[%s9837_s1 + $0x344] ss:$8 sps:$4 sm:$0xff]  }
  0xa6   :  { %4908 = vmatprep.mubr.bf16.mxu0 %v7057_v27  ;;  %v7156_v27 = vld [vmem:[%s9837_s1 + $0xa44] ss:$8 sps:$4 sm:$0xff]  }
  0xa7   :  { %4167 = vmatpush1.bf16.msra.mxu1 %v7049_v28  ;;  %v7149_v28 = vld [vmem:[%s9838_s0 + $0x1c0] ss:$108 sps:$4 sm:$0xff]  }
  0xa8   :  { %4958 = vmatpush1.bf16.msra.mxu0 %v7052_v29  ;;  %4168 = vmatprep.subr.bf16.mxu1 %v7062_v30  ;;  %v7150_v29 = vld [vmem:[%s9837_s1 + $0x340] ss:$8 sps:$4 sm:$0xff]   ;;  %v7153_v30 = vld [vmem:[%s9838_s0 + $0x1f8] ss:$108 sps:$4 sm:$0xff]  }
  0xa9   :  { %4959 = vmatprep.subr.bf16.mxu0 %v7066_v31  ;;  %v7154_v31 = vld [vmem:[%s9837_s1 + $0xa40] ss:$8 sps:$4 sm:$0xff]  }
  0xaa   :  { %4118 = vmatmul.mubr.bf16.gmra.mrb[20].mxu1 %v7059_v32  ;;  %v7159_v32 = vld [vmem:[%s9837_s1 + $0x354] ss:$8 sps:$4 sm:$0xff]  }
  0xab   :  { %4909 = vmatmul.mubr.bf16.gmra.mrb[20].mxu0 %v7063_v34  ;;  %4169 = vmatpush1.bf16.msra.mxu1 %v7060_v33  ;;  %v7162_v33 = vld [vmem:[%s9837_s1 + $0xa54] ss:$8 sps:$4 sm:$0xff]  }
  0xac   :  { %4960 = vmatpush1.bf16.msra.mxu0 %v7064_v35  ;;  %4170 = vmatprep.subr.bf16.mxu1 %v7069_v36  ;;  %v7163_v34 = vld [vmem:[%s9838_s0 + $0x29c] ss:$108 sps:$4 sm:$0xff]   ;;  %v7165_v35 = vld [vmem:[%s9838_s0 + $0x2d4] ss:$108 sps:$4 sm:$0xff]   ;;  %v7157_v36 = vld [vmem:[%s9837_s1 + $0x350] ss:$8 sps:$4 sm:$0xff]  }
  0xad   :  { %4961 = vmatprep.subr.bf16.mxu0 %v7072_v37  ;;  %4127 = vmatprep.mubr.bf16.mxu1 %v7073_v38  ;;  %v7160_v37 = vld [vmem:[%s9837_s1 + $0xa50] ss:$8 sps:$4 sm:$0xff]   ;;  %v7170_v38 = vld [vmem:[%s9837_s1 + $0x364] ss:$8 sps:$4 sm:$0xff]  }
  0xae   :  { %4918 = vmatprep.mubr.bf16.mxu0 %v7075_v39  ;;  %v7174_v39 = vld [vmem:[%s9837_s1 + $0xa64] ss:$8 sps:$4 sm:$0xff]  }
  0xaf   :  { %4171 = vmatpush1.bf16.msra.mxu1 %v7067_v40  ;;  %v7167_v40 = vld [vmem:[%s9838_s0 + $0x298] ss:$108 sps:$4 sm:$0xff]  }
  0xb0   :  { %4962 = vmatpush1.bf16.msra.mxu0 %v7070_v41  ;;  %4172 = vmatprep.subr.bf16.mxu1 %v7080_v42  ;;  %v7168_v41 = vld [vmem:[%s9837_s1 + $0x360] ss:$8 sps:$4 sm:$0xff]   ;;  %v7171_v42 = vld [vmem:[%s9838_s0 + $0x2d0] ss:$108 sps:$4 sm:$0xff]  }
  0xb1   :  { %4963 = vmatprep.subr.bf16.mxu0 %v7084_v43  ;;  %v7172_v43 = vld [vmem:[%s9837_s1 + $0xa60] ss:$8 sps:$4 sm:$0xff]  }
  0xb2   :  { %4128 = vmatmul.mubr.bf16.gmra.mrb[24].mxu1 %v7077_v44  ;;  %v7177_v44 = vld [vmem:[%s9837_s1 + $0x374] ss:$8 sps:$4 sm:$0xff]  }
  0xb3   :  { %4919 = vmatmul.mubr.bf16.gmra.mrb[24].mxu0 %v7081_v46  ;;  %4173 = vmatpush1.bf16.msra.mxu1 %v7078_v45  ;;  %v7180_v45 = vld [vmem:[%s9837_s1 + $0xa74] ss:$8 sps:$4 sm:$0xff]  }
  0xb4   :  { %4964 = vmatpush1.bf16.msra.mxu0 %v7082_v47  ;;  %4174 = vmatprep.subr.bf16.mxu1 %v7087_v48  ;;  %v7181_v46 = vld [vmem:[%s9838_s0 + $0x374] ss:$108 sps:$4 sm:$0xff]   ;;  %v7183_v47 = vld [vmem:[%s9838_s0 + $0x3ac] ss:$108 sps:$4 sm:$0xff]  }
  0xb5   :  { %4965 = vmatprep.subr.bf16.mxu0 %v7090_v49  ;;  %4137 = vmatprep.mubr.bf16.mxu1 %v7091_v50  ;;  %v7175_v48 = vld [vmem:[%s9837_s1 + $0x370] ss:$8 sps:$4 sm:$0xff]   ;;  %v7188_v50 = vld [vmem:[%s9837_s1 + $0x384] ss:$8 sps:$4 sm:$0xff]  }
  0xb6   :  { %4928 = vmatprep.mubr.bf16.mxu0 %v7093_v51  ;;  %v7178_v49 = vld [vmem:[%s9837_s1 + $0xa70] ss:$8 sps:$4 sm:$0xff]   ;;  %v7192_v51 = vld [vmem:[%s9837_s1 + $0xa84] ss:$8 sps:$4 sm:$0xff]  }
  0xb7   :  { %4175 = vmatpush1.bf16.msra.mxu1 %v7085_v52  ;;  %v7185_v52 = vld [vmem:[%s9838_s0 + $0x370] ss:$108 sps:$4 sm:$0xff]  }
  0xb8   :  { %4966 = vmatpush1.bf16.msra.mxu0 %v7088_v53  ;;  %4176 = vmatprep.subr.bf16.mxu1 %v7098_v54  ;;  %v7186_v53 = vld [vmem:[%s9837_s1 + $0x380] ss:$8 sps:$4 sm:$0xff]  }
  0xb9   :  { %4967 = vmatprep.subr.bf16.mxu0 %v7102_v55  ;;  %v7189_v54 = vld [vmem:[%s9838_s0 + $0x3a8] ss:$108 sps:$4 sm:$0xff]  }
  0xba   :  { %4138 = vmatmul.mubr.bf16.gmra.mrb[28].mxu1 %v7095_v56  ;;  %v7190_v55 = vld [vmem:[%s9837_s1 + $0xa80] ss:$8 sps:$4 sm:$0xff]   ;;  %v7195_v56 = vld [vmem:[%s9837_s1 + $0x394] ss:$8 sps:$4 sm:$0xff]  }
  0xbb   :  { %4929 = vmatmul.mubr.bf16.gmra.mrb[28].mxu0 %v7099_v58  ;;  %4177 = vmatpush1.bf16.msra.mxu1 %v7096_v57  ;;  %v7198_v57 = vld [vmem:[%s9837_s1 + $0xa94] ss:$8 sps:$4 sm:$0xff]   ;;  %v7199_v58 = vld [vmem:[%s9838_s0 + $0x44c] ss:$108 sps:$4 sm:$0xff]  }
  0xbc   :  { %4968 = vmatpush1.bf16.msra.mxu0 %v7100_v59  ;;  %4178 = vmatprep.subr.bf16.mxu1 %v7105_v60  ;;  %v7201_v59 = vld [vmem:[%s9838_s0 + $0x484] ss:$108 sps:$4 sm:$0xff]  }
  0xbd   :  { %4969 = vmatprep.subr.bf16.mxu0 %v7108_v61  ;;  %4180 = vmatprep.mubr.bf16.mxu1 %v7111_v62  ;;  %v7193_v60 = vld [vmem:[%s9837_s1 + $0x390] ss:$8 sps:$4 sm:$0xff]   ;;  %v7206_v62 = vld [vmem:[%s9837_s1 + $0x3a4] ss:$8 sps:$4 sm:$0xff]  }
  0xbe   :  { %4971 = vmatprep.mubr.bf16.mxu0 %v7114_v63  ;;  %v7196_v61 = vld [vmem:[%s9837_s1 + $0xa90] ss:$8 sps:$4 sm:$0xff]   ;;  %v7210_v63 = vld [vmem:[%s9837_s1 + $0xaa4] ss:$8 sps:$4 sm:$0xff]  }
  0xbf   :  { %4179 = vmatpush1.bf16.msra.mxu1 %v7103_v0  ;;  %v7203_v0 = vld [vmem:[%s9838_s0 + $0x448] ss:$108 sps:$4 sm:$0xff]  }
  0xc0   :  { %4970 = vmatpush1.bf16.msra.mxu0 %v7106_v1  ;;  %4261 = vmatprep.subr.bf16.mxu1 %v7117_v2  ;;  %v7204_v1 = vld [vmem:[%s9837_s1 + $0x3a0] ss:$8 sps:$4 sm:$0xff]  }
  0xc1   :  { %5052 = vmatprep.subr.bf16.mxu0 %v7120_v3  ;;  %v7207_v2 = vld [vmem:[%s9838_s0 + $0x480] ss:$108 sps:$4 sm:$0xff]  }
  0xc2   :  { %4181 = vmatmul.mubr.bf16.vlgmr.msra.gmra.mrb[0].mxu1 %v7109_v4  ;;  %v7208_v3 = vld [vmem:[%s9837_s1 + $0xaa0] ss:$8 sps:$4 sm:$0xff]   ;;  %v7213_v4 = vld [vmem:[%s9837_s1 + $0x3b4] ss:$8 sps:$4 sm:$0xff]  }
  0xc3   :  { %4972 = vmatmul.mubr.bf16.vlgmr.msra.gmra.mrb[0].mxu0 %v7112_v5  ;;  %4262 = vmatpush1.bf16.msra.mxu1 %v7115_v6  ;;  %v7216_v5 = vld [vmem:[%s9837_s1 + $0xab4] ss:$8 sps:$4 sm:$0xff]   ;;  %v7217_v6 = vld [vmem:[%s9838_s0 + $0x524] ss:$108 sps:$4 sm:$0xff]  }
  0xc4   :  { %5053 = vmatpush1.bf16.msra.mxu0 %v7118_v7  ;;  %4263 = vmatprep.subr.bf16.mxu1 %v7123_v8  ;;  %v7219_v7 = vld [vmem:[%s9838_s0 + $0x55c] ss:$108 sps:$4 sm:$0xff]   ;;  %v7211_v8 = vld [vmem:[%s9837_s1 + $0x3b0] ss:$8 sps:$4 sm:$0xff]  }
  0xc5   :  { %5054 = vmatprep.subr.bf16.mxu0 %v7126_v9  ;;  %4190 = vmatprep.mubr.bf16.mxu1 %v7127_v10  ;;  %v7214_v9 = vld [vmem:[%s9837_s1 + $0xab0] ss:$8 sps:$4 sm:$0xff]   ;;  %v7224_v10 = vld [vmem:[%s9837_s1 + $0x3c4] ss:$8 sps:$4 sm:$0xff]  }
  0xc6   :  { %4981 = vmatprep.mubr.bf16.mxu0 %v7129_v11  ;;  %v7228_v11 = vld [vmem:[%s9837_s1 + $0xac4] ss:$8 sps:$4 sm:$0xff]  }
  0xc7   :  { %4264 = vmatpush1.bf16.msra.mxu1 %v7121_v12  ;;  %v7221_v12 = vld [vmem:[%s9838_s0 + $0x520] ss:$108 sps:$4 sm:$0xff]  }
  0xc8   :  { %5055 = vmatpush1.bf16.msra.mxu0 %v7124_v13  ;;  %4265 = vmatprep.subr.bf16.mxu1 %v7134_v14  ;;  %v7222_v13 = vld [vmem:[%s9837_s1 + $0x3c0] ss:$8 sps:$4 sm:$0xff]   ;;  %v7225_v14 = vld [vmem:[%s9838_s0 + $0x558] ss:$108 sps:$4 sm:$0xff]  }
  0xc9   :  { %5056 = vmatprep.subr.bf16.mxu0 %v7138_v15  ;;  %v7226_v15 = vld [vmem:[%s9837_s1 + $0xac0] ss:$8 sps:$4 sm:$0xff]  }
  0xca   :  { %4191 = vmatmul.mubr.bf16.gmra.mrb[4].mxu1 %v7131_v16  ;;  %v7231_v16 = vld [vmem:[%s9837_s1 + $0x3d4] ss:$8 sps:$4 sm:$0xff]  }
  0xcb   :  { %4982 = vmatmul.mubr.bf16.gmra.mrb[4].mxu0 %v7135_v18  ;;  %4266 = vmatpush1.bf16.msra.mxu1 %v7132_v17  ;;  %v7234_v17 = vld [vmem:[%s9837_s1 + $0xad4] ss:$8 sps:$4 sm:$0xff]  }
  0xcc   :  { %5057 = vmatpush1.bf16.msra.mxu0 %v7136_v19  ;;  %4267 = vmatprep.subr.bf16.mxu1 %v7141_v20  ;;  %v7235_v18 = vld [vmem:[%s9838_s0 + $0x5fc] ss:$108 sps:$4 sm:$0xff]   ;;  %v7237_v19 = vld [vmem:[%s9838_s0 + $0x634] ss:$108 sps:$4 sm:$0xff]   ;;  %v7229_v20 = vld [vmem:[%s9837_s1 + $0x3d0] ss:$8 sps:$4 sm:$0xff]  }
  0xcd   :  { %5058 = vmatprep.subr.bf16.mxu0 %v7144_v21  ;;  %4200 = vmatprep.mubr.bf16.mxu1 %v7145_v22  ;;  %v7232_v21 = vld [vmem:[%s9837_s1 + $0xad0] ss:$8 sps:$4 sm:$0xff]   ;;  %v7242_v22 = vld [vmem:[%s9837_s1 + $0x3e4] ss:$8 sps:$4 sm:$0xff]  }
  0xce   :  { %4991 = vmatprep.mubr.bf16.mxu0 %v7147_v23  ;;  %v7246_v23 = vld [vmem:[%s9837_s1 + $0xae4] ss:$8 sps:$4 sm:$0xff]  }
  0xcf   :  { %4268 = vmatpush1.bf16.msra.mxu1 %v7139_v24  ;;  %v7239_v24 = vld [vmem:[%s9838_s0 + $0x5f8] ss:$108 sps:$4 sm:$0xff]  }
  0xd0   :  { %5059 = vmatpush1.bf16.msra.mxu0 %v7142_v25  ;;  %4269 = vmatprep.subr.bf16.mxu1 %v7152_v26  ;;  %v7240_v25 = vld [vmem:[%s9837_s1 + $0x3e0] ss:$8 sps:$4 sm:$0xff]   ;;  %v7243_v26 = vld [vmem:[%s9838_s0 + $0x630] ss:$108 sps:$4 sm:$0xff]  }
  0xd1   :  { %5060 = vmatprep.subr.bf16.mxu0 %v7156_v27  ;;  %v7244_v27 = vld [vmem:[%s9837_s1 + $0xae0] ss:$8 sps:$4 sm:$0xff]  }
  0xd2   :  { %4201 = vmatmul.mubr.bf16.gmra.mrb[8].mxu1 %v7149_v28  ;;  %v7249_v28 = vld [vmem:[%s9837_s1 + $0x3f4] ss:$8 sps:$4 sm:$0xff]  }
  0xd3   :  { %4992 = vmatmul.mubr.bf16.gmra.mrb[8].mxu0 %v7153_v30  ;;  %4270 = vmatpush1.bf16.msra.mxu1 %v7150_v29  ;;  %v7252_v29 = vld [vmem:[%s9837_s1 + $0xaf4] ss:$8 sps:$4 sm:$0xff]  }
  0xd4   :  { %5061 = vmatpush1.bf16.msra.mxu0 %v7154_v31  ;;  %4271 = vmatprep.subr.bf16.mxu1 %v7159_v32  ;;  %v7255_v30 = vld [vmem:[%s9838_s0 + $0x1c] ss:$108 sps:$4 sm:$0xff]   ;;  %v7258_v31 = vld [vmem:[%s9838_s0 + $0x54] ss:$108 sps:$4 sm:$0xff]   ;;  %v7247_v32 = vld [vmem:[%s9837_s1 + $0x3f0] ss:$8 sps:$4 sm:$0xff]  }
  0xd5   :  { %5062 = vmatprep.subr.bf16.mxu0 %v7162_v33  ;;  %4210 = vmatprep.mubr.bf16.mxu1 %v7163_v34  ;;  %v7250_v33 = vld [vmem:[%s9837_s1 + $0xaf0] ss:$8 sps:$4 sm:$0xff]   ;;  %v7261_v34 = vld [vmem:[%s9837_s1 + $0x404] ss:$8 sps:$4 sm:$0xff]  }
  0xd6   :  { %5001 = vmatprep.mubr.bf16.mxu0 %v7165_v35  ;;  %v7264_v35 = vld [vmem:[%s9837_s1 + $0xb04] ss:$8 sps:$4 sm:$0xff]  }
  0xd7   :  { %4272 = vmatpush1.bf16.msra.mxu1 %v7157_v36  ;;  %v7253_v36 = vld [vmem:[%s9838_s0 + $0x18] ss:$108 sps:$4 sm:$0xff]  }
  0xd8   :  { %5063 = vmatpush1.bf16.msra.mxu0 %v7160_v37  ;;  %4273 = vmatprep.subr.bf16.mxu1 %v7170_v38  ;;  %v7256_v37 = vld [vmem:[%s9838_s0 + $0x50] ss:$108 sps:$4 sm:$0xff]   ;;  %v7259_v38 = vld [vmem:[%s9837_s1 + $0x400] ss:$8 sps:$4 sm:$0xff]  }
  0xd9   :  { %5064 = vmatprep.subr.bf16.mxu0 %v7174_v39  ;;  %v7262_v39 = vld [vmem:[%s9837_s1 + $0xb00] ss:$8 sps:$4 sm:$0xff]  }
  0xda   :  { %4211 = vmatmul.mubr.bf16.gmra.mrb[12].mxu1 %v7167_v40  ;;  %v7267_v40 = vld [vmem:[%s9837_s1 + $0x414] ss:$8 sps:$4 sm:$0xff]  }
  0xdb   :  { %5002 = vmatmul.mubr.bf16.gmra.mrb[12].mxu0 %v7171_v42  ;;  %4274 = vmatpush1.bf16.msra.mxu1 %v7168_v41  ;;  %v7270_v41 = vld [vmem:[%s9837_s1 + $0xb14] ss:$8 sps:$4 sm:$0xff]  }
  0xdc   :  { %5065 = vmatpush1.bf16.msra.mxu0 %v7172_v43  ;;  %4275 = vmatprep.subr.bf16.mxu1 %v7177_v44  ;;  %v7271_v42 = vld [vmem:[%s9838_s0 + $0xf4] ss:$108 sps:$4 sm:$0xff]   ;;  %v7273_v43 = vld [vmem:[%s9838_s0 + $0x12c] ss:$108 sps:$4 sm:$0xff]  }
  0xdd   :  { %5066 = vmatprep.subr.bf16.mxu0 %v7180_v45  ;;  %4220 = vmatprep.mubr.bf16.mxu1 %v7181_v46  ;;  %v7265_v44 = vld [vmem:[%s9837_s1 + $0x410] ss:$8 sps:$4 sm:$0xff]   ;;  %v7278_v46 = vld [vmem:[%s9837_s1 + $0x424] ss:$8 sps:$4 sm:$0xff]  }
  0xde   :  { %5011 = vmatprep.mubr.bf16.mxu0 %v7183_v47  ;;  %v7268_v45 = vld [vmem:[%s9837_s1 + $0xb10] ss:$8 sps:$4 sm:$0xff]   ;;  %v7282_v47 = vld [vmem:[%s9837_s1 + $0xb24] ss:$8 sps:$4 sm:$0xff]  }
  0xdf   :  { %4276 = vmatpush1.bf16.msra.mxu1 %v7175_v48  ;;  %v7275_v48 = vld [vmem:[%s9838_s0 + $0xf0] ss:$108 sps:$4 sm:$0xff]  }
  0xe0   :  { %5067 = vmatpush1.bf16.msra.mxu0 %v7178_v49  ;;  %4277 = vmatprep.subr.bf16.mxu1 %v7188_v50  ;;  %v7276_v49 = vld [vmem:[%s9837_s1 + $0x420] ss:$8 sps:$4 sm:$0xff]  }
  0xe1   :  { %5068 = vmatprep.subr.bf16.mxu0 %v7192_v51  ;;  %v7279_v50 = vld [vmem:[%s9838_s0 + $0x128] ss:$108 sps:$4 sm:$0xff]  }
  0xe2   :  { %4221 = vmatmul.mubr.bf16.gmra.mrb[16].mxu1 %v7185_v52  ;;  %v7280_v51 = vld [vmem:[%s9837_s1 + $0xb20] ss:$8 sps:$4 sm:$0xff]   ;;  %v7285_v52 = vld [vmem:[%s9837_s1 + $0x434] ss:$8 sps:$4 sm:$0xff]  }
  0xe3   :  { %5012 = vmatmul.mubr.bf16.gmra.mrb[16].mxu0 %v7189_v54  ;;  %4278 = vmatpush1.bf16.msra.mxu1 %v7186_v53  ;;  %v7288_v53 = vld [vmem:[%s9837_s1 + $0xb34] ss:$8 sps:$4 sm:$0xff]   ;;  %v7289_v54 = vld [vmem:[%s9838_s0 + $0x1cc] ss:$108 sps:$4 sm:$0xff]  }
  0xe4   :  { %5069 = vmatpush1.bf16.msra.mxu0 %v7190_v55  ;;  %4279 = vmatprep.subr.bf16.mxu1 %v7195_v56  ;;  %v7291_v55 = vld [vmem:[%s9838_s0 + $0x204] ss:$108 sps:$4 sm:$0xff]  }
  0xe5   :  { %5070 = vmatprep.subr.bf16.mxu0 %v7198_v57  ;;  %4230 = vmatprep.mubr.bf16.mxu1 %v7199_v58  ;;  %v7283_v56 = vld [vmem:[%s9837_s1 + $0x430] ss:$8 sps:$4 sm:$0xff]   ;;  %v7296_v58 = vld [vmem:[%s9837_s1 + $0x444] ss:$8 sps:$4 sm:$0xff]  }
  0xe6   :  { %5021 = vmatprep.mubr.bf16.mxu0 %v7201_v59  ;;  %v7286_v57 = vld [vmem:[%s9837_s1 + $0xb30] ss:$8 sps:$4 sm:$0xff]   ;;  %v7300_v59 = vld [vmem:[%s9837_s1 + $0xb44] ss:$8 sps:$4 sm:$0xff]  }
  0xe7   :  { %4280 = vmatpush1.bf16.msra.mxu1 %v7193_v60  ;;  %v7293_v60 = vld [vmem:[%s9838_s0 + $0x1c8] ss:$108 sps:$4 sm:$0xff]  }
  0xe8   :  { %5071 = vmatpush1.bf16.msra.mxu0 %v7196_v61  ;;  %4281 = vmatprep.subr.bf16.mxu1 %v7206_v62  ;;  %v7294_v61 = vld [vmem:[%s9837_s1 + $0x440] ss:$8 sps:$4 sm:$0xff]  }
  0xe9   :  { %5072 = vmatprep.subr.bf16.mxu0 %v7210_v63  ;;  %v7297_v62 = vld [vmem:[%s9838_s0 + $0x200] ss:$108 sps:$4 sm:$0xff]  }
  0xea   :  { %4231 = vmatmul.mubr.bf16.gmra.mrb[20].mxu1 %v7203_v0  ;;  %v7298_v63 = vld [vmem:[%s9837_s1 + $0xb40] ss:$8 sps:$4 sm:$0xff]   ;;  %v7303_v0 = vld [vmem:[%s9837_s1 + $0x454] ss:$8 sps:$4 sm:$0xff]  }
  0xeb   :  { %5022 = vmatmul.mubr.bf16.gmra.mrb[20].mxu0 %v7207_v2  ;;  %4282 = vmatpush1.bf16.msra.mxu1 %v7204_v1  ;;  %v7306_v1 = vld [vmem:[%s9837_s1 + $0xb54] ss:$8 sps:$4 sm:$0xff]   ;;  %v7307_v2 = vld [vmem:[%s9838_s0 + $0x2a4] ss:$108 sps:$4 sm:$0xff]  }
  0xec   :  { %5073 = vmatpush1.bf16.msra.mxu0 %v7208_v3  ;;  %4283 = vmatprep.subr.bf16.mxu1 %v7213_v4  ;;  %v7309_v3 = vld [vmem:[%s9838_s0 + $0x2dc] ss:$108 sps:$4 sm:$0xff]   ;;  %v7301_v4 = vld [vmem:[%s9837_s1 + $0x450] ss:$8 sps:$4 sm:$0xff]  }
  0xed   :  { %5074 = vmatprep.subr.bf16.mxu0 %v7216_v5  ;;  %4240 = vmatprep.mubr.bf16.mxu1 %v7217_v6  ;;  %v7304_v5 = vld [vmem:[%s9837_s1 + $0xb50] ss:$8 sps:$4 sm:$0xff]   ;;  %v7314_v6 = vld [vmem:[%s9837_s1 + $0x464] ss:$8 sps:$4 sm:$0xff]  }
  0xee   :  { %5031 = vmatprep.mubr.bf16.mxu0 %v7219_v7  ;;  %v7318_v7 = vld [vmem:[%s9837_s1 + $0xb64] ss:$8 sps:$4 sm:$0xff]  }
  0xef   :  { %4284 = vmatpush1.bf16.msra.mxu1 %v7211_v8  ;;  %v7311_v8 = vld [vmem:[%s9838_s0 + $0x2a0] ss:$108 sps:$4 sm:$0xff]  }
  0xf0   :  { %5075 = vmatpush1.bf16.msra.mxu0 %v7214_v9  ;;  %4285 = vmatprep.subr.bf16.mxu1 %v7224_v10  ;;  %v7312_v9 = vld [vmem:[%s9837_s1 + $0x460] ss:$8 sps:$4 sm:$0xff]   ;;  %v7315_v10 = vld [vmem:[%s9838_s0 + $0x2d8] ss:$108 sps:$4 sm:$0xff]  }
  0xf1   :  { %5076 = vmatprep.subr.bf16.mxu0 %v7228_v11  ;;  %v7316_v11 = vld [vmem:[%s9837_s1 + $0xb60] ss:$8 sps:$4 sm:$0xff]  }
  0xf2   :  { %4241 = vmatmul.mubr.bf16.gmra.mrb[24].mxu1 %v7221_v12  ;;  %v7321_v12 = vld [vmem:[%s9837_s1 + $0x474] ss:$8 sps:$4 sm:$0xff]  }
  0xf3   :  { %5032 = vmatmul.mubr.bf16.gmra.mrb[24].mxu0 %v7225_v14  ;;  %4286 = vmatpush1.bf16.msra.mxu1 %v7222_v13  ;;  %v7324_v13 = vld [vmem:[%s9837_s1 + $0xb74] ss:$8 sps:$4 sm:$0xff]  }
  0xf4   :  { %5077 = vmatpush1.bf16.msra.mxu0 %v7226_v15  ;;  %4287 = vmatprep.subr.bf16.mxu1 %v7231_v16  ;;  %v7325_v14 = vld [vmem:[%s9838_s0 + $0x37c] ss:$108 sps:$4 sm:$0xff]   ;;  %v7327_v15 = vld [vmem:[%s9838_s0 + $0x3b4] ss:$108 sps:$4 sm:$0xff]   ;;  %v7319_v16 = vld [vmem:[%s9837_s1 + $0x470] ss:$8 sps:$4 sm:$0xff]  }
  0xf5   :  { %5078 = vmatprep.subr.bf16.mxu0 %v7234_v17  ;;  %4250 = vmatprep.mubr.bf16.mxu1 %v7235_v18  ;;  %v7322_v17 = vld [vmem:[%s9837_s1 + $0xb70] ss:$8 sps:$4 sm:$0xff]   ;;  %v7332_v18 = vld [vmem:[%s9837_s1 + $0x484] ss:$8 sps:$4 sm:$0xff]  }
  0xf6   :  { %5041 = vmatprep.mubr.bf16.mxu0 %v7237_v19  ;;  %v7336_v19 = vld [vmem:[%s9837_s1 + $0xb84] ss:$8 sps:$4 sm:$0xff]  }
  0xf7   :  { %4288 = vmatpush1.bf16.msra.mxu1 %v7229_v20  ;;  %v7329_v20 = vld [vmem:[%s9838_s0 + $0x378] ss:$108 sps:$4 sm:$0xff]  }
  0xf8   :  { %5079 = vmatpush1.bf16.msra.mxu0 %v7232_v21  ;;  %4289 = vmatprep.subr.bf16.mxu1 %v7242_v22  ;;  %v7330_v21 = vld [vmem:[%s9837_s1 + $0x480] ss:$8 sps:$4 sm:$0xff]   ;;  %v7333_v22 = vld [vmem:[%s9838_s0 + $0x3b0] ss:$108 sps:$4 sm:$0xff]  }
  0xf9   :  { %5080 = vmatprep.subr.bf16.mxu0 %v7246_v23  ;;  %v7334_v23 = vld [vmem:[%s9837_s1 + $0xb80] ss:$8 sps:$4 sm:$0xff]  }
  0xfa   :  { %4251 = vmatmul.mubr.bf16.gmra.mrb[28].mxu1 %v7239_v24  ;;  %v7339_v24 = vld [vmem:[%s9837_s1 + $0x494] ss:$8 sps:$4 sm:$0xff]  }
  0xfb   :  { %5042 = vmatmul.mubr.bf16.gmra.mrb[28].mxu0 %v7243_v26  ;;  %4290 = vmatpush1.bf16.msra.mxu1 %v7240_v25  ;;  %v7342_v25 = vld [vmem:[%s9837_s1 + $0xb94] ss:$8 sps:$4 sm:$0xff]  }
  0xfc   :  { %5081 = vmatpush1.bf16.msra.mxu0 %v7244_v27  ;;  %4291 = vmatprep.subr.bf16.mxu1 %v7249_v28  ;;  %v7343_v26 = vld [vmem:[%s9838_s0 + $0x454] ss:$108 sps:$4 sm:$0xff]   ;;  %v7345_v27 = vld [vmem:[%s9838_s0 + $0x48c] ss:$108 sps:$4 sm:$0xff]  }
  0xfd   :  { %5082 = vmatprep.subr.bf16.mxu0 %v7252_v29  ;;  %4293 = vmatprep.mubr.bf16.mxu1 %v7255_v30  ;;  %v7337_v28 = vld [vmem:[%s9837_s1 + $0x490] ss:$8 sps:$4 sm:$0xff]   ;;  %v7350_v30 = vld [vmem:[%s9837_s1 + $0x4a4] ss:$8 sps:$4 sm:$0xff]  }
  0xfe   :  { %5084 = vmatprep.mubr.bf16.mxu0 %v7258_v31  ;;  %v7340_v29 = vld [vmem:[%s9837_s1 + $0xb90] ss:$8 sps:$4 sm:$0xff]   ;;  %v7354_v31 = vld [vmem:[%s9837_s1 + $0xba4] ss:$8 sps:$4 sm:$0xff]  }
  0xff   :  { %4292 = vmatpush1.bf16.msra.mxu1 %v7247_v32  ;;  %v7347_v32 = vld [vmem:[%s9838_s0 + $0x450] ss:$108 sps:$4 sm:$0xff]  }
 0x100   :  { %5083 = vmatpush1.bf16.msra.mxu0 %v7250_v33  ;;  %4374 = vmatprep.subr.bf16.mxu1 %v7261_v34  ;;  %v7348_v33 = vld [vmem:[%s9837_s1 + $0x4a0] ss:$8 sps:$4 sm:$0xff]  }
 0x101   :  { %5165 = vmatprep.subr.bf16.mxu0 %v7264_v35  ;;  %v7351_v34 = vld [vmem:[%s9838_s0 + $0x488] ss:$108 sps:$4 sm:$0xff]  }
 0x102   :  { %4294 = vmatmul.mubr.bf16.vlgmr.msra.gmra.mrb[0].mxu1 %v7253_v36  ;;  %v7352_v35 = vld [vmem:[%s9837_s1 + $0xba0] ss:$8 sps:$4 sm:$0xff]   ;;  %v7357_v36 = vld [vmem:[%s9837_s1 + $0x4b4] ss:$8 sps:$4 sm:$0xff]  }
 0x103   :  { %5085 = vmatmul.mubr.bf16.vlgmr.msra.gmra.mrb[0].mxu0 %v7256_v37  ;;  %4375 = vmatpush1.bf16.msra.mxu1 %v7259_v38  ;;  %v7360_v37 = vld [vmem:[%s9837_s1 + $0xbb4] ss:$8 sps:$4 sm:$0xff]   ;;  %v7361_v38 = vld [vmem:[%s9838_s0 + $0x52c] ss:$108 sps:$4 sm:$0xff]  }
 0x104   :  { %5166 = vmatpush1.bf16.msra.mxu0 %v7262_v39  ;;  %4376 = vmatprep.subr.bf16.mxu1 %v7267_v40  ;;  %v7363_v39 = vld [vmem:[%s9838_s0 + $0x564] ss:$108 sps:$4 sm:$0xff]  }
 0x105   :  { %5167 = vmatprep.subr.bf16.mxu0 %v7270_v41  ;;  %4303 = vmatprep.mubr.bf16.mxu1 %v7271_v42  ;;  %v7355_v40 = vld [vmem:[%s9837_s1 + $0x4b0] ss:$8 sps:$4 sm:$0xff]   ;;  %v7368_v42 = vld [vmem:[%s9837_s1 + $0x4c4] ss:$8 sps:$4 sm:$0xff]  }
 0x106   :  { %5094 = vmatprep.mubr.bf16.mxu0 %v7273_v43  ;;  %v7358_v41 = vld [vmem:[%s9837_s1 + $0xbb0] ss:$8 sps:$4 sm:$0xff]   ;;  %v7372_v43 = vld [vmem:[%s9837_s1 + $0xbc4] ss:$8 sps:$4 sm:$0xff]  }
 0x107   :  { %4377 = vmatpush1.bf16.msra.mxu1 %v7265_v44  ;;  %v7365_v44 = vld [vmem:[%s9838_s0 + $0x528] ss:$108 sps:$4 sm:$0xff]  }
 0x108   :  { %5168 = vmatpush1.bf16.msra.mxu0 %v7268_v45  ;;  %4378 = vmatprep.subr.bf16.mxu1 %v7278_v46  ;;  %v7366_v45 = vld [vmem:[%s9837_s1 + $0x4c0] ss:$8 sps:$4 sm:$0xff]  }
 0x109   :  { %5169 = vmatprep.subr.bf16.mxu0 %v7282_v47  ;;  %v7369_v46 = vld [vmem:[%s9838_s0 + $0x560] ss:$108 sps:$4 sm:$0xff]  }
 0x10a   :  { %4304 = vmatmul.mubr.bf16.gmra.mrb[4].mxu1 %v7275_v48  ;;  %v7370_v47 = vld [vmem:[%s9837_s1 + $0xbc0] ss:$8 sps:$4 sm:$0xff]   ;;  %v7375_v48 = vld [vmem:[%s9837_s1 + $0x4d4] ss:$8 sps:$4 sm:$0xff]  }
 0x10b   :  { %5095 = vmatmul.mubr.bf16.gmra.mrb[4].mxu0 %v7279_v50  ;;  %4379 = vmatpush1.bf16.msra.mxu1 %v7276_v49  ;;  %v7378_v49 = vld [vmem:[%s9837_s1 + $0xbd4] ss:$8 sps:$4 sm:$0xff]   ;;  %v7379_v50 = vld [vmem:[%s9838_s0 + $0x604] ss:$108 sps:$4 sm:$0xff]  }
 0x10c   :  { %5170 = vmatpush1.bf16.msra.mxu0 %v7280_v51  ;;  %4380 = vmatprep.subr.bf16.mxu1 %v7285_v52  ;;  %v7381_v51 = vld [vmem:[%s9838_s0 + $0x63c] ss:$108 sps:$4 sm:$0xff]   ;;  %v7373_v52 = vld [vmem:[%s9837_s1 + $0x4d0] ss:$8 sps:$4 sm:$0xff]  }
 0x10d   :  { %5171 = vmatprep.subr.bf16.mxu0 %v7288_v53  ;;  %4313 = vmatprep.mubr.bf16.mxu1 %v7289_v54  ;;  %v7376_v53 = vld [vmem:[%s9837_s1 + $0xbd0] ss:$8 sps:$4 sm:$0xff]   ;;  %v7386_v54 = vld [vmem:[%s9837_s1 + $0x4e4] ss:$8 sps:$4 sm:$0xff]  }
 0x10e   :  { %5104 = vmatprep.mubr.bf16.mxu0 %v7291_v55  ;;  %v7390_v55 = vld [vmem:[%s9837_s1 + $0xbe4] ss:$8 sps:$4 sm:$0xff]  }
 0x10f   :  { %4381 = vmatpush1.bf16.msra.mxu1 %v7283_v56  ;;  %v7383_v56 = vld [vmem:[%s9838_s0 + $0x600] ss:$108 sps:$4 sm:$0xff]  }
 0x110   :  { %5172 = vmatpush1.bf16.msra.mxu0 %v7286_v57  ;;  %4382 = vmatprep.subr.bf16.mxu1 %v7296_v58  ;;  %v7384_v57 = vld [vmem:[%s9837_s1 + $0x4e0] ss:$8 sps:$4 sm:$0xff]   ;;  %v7387_v58 = vld [vmem:[%s9838_s0 + $0x638] ss:$108 sps:$4 sm:$0xff]  }
 0x111   :  { %5173 = vmatprep.subr.bf16.mxu0 %v7300_v59  ;;  %v7388_v59 = vld [vmem:[%s9837_s1 + $0xbe0] ss:$8 sps:$4 sm:$0xff]  }
 0x112   :  { %4314 = vmatmul.mubr.bf16.gmra.mrb[8].mxu1 %v7293_v60  ;;  %v7393_v60 = vld [vmem:[%s9837_s1 + $0x4f4] ss:$8 sps:$4 sm:$0xff]  }
 0x113   :  { %5105 = vmatmul.mubr.bf16.gmra.mrb[8].mxu0 %v7297_v62  ;;  %4383 = vmatpush1.bf16.msra.mxu1 %v7294_v61  ;;  %v7396_v61 = vld [vmem:[%s9837_s1 + $0xbf4] ss:$8 sps:$4 sm:$0xff]   ;;  %v7399_v62 = vld [vmem:[%s9838_s0 + $0x24] ss:$108 sps:$4 sm:$0xff]  }
 0x114   :  { %5174 = vmatpush1.bf16.msra.mxu0 %v7298_v63  ;;  %4384 = vmatprep.subr.bf16.mxu1 %v7303_v0  ;;  %v7402_v63 = vld [vmem:[%s9838_s0 + $0x5c] ss:$108 sps:$4 sm:$0xff]   ;;  %v7391_v0 = vld [vmem:[%s9837_s1 + $0x4f0] ss:$8 sps:$4 sm:$0xff]  }
 0x115   :  { %5175 = vmatprep.subr.bf16.mxu0 %v7306_v1  ;;  %4323 = vmatprep.mubr.bf16.mxu1 %v7307_v2  ;;  %v7394_v1 = vld [vmem:[%s9837_s1 + $0xbf0] ss:$8 sps:$4 sm:$0xff]   ;;  %v7405_v2 = vld [vmem:[%s9837_s1 + $0x504] ss:$8 sps:$4 sm:$0xff]  }
 0x116   :  { %5114 = vmatprep.mubr.bf16.mxu0 %v7309_v3  ;;  %v7408_v3 = vld [vmem:[%s9837_s1 + $0xc04] ss:$8 sps:$4 sm:$0xff]  }
 0x117   :  { %4385 = vmatpush1.bf16.msra.mxu1 %v7301_v4  ;;  %v7397_v4 = vld [vmem:[%s9838_s0 + $0x20] ss:$108 sps:$4 sm:$0xff]  }
 0x118   :  { %5176 = vmatpush1.bf16.msra.mxu0 %v7304_v5  ;;  %4386 = vmatprep.subr.bf16.mxu1 %v7314_v6  ;;  %v7400_v5 = vld [vmem:[%s9838_s0 + $0x58] ss:$108 sps:$4 sm:$0xff]   ;;  %v7403_v6 = vld [vmem:[%s9837_s1 + $0x500] ss:$8 sps:$4 sm:$0xff]  }
 0x119   :  { %5177 = vmatprep.subr.bf16.mxu0 %v7318_v7  ;;  %v7406_v7 = vld [vmem:[%s9837_s1 + $0xc00] ss:$8 sps:$4 sm:$0xff]  }
 0x11a   :  { %4324 = vmatmul.mubr.bf16.gmra.mrb[12].mxu1 %v7311_v8  ;;  %v7411_v8 = vld [vmem:[%s9837_s1 + $0x514] ss:$8 sps:$4 sm:$0xff]  }
 0x11b   :  { %5115 = vmatmul.mubr.bf16.gmra.mrb[12].mxu0 %v7315_v10  ;;  %4387 = vmatpush1.bf16.msra.mxu1 %v7312_v9  ;;  %v7414_v9 = vld [vmem:[%s9837_s1 + $0xc14] ss:$8 sps:$4 sm:$0xff]  }
 0x11c   :  { %5178 = vmatpush1.bf16.msra.mxu0 %v7316_v11  ;;  %4388 = vmatprep.subr.bf16.mxu1 %v7321_v12  ;;  %v7415_v10 = vld [vmem:[%s9838_s0 + $0xfc] ss:$108 sps:$4 sm:$0xff]   ;;  %v7417_v11 = vld [vmem:[%s9838_s0 + $0x134] ss:$108 sps:$4 sm:$0xff]   ;;  %v7409_v12 = vld [vmem:[%s9837_s1 + $0x510] ss:$8 sps:$4 sm:$0xff]  }
 0x11d   :  { %5179 = vmatprep.subr.bf16.mxu0 %v7324_v13  ;;  %4333 = vmatprep.mubr.bf16.mxu1 %v7325_v14  ;;  %v7412_v13 = vld [vmem:[%s9837_s1 + $0xc10] ss:$8 sps:$4 sm:$0xff]   ;;  %v7422_v14 = vld [vmem:[%s9837_s1 + $0x524] ss:$8 sps:$4 sm:$0xff]  }
 0x11e   :  { %5124 = vmatprep.mubr.bf16.mxu0 %v7327_v15  ;;  %v7426_v15 = vld [vmem:[%s9837_s1 + $0xc24] ss:$8 sps:$4 sm:$0xff]  }
 0x11f   :  { %4389 = vmatpush1.bf16.msra.mxu1 %v7319_v16  ;;  %v7419_v16 = vld [vmem:[%s9838_s0 + $0xf8] ss:$108 sps:$4 sm:$0xff]  }
 0x120   :  { %5180 = vmatpush1.bf16.msra.mxu0 %v7322_v17  ;;  %4390 = vmatprep.subr.bf16.mxu1 %v7332_v18  ;;  %v7420_v17 = vld [vmem:[%s9837_s1 + $0x520] ss:$8 sps:$4 sm:$0xff]   ;;  %v7423_v18 = vld [vmem:[%s9838_s0 + $0x130] ss:$108 sps:$4 sm:$0xff]  }
 0x121   :  { %5181 = vmatprep.subr.bf16.mxu0 %v7336_v19  ;;  %v7424_v19 = vld [vmem:[%s9837_s1 + $0xc20] ss:$8 sps:$4 sm:$0xff]  }
 0x122   :  { %4334 = vmatmul.mubr.bf16.gmra.mrb[16].mxu1 %v7329_v20  ;;  %v7429_v20 = vld [vmem:[%s9837_s1 + $0x534] ss:$8 sps:$4 sm:$0xff]  }
 0x123   :  { %5125 = vmatmul.mubr.bf16.gmra.mrb[16].mxu0 %v7333_v22  ;;  %4391 = vmatpush1.bf16.msra.mxu1 %v7330_v21  ;;  %v7432_v21 = vld [vmem:[%s9837_s1 + $0xc34] ss:$8 sps:$4 sm:$0xff]  }
 0x124   :  { %5182 = vmatpush1.bf16.msra.mxu0 %v7334_v23  ;;  %4392 = vmatprep.subr.bf16.mxu1 %v7339_v24  ;;  %v7433_v22 = vld [vmem:[%s9838_s0 + $0x1d4] ss:$108 sps:$4 sm:$0xff]   ;;  %v7435_v23 = vld [vmem:[%s9838_s0 + $0x20c] ss:$108 sps:$4 sm:$0xff]  }
 0x125   :  { %5183 = vmatprep.subr.bf16.mxu0 %v7342_v25  ;;  %4343 = vmatprep.mubr.bf16.mxu1 %v7343_v26  ;;  %v7427_v24 = vld [vmem:[%s9837_s1 + $0x530] ss:$8 sps:$4 sm:$0xff]   ;;  %v7440_v26 = vld [vmem:[%s9837_s1 + $0x544] ss:$8 sps:$4 sm:$0xff]  }
 0x126   :  { %5134 = vmatprep.mubr.bf16.mxu0 %v7345_v27  ;;  %v7430_v25 = vld [vmem:[%s9837_s1 + $0xc30] ss:$8 sps:$4 sm:$0xff]   ;;  %v7444_v27 = vld [vmem:[%s9837_s1 + $0xc44] ss:$8 sps:$4 sm:$0xff]  }
 0x127   :  { %4393 = vmatpush1.bf16.msra.mxu1 %v7337_v28  ;;  %v7437_v28 = vld [vmem:[%s9838_s0 + $0x1d0] ss:$108 sps:$4 sm:$0xff]  }
 0x128   :  { %5184 = vmatpush1.bf16.msra.mxu0 %v7340_v29  ;;  %4394 = vmatprep.subr.bf16.mxu1 %v7350_v30  ;;  %v7438_v29 = vld [vmem:[%s9837_s1 + $0x540] ss:$8 sps:$4 sm:$0xff]  }
 0x129   :  { %5185 = vmatprep.subr.bf16.mxu0 %v7354_v31  ;;  %v7441_v30 = vld [vmem:[%s9838_s0 + $0x208] ss:$108 sps:$4 sm:$0xff]  }
 0x12a   :  { %4344 = vmatmul.mubr.bf16.gmra.mrb[20].mxu1 %v7347_v32  ;;  %v7442_v31 = vld [vmem:[%s9837_s1 + $0xc40] ss:$8 sps:$4 sm:$0xff]   ;;  %v7447_v32 = vld [vmem:[%s9837_s1 + $0x554] ss:$8 sps:$4 sm:$0xff]  }
 0x12b   :  { %5135 = vmatmul.mubr.bf16.gmra.mrb[20].mxu0 %v7351_v34  ;;  %4395 = vmatpush1.bf16.msra.mxu1 %v7348_v33  ;;  %v7450_v33 = vld [vmem:[%s9837_s1 + $0xc54] ss:$8 sps:$4 sm:$0xff]   ;;  %v7451_v34 = vld [vmem:[%s9838_s0 + $0x2ac] ss:$108 sps:$4 sm:$0xff]  }
 0x12c   :  { %5186 = vmatpush1.bf16.msra.mxu0 %v7352_v35  ;;  %4396 = vmatprep.subr.bf16.mxu1 %v7357_v36  ;;  %v7453_v35 = vld [vmem:[%s9838_s0 + $0x2e4] ss:$108 sps:$4 sm:$0xff]  }
 0x12d   :  { %5187 = vmatprep.subr.bf16.mxu0 %v7360_v37  ;;  %4353 = vmatprep.mubr.bf16.mxu1 %v7361_v38  ;;  %v7445_v36 = vld [vmem:[%s9837_s1 + $0x550] ss:$8 sps:$4 sm:$0xff]   ;;  %v7458_v38 = vld [vmem:[%s9837_s1 + $0x564] ss:$8 sps:$4 sm:$0xff]  }
 0x12e   :  { %5144 = vmatprep.mubr.bf16.mxu0 %v7363_v39  ;;  %v7448_v37 = vld [vmem:[%s9837_s1 + $0xc50] ss:$8 sps:$4 sm:$0xff]   ;;  %v7462_v39 = vld [vmem:[%s9837_s1 + $0xc64] ss:$8 sps:$4 sm:$0xff]  }
 0x12f   :  { %4397 = vmatpush1.bf16.msra.mxu1 %v7355_v40  ;;  %v7455_v40 = vld [vmem:[%s9838_s0 + $0x2a8] ss:$108 sps:$4 sm:$0xff]  }
 0x130   :  { %5188 = vmatpush1.bf16.msra.mxu0 %v7358_v41  ;;  %4398 = vmatprep.subr.bf16.mxu1 %v7368_v42  ;;  %v7456_v41 = vld [vmem:[%s9837_s1 + $0x560] ss:$8 sps:$4 sm:$0xff]  }
 0x131   :  { %5189 = vmatprep.subr.bf16.mxu0 %v7372_v43  ;;  %v7459_v42 = vld [vmem:[%s9838_s0 + $0x2e0] ss:$108 sps:$4 sm:$0xff]  }
 0x132   :  { %4354 = vmatmul.mubr.bf16.gmra.mrb[24].mxu1 %v7365_v44  ;;  %v7460_v43 = vld [vmem:[%s9837_s1 + $0xc60] ss:$8 sps:$4 sm:$0xff]   ;;  %v7465_v44 = vld [vmem:[%s9837_s1 + $0x574] ss:$8 sps:$4 sm:$0xff]  }
 0x133   :  { %5145 = vmatmul.mubr.bf16.gmra.mrb[24].mxu0 %v7369_v46  ;;  %4399 = vmatpush1.bf16.msra.mxu1 %v7366_v45  ;;  %v7468_v45 = vld [vmem:[%s9837_s1 + $0xc74] ss:$8 sps:$4 sm:$0xff]   ;;  %v7469_v46 = vld [vmem:[%s9838_s0 + $0x384] ss:$108 sps:$4 sm:$0xff]  }
 0x134   :  { %5190 = vmatpush1.bf16.msra.mxu0 %v7370_v47  ;;  %4400 = vmatprep.subr.bf16.mxu1 %v7375_v48  ;;  %v7471_v47 = vld [vmem:[%s9838_s0 + $0x3bc] ss:$108 sps:$4 sm:$0xff]   ;;  %v7463_v48 = vld [vmem:[%s9837_s1 + $0x570] ss:$8 sps:$4 sm:$0xff]  }
 0x135   :  { %5191 = vmatprep.subr.bf16.mxu0 %v7378_v49  ;;  %4363 = vmatprep.mubr.bf16.mxu1 %v7379_v50  ;;  %v7466_v49 = vld [vmem:[%s9837_s1 + $0xc70] ss:$8 sps:$4 sm:$0xff]   ;;  %v7476_v50 = vld [vmem:[%s9837_s1 + $0x584] ss:$8 sps:$4 sm:$0xff]  }
 0x136   :  { %5154 = vmatprep.mubr.bf16.mxu0 %v7381_v51  ;;  %v7480_v51 = vld [vmem:[%s9837_s1 + $0xc84] ss:$8 sps:$4 sm:$0xff]  }
 0x137   :  { %4401 = vmatpush1.bf16.msra.mxu1 %v7373_v52  ;;  %v7473_v52 = vld [vmem:[%s9838_s0 + $0x380] ss:$108 sps:$4 sm:$0xff]  }
 0x138   :  { %5192 = vmatpush1.bf16.msra.mxu0 %v7376_v53  ;;  %4402 = vmatprep.subr.bf16.mxu1 %v7386_v54  ;;  %v7474_v53 = vld [vmem:[%s9837_s1 + $0x580] ss:$8 sps:$4 sm:$0xff]   ;;  %v7477_v54 = vld [vmem:[%s9838_s0 + $0x3b8] ss:$108 sps:$4 sm:$0xff]  }
 0x139   :  { %5193 = vmatprep.subr.bf16.mxu0 %v7390_v55  ;;  %v7478_v55 = vld [vmem:[%s9837_s1 + $0xc80] ss:$8 sps:$4 sm:$0xff]  }
 0x13a   :  { %4364 = vmatmul.mubr.bf16.gmra.mrb[28].mxu1 %v7383_v56  ;;  %v7483_v56 = vld [vmem:[%s9837_s1 + $0x594] ss:$8 sps:$4 sm:$0xff]  }
 0x13b   :  { %5155 = vmatmul.mubr.bf16.gmra.mrb[28].mxu0 %v7387_v58  ;;  %4403 = vmatpush1.bf16.msra.mxu1 %v7384_v57  ;;  %v7486_v57 = vld [vmem:[%s9837_s1 + $0xc94] ss:$8 sps:$4 sm:$0xff]  }
 0x13c   :  { %5194 = vmatpush1.bf16.msra.mxu0 %v7388_v59  ;;  %4404 = vmatprep.subr.bf16.mxu1 %v7393_v60  ;;  %v7487_v58 = vld [vmem:[%s9838_s0 + $0x45c] ss:$108 sps:$4 sm:$0xff]   ;;  %v7489_v59 = vld [vmem:[%s9838_s0 + $0x494] ss:$108 sps:$4 sm:$0xff]   ;;  %v7481_v60 = vld [vmem:[%s9837_s1 + $0x590] ss:$8 sps:$4 sm:$0xff]  }
 0x13d   :  { %5195 = vmatprep.subr.bf16.mxu0 %v7396_v61  ;;  %4406 = vmatprep.mubr.bf16.mxu1 %v7399_v62  ;;  %v7484_v61 = vld [vmem:[%s9837_s1 + $0xc90] ss:$8 sps:$4 sm:$0xff]   ;;  %v7494_v62 = vld [vmem:[%s9837_s1 + $0x5a4] ss:$8 sps:$4 sm:$0xff]  }
 0x13e   :  { %5197 = vmatprep.mubr.bf16.mxu0 %v7402_v63  ;;  %v7498_v63 = vld [vmem:[%s9837_s1 + $0xca4] ss:$8 sps:$4 sm:$0xff]  }
 0x13f   :  { %4405 = vmatpush1.bf16.msra.mxu1 %v7391_v0  ;;  %v7491_v0 = vld [vmem:[%s9838_s0 + $0x458] ss:$108 sps:$4 sm:$0xff]  }
 0x140   :  { %5196 = vmatpush1.bf16.msra.mxu0 %v7394_v1  ;;  %4487 = vmatprep.subr.bf16.mxu1 %v7405_v2  ;;  %v7492_v1 = vld [vmem:[%s9837_s1 + $0x5a0] ss:$8 sps:$4 sm:$0xff]   ;;  %v7495_v2 = vld [vmem:[%s9838_s0 + $0x490] ss:$108 sps:$4 sm:$0xff]  }
 0x141   :  { %5278 = vmatprep.subr.bf16.mxu0 %v7408_v3  ;;  %v7496_v3 = vld [vmem:[%s9837_s1 + $0xca0] ss:$8 sps:$4 sm:$0xff]  }
 0x142   :  { %4407 = vmatmul.mubr.bf16.vlgmr.msra.gmra.mrb[0].mxu1 %v7397_v4  ;;  %v7501_v4 = vld [vmem:[%s9837_s1 + $0x5b4] ss:$8 sps:$4 sm:$0xff]  }
 0x143   :  { %5198 = vmatmul.mubr.bf16.vlgmr.msra.gmra.mrb[0].mxu0 %v7400_v5  ;;  %4488 = vmatpush1.bf16.msra.mxu1 %v7403_v6  ;;  %v7504_v5 = vld [vmem:[%s9837_s1 + $0xcb4] ss:$8 sps:$4 sm:$0xff]  }
 0x144   :  { %5279 = vmatpush1.bf16.msra.mxu0 %v7406_v7  ;;  %4489 = vmatprep.subr.bf16.mxu1 %v7411_v8  ;;  %v7505_v6 = vld [vmem:[%s9838_s0 + $0x534] ss:$108 sps:$4 sm:$0xff]   ;;  %v7507_v7 = vld [vmem:[%s9838_s0 + $0x56c] ss:$108 sps:$4 sm:$0xff]  }
 0x145   :  { %5280 = vmatprep.subr.bf16.mxu0 %v7414_v9  ;;  %4416 = vmatprep.mubr.bf16.mxu1 %v7415_v10  ;;  %v7499_v8 = vld [vmem:[%s9837_s1 + $0x5b0] ss:$8 sps:$4 sm:$0xff]   ;;  %v7512_v10 = vld [vmem:[%s9837_s1 + $0x5c4] ss:$8 sps:$4 sm:$0xff]  }
 0x146   :  { %5207 = vmatprep.mubr.bf16.mxu0 %v7417_v11  ;;  %v7502_v9 = vld [vmem:[%s9837_s1 + $0xcb0] ss:$8 sps:$4 sm:$0xff]  }
 0x147   :  { %4490 = vmatpush1.bf16.msra.mxu1 %v7409_v12  ;;  %v7509_v11 = vld [vmem:[%s9838_s0 + $0x530] ss:$108 sps:$4 sm:$0xff]   ;;  %v7516_v12 = vld [vmem:[%s9837_s1 + $0xcc4] ss:$8 sps:$4 sm:$0xff]  }
 0x148   :  { %5281 = vmatpush1.bf16.msra.mxu0 %v7412_v13  ;;  %4491 = vmatprep.subr.bf16.mxu1 %v7422_v14  ;;  %v7510_v13 = vld [vmem:[%s9837_s1 + $0x5c0] ss:$8 sps:$4 sm:$0xff]  }
 0x149   :  { %5282 = vmatprep.subr.bf16.mxu0 %v7426_v15  ;;  %v7513_v14 = vld [vmem:[%s9838_s0 + $0x568] ss:$108 sps:$4 sm:$0xff]  }
 0x14a   :  { %4417 = vmatmul.mubr.bf16.gmra.mrb[4].mxu1 %v7419_v16  ;;  %v7514_v15 = vld [vmem:[%s9837_s1 + $0xcc0] ss:$8 sps:$4 sm:$0xff]   ;;  %v7519_v16 = vld [vmem:[%s9837_s1 + $0x5d4] ss:$8 sps:$4 sm:$0xff]  }
 0x14b   :  { %5208 = vmatmul.mubr.bf16.gmra.mrb[4].mxu0 %v7423_v18  ;;  %4492 = vmatpush1.bf16.msra.mxu1 %v7420_v17  ;;  %v7522_v17 = vld [vmem:[%s9837_s1 + $0xcd4] ss:$8 sps:$4 sm:$0xff]   ;;  %v7523_v18 = vld [vmem:[%s9838_s0 + $0x60c] ss:$108 sps:$4 sm:$0xff]  }
 0x14c   :  { %5283 = vmatpush1.bf16.msra.mxu0 %v7424_v19  ;;  %4493 = vmatprep.subr.bf16.mxu1 %v7429_v20  ;;  %v7525_v19 = vld [vmem:[%s9838_s0 + $0x644] ss:$108 sps:$4 sm:$0xff]  }
 0x14d   :  { %5284 = vmatprep.subr.bf16.mxu0 %v7432_v21  ;;  %4426 = vmatprep.mubr.bf16.mxu1 %v7433_v22  ;;  %v7517_v20 = vld [vmem:[%s9837_s1 + $0x5d0] ss:$8 sps:$4 sm:$0xff]   ;;  %v7530_v22 = vld [vmem:[%s9837_s1 + $0x5e4] ss:$8 sps:$4 sm:$0xff]  }
 0x14e   :  { %5217 = vmatprep.mubr.bf16.mxu0 %v7435_v23  ;;  %v7520_v21 = vld [vmem:[%s9837_s1 + $0xcd0] ss:$8 sps:$4 sm:$0xff]   ;;  %v7527_v23 = vld [vmem:[%s9838_s0 + $0x608] ss:$108 sps:$4 sm:$0xff]  }
 0x14f   :  { %4494 = vmatpush1.bf16.msra.mxu1 %v7427_v24  ;;  %v7534_v24 = vld [vmem:[%s9837_s1 + $0xce4] ss:$8 sps:$4 sm:$0xff]  }
 0x150   :  { %5285 = vmatpush1.bf16.msra.mxu0 %v7430_v25  ;;  %4495 = vmatprep.subr.bf16.mxu1 %v7440_v26  ;;  %v7528_v25 = vld [vmem:[%s9837_s1 + $0x5e0] ss:$8 sps:$4 sm:$0xff]  }
 0x151   :  { %5286 = vmatprep.subr.bf16.mxu0 %v7444_v27  ;;  %v7531_v26 = vld [vmem:[%s9838_s0 + $0x640] ss:$108 sps:$4 sm:$0xff]  }
 0x152   :  { %4427 = vmatmul.mubr.bf16.gmra.mrb[8].mxu1 %v7437_v28  ;;  %v7532_v27 = vld [vmem:[%s9837_s1 + $0xce0] ss:$8 sps:$4 sm:$0xff]   ;;  %v7537_v28 = vld [vmem:[%s9837_s1 + $0x5f4] ss:$8 sps:$4 sm:$0xff]  }
 0x153   :  { %5218 = vmatmul.mubr.bf16.gmra.mrb[8].mxu0 %v7441_v30  ;;  %4496 = vmatpush1.bf16.msra.mxu1 %v7438_v29  ;;  %v7540_v29 = vld [vmem:[%s9837_s1 + $0xcf4] ss:$8 sps:$4 sm:$0xff]   ;;  %v7543_v30 = vld [vmem:[%s9838_s0 + $0x2c] ss:$108 sps:$4 sm:$0xff]  }
 0x154   :  { %5287 = vmatpush1.bf16.msra.mxu0 %v7442_v31  ;;  %4497 = vmatprep.subr.bf16.mxu1 %v7447_v32  ;;  %v7546_v31 = vld [vmem:[%s9838_s0 + $0x64] ss:$108 sps:$4 sm:$0xff]  }
 0x155   :  { %5288 = vmatprep.subr.bf16.mxu0 %v7450_v33  ;;  %4436 = vmatprep.mubr.bf16.mxu1 %v7451_v34  ;;  %v7535_v32 = vld [vmem:[%s9837_s1 + $0x5f0] ss:$8 sps:$4 sm:$0xff]   ;;  %v7549_v34 = vld [vmem:[%s9837_s1 + $0x604] ss:$8 sps:$4 sm:$0xff]  }
 0x156   :  { %5227 = vmatprep.mubr.bf16.mxu0 %v7453_v35  ;;  %v7538_v33 = vld [vmem:[%s9837_s1 + $0xcf0] ss:$8 sps:$4 sm:$0xff]   ;;  %v7552_v35 = vld [vmem:[%s9837_s1 + $0xd04] ss:$8 sps:$4 sm:$0xff]  }
 0x157   :  { %4498 = vmatpush1.bf16.msra.mxu1 %v7445_v36  ;;  %v7541_v36 = vld [vmem:[%s9838_s0 + $0x28] ss:$108 sps:$4 sm:$0xff]  }
 0x158   :  { %5289 = vmatpush1.bf16.msra.mxu0 %v7448_v37  ;;  %4499 = vmatprep.subr.bf16.mxu1 %v7458_v38  ;;  %v7544_v37 = vld [vmem:[%s9838_s0 + $0x60] ss:$108 sps:$4 sm:$0xff]  }
 0x159   :  { %5290 = vmatprep.subr.bf16.mxu0 %v7462_v39  ;;  %v7547_v38 = vld [vmem:[%s9837_s1 + $0x600] ss:$8 sps:$4 sm:$0xff]  }
 0x15a   :  { %4437 = vmatmul.mubr.bf16.gmra.mrb[12].mxu1 %v7455_v40  ;;  %v7550_v39 = vld [vmem:[%s9837_s1 + $0xd00] ss:$8 sps:$4 sm:$0xff]   ;;  %v7555_v40 = vld [vmem:[%s9837_s1 + $0x614] ss:$8 sps:$4 sm:$0xff]  }
 0x15b   :  { %5228 = vmatmul.mubr.bf16.gmra.mrb[12].mxu0 %v7459_v42  ;;  %4500 = vmatpush1.bf16.msra.mxu1 %v7456_v41  ;;  %v7556_v41 = vld [vmem:[%s9838_s0 + $0x104] ss:$108 sps:$4 sm:$0xff]   ;;  %v7558_v42 = vld [vmem:[%s9838_s0 + $0x13c] ss:$108 sps:$4 sm:$0xff]  }
 0x15c   :  { %5291 = vmatpush1.bf16.msra.mxu0 %v7460_v43  ;;  %4501 = vmatprep.subr.bf16.mxu1 %v7465_v44  ;;  %v7567_v43 = vld [vmem:[%s9837_s1 + $0xd14] ss:$8 sps:$4 sm:$0xff]   ;;  %v7553_v44 = vld [vmem:[%s9837_s1 + $0x610] ss:$8 sps:$4 sm:$0xff]  }
 0x15d   :  { %5292 = vmatprep.subr.bf16.mxu0 %v7468_v45  ;;  %4446 = vmatprep.mubr.bf16.mxu1 %v7469_v46  ;;  %v7563_v45 = vld [vmem:[%s9837_s1 + $0x624] ss:$8 sps:$4 sm:$0xff]   ;;  %v7565_v46 = vld [vmem:[%s9837_s1 + $0xd10] ss:$8 sps:$4 sm:$0xff]  }
 0x15e   :  { %5237 = vmatprep.mubr.bf16.mxu0 %v7471_v47  ;;  %v7582_v47 = vld [vmem:[%s9837_s1 + $0xd24] ss:$8 sps:$4 sm:$0xff]  }
 0x15f   :  { %4502 = vmatpush1.bf16.msra.mxu1 %v7463_v48  ;;  %v7560_v48 = vld [vmem:[%s9838_s0 + $0x100] ss:$108 sps:$4 sm:$0xff]  }
 0x160   :  { %5293 = vmatpush1.bf16.msra.mxu0 %v7466_v49  ;;  %4503 = vmatprep.subr.bf16.mxu1 %v7476_v50  ;;  %v7561_v49 = vld [vmem:[%s9837_s1 + $0x620] ss:$8 sps:$4 sm:$0xff]   ;;  %v7564_v50 = vld [vmem:[%s9838_s0 + $0x138] ss:$108 sps:$4 sm:$0xff]  }
 0x161   :  { %5294 = vmatprep.subr.bf16.mxu0 %v7480_v51  ;;  %v7570_v51 = vld [vmem:[%s9837_s1 + $0x634] ss:$8 sps:$4 sm:$0xff]  }
 0x162   :  { %4447 = vmatmul.mubr.bf16.gmra.mrb[16].mxu1 %v7473_v52  ;;  %v7571_v52 = vld [vmem:[%s9838_s0 + $0x1dc] ss:$108 sps:$4 sm:$0xff]  }
 0x163   :  { %5238 = vmatmul.mubr.bf16.gmra.mrb[16].mxu0 %v7477_v54  ;;  %4504 = vmatpush1.bf16.msra.mxu1 %v7474_v53  ;;  %v7573_v53 = vld [vmem:[%s9838_s0 + $0x214] ss:$108 sps:$4 sm:$0xff]  }
 0x164   :  { %5295 = vmatpush1.bf16.msra.mxu0 %v7478_v55  ;;  %4505 = vmatprep.subr.bf16.mxu1 %v7483_v56  ;;  %v7580_v54 = vld [vmem:[%s9837_s1 + $0xd20] ss:$8 sps:$4 sm:$0xff]   ;;  %v7597_v55 = vld [vmem:[%s9837_s1 + $0xd34] ss:$8 sps:$4 sm:$0xff]   ;;  %v7568_v56 = vld [vmem:[%s9837_s1 + $0x630] ss:$8 sps:$4 sm:$0xff]  }
 0x165   :  { %5296 = vmatprep.subr.bf16.mxu0 %v7486_v57  ;;  %4456 = vmatprep.mubr.bf16.mxu1 %v7487_v58  ;;  %v7575_v57 = vld [vmem:[%s9838_s0 + $0x1d8] ss:$108 sps:$4 sm:$0xff]  }
 0x166   :  { %5247 = vmatprep.mubr.bf16.mxu0 %v7489_v59  ;;  %v7578_v58 = vld [vmem:[%s9837_s1 + $0x644] ss:$8 sps:$4 sm:$0xff]   ;;  %v7595_v59 = vld [vmem:[%s9837_s1 + $0xd30] ss:$8 sps:$4 sm:$0xff]  }
 0x167   :  { %4506 = vmatpush1.bf16.msra.mxu1 %v7481_v60  ;;  %v7576_v60 = vld [vmem:[%s9837_s1 + $0x640] ss:$8 sps:$4 sm:$0xff]  }
 0x168   :  { %5297 = vmatpush1.bf16.msra.mxu0 %v7484_v61  ;;  %4507 = vmatprep.subr.bf16.mxu1 %v7494_v62  ;;  %v7579_v61 = vld [vmem:[%s9838_s0 + $0x210] ss:$108 sps:$4 sm:$0xff]  }
 0x169   :  { %5298 = vmatprep.subr.bf16.mxu0 %v7498_v63  ;;  %v7585_v62 = vld [vmem:[%s9837_s1 + $0x654] ss:$8 sps:$4 sm:$0xff]  }
 0x16a   :  { %4457 = vmatmul.mubr.bf16.gmra.mrb[20].mxu1 %v7491_v0  ;;  %v7586_v63 = vld [vmem:[%s9838_s0 + $0x2b4] ss:$108 sps:$4 sm:$0xff]   ;;  %v7588_v0 = vld [vmem:[%s9838_s0 + $0x2ec] ss:$108 sps:$4 sm:$0xff]  }
 0x16b   :  { %5248 = vmatmul.mubr.bf16.gmra.mrb[20].mxu0 %v7495_v2  ;;  %4508 = vmatpush1.bf16.msra.mxu1 %v7492_v1  ;;  %v7612_v1 = vld [vmem:[%s9837_s1 + $0xd44] ss:$8 sps:$4 sm:$0xff]   ;;  %v7610_v2 = vld [vmem:[%s9837_s1 + $0xd40] ss:$8 sps:$4 sm:$0xff]  }
 0x16c   :  { %5299 = vmatpush1.bf16.msra.mxu0 %v7496_v3  ;;  %4509 = vmatprep.subr.bf16.mxu1 %v7501_v4  ;;  %v7583_v3 = vld [vmem:[%s9837_s1 + $0x650] ss:$8 sps:$4 sm:$0xff]   ;;  %v7627_v4 = vld [vmem:[%s9837_s1 + $0xd54] ss:$8 sps:$4 sm:$0xff]  }
 0x16d   :  { %5300 = vmatprep.subr.bf16.mxu0 %v7504_v5  ;;  %4466 = vmatprep.mubr.bf16.mxu1 %v7505_v6  ;;  %v7593_v5 = vld [vmem:[%s9837_s1 + $0x664] ss:$8 sps:$4 sm:$0xff]   ;;  %v7590_v6 = vld [vmem:[%s9838_s0 + $0x2b0] ss:$108 sps:$4 sm:$0xff]  }
 0x16e   :  { %5257 = vmatprep.mubr.bf16.mxu0 %v7507_v7  ;;  %v7591_v7 = vld [vmem:[%s9837_s1 + $0x660] ss:$8 sps:$4 sm:$0xff]  }
 0x16f   :  { %4510 = vmatpush1.bf16.msra.mxu1 %v7499_v8  ;;  %v7594_v8 = vld [vmem:[%s9838_s0 + $0x2e8] ss:$108 sps:$4 sm:$0xff]  }
 0x170   :  { %5301 = vmatpush1.bf16.msra.mxu0 %v7502_v9  ;;  %4511 = vmatprep.subr.bf16.mxu1 %v7512_v10  ;;  %v7600_v9 = vld [vmem:[%s9837_s1 + $0x674] ss:$8 sps:$4 sm:$0xff]   ;;  %v7601_v10 = vld [vmem:[%s9838_s0 + $0x38c] ss:$108 sps:$4 sm:$0xff]  }
 0x171   :  { %5302 = vmatprep.subr.bf16.mxu0 %v7516_v12  ;;  %v7625_v12 = vld [vmem:[%s9837_s1 + $0xd50] ss:$8 sps:$4 sm:$0xff]  }
 0x172   :  { %4467 = vmatmul.mubr.bf16.gmra.mrb[24].mxu1 %v7509_v11  ;;  %v7603_v11 = vld [vmem:[%s9838_s0 + $0x3c4] ss:$108 sps:$4 sm:$0xff]  }
 0x173   :  { %5258 = vmatmul.mubr.bf16.gmra.mrb[24].mxu0 %v7513_v14  ;;  %4512 = vmatpush1.bf16.msra.mxu1 %v7510_v13  ;;  %v7642_v13 = vld [vmem:[%s9837_s1 + $0xd64] ss:$8 sps:$4 sm:$0xff]   ;;  %v7598_v14 = vld [vmem:[%s9837_s1 + $0x670] ss:$8 sps:$4 sm:$0xff]  }
 0x174   :  { %5303 = vmatpush1.bf16.msra.mxu0 %v7514_v15  ;;  %4513 = vmatprep.subr.bf16.mxu1 %v7519_v16  ;;  %v7605_v15 = vld [vmem:[%s9838_s0 + $0x388] ss:$108 sps:$4 sm:$0xff]   ;;  %v7608_v16 = vld [vmem:[%s9837_s1 + $0x684] ss:$8 sps:$4 sm:$0xff]  }
 0x175   :  { %5304 = vmatprep.subr.bf16.mxu0 %v7522_v17  ;;  %4476 = vmatprep.mubr.bf16.mxu1 %v7523_v18  ;;  %v7606_v17 = vld [vmem:[%s9837_s1 + $0x680] ss:$8 sps:$4 sm:$0xff]  }
 0x176   :  { %5267 = vmatprep.mubr.bf16.mxu0 %v7525_v19  ;;  %v7640_v18 = vld [vmem:[%s9837_s1 + $0xd60] ss:$8 sps:$4 sm:$0xff]  }
 0x177   :  { %4514 = vmatpush1.bf16.msra.mxu1 %v7517_v20  ;;  %v7609_v19 = vld [vmem:[%s9838_s0 + $0x3c0] ss:$108 sps:$4 sm:$0xff]   ;;  %v7615_v20 = vld [vmem:[%s9837_s1 + $0x694] ss:$8 sps:$4 sm:$0xff]  }
 0x178   :  { %5305 = vmatpush1.bf16.msra.mxu0 %v7520_v21  ;;  %4515 = vmatprep.subr.bf16.mxu1 %v7530_v22  ;;  %v7616_v21 = vld [vmem:[%s9838_s0 + $0x464] ss:$108 sps:$4 sm:$0xff]   ;;  %v7618_v22 = vld [vmem:[%s9838_s0 + $0x49c] ss:$108 sps:$4 sm:$0xff]  }
 0x179   :  { %5306 = vmatprep.subr.bf16.mxu0 %v7534_v24  ;;  %v7655_v24 = vld [vmem:[%s9837_s1 + $0xd70] ss:$8 sps:$4 sm:$0xff]  }
 0x17a   :  { %4477 = vmatmul.mubr.bf16.gmra.mrb[28].mxu1 %v7527_v23  ;;  %v7657_v23 = vld [vmem:[%s9837_s1 + $0xd74] ss:$8 sps:$4 sm:$0xff]  }
 0x17b   :  { %5268 = vmatmul.mubr.bf16.gmra.mrb[28].mxu0 %v7531_v26  ;;  %4516 = vmatpush1.bf16.msra.mxu1 %v7528_v25  ;;  %v7613_v25 = vld [vmem:[%s9837_s1 + $0x690] ss:$8 sps:$4 sm:$0xff]   ;;  %v7620_v26 = vld [vmem:[%s9838_s0 + $0x460] ss:$108 sps:$4 sm:$0xff]  }
 0x17c   :  { %5307 = vmatpush1.bf16.msra.mxu0 %v7532_v27  ;;  %4517 = vmatprep.subr.bf16.mxu1 %v7537_v28  ;;  %v7623_v27 = vld [vmem:[%s9837_s1 + $0x6a4] ss:$8 sps:$4 sm:$0xff]   ;;  %v7621_v28 = vld [vmem:[%s9837_s1 + $0x6a0] ss:$8 sps:$4 sm:$0xff]  }
 0x17d   :  { %5308 = vmatprep.subr.bf16.mxu0 %v7540_v29  ;;  %4519 = vmatprep.mubr.bf16.mxu1 %v7543_v30  ;;  %v7624_v29 = vld [vmem:[%s9838_s0 + $0x498] ss:$108 sps:$4 sm:$0xff]   ;;  %v7630_v30 = vld [vmem:[%s9837_s1 + $0x6b4] ss:$8 sps:$4 sm:$0xff]  }
 0x17e   :  { %5310 = vmatprep.mubr.bf16.mxu0 %v7546_v31  ;;  %v7631_v31 = vld [vmem:[%s9838_s0 + $0x53c] ss:$108 sps:$4 sm:$0xff]  }
 0x17f   :  { %4518 = vmatpush1.bf16.msra.mxu1 %v7535_v32  ;;  %v7633_v32 = vld [vmem:[%s9838_s0 + $0x574] ss:$108 sps:$4 sm:$0xff]  }
 0x180   :  { %5309 = vmatpush1.bf16.msra.mxu0 %v7538_v33  ;;  %4600 = vmatprep.subr.bf16.mxu1 %v7549_v34  ;;  %v7628_v33 = vld [vmem:[%s9837_s1 + $0x6b0] ss:$8 sps:$4 sm:$0xff]  }
 0x181   :  { %5391 = vmatprep.subr.bf16.mxu0 %v7552_v35  ;;  %v7635_v34 = vld [vmem:[%s9838_s0 + $0x538] ss:$108 sps:$4 sm:$0xff]  }
 0x182   :  { %4520 = vmatmul.mubr.bf16.vlgmr.msra.gmra.mrb[0].mxu1 %v7541_v36  ;;  %v7638_v35 = vld [vmem:[%s9837_s1 + $0x6c4] ss:$8 sps:$4 sm:$0xff]   ;;  %v7636_v36 = vld [vmem:[%s9837_s1 + $0x6c0] ss:$8 sps:$4 sm:$0xff]  }
 0x183   :  { %5311 = vmatmul.mubr.bf16.vlgmr.msra.gmra.mrb[0].mxu0 %v7544_v37  ;;  %4601 = vmatpush1.bf16.msra.mxu1 %v7547_v38  ;;  %v7639_v37 = vld [vmem:[%s9838_s0 + $0x570] ss:$108 sps:$4 sm:$0xff]   ;;  %v7646_v38 = vld [vmem:[%s9838_s0 + $0x614] ss:$108 sps:$4 sm:$0xff]  }
 0x184   :  { %5392 = vmatpush1.bf16.msra.mxu0 %v7550_v39  ;;  %4602 = vmatprep.subr.bf16.mxu1 %v7555_v40  ;;  %v7645_v39 = vld [vmem:[%s9837_s1 + $0x6d4] ss:$8 sps:$4 sm:$0xff]   ;;  %v7648_v40 = vld [vmem:[%s9838_s0 + $0x64c] ss:$108 sps:$4 sm:$0xff]  }
 0x185   :  { %4529 = vmatprep.mubr.bf16.mxu1 %v7556_v41  ;;  %5320 = vmatprep.mubr.bf16.mxu0 %v7558_v42  ;;  %v7643_v41 = vld [vmem:[%s9837_s1 + $0x6d0] ss:$8 sps:$4 sm:$0xff]   ;;  %v7653_v42 = vld [vmem:[%s9837_s1 + $0x6e4] ss:$8 sps:$4 sm:$0xff]  }
 0x186   :  { %5393 = vmatprep.subr.bf16.mxu0 %v7567_v43  ;;  %v7650_v43 = vld [vmem:[%s9838_s0 + $0x610] ss:$108 sps:$4 sm:$0xff]  }
 0x187   :  { %4603 = vmatpush1.bf16.msra.mxu1 %v7553_v44  ;;  %v7654_v44 = vld [vmem:[%s9838_s0 + $0x648] ss:$108 sps:$4 sm:$0xff]  }
 0x188   :  { %5394 = vmatpush1.bf16.msra.mxu0 %v7565_v46  ;;  %4604 = vmatprep.subr.bf16.mxu1 %v7563_v45  ;;  %v7651_v45 = vld [vmem:[%s9837_s1 + $0x6e0] ss:$8 sps:$4 sm:$0xff]  }
 0x189   :  { %5395 = vmatprep.subr.bf16.mxu0 %v7582_v47  ;;  %v7663_v46 = vld [vmem:[%s9838_s0 + $0x34] ss:$108 sps:$4 sm:$0xff]  }
 0x18a   :  { %4530 = vmatmul.mubr.bf16.gmra.mrb[4].mxu1 %v7560_v48  ;;  %v7660_v47 = vld [vmem:[%s9837_s1 + $0x6f4] ss:$8 sps:$4 sm:$0xff]   ;;  %v7658_v48 = vld [vmem:[%s9837_s1 + $0x6f0] ss:$8 sps:$4 sm:$0xff]  }
 0x18b   :  { %5321 = vmatmul.mubr.bf16.gmra.mrb[4].mxu0 %v7564_v50  ;;  %4605 = vmatpush1.bf16.msra.mxu1 %v7561_v49  ;;  %v7693_v49 = vmov 0   ;;  %v7661_v50 = vld [vmem:[%s9838_s0 + $0x30] ss:$108 sps:$4 sm:$0xff]  }
 0x18c   :  { %4539 = vmatprep.mubr.bf16.mxu1 %v7571_v52  ;;  %4606 = vmatprep.subr.bf16.mxu1 %v7570_v51  ;;  %v7664_v51 = vld [vmem:[%s9838_s0 + $0x68] ss:$108 sps:$4 sm:$0xff]   ;;  %v7665_v52 = vld [vmem:[%s9838_s0 + $0x10c] ss:$108 sps:$4 sm:$0xff]  }
 0x18d   :  { %5330 = vmatprep.mubr.bf16.mxu0 %v7573_v53  ;;  %5396 = vmatpush1.bf16.msra.mxu0 %v7580_v54  ;;  %v7667_v53 = vld [vmem:[%s9838_s0 + $0x108] ss:$108 sps:$4 sm:$0xff]   ;;  %v7668_v54 = vld [vmem:[%s9838_s0 + $0x140] ss:$108 sps:$4 sm:$0xff]  }
 0x18e   :  { %5397 = vmatprep.subr.bf16.mxu0 %v7597_v55  ;;  %v7669_v55 = vld [vmem:[%s9838_s0 + $0x1e4] ss:$108 sps:$4 sm:$0xff]  }
 0x18f   :  { %4607 = vmatpush1.bf16.msra.mxu1 %v7568_v56  ;;  %v7671_v56 = vld [vmem:[%s9838_s0 + $0x1e0] ss:$108 sps:$4 sm:$0xff]  }
 0x190   :  { %4608 = vmatprep.subr.bf16.mxu1 %v7578_v58  ;;  %v7673_v58 = vld [vmem:[%s9838_s0 + $0x2bc] ss:$108 sps:$4 sm:$0xff]  }
 0x191   :  { %5398 = vmatpush1.bf16.msra.mxu0 %v7595_v59  ;;  %v7675_v59 = vld [vmem:[%s9838_s0 + $0x2b8] ss:$108 sps:$4 sm:$0xff]  }
 0x192   :  { %4540 = vmatmul.mubr.bf16.gmra.mrb[8].mxu1 %v7575_v57  ;;  %5399 = vmatprep.subr.bf16.mxu0 %v7612_v1  ;;  %v7672_v57 = vld [vmem:[%s9838_s0 + $0x218] ss:$108 sps:$4 sm:$0xff]   ;;  %v7683_v1 = vld [vmem:[%s9838_s0 + $0x468] ss:$108 sps:$4 sm:$0xff]  }
 0x193   :  { %5331 = vmatmul.mubr.bf16.gmra.mrb[8].mxu0 %v7579_v61  ;;  %4609 = vmatpush1.bf16.msra.mxu1 %v7576_v60  ;;  %v7676_v60 = vld [vmem:[%s9838_s0 + $0x2f0] ss:$108 sps:$4 sm:$0xff]   ;;  %v7677_v61 = vld [vmem:[%s9838_s0 + $0x394] ss:$108 sps:$4 sm:$0xff]  }
 0x194   :  { %4549 = vmatprep.mubr.bf16.mxu1 %v7586_v63  ;;  %4610 = vmatprep.subr.bf16.mxu1 %v7585_v62  ;;  %v7679_v62 = vld [vmem:[%s9838_s0 + $0x390] ss:$108 sps:$4 sm:$0xff]   ;;  %v7680_v63 = vld [vmem:[%s9838_s0 + $0x3c8] ss:$108 sps:$4 sm:$0xff]  }
 0x195   :  { %5340 = vmatprep.mubr.bf16.mxu0 %v7588_v0  ;;  %5400 = vmatpush1.bf16.msra.mxu0 %v7610_v2  ;;  %v7681_v0 = vld [vmem:[%s9838_s0 + $0x46c] ss:$108 sps:$4 sm:$0xff]  }
 0x196   :  { %5401 = vmatprep.subr.bf16.mxu0 %v7627_v4  ;;  %v7684_v2 = vld [vmem:[%s9838_s0 + $0x4a0] ss:$108 sps:$4 sm:$0xff]  }
 0x197   :  { %4611 = vmatpush1.bf16.msra.mxu1 %v7583_v3  ;;  %v7685_v3 = vld [vmem:[%s9838_s0 + $0x544] ss:$108 sps:$4 sm:$0xff]   ;;  %v7687_v4 = vld [vmem:[%s9838_s0 + $0x540] ss:$108 sps:$4 sm:$0xff]  }
 0x198   :  { %4612 = vmatprep.subr.bf16.mxu1 %v7593_v5  ;;  %v7688_v5 = vld [vmem:[%s9838_s0 + $0x578] ss:$108 sps:$4 sm:$0xff]  }
 0x199   :  { %5402 = vmatpush1.bf16.msra.mxu0 %v7625_v12  ;;  %v5504_v12 = vld [vmem:[%s9839_s2] sm:$0x3] }
 0x19a   :  { %4550 = vmatmul.mubr.bf16.gmra.mrb[12].mxu1 %v7590_v6  ;;  %5403 = vmatprep.subr.bf16.mxu0 %v7642_v13  ;;  %v7689_v6 = vld [vmem:[%s9838_s0 + $0x61c] ss:$108 sps:$4 sm:$0xff]  }
 0x19b   :  { %5341 = vmatmul.mubr.bf16.gmra.mrb[12].mxu0 %v7594_v8  ;;  %4613 = vmatpush1.bf16.msra.mxu1 %v7591_v7  ;;  %v7691_v7 = vld [vmem:[%s9838_s0 + $0x618] ss:$108 sps:$4 sm:$0xff]   ;;  %v7692_v8 = vld [vmem:[%s9838_s0 + $0x650] ss:$108 sps:$4 sm:$0xff]  }
 0x19c   :  { %4559 = vmatprep.mubr.bf16.mxu1 %v7601_v10  ;;  %4614 = vmatprep.subr.bf16.mxu1 %v7600_v9  ;;  %v5506_v9 = vlaneseq }
 0x19d   :  { %5350 = vmatprep.mubr.bf16.mxu0 %v7603_v11  ;;  %5404 = vmatpush1.bf16.msra.mxu0 %v7640_v18 }
 0x19e   :  { %5405 = vmatprep.subr.bf16.mxu0 %v7657_v23  ;;  %v5507_v10 = vshrl.u32 %v5506_v9, 7 }
 0x19f   :  { %4615 = vmatpush1.bf16.msra.mxu1 %v7598_v14  ;;  %v5548_v14 = vld [vmem:[%s9840_s3] sm:$0x3] }
 0x1a0   :  { %4616 = vmatprep.subr.bf16.mxu1 %v7608_v16  ;;  %v5508_v11 = vsub.s32 0, %v5507_v10  ;;  %v5512_v13 = vsub.s32 1, %v5507_v10 }
 0x1a1   :  { %5406 = vmatpush1.bf16.msra.mxu0 %v7655_v24 }
 0x1a2   :  { %4560 = vmatmul.mubr.bf16.gmra.mrb[16].mxu1 %v7605_v15  ;;  %v9669_v15 = vrot.slane %v5504_v12, %v5508_v11  ;;  %v9671_v18 = vrot.slane %v5504_v12, %v5512_v13  ;;  %v9675_v24 = vrot.slane %v5548_v14, %v5512_v13 }
 0x1a3   :  { %5351 = vmatmul.mubr.bf16.gmra.mrb[16].mxu0 %v7609_v19  ;;  %4617 = vmatpush1.bf16.msra.mxu1 %v7606_v17 }
 0x1a4   :  { %4569 = vmatprep.mubr.bf16.mxu1 %v7616_v21  ;;  %4618 = vmatprep.subr.bf16.mxu1 %v7615_v20  ;;  %v9673_v20 = vrot.slane %v5548_v14, %v5508_v11 }
 0x1a5   :  { %5360 = vmatprep.mubr.bf16.mxu0 %v7618_v22 }
 0x1a7   :  { %4619 = vmatpush1.bf16.msra.mxu1 %v7613_v25 }
 0x1a8   :  { %4620 = vmatprep.subr.bf16.mxu1 %v7623_v27 }
 0x1aa   :  { %4570 = vmatmul.mubr.bf16.gmra.mrb[20].mxu1 %v7620_v26 }
 0x1ab   :  { %5361 = vmatmul.mubr.bf16.gmra.mrb[20].mxu0 %v7624_v29  ;;  %4621 = vmatpush1.bf16.msra.mxu1 %v7621_v28 }
 0x1ac   :  { %4579 = vmatprep.mubr.bf16.mxu1 %v7631_v31  ;;  %4622 = vmatprep.subr.bf16.mxu1 %v7630_v30 }
 0x1ad   :  { %5370 = vmatprep.mubr.bf16.mxu0 %v7633_v32 }
 0x1af   :  { %4623 = vmatpush1.bf16.msra.mxu1 %v7628_v33 }
 0x1b0   :  { %4624 = vmatprep.subr.bf16.mxu1 %v7638_v35 }
 0x1b2   :  { %4580 = vmatmul.mubr.bf16.gmra.mrb[24].mxu1 %v7635_v34 }
 0x1b3   :  { %5371 = vmatmul.mubr.bf16.gmra.mrb[24].mxu0 %v7639_v37  ;;  %4625 = vmatpush1.bf16.msra.mxu1 %v7636_v36 }
 0x1b4   :  { %4589 = vmatprep.mubr.bf16.mxu1 %v7646_v38  ;;  %4626 = vmatprep.subr.bf16.mxu1 %v7645_v39 }
 0x1b5   :  { %5380 = vmatprep.mubr.bf16.mxu0 %v7648_v40 }
 0x1b7   :  { %4627 = vmatpush1.bf16.msra.mxu1 %v7643_v41 }
 0x1b8   :  { %4628 = vmatprep.subr.bf16.mxu1 %v7653_v42 }
 0x1ba   :  { %4590 = vmatmul.mubr.bf16.gmra.mrb[28].mxu1 %v7650_v43 }
 0x1bb   :  { %5381 = vmatmul.mubr.bf16.gmra.mrb[28].mxu0 %v7654_v44  ;;  %4629 = vmatpush1.bf16.msra.mxu1 %v7651_v45 }
 0x1bc   :  { %4632 = vmatprep.mubr.bf16.mxu1 %v7663_v46  ;;  %4630 = vmatprep.subr.bf16.mxu1 %v7660_v47 }
 0x1bd   :  { %5423 = vmatprep.mubr.bf16.mxu0 %v7693_v49 }
 0x1bf   :  { %4631 = vmatpush1.bf16.msra.mxu1 %v7658_v48 }
 0x1c2   :  { %4633 = vmatmul.mubr.bf16.vlgmr.msra.gmra.mrb[0].mxu1 %v7661_v50 }
 0x1c3   :  { %5424 = vmatmul.mubr.bf16.vlgmr.msra.gmra.mrb[0].mxu0 %v7664_v51  ;;  %4642 = vmatprep.mubr.bf16.mxu1 %v7665_v52 }
 0x1c4   :  { %5433 = vmatprep.mubr.bf16.mxu0 %v7693_v49 }
 0x1ca   :  { %4643 = vmatmul.mubr.bf16.gmra.mrb[4].mxu1 %v7667_v53 }
 0x1cb   :  { %5434 = vmatmul.mubr.bf16.gmra.mrb[4].mxu0 %v7668_v54  ;;  %4652 = vmatprep.mubr.bf16.mxu1 %v7669_v55 }
 0x1cc   :  { %5443 = vmatprep.mubr.bf16.mxu0 %v7693_v49 }
 0x1d2   :  { %4653 = vmatmul.mubr.bf16.gmra.mrb[8].mxu1 %v7671_v56 }
 0x1d3   :  { %5444 = vmatmul.mubr.bf16.gmra.mrb[8].mxu0 %v7672_v57  ;;  %4662 = vmatprep.mubr.bf16.mxu1 %v7673_v58 }
 0x1d4   :  { %5453 = vmatprep.mubr.bf16.mxu0 %v7693_v49 }
 0x1da   :  { %4663 = vmatmul.mubr.bf16.gmra.mrb[12].mxu1 %v7675_v59 }
 0x1db   :  { %5454 = vmatmul.mubr.bf16.gmra.mrb[12].mxu0 %v7676_v60  ;;  %4672 = vmatprep.mubr.bf16.mxu1 %v7677_v61 }
 0x1dc   :  { %5463 = vmatprep.mubr.bf16.mxu0 %v7693_v49 }
 0x1e2   :  { %4673 = vmatmul.mubr.bf16.gmra.mrb[16].mxu1 %v7679_v62 }
 0x1e3   :  { %5464 = vmatmul.mubr.bf16.gmra.mrb[16].mxu0 %v7680_v63  ;;  %4682 = vmatprep.mubr.bf16.mxu1 %v7681_v0 }
 0x1e4   :  { %5473 = vmatprep.mubr.bf16.mxu0 %v7693_v49 }
 0x1ea   :  { %4683 = vmatmul.mubr.bf16.gmra.mrb[20].mxu1 %v7683_v1 }
 0x1eb   :  { %5474 = vmatmul.mubr.bf16.gmra.mrb[20].mxu0 %v7684_v2  ;;  %4692 = vmatprep.mubr.bf16.mxu1 %v7685_v3 }
 0x1ec   :  { %5483 = vmatprep.mubr.bf16.mxu0 %v7693_v49 }
 0x1f2   :  { %4693 = vmatmul.mubr.bf16.gmra.mrb[24].mxu1 %v7687_v4 }
 0x1f3   :  { %5484 = vmatmul.mubr.bf16.gmra.mrb[24].mxu0 %v7688_v5  ;;  %4702 = vmatprep.mubr.bf16.mxu1 %v7689_v6 }
 0x1f4   :  { %5493 = vmatprep.mubr.bf16.mxu0 %v7693_v49 }
 0x1fa   :  { %4703 = vmatmul.mubr.bf16.gmra.mrb[28].mxu1 %v7691_v7 }
 0x1fb   :  { %5494 = vmatmul.mubr.bf16.gmra.mrb[28].mxu0 %v7692_v8 }
 0x295   :  { %v4634_v16 = vpop.f32.mrb[0].mxu1 }
 0x296   :  { %v5425_v17 = vpop.f32.mrb[0].mxu0  ;;  %v4636_v21 = vpop.f32.mrb[1].mxu1 }
 0x297   :  { %v6308_v19 = vadd.f32 %v5425_v17, %v4634_v16  ;;  %v5427_v22 = vpop.f32.mrb[1].mxu0  ;;  %v4638_v25 = vpop.f32.mrb[2].mxu1 }
 0x298   :  { %v6309_v23 = vadd.f32 %v5427_v22, %v4636_v21  ;;  %v5429_v26 = vpop.f32.mrb[2].mxu0  ;;  %v4640_v29 = vpop.f32.mrb[3].mxu1 }
 0x299   :  { %v5516_v27 = vmul.f32 %v6308_v19, %v9669_v15  ;;  %v6310_v28 = vadd.f32 %v5429_v26, %v4638_v25  ;;  %v5431_v30 = vpop.f32.mrb[3].mxu0 }
 0x29a   :  { %v5517_v31 = vmul.f32 %v6309_v23, %v9671_v18  ;;  %v6311_v32 = vadd.f32 %v5431_v30, %v4640_v29 }
 0x29b   :  { %v5560_v33 = vadd.f32 %v9673_v20, %v5516_v27  ;;  %v5518_v34 = vmul.f32 %v6310_v28, %v9669_v15 }
 0x29c   :  { %v5561_v35 = vadd.f32 %v9675_v24, %v5517_v31  ;;  %v5519_v36 = vmul.f32 %v6311_v32, %v9671_v18 }
 0x29d   :  { %v5592_v37 = vmax.f32 %v5560_v33, 0.0  ;;  %v5562_v38 = vadd.f32 %v9673_v20, %v5518_v34  ;;  %v4644_v41 = vpop.f32.mrb[4].mxu1 }
 0x29e   :  { %v5593_v39 = vmax.f32 %v5561_v35, 0.0  ;;  %v5563_v40 = vadd.f32 %v9675_v24, %v5519_v36  ;;  %v5435_v42 = vpop.f32.mrb[4].mxu0  ;;  %v4646_v45 = vpop.f32.mrb[5].mxu1 }
 0x29f   :  { %5624 = vst [vmem:[%s9841_s4] sm:$0xff] %v5592_v37  ;;  %v5594_v43 = vmax.f32 %v5562_v38, 0.0  ;;  %v6312_v44 = vadd.f32 %v5435_v42, %v4644_v41  ;;  %v5437_v46 = vpop.f32.mrb[5].mxu0  ;;  %v4648_v49 = vpop.f32.mrb[6].mxu1 }
 0x2a0   :  { %5625 = vst [vmem:[%s9841_s4 + $0x8] sm:$0xff] %v5593_v39  ;;  %v5595_v47 = vmax.f32 %v5563_v40, 0.0  ;;  %v6313_v48 = vadd.f32 %v5437_v46, %v4646_v45  ;;  %v5439_v50 = vpop.f32.mrb[6].mxu0  ;;  %v4650_v53 = vpop.f32.mrb[7].mxu1 }
 0x2a1   :  { %5626 = vst [vmem:[%s9841_s4 + $0x10] sm:$0xff] %v5594_v43  ;;  %v5520_v51 = vmul.f32 %v6312_v44, %v9669_v15  ;;  %v6314_v52 = vadd.f32 %v5439_v50, %v4648_v49  ;;  %v5441_v54 = vpop.f32.mrb[7].mxu0 }
 0x2a2   :  { %5627 = vst [vmem:[%s9841_s4 + $0x18] sm:$0xff] %v5595_v47  ;;  %v5521_v55 = vmul.f32 %v6313_v48, %v9671_v18  ;;  %v6315_v56 = vadd.f32 %v5441_v54, %v4650_v53 }
 0x2a3   :  { %v5564_v57 = vadd.f32 %v9673_v20, %v5520_v51  ;;  %v5522_v58 = vmul.f32 %v6314_v52, %v9669_v15 }
 0x2a4   :  { %v5565_v59 = vadd.f32 %v9675_v24, %v5521_v55  ;;  %v5523_v60 = vmul.f32 %v6315_v56, %v9671_v18 }
 0x2a5   :  { %v5596_v61 = vmax.f32 %v5564_v57, 0.0  ;;  %v5566_v62 = vadd.f32 %v9673_v20, %v5522_v58  ;;  %v4654_v1 = vpop.f32.mrb[8].mxu1 }
 0x2a6   :  { %v5597_v63 = vmax.f32 %v5565_v59, 0.0  ;;  %v5567_v0 = vadd.f32 %v9675_v24, %v5523_v60  ;;  %v5445_v2 = vpop.f32.mrb[8].mxu0  ;;  %v4656_v5 = vpop.f32.mrb[9].mxu1 }
 0x2a7   :  { %5628 = vst [vmem:[%s9841_s4 + $0x20] sm:$0xff] %v5596_v61  ;;  %v5598_v3 = vmax.f32 %v5566_v62, 0.0  ;;  %v6316_v4 = vadd.f32 %v5445_v2, %v4654_v1  ;;  %v5447_v6 = vpop.f32.mrb[9].mxu0  ;;  %v4658_v9 = vpop.f32.mrb[10].mxu1 }
 0x2a8   :  { %5629 = vst [vmem:[%s9841_s4 + $0x28] sm:$0xff] %v5597_v63  ;;  %v5599_v7 = vmax.f32 %v5567_v0, 0.0  ;;  %v6317_v8 = vadd.f32 %v5447_v6, %v4656_v5  ;;  %v5449_v10 = vpop.f32.mrb[10].mxu0  ;;  %v4660_v13 = vpop.f32.mrb[11].mxu1 }
 0x2a9   :  { %5630 = vst [vmem:[%s9841_s4 + $0x30] sm:$0xff] %v5598_v3  ;;  %v5524_v11 = vmul.f32 %v6316_v4, %v9669_v15  ;;  %v6318_v12 = vadd.f32 %v5449_v10, %v4658_v9  ;;  %v5451_v14 = vpop.f32.mrb[11].mxu0 }
 0x2aa   :  { %5631 = vst [vmem:[%s9841_s4 + $0x38] sm:$0xff] %v5599_v7  ;;  %v5525_v16 = vmul.f32 %v6317_v8, %v9671_v18  ;;  %v6319_v17 = vadd.f32 %v5451_v14, %v4660_v13 }
 0x2ab   :  { %v5568_v19 = vadd.f32 %v9673_v20, %v5524_v11  ;;  %v5526_v21 = vmul.f32 %v6318_v12, %v9669_v15 }
 0x2ac   :  { %v5569_v22 = vadd.f32 %v9675_v24, %v5525_v16  ;;  %v5527_v23 = vmul.f32 %v6319_v17, %v9671_v18 }
 0x2ad   :  { %v5600_v25 = vmax.f32 %v5568_v19, 0.0  ;;  %v5570_v26 = vadd.f32 %v9673_v20, %v5526_v21  ;;  %v4664_v29 = vpop.f32.mrb[12].mxu1 }
 0x2ae   :  { %v5601_v27 = vmax.f32 %v5569_v22, 0.0  ;;  %v5571_v28 = vadd.f32 %v9675_v24, %v5527_v23  ;;  %v5455_v30 = vpop.f32.mrb[12].mxu0  ;;  %v4666_v33 = vpop.f32.mrb[13].mxu1 }
 0x2af   :  { %5632 = vst [vmem:[%s9841_s4 + $0x40] sm:$0xff] %v5600_v25  ;;  %v5602_v31 = vmax.f32 %v5570_v26, 0.0  ;;  %v6320_v32 = vadd.f32 %v5455_v30, %v4664_v29  ;;  %v5457_v34 = vpop.f32.mrb[13].mxu0  ;;  %v4668_v37 = vpop.f32.mrb[14].mxu1 }
 0x2b0   :  { %5633 = vst [vmem:[%s9841_s4 + $0x48] sm:$0xff] %v5601_v27  ;;  %v5603_v35 = vmax.f32 %v5571_v28, 0.0  ;;  %v6321_v36 = vadd.f32 %v5457_v34, %v4666_v33  ;;  %v5459_v38 = vpop.f32.mrb[14].mxu0  ;;  %v4670_v41 = vpop.f32.mrb[15].mxu1 }
 0x2b1   :  { %5634 = vst [vmem:[%s9841_s4 + $0x50] sm:$0xff] %v5602_v31  ;;  %v5528_v39 = vmul.f32 %v6320_v32, %v9669_v15  ;;  %v6322_v40 = vadd.f32 %v5459_v38, %v4668_v37  ;;  %v5461_v42 = vpop.f32.mrb[15].mxu0 }
 0x2b2   :  { %5635 = vst [vmem:[%s9841_s4 + $0x58] sm:$0xff] %v5603_v35  ;;  %v5529_v43 = vmul.f32 %v6321_v36, %v9671_v18  ;;  %v6323_v44 = vadd.f32 %v5461_v42, %v4670_v41 }
 0x2b3   :  { %v5572_v45 = vadd.f32 %v9673_v20, %v5528_v39  ;;  %v5530_v46 = vmul.f32 %v6322_v40, %v9669_v15 }
 0x2b4   :  { %v5573_v47 = vadd.f32 %v9675_v24, %v5529_v43  ;;  %v5531_v48 = vmul.f32 %v6323_v44, %v9671_v18 }
 0x2b5   :  { %v5604_v49 = vmax.f32 %v5572_v45, 0.0  ;;  %v5574_v50 = vadd.f32 %v9673_v20, %v5530_v46  ;;  %v4674_v53 = vpop.f32.mrb[16].mxu1 }
 0x2b6   :  { %v5605_v51 = vmax.f32 %v5573_v47, 0.0  ;;  %v5575_v52 = vadd.f32 %v9675_v24, %v5531_v48  ;;  %v5465_v54 = vpop.f32.mrb[16].mxu0  ;;  %v4676_v57 = vpop.f32.mrb[17].mxu1 }
 0x2b7   :  { %5636 = vst [vmem:[%s9841_s4 + $0x60] sm:$0xff] %v5604_v49  ;;  %v5606_v55 = vmax.f32 %v5574_v50, 0.0  ;;  %v6324_v56 = vadd.f32 %v5465_v54, %v4674_v53  ;;  %v5467_v58 = vpop.f32.mrb[17].mxu0  ;;  %v4678_v61 = vpop.f32.mrb[18].mxu1 }
 0x2b8   :  { %5637 = vst [vmem:[%s9841_s4 + $0x68] sm:$0xff] %v5605_v51  ;;  %v5607_v59 = vmax.f32 %v5575_v52, 0.0  ;;  %v6325_v60 = vadd.f32 %v5467_v58, %v4676_v57  ;;  %v5469_v62 = vpop.f32.mrb[18].mxu0  ;;  %v4680_v1 = vpop.f32.mrb[19].mxu1 }
 0x2b9   :  { %5638 = vst [vmem:[%s9841_s4 + $0x70] sm:$0xff] %v5606_v55  ;;  %v5532_v63 = vmul.f32 %v6324_v56, %v9669_v15  ;;  %v6326_v0 = vadd.f32 %v5469_v62, %v4678_v61  ;;  %v5471_v2 = vpop.f32.mrb[19].mxu0 }
 0x2ba   :  { %5639 = vst [vmem:[%s9841_s4 + $0x78] sm:$0xff] %v5607_v59  ;;  %v5533_v3 = vmul.f32 %v6325_v60, %v9671_v18  ;;  %v6327_v4 = vadd.f32 %v5471_v2, %v4680_v1 }
 0x2bb   :  { %v5576_v5 = vadd.f32 %v9673_v20, %v5532_v63  ;;  %v5534_v6 = vmul.f32 %v6326_v0, %v9669_v15 }
 0x2bc   :  { %v5577_v7 = vadd.f32 %v9675_v24, %v5533_v3  ;;  %v5535_v8 = vmul.f32 %v6327_v4, %v9671_v18 }
 0x2bd   :  { %v5608_v9 = vmax.f32 %v5576_v5, 0.0  ;;  %v5578_v10 = vadd.f32 %v9673_v20, %v5534_v6  ;;  %v4684_v13 = vpop.f32.mrb[20].mxu1 }
 0x2be   :  { %v5609_v11 = vmax.f32 %v5577_v7, 0.0  ;;  %v5579_v12 = vadd.f32 %v9675_v24, %v5535_v8  ;;  %v5475_v14 = vpop.f32.mrb[20].mxu0  ;;  %v4686_v19 = vpop.f32.mrb[21].mxu1 }
 0x2bf   :  { %5640 = vst [vmem:[%s9841_s4 + $0x80] sm:$0xff] %v5608_v9  ;;  %v5610_v16 = vmax.f32 %v5578_v10, 0.0  ;;  %v6328_v17 = vadd.f32 %v5475_v14, %v4684_v13  ;;  %v5477_v21 = vpop.f32.mrb[21].mxu0  ;;  %v4688_v25 = vpop.f32.mrb[22].mxu1 }
 0x2c0   :  { %5641 = vst [vmem:[%s9841_s4 + $0x88] sm:$0xff] %v5609_v11  ;;  %v5611_v22 = vmax.f32 %v5579_v12, 0.0  ;;  %v6329_v23 = vadd.f32 %v5477_v21, %v4686_v19  ;;  %v5479_v26 = vpop.f32.mrb[22].mxu0  ;;  %v4690_v29 = vpop.f32.mrb[23].mxu1 }
 0x2c1   :  { %5642 = vst [vmem:[%s9841_s4 + $0x90] sm:$0xff] %v5610_v16  ;;  %v5536_v27 = vmul.f32 %v6328_v17, %v9669_v15  ;;  %v6330_v28 = vadd.f32 %v5479_v26, %v4688_v25  ;;  %v5481_v30 = vpop.f32.mrb[23].mxu0 }
 0x2c2   :  { %5643 = vst [vmem:[%s9841_s4 + $0x98] sm:$0xff] %v5611_v22  ;;  %v5537_v31 = vmul.f32 %v6329_v23, %v9671_v18  ;;  %v6331_v32 = vadd.f32 %v5481_v30, %v4690_v29 }
 0x2c3   :  { %v5580_v33 = vadd.f32 %v9673_v20, %v5536_v27  ;;  %v5538_v34 = vmul.f32 %v6330_v28, %v9669_v15 }
 0x2c4   :  { %v5581_v35 = vadd.f32 %v9675_v24, %v5537_v31  ;;  %v5539_v36 = vmul.f32 %v6331_v32, %v9671_v18 }
 0x2c5   :  { %v5612_v37 = vmax.f32 %v5580_v33, 0.0  ;;  %v5582_v38 = vadd.f32 %v9673_v20, %v5538_v34  ;;  %v4694_v41 = vpop.f32.mrb[24].mxu1 }
 0x2c6   :  { %v5613_v39 = vmax.f32 %v5581_v35, 0.0  ;;  %v5583_v40 = vadd.f32 %v9675_v24, %v5539_v36  ;;  %v5485_v42 = vpop.f32.mrb[24].mxu0  ;;  %v4696_v45 = vpop.f32.mrb[25].mxu1 }
 0x2c7   :  { %5644 = vst [vmem:[%s9841_s4 + $0xa0] sm:$0xff] %v5612_v37  ;;  %v5614_v43 = vmax.f32 %v5582_v38, 0.0  ;;  %v6332_v44 = vadd.f32 %v5485_v42, %v4694_v41  ;;  %v5487_v46 = vpop.f32.mrb[25].mxu0  ;;  %v4698_v49 = vpop.f32.mrb[26].mxu1 }
 0x2c8   :  { %5645 = vst [vmem:[%s9841_s4 + $0xa8] sm:$0xff] %v5613_v39  ;;  %v5615_v47 = vmax.f32 %v5583_v40, 0.0  ;;  %v6333_v48 = vadd.f32 %v5487_v46, %v4696_v45  ;;  %v5489_v50 = vpop.f32.mrb[26].mxu0  ;;  %v4700_v53 = vpop.f32.mrb[27].mxu1 }
 0x2c9   :  { %5646 = vst [vmem:[%s9841_s4 + $0xb0] sm:$0xff] %v5614_v43  ;;  %v5540_v51 = vmul.f32 %v6332_v44, %v9669_v15  ;;  %v6334_v52 = vadd.f32 %v5489_v50, %v4698_v49  ;;  %v5491_v54 = vpop.f32.mrb[27].mxu0 }
 0x2ca   :  { %5647 = vst [vmem:[%s9841_s4 + $0xb8] sm:$0xff] %v5615_v47  ;;  %v5541_v55 = vmul.f32 %v6333_v48, %v9671_v18  ;;  %v6335_v56 = vadd.f32 %v5491_v54, %v4700_v53 }
 0x2cb   :  { %v5584_v57 = vadd.f32 %v9673_v20, %v5540_v51  ;;  %v5542_v58 = vmul.f32 %v6334_v52, %v9669_v15 }
 0x2cc   :  { %v5585_v59 = vadd.f32 %v9675_v24, %v5541_v55  ;;  %v5543_v60 = vmul.f32 %v6335_v56, %v9671_v18 }
 0x2cd   :  { %v5616_v61 = vmax.f32 %v5584_v57, 0.0  ;;  %v5586_v62 = vadd.f32 %v9673_v20, %v5542_v58  ;;  %v4704_v1 = vpop.f32.mrb[28].mxu1 }
 0x2ce   :  { %v5617_v63 = vmax.f32 %v5585_v59, 0.0  ;;  %v5587_v0 = vadd.f32 %v9675_v24, %v5543_v60  ;;  %v5495_v2 = vpop.f32.mrb[28].mxu0  ;;  %v4706_v5 = vpop.f32.mrb[29].mxu1 }
 0x2cf   :  { %5648 = vst [vmem:[%s9841_s4 + $0xc0] sm:$0xff] %v5616_v61  ;;  %v5618_v3 = vmax.f32 %v5586_v62, 0.0  ;;  %v6336_v4 = vadd.f32 %v5495_v2, %v4704_v1  ;;  %v5497_v6 = vpop.f32.mrb[29].mxu0  ;;  %v4708_v9 = vpop.f32.mrb[30].mxu1 }
 0x2d0   :  { %5649 = vst [vmem:[%s9841_s4 + $0xc8] sm:$0xff] %v5617_v63  ;;  %v5619_v7 = vmax.f32 %v5587_v0, 0.0  ;;  %v6337_v8 = vadd.f32 %v5497_v6, %v4706_v5  ;;  %v5499_v10 = vpop.f32.mrb[30].mxu0  ;;  %v4710_v13 = vpop.f32.mrb[31].mxu1 }
 0x2d1   :  { %5650 = vst [vmem:[%s9841_s4 + $0xd0] sm:$0xff] %v5618_v3  ;;  %v5544_v11 = vmul.f32 %v6336_v4, %v9669_v15  ;;  %v6338_v12 = vadd.f32 %v5499_v10, %v4708_v9  ;;  %v5501_v14 = vpop.f32.mrb[31].mxu0 }
 0x2d2   :  { %5651 = vst [vmem:[%s9841_s4 + $0xd8] sm:$0xff] %v5619_v7  ;;  %v5545_v16 = vmul.f32 %v6337_v8, %v9671_v18  ;;  %v6339_v17 = vadd.f32 %v5501_v14, %v4710_v13 }
 0x2d3   :  { %v5588_v19 = vadd.f32 %v9673_v20, %v5544_v11  ;;  %v5546_v21 = vmul.f32 %v6338_v12, %v9669_v15 }
 0x2d4   :  { %v5589_v22 = vadd.f32 %v9675_v24, %v5545_v16  ;;  %v5547_v23 = vmul.f32 %v6339_v17, %v9671_v18 }
 0x2d5   :  { %v5620_v25 = vmax.f32 %v5588_v19, 0.0  ;;  %v5590_v26 = vadd.f32 %v9673_v20, %v5546_v21 }
 0x2d6   :  { %v5621_v27 = vmax.f32 %v5589_v22, 0.0  ;;  %v5591_v28 = vadd.f32 %v9675_v24, %v5547_v23 }
 0x2d7   :  { %5652 = vst [vmem:[%s9841_s4 + $0xe0] sm:$0xff] %v5620_v25  ;;  %v5622_v29 = vmax.f32 %v5590_v26, 0.0 }
 0x2d8   :  { %5653 = vst [vmem:[%s9841_s4 + $0xe8] sm:$0xff] %v5621_v27  ;;  %v5623_v15 = vmax.f32 %v5591_v28, 0.0 }
 0x2d9   :  { %5654 = vst [vmem:[%s9841_s4 + $0xf0] sm:$0xff] %v5622_v29 }
 0x2da   :  { %5655 = vst [vmem:[%s9841_s4 + $0xf8] sm:$0xff] %v5623_v15 }

</bundles_post_ra>
